<compile_context>
chip_gen: v5e
topology: v5e:2x2
jax: 0.10.0
libtpu: 0.0.40
codegen_flags: <defaults>
</compile_context>

<pallas_src>
import functools

import jax
import jax.numpy as jnp
import numpy as np
from jax import lax
from jax.experimental import pallas as pl
from jax.experimental.pallas import tpu as pltpu


# ---------------------------------------------------------------------------
# Fused Pallas kernel: the whole DetNet body for one image per grid step.
# ---------------------------------------------------------------------------
def _body_kernel(x_ref,
                 w1p_ref, b1p_ref, w2p_ref, b2p_ref, w3p_ref, b3p_ref,
                 wpp_ref, bpp_ref,
                 w1s_ref, b1s_ref, w2s_ref, b2s_ref, w3s_ref, b3s_ref,
                 o_ref, pad_ref, *, H, W, n_blocks):
    f0 = w1p_ref.shape[-1]
    f2 = w3p_ref.shape[-1]
    m = H * W

    # Zero only the 2-wide halo strips of the padded conv2 scratch, once per
    # grid step (interior is fully overwritten by every block; the overlapping
    # corners are harmless).
    pad_ref[:, :2, :, :] = jnp.zeros((1, 2, W + 4, f0), pad_ref.dtype)
    pad_ref[:, H + 2:, :, :] = jnp.zeros((1, 2, W + 4, f0), pad_ref.dtype)
    pad_ref[:, :, :2, :] = jnp.zeros((1, H + 4, 2, f0), pad_ref.dtype)
    pad_ref[:, :, W + 2:, :] = jnp.zeros((1, H + 4, 2, f0), pad_ref.dtype)

    def res_block(x2d, w1, b1, w2, b2, w3, b3, wproj=None, bproj=None):
        """One dilated residual block, fully VMEM/vreg resident.

        x2d: f32 (m, Cin).  Weights are bf16 with BN scale folded; biases f32.
        """
        x_bf = x2d.astype(jnp.bfloat16)

        # conv1: 1x1 (bf16 operands, f32 accumulate) + folded-BN bias + ReLU.
        h1 = jnp.dot(x_bf, w1, preferred_element_type=jnp.float32)
        h1 = jnp.maximum(h1 + b1, 0.0)

        # conv2: 3x3, dilation=2, pad=2.  Write the bf16 activation into the
        # zero-padded scratch, gather the 9 dilated taps into one contiguous
        # (m, 9*f0) im2col operand, and run a single K=9*f0 MXU matmul.
        pad_ref[:, 2:2 + H, 2:2 + W, :] = (
            h1.astype(jnp.bfloat16).reshape(1, H, W, f0))
        taps = []
        for t in range(9):                                   # static unroll
            kh, kw = divmod(t, 3)
            tap = pad_ref[:, kh * 2:kh * 2 + H, kw * 2:kw * 2 + W, :]
            taps.append(tap.reshape(m, f0))
        cols = jnp.concatenate(taps, axis=-1)                # bf16 (m, 9*f0)
        h2 = jnp.dot(cols, w2, preferred_element_type=jnp.float32)
        h2 = jnp.maximum(h2 + b2, 0.0).astype(jnp.bfloat16)  # cast early

        # conv3: 1x1 + folded-BN bias.
        h3 = jnp.dot(h2, w3, preferred_element_type=jnp.float32) + b3

        # Skip path (projection or identity); epilogue stays in f32 (VPU).
        if wproj is not None:
            skip = jnp.dot(x_bf, wproj,
                           preferred_element_type=jnp.float32) + bproj
        else:
            skip = x2d
        return jnp.maximum(h3 + skip, 0.0)                    # f32 (m, f2)

    cin = x_ref.shape[-1]
    out = res_block(x_ref[...].reshape(m, cin),
                    w1p_ref[...], b1p_ref[...], w2p_ref[...], b2p_ref[...],
                    w3p_ref[...], b3p_ref[...], wpp_ref[...], bpp_ref[...])
    for b in range(n_blocks):                                 # static unroll
        out = res_block(out, w1s_ref[b], b1s_ref[b], w2s_ref[b], b2s_ref[b],
                        w3s_ref[b], b3s_ref[b])
    o_ref[...] = out.reshape(1, H, W, f2)


def detnet_body_fused(x_nhwc, params):
    """Whole DETNET_BODY forward as a single pallas_call, grid over batch."""
    N, H, W, Cin = x_nhwc.shape
    pp = params["proj"]
    blocks = params["blocks"]
    nb = len(blocks)
    f0 = pp["w1f"].shape[1]
    f1 = pp["w2f"].shape[-1]
    f2 = pp["w3f"].shape[1]

    # Host-side repack: HWIO (3,3,f0,f1) -> (9*f0, f1) matching the in-kernel
    # im2col tap order; identity-block weights stacked on a leading axis.
    w2p = pp["w2f"].reshape(9 * f0, f1)
    w1s = jnp.stack([b["w1f"] for b in blocks])               # (nb, f2, f0)
    b1s = jnp.stack([b["b1"] for b in blocks])                # (nb, 1, f0)
    w2s = jnp.stack([b["w2f"].reshape(9 * f0, f1) for b in blocks])
    b2s = jnp.stack([b["b2"] for b in blocks])
    w3s = jnp.stack([b["w3f"] for b in blocks])
    b3s = jnp.stack([b["b3"] for b in blocks])

    args = [x_nhwc.astype(jnp.float32),
            pp["w1f"], pp["b1"], w2p, pp["b2"], pp["w3f"], pp["b3"],
            pp["wpf"], pp["bp"],
            w1s, b1s, w2s, b2s, w3s, b3s]

    def _full(a):                       # grid-invariant (weight) input spec
        nd = a.ndim
        return pl.BlockSpec(a.shape, lambda n, _nd=nd: (0,) * _nd)

    in_specs = ([pl.BlockSpec((1, H, W, Cin), lambda n: (n, 0, 0, 0))]
                + [_full(a) for a in args[1:]])

    kernel = functools.partial(_body_kernel, H=H, W=W, n_blocks=nb)
    return pl.pallas_call(
        kernel,
        out_shape=jax.ShapeDtypeStruct((N, H, W, f2), jnp.float32),
        grid=(N,),
        in_specs=in_specs,
        out_specs=pl.BlockSpec((1, H, W, f2), lambda n: (n, 0, 0, 0)),
        scratch_shapes=[pltpu.VMEM((1, H + 4, W + 4, f0), jnp.bfloat16)],
        compiler_params=pltpu.CompilerParams(
            dimension_semantics=("parallel",)),    # batch axis -> both v7x TCs
    )(*args)


# ---------------------------------------------------------------------------
# Parameter init (deterministic, synthetic); BN scale folded into bf16 weights
# ---------------------------------------------------------------------------
def _init_bn(key, c):
    kg, kb, km, kv = jax.random.split(key, 4)
    gamma = 1.0 + 0.1 * jax.random.normal(kg, (c,), jnp.float32)
    beta = 0.1 * jax.random.normal(kb, (c,), jnp.float32)
    mean = 0.1 * jax.random.normal(km, (c,), jnp.float32)
    var = 1.0 + 0.1 * jnp.abs(jax.random.normal(kv, (c,), jnp.float32))
    eps = 1e-5
    scale = gamma / jnp.sqrt(var + eps)
    bias = beta - mean * scale
    return scale, bias


def init_res_block(key, cin, filters_list, proj):
    f0, f1, f2 = filters_list
    ks = jax.random.split(key, 8)
    p = {}
    w1 = 0.05 * jax.random.normal(ks[0], (cin, f0), jnp.float32)
    s1, b1 = _init_bn(ks[1], f0)
    p["w1f"] = (w1 * s1[None, :]).astype(jnp.bfloat16)
    p["b1"] = b1.reshape(1, f0)
    # HWIO layout (kh, kw, Cin, Cout) — matches in-kernel tap order.
    w2 = 0.05 * jax.random.normal(ks[2], (3, 3, f0, f1), jnp.float32)
    s2, b2 = _init_bn(ks[3], f1)
    p["w2f"] = (w2 * s2[None, None, None, :]).astype(jnp.bfloat16)
    p["b2"] = b2.reshape(1, f1)
    w3 = 0.05 * jax.random.normal(ks[4], (f1, f2), jnp.float32)
    # NOTE: PyTorch DILATED_RES_BLOCK_PROJ declares conv3_b = BatchNorm2d(f1);
    # the forward only works when f1 == f2 (true for DetNet configs and ours).
    s3, b3 = _init_bn(ks[5], f2)
    p["w3f"] = (w3 * s3[None, :]).astype(jnp.bfloat16)
    p["b3"] = b3.reshape(1, f2)
    if proj:
        wp = 0.05 * jax.random.normal(ks[6], (cin, f2), jnp.float32)
        sp, bp = _init_bn(ks[7], f2)
        p["wpf"] = (wp * sp[None, :]).astype(jnp.bfloat16)
        p["bp"] = bp.reshape(1, f2)
    return p


# ---------------------------------------------------------------------------
# Body wrapper (single fused Pallas call)
# ---------------------------------------------------------------------------
@jax.jit
def detnet_body(x_nchw, params):
    x = jnp.transpose(x_nchw, (0, 2, 3, 1))                # NCHW -> NHWC
    out = detnet_body_fused(x, params)
    return jnp.transpose(out, (0, 3, 1, 2))                # back to NCHW


# ---------------------------------------------------------------------------
# Pure-JAX reference (same bf16-operand / f32-accumulate numerics)
# ---------------------------------------------------------------------------
def _ref_block(x_nhwc, p, proj):
    def mm1x1(x, w):
        return jnp.einsum("nhwc,co->nhwo", x.astype(jnp.bfloat16), w,
                          preferred_element_type=jnp.float32)

    h = jnp.maximum(mm1x1(x_nhwc, p["w1f"]) + p["b1"], 0.0)
    h = lax.conv_general_dilated(
        h.astype(jnp.bfloat16), p["w2f"], window_strides=(1, 1),
        padding=((2, 2), (2, 2)), rhs_dilation=(2, 2),
        dimension_numbers=("NHWC", "HWIO", "NHWC"),
        preferred_element_type=jnp.float32)
    h = jnp.maximum(h + p["b2"], 0.0)
    h = mm1x1(h, p["w3f"]) + p["b3"]
    skip = (mm1x1(x_nhwc, p["wpf"]) + p["bp"]) if proj else x_nhwc
    return jnp.maximum(h + skip, 0.0)


def detnet_body_ref(x_nchw, params):
    x = jnp.transpose(x_nchw, (0, 2, 3, 1)).astype(jnp.float32)
    out = _ref_block(x, params["proj"], proj=True)
    for p in params["blocks"]:
        out = _ref_block(out, p, proj=False)
    return jnp.transpose(out, (0, 3, 1, 2))


# ---------------------------------------------------------------------------
if __name__ == "__main__":
    # DETNET_BODY(in_channels=64, filters_list=[32, 256, 256], num_blocks=4):
    #   proj block (64 -> 256) followed by 3 identity dilated res blocks (256).
    key = jax.random.PRNGKey(0)
    k_x, k_p, k_b = jax.random.split(key, 3)

    N, C_IN, H, W = 2, 64, 8, 8
    filters_list = [32, 256, 256]
    x = jax.random.normal(k_x, (N, C_IN, H, W), jnp.float32)

    params = {
        "proj": init_res_block(k_p, C_IN, filters_list, proj=True),
        "blocks": [
            init_res_block(kb, filters_list[2], filters_list, proj=False)
            for kb in jax.random.split(k_b, 3)    # num_blocks == 4 -> 3 blocks
        ],
    }

    out = jax.block_until_ready(detnet_body(x, params))
    assert out.shape == (N, filters_list[2], H, W), out.shape

    ref = jax.block_until_ready(detnet_body_ref(x, params))
    # Both paths use bf16 MXU operands with f32 accumulation; remaining
    # differences come from accumulation order / bf16 re-quantization at the
    # block boundaries, hence the 1e-2 tolerance.
    np.testing.assert_allclose(np.asarray(out), np.asarray(ref),
                               rtol=1e-2, atol=1e-2)

    print("KERNEL_OK")
</pallas_src>

<mosaic_0001>
module attributes {stable_mosaic.version = 11 : i64} {
  func.func @_body_kernel(%arg0: i32, %arg1: memref<1x8x8x64xf32, #tpu.memory_space<vmem>>, %arg2: memref<64x32xbf16, #tpu.memory_space<vmem>>, %arg3: memref<1x32xf32, #tpu.memory_space<vmem>>, %arg4: memref<288x256xbf16, #tpu.memory_space<vmem>>, %arg5: memref<1x256xf32, #tpu.memory_space<vmem>>, %arg6: memref<256x256xbf16, #tpu.memory_space<vmem>>, %arg7: memref<1x256xf32, #tpu.memory_space<vmem>>, %arg8: memref<64x256xbf16, #tpu.memory_space<vmem>>, %arg9: memref<1x256xf32, #tpu.memory_space<vmem>>, %arg10: memref<3x256x32xbf16, #tpu.memory_space<vmem>>, %arg11: memref<3x1x32xf32, #tpu.memory_space<vmem>>, %arg12: memref<3x288x256xbf16, #tpu.memory_space<vmem>>, %arg13: memref<3x1x256xf32, #tpu.memory_space<vmem>>, %arg14: memref<3x256x256xbf16, #tpu.memory_space<vmem>>, %arg15: memref<3x1x256xf32, #tpu.memory_space<vmem>>, %arg16: memref<1x8x8x256xf32, #tpu.memory_space<vmem>>, %arg17: memref<1x12x12x32xbf16, #tpu.memory_space<vmem>>) attributes {dimension_semantics = [#tpu.dimension_semantics<parallel>], iteration_bounds = array<i64: 2>, scalar_prefetch = 0 : i64, scratch_operands = 1 : i64, tpu.core_type = #tpu.core_type<tc>, window_params = [{transform_indices = @transform_0, window_bounds = array<i64: 1, 8, 8, 64>}, {pipeline_mode = #tpu.pipeline_mode<synchronous>, transform_indices = @transform_1, window_bounds = array<i64: 64, 32>}, {pipeline_mode = #tpu.pipeline_mode<synchronous>, transform_indices = @transform_2, window_bounds = array<i64: 1, 32>}, {pipeline_mode = #tpu.pipeline_mode<synchronous>, transform_indices = @transform_3, window_bounds = array<i64: 288, 256>}, {pipeline_mode = #tpu.pipeline_mode<synchronous>, transform_indices = @transform_4, window_bounds = array<i64: 1, 256>}, {pipeline_mode = #tpu.pipeline_mode<synchronous>, transform_indices = @transform_5, window_bounds = array<i64: 256, 256>}, {pipeline_mode = #tpu.pipeline_mode<synchronous>, transform_indices = @transform_6, window_bounds = array<i64: 1, 256>}, {pipeline_mode = #tpu.pipeline_mode<synchronous>, transform_indices = @transform_7, window_bounds = array<i64: 64, 256>}, {pipeline_mode = #tpu.pipeline_mode<synchronous>, transform_indices = @transform_8, window_bounds = array<i64: 1, 256>}, {pipeline_mode = #tpu.pipeline_mode<synchronous>, transform_indices = @transform_9, window_bounds = array<i64: 3, 256, 32>}, {pipeline_mode = #tpu.pipeline_mode<synchronous>, transform_indices = @transform_10, window_bounds = array<i64: 3, 1, 32>}, {pipeline_mode = #tpu.pipeline_mode<synchronous>, transform_indices = @transform_11, window_bounds = array<i64: 3, 288, 256>}, {pipeline_mode = #tpu.pipeline_mode<synchronous>, transform_indices = @transform_12, window_bounds = array<i64: 3, 1, 256>}, {pipeline_mode = #tpu.pipeline_mode<synchronous>, transform_indices = @transform_13, window_bounds = array<i64: 3, 256, 256>}, {pipeline_mode = #tpu.pipeline_mode<synchronous>, transform_indices = @transform_14, window_bounds = array<i64: 3, 1, 256>}, {transform_indices = @transform_15, window_bounds = array<i64: 1, 8, 8, 256>}]} {
    %cst = arith.constant 0.000000e+00 : bf16
    %0 = vector.broadcast %cst : bf16 to vector<1x2x12x32xbf16>
    %c0 = arith.constant 0 : index
    %c0_0 = arith.constant 0 : index
    %c0_1 = arith.constant 0 : index
    %c0_2 = arith.constant 0 : index
    %1 = vector.load %arg17[%c0, %c0_0, %c0_1, %c0_2] : memref<1x12x12x32xbf16, #tpu.memory_space<vmem>>, vector<1x2x12x32xbf16>
    tpu.vector_store %arg17[%c0, %c0_0, %c0_1, %c0_2], %0 {strides = array<i32>} : memref<1x12x12x32xbf16, #tpu.memory_space<vmem>>, vector<1x2x12x32xbf16>,
    %cst_3 = arith.constant 0.000000e+00 : bf16
    %2 = vector.broadcast %cst_3 : bf16 to vector<1x2x12x32xbf16>
    %c0_4 = arith.constant 0 : index
    %c10 = arith.constant 10 : index
    %c0_5 = arith.constant 0 : index
    %c0_6 = arith.constant 0 : index
    %3 = vector.load %arg17[%c0_4, %c10, %c0_5, %c0_6] : memref<1x12x12x32xbf16, #tpu.memory_space<vmem>>, vector<1x2x12x32xbf16>
    tpu.vector_store %arg17[%c0_4, %c10, %c0_5, %c0_6], %2 {strides = array<i32>} : memref<1x12x12x32xbf16, #tpu.memory_space<vmem>>, vector<1x2x12x32xbf16>,
    %cst_7 = arith.constant 0.000000e+00 : bf16
    %4 = vector.broadcast %cst_7 : bf16 to vector<1x12x2x32xbf16>
    %c0_8 = arith.constant 0 : index
    %c0_9 = arith.constant 0 : index
    %c0_10 = arith.constant 0 : index
    %c0_11 = arith.constant 0 : index
    %5 = vector.load %arg17[%c0_8, %c0_9, %c0_10, %c0_11] : memref<1x12x12x32xbf16, #tpu.memory_space<vmem>>, vector<1x12x2x32xbf16>
    tpu.vector_store %arg17[%c0_8, %c0_9, %c0_10, %c0_11], %4 {strides = array<i32>} : memref<1x12x12x32xbf16, #tpu.memory_space<vmem>>, vector<1x12x2x32xbf16>,
    %cst_12 = arith.constant 0.000000e+00 : bf16
    %6 = vector.broadcast %cst_12 : bf16 to vector<1x12x2x32xbf16>
    %c0_13 = arith.constant 0 : index
    %c0_14 = arith.constant 0 : index
    %c10_15 = arith.constant 10 : index
    %c0_16 = arith.constant 0 : index
    %7 = vector.load %arg17[%c0_13, %c0_14, %c10_15, %c0_16] : memref<1x12x12x32xbf16, #tpu.memory_space<vmem>>, vector<1x12x2x32xbf16>
    tpu.vector_store %arg17[%c0_13, %c0_14, %c10_15, %c0_16], %6 {strides = array<i32>} : memref<1x12x12x32xbf16, #tpu.memory_space<vmem>>, vector<1x12x2x32xbf16>,
    %c0_17 = arith.constant 0 : index
    %c0_18 = arith.constant 0 : index
    %c0_19 = arith.constant 0 : index
    %c0_20 = arith.constant 0 : index
    %8 = vector.load %arg1[%c0_17, %c0_18, %c0_19, %c0_20] : memref<1x8x8x64xf32, #tpu.memory_space<vmem>>, vector<1x8x8x64xf32>
    %9 = vector.shape_cast %8 : vector<1x8x8x64xf32> to vector<64x64xf32>
    %c0_21 = arith.constant 0 : index
    %c0_22 = arith.constant 0 : index
    %10 = vector.load %arg2[%c0_21, %c0_22] : memref<64x32xbf16, #tpu.memory_space<vmem>>, vector<64x32xbf16>
    %c0_23 = arith.constant 0 : index
    %c0_24 = arith.constant 0 : index
    %11 = vector.load %arg3[%c0_23, %c0_24] : memref<1x32xf32, #tpu.memory_space<vmem>>, vector<1x32xf32>
    %c0_25 = arith.constant 0 : index
    %c0_26 = arith.constant 0 : index
    %12 = vector.load %arg4[%c0_25, %c0_26] : memref<288x256xbf16, #tpu.memory_space<vmem>>, vector<288x256xbf16>
    %c0_27 = arith.constant 0 : index
    %c0_28 = arith.constant 0 : index
    %13 = vector.load %arg5[%c0_27, %c0_28] : memref<1x256xf32, #tpu.memory_space<vmem>>, vector<1x256xf32>
    %c0_29 = arith.constant 0 : index
    %c0_30 = arith.constant 0 : index
    %14 = vector.load %arg6[%c0_29, %c0_30] : memref<256x256xbf16, #tpu.memory_space<vmem>>, vector<256x256xbf16>
    %c0_31 = arith.constant 0 : index
    %c0_32 = arith.constant 0 : index
    %15 = vector.load %arg7[%c0_31, %c0_32] : memref<1x256xf32, #tpu.memory_space<vmem>>, vector<1x256xf32>
    %c0_33 = arith.constant 0 : index
    %c0_34 = arith.constant 0 : index
    %16 = vector.load %arg8[%c0_33, %c0_34] : memref<64x256xbf16, #tpu.memory_space<vmem>>, vector<64x256xbf16>
    %c0_35 = arith.constant 0 : index
    %c0_36 = arith.constant 0 : index
    %17 = vector.load %arg9[%c0_35, %c0_36] : memref<1x256xf32, #tpu.memory_space<vmem>>, vector<1x256xf32>
    %18 = arith.truncf %9 : vector<64x64xf32> to vector<64x64xbf16>
    %cst_37 = arith.constant dense<0.000000e+00> : vector<64x32xf32>
    %19 = tpu.matmul %18, %10, %cst_37 {dimension_numbers = #tpu.dot_dimension_numbers<[1], [0], [0], [1], [0, 0, 1, 1], [], []>} : vector<64x64xbf16>, vector<64x32xbf16>, vector<64x32xf32> -> vector<64x32xf32>
    %20 = vector.broadcast %11 : vector<1x32xf32> to vector<64x32xf32>
    %21 = arith.addf %19, %20 : vector<64x32xf32>
    %cst_38 = arith.constant 0.000000e+00 : f32
    %22 = vector.broadcast %cst_38 : f32 to vector<64x32xf32>
    %23 = arith.maximumf %21, %22 : vector<64x32xf32>
    %24 = arith.truncf %23 : vector<64x32xf32> to vector<64x32xbf16>
    %25 = vector.shape_cast %24 : vector<64x32xbf16> to vector<1x8x8x32xbf16>
    %c0_39 = arith.constant 0 : index
    %c2 = arith.constant 2 : index
    %c2_40 = arith.constant 2 : index
    %c0_41 = arith.constant 0 : index
    %26 = vector.load %arg17[%c0_39, %c2, %c2_40, %c0_41] : memref<1x12x12x32xbf16, #tpu.memory_space<vmem>>, vector<1x8x8x32xbf16>
    tpu.vector_store %arg17[%c0_39, %c2, %c2_40, %c0_41], %25 {strides = array<i32>} : memref<1x12x12x32xbf16, #tpu.memory_space<vmem>>, vector<1x8x8x32xbf16>,
    %c0_42 = arith.constant 0 : index
    %c0_43 = arith.constant 0 : index
    %c0_44 = arith.constant 0 : index
    %c0_45 = arith.constant 0 : index
    %27 = vector.load %arg17[%c0_42, %c0_43, %c0_44, %c0_45] : memref<1x12x12x32xbf16, #tpu.memory_space<vmem>>, vector<1x8x8x32xbf16>
    %28 = vector.shape_cast %27 : vector<1x8x8x32xbf16> to vector<64x32xbf16>
    %c0_46 = arith.constant 0 : index
    %c0_47 = arith.constant 0 : index
    %c2_48 = arith.constant 2 : index
    %c0_49 = arith.constant 0 : index
    %29 = vector.load %arg17[%c0_46, %c0_47, %c2_48, %c0_49] : memref<1x12x12x32xbf16, #tpu.memory_space<vmem>>, vector<1x8x8x32xbf16>
    %30 = vector.shape_cast %29 : vector<1x8x8x32xbf16> to vector<64x32xbf16>
    %c0_50 = arith.constant 0 : index
    %c0_51 = arith.constant 0 : index
    %c4 = arith.constant 4 : index
    %c0_52 = arith.constant 0 : index
    %31 = vector.load %arg17[%c0_50, %c0_51, %c4, %c0_52] : memref<1x12x12x32xbf16, #tpu.memory_space<vmem>>, vector<1x8x8x32xbf16>
    %32 = vector.shape_cast %31 : vector<1x8x8x32xbf16> to vector<64x32xbf16>
    %c0_53 = arith.constant 0 : index
    %c2_54 = arith.constant 2 : index
    %c0_55 = arith.constant 0 : index
    %c0_56 = arith.constant 0 : index
    %33 = vector.load %arg17[%c0_53, %c2_54, %c0_55, %c0_56] : memref<1x12x12x32xbf16, #tpu.memory_space<vmem>>, vector<1x8x8x32xbf16>
    %34 = vector.shape_cast %33 : vector<1x8x8x32xbf16> to vector<64x32xbf16>
    %c0_57 = arith.constant 0 : index
    %c2_58 = arith.constant 2 : index
    %c2_59 = arith.constant 2 : index
    %c0_60 = arith.constant 0 : index
    %35 = vector.load %arg17[%c0_57, %c2_58, %c2_59, %c0_60] : memref<1x12x12x32xbf16, #tpu.memory_space<vmem>>, vector<1x8x8x32xbf16>
    %36 = vector.shape_cast %35 : vector<1x8x8x32xbf16> to vector<64x32xbf16>
    %c0_61 = arith.constant 0 : index
    %c2_62 = arith.constant 2 : index
    %c4_63 = arith.constant 4 : index
    %c0_64 = arith.constant 0 : index
    %37 = vector.load %arg17[%c0_61, %c2_62, %c4_63, %c0_64] : memref<1x12x12x32xbf16, #tpu.memory_space<vmem>>, vector<1x8x8x32xbf16>
    %38 = vector.shape_cast %37 : vector<1x8x8x32xbf16> to vector<64x32xbf16>
    %c0_65 = arith.constant 0 : index
    %c4_66 = arith.constant 4 : index
    %c0_67 = arith.constant 0 : index
    %c0_68 = arith.constant 0 : index
    %39 = vector.load %arg17[%c0_65, %c4_66, %c0_67, %c0_68] : memref<1x12x12x32xbf16, #tpu.memory_space<vmem>>, vector<1x8x8x32xbf16>
    %40 = vector.shape_cast %39 : vector<1x8x8x32xbf16> to vector<64x32xbf16>
    %c0_69 = arith.constant 0 : index
    %c4_70 = arith.constant 4 : index
    %c2_71 = arith.constant 2 : index
    %c0_72 = arith.constant 0 : index
    %41 = vector.load %arg17[%c0_69, %c4_70, %c2_71, %c0_72] : memref<1x12x12x32xbf16, #tpu.memory_space<vmem>>, vector<1x8x8x32xbf16>
    %42 = vector.shape_cast %41 : vector<1x8x8x32xbf16> to vector<64x32xbf16>
    %c0_73 = arith.constant 0 : index
    %c4_74 = arith.constant 4 : index
    %c4_75 = arith.constant 4 : index
    %c0_76 = arith.constant 0 : index
    %43 = vector.load %arg17[%c0_73, %c4_74, %c4_75, %c0_76] : memref<1x12x12x32xbf16, #tpu.memory_space<vmem>>, vector<1x8x8x32xbf16>
    %44 = vector.shape_cast %43 : vector<1x8x8x32xbf16> to vector<64x32xbf16>
    %45 = tpu.concatenate %28, %30, %32, %34, %36, %38, %40, %42, %44 in 1 : vector<64x32xbf16>, vector<64x32xbf16>, vector<64x32xbf16>, vector<64x32xbf16>, vector<64x32xbf16>, vector<64x32xbf16>, vector<64x32xbf16>, vector<64x32xbf16>, vector<64x32xbf16> -> vector<64x288xbf16>
    %cst_77 = arith.constant dense<0.000000e+00> : vector<64x256xf32>
    %46 = tpu.matmul %45, %12, %cst_77 {dimension_numbers = #tpu.dot_dimension_numbers<[1], [0], [0], [1], [0, 0, 1, 1], [], []>} : vector<64x288xbf16>, vector<288x256xbf16>, vector<64x256xf32> -> vector<64x256xf32>
    %47 = vector.broadcast %13 : vector<1x256xf32> to vector<64x256xf32>
    %48 = arith.addf %46, %47 : vector<64x256xf32>
    %cst_78 = arith.constant 0.000000e+00 : f32
    %49 = vector.broadcast %cst_78 : f32 to vector<64x256xf32>
    %50 = arith.maximumf %48, %49 : vector<64x256xf32>
    %51 = arith.truncf %50 : vector<64x256xf32> to vector<64x256xbf16>
    %cst_79 = arith.constant dense<0.000000e+00> : vector<64x256xf32>
    %52 = tpu.matmul %51, %14, %cst_79 {dimension_numbers = #tpu.dot_dimension_numbers<[1], [0], [0], [1], [0, 0, 1, 1], [], []>} : vector<64x256xbf16>, vector<256x256xbf16>, vector<64x256xf32> -> vector<64x256xf32>
    %53 = vector.broadcast %15 : vector<1x256xf32> to vector<64x256xf32>
    %54 = arith.addf %52, %53 : vector<64x256xf32>
    %cst_80 = arith.constant dense<0.000000e+00> : vector<64x256xf32>
    %55 = tpu.matmul %18, %16, %cst_80 {dimension_numbers = #tpu.dot_dimension_numbers<[1], [0], [0], [1], [0, 0, 1, 1], [], []>} : vector<64x64xbf16>, vector<64x256xbf16>, vector<64x256xf32> -> vector<64x256xf32>
    %56 = vector.broadcast %17 : vector<1x256xf32> to vector<64x256xf32>
    %57 = arith.addf %55, %56 : vector<64x256xf32>
    %58 = arith.addf %54, %57 : vector<64x256xf32>
    %cst_81 = arith.constant 0.000000e+00 : f32
    %59 = vector.broadcast %cst_81 : f32 to vector<64x256xf32>
    %60 = arith.maximumf %58, %59 : vector<64x256xf32>
    %c0_82 = arith.constant 0 : index
    %c0_83 = arith.constant 0 : index
    %c0_84 = arith.constant 0 : index
    %61 = vector.load %arg10[%c0_82, %c0_83, %c0_84] : memref<3x256x32xbf16, #tpu.memory_space<vmem>>, vector<1x256x32xbf16>
    %62 = vector.shape_cast %61 : vector<1x256x32xbf16> to vector<256x32xbf16>
    %c0_85 = arith.constant 0 : index
    %c0_86 = arith.constant 0 : index
    %c0_87 = arith.constant 0 : index
    %63 = vector.load %arg11[%c0_85, %c0_86, %c0_87] : memref<3x1x32xf32, #tpu.memory_space<vmem>>, vector<1x1x32xf32>
    %64 = vector.shape_cast %63 : vector<1x1x32xf32> to vector<1x32xf32>
    %c0_88 = arith.constant 0 : index
    %c0_89 = arith.constant 0 : index
    %c0_90 = arith.constant 0 : index
    %65 = vector.load %arg12[%c0_88, %c0_89, %c0_90] : memref<3x288x256xbf16, #tpu.memory_space<vmem>>, vector<1x288x256xbf16>
    %66 = vector.shape_cast %65 : vector<1x288x256xbf16> to vector<288x256xbf16>
    %c0_91 = arith.constant 0 : index
    %c0_92 = arith.constant 0 : index
    %c0_93 = arith.constant 0 : index
    %67 = vector.load %arg13[%c0_91, %c0_92, %c0_93] : memref<3x1x256xf32, #tpu.memory_space<vmem>>, vector<1x1x256xf32>
    %68 = vector.shape_cast %67 : vector<1x1x256xf32> to vector<1x256xf32>
    %c0_94 = arith.constant 0 : index
    %c0_95 = arith.constant 0 : index
    %c0_96 = arith.constant 0 : index
    %69 = vector.load %arg14[%c0_94, %c0_95, %c0_96] : memref<3x256x256xbf16, #tpu.memory_space<vmem>>, vector<1x256x256xbf16>
    %70 = vector.shape_cast %69 : vector<1x256x256xbf16> to vector<256x256xbf16>
    %c0_97 = arith.constant 0 : index
    %c0_98 = arith.constant 0 : index
    %c0_99 = arith.constant 0 : index
    %71 = vector.load %arg15[%c0_97, %c0_98, %c0_99] : memref<3x1x256xf32, #tpu.memory_space<vmem>>, vector<1x1x256xf32>
    %72 = vector.shape_cast %71 : vector<1x1x256xf32> to vector<1x256xf32>
    %73 = arith.truncf %60 : vector<64x256xf32> to vector<64x256xbf16>
    %cst_100 = arith.constant dense<0.000000e+00> : vector<64x32xf32>
    %74 = tpu.matmul %73, %62, %cst_100 {dimension_numbers = #tpu.dot_dimension_numbers<[1], [0], [0], [1], [0, 0, 1, 1], [], []>} : vector<64x256xbf16>, vector<256x32xbf16>, vector<64x32xf32> -> vector<64x32xf32>
    %75 = vector.broadcast %64 : vector<1x32xf32> to vector<64x32xf32>
    %76 = arith.addf %74, %75 : vector<64x32xf32>
    %cst_101 = arith.constant 0.000000e+00 : f32
    %77 = vector.broadcast %cst_101 : f32 to vector<64x32xf32>
    %78 = arith.maximumf %76, %77 : vector<64x32xf32>
    %79 = arith.truncf %78 : vector<64x32xf32> to vector<64x32xbf16>
    %80 = vector.shape_cast %79 : vector<64x32xbf16> to vector<1x8x8x32xbf16>
    %c0_102 = arith.constant 0 : index
    %c2_103 = arith.constant 2 : index
    %c2_104 = arith.constant 2 : index
    %c0_105 = arith.constant 0 : index
    %81 = vector.load %arg17[%c0_102, %c2_103, %c2_104, %c0_105] : memref<1x12x12x32xbf16, #tpu.memory_space<vmem>>, vector<1x8x8x32xbf16>
    tpu.vector_store %arg17[%c0_102, %c2_103, %c2_104, %c0_105], %80 {strides = array<i32>} : memref<1x12x12x32xbf16, #tpu.memory_space<vmem>>, vector<1x8x8x32xbf16>,
    %c0_106 = arith.constant 0 : index
    %c0_107 = arith.constant 0 : index
    %c0_108 = arith.constant 0 : index
    %c0_109 = arith.constant 0 : index
    %82 = vector.load %arg17[%c0_106, %c0_107, %c0_108, %c0_109] : memref<1x12x12x32xbf16, #tpu.memory_space<vmem>>, vector<1x8x8x32xbf16>
    %83 = vector.shape_cast %82 : vector<1x8x8x32xbf16> to vector<64x32xbf16>
    %c0_110 = arith.constant 0 : index
    %c0_111 = arith.constant 0 : index
    %c2_112 = arith.constant 2 : index
    %c0_113 = arith.constant 0 : index
    %84 = vector.load %arg17[%c0_110, %c0_111, %c2_112, %c0_113] : memref<1x12x12x32xbf16, #tpu.memory_space<vmem>>, vector<1x8x8x32xbf16>
    %85 = vector.shape_cast %84 : vector<1x8x8x32xbf16> to vector<64x32xbf16>
    %c0_114 = arith.constant 0 : index
    %c0_115 = arith.constant 0 : index
    %c4_116 = arith.constant 4 : index
    %c0_117 = arith.constant 0 : index
    %86 = vector.load %arg17[%c0_114, %c0_115, %c4_116, %c0_117] : memref<1x12x12x32xbf16, #tpu.memory_space<vmem>>, vector<1x8x8x32xbf16>
    %87 = vector.shape_cast %86 : vector<1x8x8x32xbf16> to vector<64x32xbf16>
    %c0_118 = arith.constant 0 : index
    %c2_119 = arith.constant 2 : index
    %c0_120 = arith.constant 0 : index
    %c0_121 = arith.constant 0 : index
    %88 = vector.load %arg17[%c0_118, %c2_119, %c0_120, %c0_121] : memref<1x12x12x32xbf16, #tpu.memory_space<vmem>>, vector<1x8x8x32xbf16>
    %89 = vector.shape_cast %88 : vector<1x8x8x32xbf16> to vector<64x32xbf16>
    %c0_122 = arith.constant 0 : index
    %c2_123 = arith.constant 2 : index
    %c2_124 = arith.constant 2 : index
    %c0_125 = arith.constant 0 : index
    %90 = vector.load %arg17[%c0_122, %c2_123, %c2_124, %c0_125] : memref<1x12x12x32xbf16, #tpu.memory_space<vmem>>, vector<1x8x8x32xbf16>
    %91 = vector.shape_cast %90 : vector<1x8x8x32xbf16> to vector<64x32xbf16>
    %c0_126 = arith.constant 0 : index
    %c2_127 = arith.constant 2 : index
    %c4_128 = arith.constant 4 : index
    %c0_129 = arith.constant 0 : index
    %92 = vector.load %arg17[%c0_126, %c2_127, %c4_128, %c0_129] : memref<1x12x12x32xbf16, #tpu.memory_space<vmem>>, vector<1x8x8x32xbf16>
    %93 = vector.shape_cast %92 : vector<1x8x8x32xbf16> to vector<64x32xbf16>
    %c0_130 = arith.constant 0 : index
    %c4_131 = arith.constant 4 : index
    %c0_132 = arith.constant 0 : index
    %c0_133 = arith.constant 0 : index
    %94 = vector.load %arg17[%c0_130, %c4_131, %c0_132, %c0_133] : memref<1x12x12x32xbf16, #tpu.memory_space<vmem>>, vector<1x8x8x32xbf16>
    %95 = vector.shape_cast %94 : vector<1x8x8x32xbf16> to vector<64x32xbf16>
    %c0_134 = arith.constant 0 : index
    %c4_135 = arith.constant 4 : index
    %c2_136 = arith.constant 2 : index
    %c0_137 = arith.constant 0 : index
    %96 = vector.load %arg17[%c0_134, %c4_135, %c2_136, %c0_137] : memref<1x12x12x32xbf16, #tpu.memory_space<vmem>>, vector<1x8x8x32xbf16>
    %97 = vector.shape_cast %96 : vector<1x8x8x32xbf16> to vector<64x32xbf16>
    %c0_138 = arith.constant 0 : index
    %c4_139 = arith.constant 4 : index
    %c4_140 = arith.constant 4 : index
    %c0_141 = arith.constant 0 : index
    %98 = vector.load %arg17[%c0_138, %c4_139, %c4_140, %c0_141] : memref<1x12x12x32xbf16, #tpu.memory_space<vmem>>, vector<1x8x8x32xbf16>
    %99 = vector.shape_cast %98 : vector<1x8x8x32xbf16> to vector<64x32xbf16>
    %100 = tpu.concatenate %83, %85, %87, %89, %91, %93, %95, %97, %99 in 1 : vector<64x32xbf16>, vector<64x32xbf16>, vector<64x32xbf16>, vector<64x32xbf16>, vector<64x32xbf16>, vector<64x32xbf16>, vector<64x32xbf16>, vector<64x32xbf16>, vector<64x32xbf16> -> vector<64x288xbf16>
    %cst_142 = arith.constant dense<0.000000e+00> : vector<64x256xf32>
    %101 = tpu.matmul %100, %66, %cst_142 {dimension_numbers = #tpu.dot_dimension_numbers<[1], [0], [0], [1], [0, 0, 1, 1], [], []>} : vector<64x288xbf16>, vector<288x256xbf16>, vector<64x256xf32> -> vector<64x256xf32>
    %102 = vector.broadcast %68 : vector<1x256xf32> to vector<64x256xf32>
    %103 = arith.addf %101, %102 : vector<64x256xf32>
    %cst_143 = arith.constant 0.000000e+00 : f32
    %104 = vector.broadcast %cst_143 : f32 to vector<64x256xf32>
    %105 = arith.maximumf %103, %104 : vector<64x256xf32>
    %106 = arith.truncf %105 : vector<64x256xf32> to vector<64x256xbf16>
    %cst_144 = arith.constant dense<0.000000e+00> : vector<64x256xf32>
    %107 = tpu.matmul %106, %70, %cst_144 {dimension_numbers = #tpu.dot_dimension_numbers<[1], [0], [0], [1], [0, 0, 1, 1], [], []>} : vector<64x256xbf16>, vector<256x256xbf16>, vector<64x256xf32> -> vector<64x256xf32>
    %108 = vector.broadcast %72 : vector<1x256xf32> to vector<64x256xf32>
    %109 = arith.addf %107, %108 : vector<64x256xf32>
    %110 = arith.addf %109, %60 : vector<64x256xf32>
    %cst_145 = arith.constant 0.000000e+00 : f32
    %111 = vector.broadcast %cst_145 : f32 to vector<64x256xf32>
    %112 = arith.maximumf %110, %111 : vector<64x256xf32>
    %c1 = arith.constant 1 : index
    %c0_146 = arith.constant 0 : index
    %c0_147 = arith.constant 0 : index
    %113 = vector.load %arg10[%c1, %c0_146, %c0_147] : memref<3x256x32xbf16, #tpu.memory_space<vmem>>, vector<1x256x32xbf16>
    %114 = vector.shape_cast %113 : vector<1x256x32xbf16> to vector<256x32xbf16>
    %c1_148 = arith.constant 1 : index
    %c0_149 = arith.constant 0 : index
    %c0_150 = arith.constant 0 : index
    %115 = vector.load %arg11[%c1_148, %c0_149, %c0_150] : memref<3x1x32xf32, #tpu.memory_space<vmem>>, vector<1x1x32xf32>
    %116 = vector.shape_cast %115 : vector<1x1x32xf32> to vector<1x32xf32>
    %c1_151 = arith.constant 1 : index
    %c0_152 = arith.constant 0 : index
    %c0_153 = arith.constant 0 : index
    %117 = vector.load %arg12[%c1_151, %c0_152, %c0_153] : memref<3x288x256xbf16, #tpu.memory_space<vmem>>, vector<1x288x256xbf16>
    %118 = vector.shape_cast %117 : vector<1x288x256xbf16> to vector<288x256xbf16>
    %c1_154 = arith.constant 1 : index
    %c0_155 = arith.constant 0 : index
    %c0_156 = arith.constant 0 : index
    %119 = vector.load %arg13[%c1_154, %c0_155, %c0_156] : memref<3x1x256xf32, #tpu.memory_space<vmem>>, vector<1x1x256xf32>
    %120 = vector.shape_cast %119 : vector<1x1x256xf32> to vector<1x256xf32>
    %c1_157 = arith.constant 1 : index
    %c0_158 = arith.constant 0 : index
    %c0_159 = arith.constant 0 : index
    %121 = vector.load %arg14[%c1_157, %c0_158, %c0_159] : memref<3x256x256xbf16, #tpu.memory_space<vmem>>, vector<1x256x256xbf16>
    %122 = vector.shape_cast %121 : vector<1x256x256xbf16> to vector<256x256xbf16>
    %c1_160 = arith.constant 1 : index
    %c0_161 = arith.constant 0 : index
    %c0_162 = arith.constant 0 : index
    %123 = vector.load %arg15[%c1_160, %c0_161, %c0_162] : memref<3x1x256xf32, #tpu.memory_space<vmem>>, vector<1x1x256xf32>
    %124 = vector.shape_cast %123 : vector<1x1x256xf32> to vector<1x256xf32>
    %125 = arith.truncf %112 : vector<64x256xf32> to vector<64x256xbf16>
    %cst_163 = arith.constant dense<0.000000e+00> : vector<64x32xf32>
    %126 = tpu.matmul %125, %114, %cst_163 {dimension_numbers = #tpu.dot_dimension_numbers<[1], [0], [0], [1], [0, 0, 1, 1], [], []>} : vector<64x256xbf16>, vector<256x32xbf16>, vector<64x32xf32> -> vector<64x32xf32>
    %127 = vector.broadcast %116 : vector<1x32xf32> to vector<64x32xf32>
    %128 = arith.addf %126, %127 : vector<64x32xf32>
    %cst_164 = arith.constant 0.000000e+00 : f32
    %129 = vector.broadcast %cst_164 : f32 to vector<64x32xf32>
    %130 = arith.maximumf %128, %129 : vector<64x32xf32>
    %131 = arith.truncf %130 : vector<64x32xf32> to vector<64x32xbf16>
    %132 = vector.shape_cast %131 : vector<64x32xbf16> to vector<1x8x8x32xbf16>
    %c0_165 = arith.constant 0 : index
    %c2_166 = arith.constant 2 : index
    %c2_167 = arith.constant 2 : index
    %c0_168 = arith.constant 0 : index
    %133 = vector.load %arg17[%c0_165, %c2_166, %c2_167, %c0_168] : memref<1x12x12x32xbf16, #tpu.memory_space<vmem>>, vector<1x8x8x32xbf16>
    tpu.vector_store %arg17[%c0_165, %c2_166, %c2_167, %c0_168], %132 {strides = array<i32>} : memref<1x12x12x32xbf16, #tpu.memory_space<vmem>>, vector<1x8x8x32xbf16>,
    %c0_169 = arith.constant 0 : index
    %c0_170 = arith.constant 0 : index
    %c0_171 = arith.constant 0 : index
    %c0_172 = arith.constant 0 : index
    %134 = vector.load %arg17[%c0_169, %c0_170, %c0_171, %c0_172] : memref<1x12x12x32xbf16, #tpu.memory_space<vmem>>, vector<1x8x8x32xbf16>
    %135 = vector.shape_cast %134 : vector<1x8x8x32xbf16> to vector<64x32xbf16>
    %c0_173 = arith.constant 0 : index
    %c0_174 = arith.constant 0 : index
    %c2_175 = arith.constant 2 : index
    %c0_176 = arith.constant 0 : index
    %136 = vector.load %arg17[%c0_173, %c0_174, %c2_175, %c0_176] : memref<1x12x12x32xbf16, #tpu.memory_space<vmem>>, vector<1x8x8x32xbf16>
    %137 = vector.shape_cast %136 : vector<1x8x8x32xbf16> to vector<64x32xbf16>
    %c0_177 = arith.constant 0 : index
    %c0_178 = arith.constant 0 : index
    %c4_179 = arith.constant 4 : index
    %c0_180 = arith.constant 0 : index
    %138 = vector.load %arg17[%c0_177, %c0_178, %c4_179, %c0_180] : memref<1x12x12x32xbf16, #tpu.memory_space<vmem>>, vector<1x8x8x32xbf16>
    %139 = vector.shape_cast %138 : vector<1x8x8x32xbf16> to vector<64x32xbf16>
    %c0_181 = arith.constant 0 : index
    %c2_182 = arith.constant 2 : index
    %c0_183 = arith.constant 0 : index
    %c0_184 = arith.constant 0 : index
    %140 = vector.load %arg17[%c0_181, %c2_182, %c0_183, %c0_184] : memref<1x12x12x32xbf16, #tpu.memory_space<vmem>>, vector<1x8x8x32xbf16>
    %141 = vector.shape_cast %140 : vector<1x8x8x32xbf16> to vector<64x32xbf16>
    %c0_185 = arith.constant 0 : index
    %c2_186 = arith.constant 2 : index
    %c2_187 = arith.constant 2 : index
    %c0_188 = arith.constant 0 : index
    %142 = vector.load %arg17[%c0_185, %c2_186, %c2_187, %c0_188] : memref<1x12x12x32xbf16, #tpu.memory_space<vmem>>, vector<1x8x8x32xbf16>
    %143 = vector.shape_cast %142 : vector<1x8x8x32xbf16> to vector<64x32xbf16>
    %c0_189 = arith.constant 0 : index
    %c2_190 = arith.constant 2 : index
    %c4_191 = arith.constant 4 : index
    %c0_192 = arith.constant 0 : index
    %144 = vector.load %arg17[%c0_189, %c2_190, %c4_191, %c0_192] : memref<1x12x12x32xbf16, #tpu.memory_space<vmem>>, vector<1x8x8x32xbf16>
    %145 = vector.shape_cast %144 : vector<1x8x8x32xbf16> to vector<64x32xbf16>
    %c0_193 = arith.constant 0 : index
    %c4_194 = arith.constant 4 : index
    %c0_195 = arith.constant 0 : index
    %c0_196 = arith.constant 0 : index
    %146 = vector.load %arg17[%c0_193, %c4_194, %c0_195, %c0_196] : memref<1x12x12x32xbf16, #tpu.memory_space<vmem>>, vector<1x8x8x32xbf16>
    %147 = vector.shape_cast %146 : vector<1x8x8x32xbf16> to vector<64x32xbf16>
    %c0_197 = arith.constant 0 : index
    %c4_198 = arith.constant 4 : index
    %c2_199 = arith.constant 2 : index
    %c0_200 = arith.constant 0 : index
    %148 = vector.load %arg17[%c0_197, %c4_198, %c2_199, %c0_200] : memref<1x12x12x32xbf16, #tpu.memory_space<vmem>>, vector<1x8x8x32xbf16>
    %149 = vector.shape_cast %148 : vector<1x8x8x32xbf16> to vector<64x32xbf16>
    %c0_201 = arith.constant 0 : index
    %c4_202 = arith.constant 4 : index
    %c4_203 = arith.constant 4 : index
    %c0_204 = arith.constant 0 : index
    %150 = vector.load %arg17[%c0_201, %c4_202, %c4_203, %c0_204] : memref<1x12x12x32xbf16, #tpu.memory_space<vmem>>, vector<1x8x8x32xbf16>
    %151 = vector.shape_cast %150 : vector<1x8x8x32xbf16> to vector<64x32xbf16>
    %152 = tpu.concatenate %135, %137, %139, %141, %143, %145, %147, %149, %151 in 1 : vector<64x32xbf16>, vector<64x32xbf16>, vector<64x32xbf16>, vector<64x32xbf16>, vector<64x32xbf16>, vector<64x32xbf16>, vector<64x32xbf16>, vector<64x32xbf16>, vector<64x32xbf16> -> vector<64x288xbf16>
    %cst_205 = arith.constant dense<0.000000e+00> : vector<64x256xf32>
    %153 = tpu.matmul %152, %118, %cst_205 {dimension_numbers = #tpu.dot_dimension_numbers<[1], [0], [0], [1], [0, 0, 1, 1], [], []>} : vector<64x288xbf16>, vector<288x256xbf16>, vector<64x256xf32> -> vector<64x256xf32>
    %154 = vector.broadcast %120 : vector<1x256xf32> to vector<64x256xf32>
    %155 = arith.addf %153, %154 : vector<64x256xf32>
    %cst_206 = arith.constant 0.000000e+00 : f32
    %156 = vector.broadcast %cst_206 : f32 to vector<64x256xf32>
    %157 = arith.maximumf %155, %156 : vector<64x256xf32>
    %158 = arith.truncf %157 : vector<64x256xf32> to vector<64x256xbf16>
    %cst_207 = arith.constant dense<0.000000e+00> : vector<64x256xf32>
    %159 = tpu.matmul %158, %122, %cst_207 {dimension_numbers = #tpu.dot_dimension_numbers<[1], [0], [0], [1], [0, 0, 1, 1], [], []>} : vector<64x256xbf16>, vector<256x256xbf16>, vector<64x256xf32> -> vector<64x256xf32>
    %160 = vector.broadcast %124 : vector<1x256xf32> to vector<64x256xf32>
    %161 = arith.addf %159, %160 : vector<64x256xf32>
    %162 = arith.addf %161, %112 : vector<64x256xf32>
    %cst_208 = arith.constant 0.000000e+00 : f32
    %163 = vector.broadcast %cst_208 : f32 to vector<64x256xf32>
    %164 = arith.maximumf %162, %163 : vector<64x256xf32>
    %c2_209 = arith.constant 2 : index
    %c0_210 = arith.constant 0 : index
    %c0_211 = arith.constant 0 : index
    %165 = vector.load %arg10[%c2_209, %c0_210, %c0_211] : memref<3x256x32xbf16, #tpu.memory_space<vmem>>, vector<1x256x32xbf16>
    %166 = vector.shape_cast %165 : vector<1x256x32xbf16> to vector<256x32xbf16>
    %c2_212 = arith.constant 2 : index
    %c0_213 = arith.constant 0 : index
    %c0_214 = arith.constant 0 : index
    %167 = vector.load %arg11[%c2_212, %c0_213, %c0_214] : memref<3x1x32xf32, #tpu.memory_space<vmem>>, vector<1x1x32xf32>
    %168 = vector.shape_cast %167 : vector<1x1x32xf32> to vector<1x32xf32>
    %c2_215 = arith.constant 2 : index
    %c0_216 = arith.constant 0 : index
    %c0_217 = arith.constant 0 : index
    %169 = vector.load %arg12[%c2_215, %c0_216, %c0_217] : memref<3x288x256xbf16, #tpu.memory_space<vmem>>, vector<1x288x256xbf16>
    %170 = vector.shape_cast %169 : vector<1x288x256xbf16> to vector<288x256xbf16>
    %c2_218 = arith.constant 2 : index
    %c0_219 = arith.constant 0 : index
    %c0_220 = arith.constant 0 : index
    %171 = vector.load %arg13[%c2_218, %c0_219, %c0_220] : memref<3x1x256xf32, #tpu.memory_space<vmem>>, vector<1x1x256xf32>
    %172 = vector.shape_cast %171 : vector<1x1x256xf32> to vector<1x256xf32>
    %c2_221 = arith.constant 2 : index
    %c0_222 = arith.constant 0 : index
    %c0_223 = arith.constant 0 : index
    %173 = vector.load %arg14[%c2_221, %c0_222, %c0_223] : memref<3x256x256xbf16, #tpu.memory_space<vmem>>, vector<1x256x256xbf16>
    %174 = vector.shape_cast %173 : vector<1x256x256xbf16> to vector<256x256xbf16>
    %c2_224 = arith.constant 2 : index
    %c0_225 = arith.constant 0 : index
    %c0_226 = arith.constant 0 : index
    %175 = vector.load %arg15[%c2_224, %c0_225, %c0_226] : memref<3x1x256xf32, #tpu.memory_space<vmem>>, vector<1x1x256xf32>
    %176 = vector.shape_cast %175 : vector<1x1x256xf32> to vector<1x256xf32>
    %177 = arith.truncf %164 : vector<64x256xf32> to vector<64x256xbf16>
    %cst_227 = arith.constant dense<0.000000e+00> : vector<64x32xf32>
    %178 = tpu.matmul %177, %166, %cst_227 {dimension_numbers = #tpu.dot_dimension_numbers<[1], [0], [0], [1], [0, 0, 1, 1], [], []>} : vector<64x256xbf16>, vector<256x32xbf16>, vector<64x32xf32> -> vector<64x32xf32>
    %179 = vector.broadcast %168 : vector<1x32xf32> to vector<64x32xf32>
    %180 = arith.addf %178, %179 : vector<64x32xf32>
    %cst_228 = arith.constant 0.000000e+00 : f32
    %181 = vector.broadcast %cst_228 : f32 to vector<64x32xf32>
    %182 = arith.maximumf %180, %181 : vector<64x32xf32>
    %183 = arith.truncf %182 : vector<64x32xf32> to vector<64x32xbf16>
    %184 = vector.shape_cast %183 : vector<64x32xbf16> to vector<1x8x8x32xbf16>
    %c0_229 = arith.constant 0 : index
    %c2_230 = arith.constant 2 : index
    %c2_231 = arith.constant 2 : index
    %c0_232 = arith.constant 0 : index
    %185 = vector.load %arg17[%c0_229, %c2_230, %c2_231, %c0_232] : memref<1x12x12x32xbf16, #tpu.memory_space<vmem>>, vector<1x8x8x32xbf16>
    tpu.vector_store %arg17[%c0_229, %c2_230, %c2_231, %c0_232], %184 {strides = array<i32>} : memref<1x12x12x32xbf16, #tpu.memory_space<vmem>>, vector<1x8x8x32xbf16>,
    %c0_233 = arith.constant 0 : index
    %c0_234 = arith.constant 0 : index
    %c0_235 = arith.constant 0 : index
    %c0_236 = arith.constant 0 : index
    %186 = vector.load %arg17[%c0_233, %c0_234, %c0_235, %c0_236] : memref<1x12x12x32xbf16, #tpu.memory_space<vmem>>, vector<1x8x8x32xbf16>
    %187 = vector.shape_cast %186 : vector<1x8x8x32xbf16> to vector<64x32xbf16>
    %c0_237 = arith.constant 0 : index
    %c0_238 = arith.constant 0 : index
    %c2_239 = arith.constant 2 : index
    %c0_240 = arith.constant 0 : index
    %188 = vector.load %arg17[%c0_237, %c0_238, %c2_239, %c0_240] : memref<1x12x12x32xbf16, #tpu.memory_space<vmem>>, vector<1x8x8x32xbf16>
    %189 = vector.shape_cast %188 : vector<1x8x8x32xbf16> to vector<64x32xbf16>
    %c0_241 = arith.constant 0 : index
    %c0_242 = arith.constant 0 : index
    %c4_243 = arith.constant 4 : index
    %c0_244 = arith.constant 0 : index
    %190 = vector.load %arg17[%c0_241, %c0_242, %c4_243, %c0_244] : memref<1x12x12x32xbf16, #tpu.memory_space<vmem>>, vector<1x8x8x32xbf16>
    %191 = vector.shape_cast %190 : vector<1x8x8x32xbf16> to vector<64x32xbf16>
    %c0_245 = arith.constant 0 : index
    %c2_246 = arith.constant 2 : index
    %c0_247 = arith.constant 0 : index
    %c0_248 = arith.constant 0 : index
    %192 = vector.load %arg17[%c0_245, %c2_246, %c0_247, %c0_248] : memref<1x12x12x32xbf16, #tpu.memory_space<vmem>>, vector<1x8x8x32xbf16>
    %193 = vector.shape_cast %192 : vector<1x8x8x32xbf16> to vector<64x32xbf16>
    %c0_249 = arith.constant 0 : index
    %c2_250 = arith.constant 2 : index
    %c2_251 = arith.constant 2 : index
    %c0_252 = arith.constant 0 : index
    %194 = vector.load %arg17[%c0_249, %c2_250, %c2_251, %c0_252] : memref<1x12x12x32xbf16, #tpu.memory_space<vmem>>, vector<1x8x8x32xbf16>
    %195 = vector.shape_cast %194 : vector<1x8x8x32xbf16> to vector<64x32xbf16>
    %c0_253 = arith.constant 0 : index
    %c2_254 = arith.constant 2 : index
    %c4_255 = arith.constant 4 : index
    %c0_256 = arith.constant 0 : index
    %196 = vector.load %arg17[%c0_253, %c2_254, %c4_255, %c0_256] : memref<1x12x12x32xbf16, #tpu.memory_space<vmem>>, vector<1x8x8x32xbf16>
    %197 = vector.shape_cast %196 : vector<1x8x8x32xbf16> to vector<64x32xbf16>
    %c0_257 = arith.constant 0 : index
    %c4_258 = arith.constant 4 : index
    %c0_259 = arith.constant 0 : index
    %c0_260 = arith.constant 0 : index
    %198 = vector.load %arg17[%c0_257, %c4_258, %c0_259, %c0_260] : memref<1x12x12x32xbf16, #tpu.memory_space<vmem>>, vector<1x8x8x32xbf16>
    %199 = vector.shape_cast %198 : vector<1x8x8x32xbf16> to vector<64x32xbf16>
    %c0_261 = arith.constant 0 : index
    %c4_262 = arith.constant 4 : index
    %c2_263 = arith.constant 2 : index
    %c0_264 = arith.constant 0 : index
    %200 = vector.load %arg17[%c0_261, %c4_262, %c2_263, %c0_264] : memref<1x12x12x32xbf16, #tpu.memory_space<vmem>>, vector<1x8x8x32xbf16>
    %201 = vector.shape_cast %200 : vector<1x8x8x32xbf16> to vector<64x32xbf16>
    %c0_265 = arith.constant 0 : index
    %c4_266 = arith.constant 4 : index
    %c4_267 = arith.constant 4 : index
    %c0_268 = arith.constant 0 : index
    %202 = vector.load %arg17[%c0_265, %c4_266, %c4_267, %c0_268] : memref<1x12x12x32xbf16, #tpu.memory_space<vmem>>, vector<1x8x8x32xbf16>
    %203 = vector.shape_cast %202 : vector<1x8x8x32xbf16> to vector<64x32xbf16>
    %204 = tpu.concatenate %187, %189, %191, %193, %195, %197, %199, %201, %203 in 1 : vector<64x32xbf16>, vector<64x32xbf16>, vector<64x32xbf16>, vector<64x32xbf16>, vector<64x32xbf16>, vector<64x32xbf16>, vector<64x32xbf16>, vector<64x32xbf16>, vector<64x32xbf16> -> vector<64x288xbf16>
    %cst_269 = arith.constant dense<0.000000e+00> : vector<64x256xf32>
    %205 = tpu.matmul %204, %170, %cst_269 {dimension_numbers = #tpu.dot_dimension_numbers<[1], [0], [0], [1], [0, 0, 1, 1], [], []>} : vector<64x288xbf16>, vector<288x256xbf16>, vector<64x256xf32> -> vector<64x256xf32>
    %206 = vector.broadcast %172 : vector<1x256xf32> to vector<64x256xf32>
    %207 = arith.addf %205, %206 : vector<64x256xf32>
    %cst_270 = arith.constant 0.000000e+00 : f32
    %208 = vector.broadcast %cst_270 : f32 to vector<64x256xf32>
    %209 = arith.maximumf %207, %208 : vector<64x256xf32>
    %210 = arith.truncf %209 : vector<64x256xf32> to vector<64x256xbf16>
    %cst_271 = arith.constant dense<0.000000e+00> : vector<64x256xf32>
    %211 = tpu.matmul %210, %174, %cst_271 {dimension_numbers = #tpu.dot_dimension_numbers<[1], [0], [0], [1], [0, 0, 1, 1], [], []>} : vector<64x256xbf16>, vector<256x256xbf16>, vector<64x256xf32> -> vector<64x256xf32>
    %212 = vector.broadcast %176 : vector<1x256xf32> to vector<64x256xf32>
    %213 = arith.addf %211, %212 : vector<64x256xf32>
    %214 = arith.addf %213, %164 : vector<64x256xf32>
    %cst_272 = arith.constant 0.000000e+00 : f32
    %215 = vector.broadcast %cst_272 : f32 to vector<64x256xf32>
    %216 = arith.maximumf %214, %215 : vector<64x256xf32>
    %217 = vector.shape_cast %216 : vector<64x256xf32> to vector<1x8x8x256xf32>
    %c0_273 = arith.constant 0 : index
    %c0_274 = arith.constant 0 : index
    %c0_275 = arith.constant 0 : index
    %c0_276 = arith.constant 0 : index
    %218 = vector.load %arg16[%c0_273, %c0_274, %c0_275, %c0_276] : memref<1x8x8x256xf32, #tpu.memory_space<vmem>>, vector<1x8x8x256xf32>
    tpu.vector_store %arg16[%c0_273, %c0_274, %c0_275, %c0_276], %217 {strides = array<i32>} : memref<1x8x8x256xf32, #tpu.memory_space<vmem>>, vector<1x8x8x256xf32>,
    return
  }
  func.func @transform_0(%arg0: i32) -> (i32, i32, i32, i32) {
    %c0_i32 = arith.constant 0 : i32
    %c0_i32_0 = arith.constant 0 : i32
    %c0_i32_1 = arith.constant 0 : i32
    %c0_i32_2 = arith.constant 0 : i32
    return %arg0, %c0_i32, %c0_i32_0, %c0_i32_1 : i32, i32, i32, i32
  }
  func.func @transform_1(%arg0: i32) -> (i32, i32) {
    %c0_i32 = arith.constant 0 : i32
    %c0_i32_0 = arith.constant 0 : i32
    %c0_i32_1 = arith.constant 0 : i32
    return %c0_i32, %c0_i32_0 : i32, i32
  }
  func.func @transform_2(%arg0: i32) -> (i32, i32) {
    %c0_i32 = arith.constant 0 : i32
    %c0_i32_0 = arith.constant 0 : i32
    %c0_i32_1 = arith.constant 0 : i32
    return %c0_i32, %c0_i32_0 : i32, i32
  }
  func.func @transform_3(%arg0: i32) -> (i32, i32) {
    %c0_i32 = arith.constant 0 : i32
    %c0_i32_0 = arith.constant 0 : i32
    %c0_i32_1 = arith.constant 0 : i32
    return %c0_i32, %c0_i32_0 : i32, i32
  }
  func.func @transform_4(%arg0: i32) -> (i32, i32) {
    %c0_i32 = arith.constant 0 : i32
    %c0_i32_0 = arith.constant 0 : i32
    %c0_i32_1 = arith.constant 0 : i32
    return %c0_i32, %c0_i32_0 : i32, i32
  }
  func.func @transform_5(%arg0: i32) -> (i32, i32) {
    %c0_i32 = arith.constant 0 : i32
    %c0_i32_0 = arith.constant 0 : i32
    %c0_i32_1 = arith.constant 0 : i32
    return %c0_i32, %c0_i32_0 : i32, i32
  }
  func.func @transform_6(%arg0: i32) -> (i32, i32) {
    %c0_i32 = arith.constant 0 : i32
    %c0_i32_0 = arith.constant 0 : i32
    %c0_i32_1 = arith.constant 0 : i32
    return %c0_i32, %c0_i32_0 : i32, i32
  }
  func.func @transform_7(%arg0: i32) -> (i32, i32) {
    %c0_i32 = arith.constant 0 : i32
    %c0_i32_0 = arith.constant 0 : i32
    %c0_i32_1 = arith.constant 0 : i32
    return %c0_i32, %c0_i32_0 : i32, i32
  }
  func.func @transform_8(%arg0: i32) -> (i32, i32) {
    %c0_i32 = arith.constant 0 : i32
    %c0_i32_0 = arith.constant 0 : i32
    %c0_i32_1 = arith.constant 0 : i32
    return %c0_i32, %c0_i32_0 : i32, i32
  }
  func.func @transform_9(%arg0: i32) -> (i32, i32, i32) {
    %c0_i32 = arith.constant 0 : i32
    %c0_i32_0 = arith.constant 0 : i32
    %c0_i32_1 = arith.constant 0 : i32
    %c0_i32_2 = arith.constant 0 : i32
    return %c0_i32, %c0_i32_0, %c0_i32_1 : i32, i32, i32
  }
  func.func @transform_10(%arg0: i32) -> (i32, i32, i32) {
    %c0_i32 = arith.constant 0 : i32
    %c0_i32_0 = arith.constant 0 : i32
    %c0_i32_1 = arith.constant 0 : i32
    %c0_i32_2 = arith.constant 0 : i32
    return %c0_i32, %c0_i32_0, %c0_i32_1 : i32, i32, i32
  }
  func.func @transform_11(%arg0: i32) -> (i32, i32, i32) {
    %c0_i32 = arith.constant 0 : i32
    %c0_i32_0 = arith.constant 0 : i32
    %c0_i32_1 = arith.constant 0 : i32
    %c0_i32_2 = arith.constant 0 : i32
    return %c0_i32, %c0_i32_0, %c0_i32_1 : i32, i32, i32
  }
  func.func @transform_12(%arg0: i32) -> (i32, i32, i32) {
    %c0_i32 = arith.constant 0 : i32
    %c0_i32_0 = arith.constant 0 : i32
    %c0_i32_1 = arith.constant 0 : i32
    %c0_i32_2 = arith.constant 0 : i32
    return %c0_i32, %c0_i32_0, %c0_i32_1 : i32, i32, i32
  }
  func.func @transform_13(%arg0: i32) -> (i32, i32, i32) {
    %c0_i32 = arith.constant 0 : i32
    %c0_i32_0 = arith.constant 0 : i32
    %c0_i32_1 = arith.constant 0 : i32
    %c0_i32_2 = arith.constant 0 : i32
    return %c0_i32, %c0_i32_0, %c0_i32_1 : i32, i32, i32
  }
  func.func @transform_14(%arg0: i32) -> (i32, i32, i32) {
    %c0_i32 = arith.constant 0 : i32
    %c0_i32_0 = arith.constant 0 : i32
    %c0_i32_1 = arith.constant 0 : i32
    %c0_i32_2 = arith.constant 0 : i32
    return %c0_i32, %c0_i32_0, %c0_i32_1 : i32, i32, i32
  }
  func.func @transform_15(%arg0: i32) -> (i32, i32, i32, i32) {
    %c0_i32 = arith.constant 0 : i32
    %c0_i32_0 = arith.constant 0 : i32
    %c0_i32_1 = arith.constant 0 : i32
    %c0_i32_2 = arith.constant 0 : i32
    return %arg0, %c0_i32, %c0_i32_0, %c0_i32_1 : i32, i32, i32, i32
  }
}

</mosaic_0001>

<bundles_post_ra>
// kernel: detnet_body.1
= control target key start
LH: loop header
LB: loop body
LE: loop exit
PB: predicated region body
PF: predicated region fallthrough
CT: control target
= control target key end

     0   :  { %s13535_s0 = inlined_call_operand.vmem [shape: f32[2,8,8,64], index: 0, kind: input, shape index: {}]   ;;  %s13536_s1 = inlined_call_operand.vmem [shape: bf16[64,32], index: 1, kind: input, shape index: {}]   ;;  %s13537_s2 = inlined_call_operand.vmem [shape: f32[1,32], index: 2, kind: input, shape index: {}]   ;;  %s13538_s3 = inlined_call_operand.vmem [shape: bf16[288,256], index: 3, kind: input, shape index: {}]   ;;  %s13539_s4 = inlined_call_operand.vmem [shape: f32[1,256], index: 4, kind: input, shape index: {}]   ;;  %s13540_s5 = inlined_call_operand.vmem [shape: bf16[256,256], index: 5, kind: input, shape index: {}]   ;;  %s13541_s6 = inlined_call_operand.vmem [shape: f32[1,256], index: 6, kind: input, shape index: {}]   ;;  %s13542_s7 = inlined_call_operand.vmem [shape: bf16[64,256], index: 7, kind: input, shape index: {}]   ;;  %s13543_s8 = inlined_call_operand.vmem [shape: f32[1,256], index: 8, kind: input, shape index: {}]   ;;  %s13544_s9 = inlined_call_operand.vmem [shape: bf16[3,256,32], index: 9, kind: input, shape index: {}]   ;;  %s13545_s10 = inlined_call_operand.vmem [shape: f32[3,1,32], index: 10, kind: input, shape index: {}]   ;;  %s13546_s11 = inlined_call_operand.vmem [shape: bf16[3,288,256], index: 11, kind: input, shape index: {}]   ;;  %s13547_s12 = inlined_call_operand.vmem [shape: f32[3,1,256], index: 12, kind: input, shape index: {}]   ;;  %s13548_s13 = inlined_call_operand.vmem [shape: bf16[3,256,256], index: 13, kind: input, shape index: {}]   ;;  %s13549_s14 = inlined_call_operand.vmem [shape: f32[3,1,256], index: 14, kind: input, shape index: {}]   ;;  %s13550_s15 = inlined_call_operand.hbm [shape: f32[2,8,8,256], index: 15, kind: output, shape index: {}]  }
   0x1   :  { %13573 = sst [smem:[#allocation11_spill]] %s13535_s0 }
   0x2   :  { %13574 = sst [smem:[#allocation12_spill]] %s13536_s1 }
   0x3   :  { %13575 = sst [smem:[#allocation13_spill]] %s13537_s2 }
   0x4   :  { %20 = vsyncpa [#allocation4], 0 }
   0x5   :  { %22 = vsyncpa [#allocation4 + $0x1], 0  ;;  %s10009_s18 = smov 0   ;;  %s10011_s19 = smov 0  }
   0x6   :  { %s10013_s20 = smov 0   ;;  %s10015_s21 = smov 0  }
   0x7 LB: > { %13576 = sst [smem:[#allocation6_spill]] %s9909_s18  ;;  %s10030_s22 = sadd.s32 4294967295, %s9921_s21   ;;  %s9921_s21 = sphi %s10015_s21, %s13606_s21   ;;  %s9917_s20 = sphi %s10013_s20, %s13608_s20   ;;  %s9913_s19 = sphi %s10011_s19, %s13610_s19   ;;  %s9909_s18 = sphi %s10009_s18, %s13609_s18  }
   0x8   : > { %13577 = sst [smem:[#allocation7_spill]] %s9917_s20  ;;  %s7452_s23 = sadd.s32 4294967294, %s9921_s21  }
   0x9   : > { %s10034_s24 = sadd.s32 1, %s9921_s21   ;;  %s355_s25 = sadd.s32 1, %s9917_s20 }
   0xa   : > { %13578 = sst [smem:[#allocation8_spill]] %s10034_s24  ;;  %s352_s26 = ssub.s32 %s9921_s21, %s10034_s24 }
   0xb   : > { %p365_p0 = scmp.ne.s32.totalorder %s9917_s20, %s9913_s19  ;;  %p353_p1 = scmp.eq.s32.totalorder %s352_s26, 0 }
   0xc   : > { %p366_p2 = scmp.eq.s32.totalorder %s10030_s22, 1  ;;  %p371_p3 = scmp.ne.s32.totalorder %s9913_s19, %s9909_s18 }
   0xd   : > { %p372_p4 = scmp.eq.s32.totalorder %s7452_s23, 1  ;;  %p7455_p7 = scmp.ge.s32.totalorder %s9921_s21, 1 }
   0xe   : > { %s10045_s27 = scalar_select %p353_p1, %s9917_s20, %s355_s25  }
   0xf   : > { %p10047_p5 = por %p366_p2, %p365_p0  ;;  %p10051_p6 = por %p372_p4, %p371_p3 }
  0x10   : > { %13579 = sst [smem:[#allocation9_spill]] %s10045_s27  ;;  %p440_p8 = scmp.lt.s32.totalorder %s9921_s21, 3 }
  0x11   : > { %s13581_s29 = scalar_select %p10051_p6, 1, 0 }
  0x12   : > { %p441_p9 = pnand %p7455_p7, %p440_p8 }
  0x13   : > { %13582 = sst [smem:[#allocation10_spill]] %s13581_s29  ;;  %p488_p10 = scmp.lt.s32.totalorder (!%p441_p9), %s10030_s22, 1 }
  0x14   : > { %444 = sbr.rel (%p441_p9) target bundleno = 2711 (0xa97), region = 80  ;;  %s13583_s1 = sld [smem:[#allocation12_spill]] (!%p441_p9) }
  0x15   : > { %s13584_s0 = sld [smem:[#allocation11_spill]] (!%p441_p9)  ;;  %s13558_s18 = smov (!%p441_p9), 32  }
  0x16   : > { %s13589_s2 = sld [smem:[#allocation13_spill]] (!%p441_p9)  ;;  %s13556_s27 = smov (!%p441_p9), 64  }
  0x17   : > { %s13560_s24 = smov (!%p441_p9), 96  }
  0x19   : > { %s489_s25 = scalar_select %p488_p10, %s10030_s22, 1  ;;  %vm658_vm0 = vcmask 523264   ;;  %vm494_vm1 = vcmask 257024   ;;  %vm496_vm2 = vcmask 254976   ;;  %v9923_v16 = vmov 0  }
  0x1a   : > { %v9430_v0 = vld [vmem:[%s13583_s1 + $0x18] sm:$0xff]  ;;  %v9429_v1 = vld [vmem:[%s13583_s1 + $0x10] sm:$0xff]  ;;  %v9428_v2 = vld [vmem:[%s13583_s1 + $0x8] sm:$0xff]  ;;  %495 = vst.msk [vmem:[#allocation2] sm:$0xf] %vm494_vm1, %v9923_v16  ;;  %vm505_vm3 = vcmask 253952  }
  0x1b   : > { %675 = vmatpush.bf16.msra.mxu0 %v9430_v0  ;;  %s9426_s26 = sshll.u32 %s489_s25, 6  ;;  %v9427_v3 = vld [vmem:[%s13583_s1] sm:$0xff]  ;;  %497 = vst.msk [vmem:[#allocation2 + $0x4] sm:$0x3] %vm496_vm2, %v9923_v16  ;;  %vm814_vm4 = vcmask 1042432   ;;  %vm815_vm5 = vcmask 1046532  }
  0x1c   : > { %s492_s30 = scalar_lea.vmem %s13584_s0, %s9426_s26  ;;  %498 = vst.msk [vmem:[#allocation2 + $0x8] sm:$0xf] %vm494_vm1, %v9923_v16  ;;  %vm10098_vm6 = vmor %vm814_vm4, %vm815_vm5  ;;  %vm518_vm7 = vcmask 254977   ;;  %vm881_vm8 = vcmask 1041408   ;;  %vm882_vm9 = vcmask 1045508   ;;  %vm757_vm11 = vcmask 257025  }
  0x1d   : > { %v531_v4 = vld [vmem:[%s492_s30] sm:$0xff]  ;;  %v532_v5 = vld [vmem:[%s492_s30 + $0x8] sm:$0xff]  ;;  %v533_v7 = vld [vmem:[%s492_s30 + $0x10] sm:$0xff]  ;;  %499 = vst.msk [vmem:[#allocation2 + $0xc] sm:$0x3] %vm496_vm2, %v9923_v16  ;;  %vm1369_vm12 = vcmask 261120  }
  0x1e   : > { %v10074_v6 = vpack.c.bf16 %v532_v5, %v531_v4  ;;  %v534_v8 = vld [vmem:[%s492_s30 + $0x18] sm:$0xff]  ;;  %v535_v10 = vld [vmem:[%s492_s30 + $0x20] sm:$0xff]  ;;  %v536_v11 = vld [vmem:[%s492_s30 + $0x28] sm:$0xff]  ;;  %501 = vst.msk [vmem:[#allocation2 + $0x50] sm:$0xf] %vm494_vm1, %v9923_v16  ;;  %vm1390_vm13 = vcmask 785408  }
  0x1f   : > { %676 = vmatpush.bf16.msra.mxu0 %v9429_v1  ;;  %v10078_v9 = vpack.c.bf16 %v534_v8, %v533_v7  ;;  %v10082_v12 = vpack.c.bf16 %v536_v11, %v535_v10  ;;  %v537_v13 = vld [vmem:[%s492_s30 + $0x30] sm:$0xff]  ;;  %v538_v14 = vld [vmem:[%s492_s30 + $0x38] sm:$0xff]  ;;  %502 = vst.msk [vmem:[#allocation2 + $0x54] sm:$0x3] %vm496_vm2, %v9923_v16  ;;  %vm10145_vm10 = vmor %vm881_vm8, %vm882_vm9  ;;  %s13590_s25 = smov 32   ;;  %s13591_s26 = smov 64  }
  0x20   : > { %v10086_v15 = vpack.c.bf16 %v538_v14, %v537_v13  ;;  %503 = vst.msk [vmem:[#allocation2 + $0x58] sm:$0xf] %vm494_vm1, %v9923_v16  ;;  %v10166_v43 = vld [vmem:[%s13589_s2] ss:$0 sm:$0xff]  ;;  %v7713_v54 = vld [vmem:[%s13538_s3 + $0x110] sm:$0xf] }
  0x21   : > { %v782_v17 = vld [vmem:[#allocation2] sm:$0xe]  ;;  %504 = vst.msk [vmem:[#allocation2 + $0x5c] sm:$0x3] %vm496_vm2, %v9923_v16  ;;  %v9466_v55 = vld [vmem:[%s13538_s3 + $0x114] sm:$0xf0] }
  0x22   : > { %v783_v18 = vld [vmem:[#allocation2 + $0x4] sm:$0x1]  ;;  %v7479_v19 = vrot.slane %v782_v17, 9  ;;  %506 = vst.msk [vmem:[#allocation2] sm:$0x1] %vm505_vm3, %v9923_v16  ;;  %v7714_v57 = vor.u32 %v9466_v55, %v7713_v54  ;;  %s13592_s30 = smov 96  }
  0x23   : > { %677 = vmatpush.bf16.msra.mxu0 %v9428_v2  ;;  %v784_v20 = vld [vmem:[#allocation2 + $0x8] sm:$0xe]  ;;  %v819_v22 = vrot.slane %v783_v18, 5  ;;  %507 = vst.msk [vmem:[#allocation2 + $0x8] sm:$0x1] %vm505_vm3, %v9923_v16  ;;  %s9807_s1 = sshll.u32 %s10030_s22, 7 }
  0x24   : > { %v785_v23 = vld [vmem:[#allocation2 + $0xc] sm:$0x1]  ;;  %v7480_v24 = vrot.slane %v784_v20, 9  ;;  %508 = vst.msk [vmem:[#allocation2 + $0x10] sm:$0x1] %vm505_vm3, %v9923_v16  ;;  %9808 = vmatpush.bf16.msra.mxu3 %v7714_v57 }
  0x25   : > { %v820_v25 = vsel %vm10098_vm6, %v7479_v19, %v819_v22  ;;  %v823_v26 = vrot.slane %v785_v23, 5  ;;  %509 = vst.msk [vmem:[#allocation2 + $0x18] sm:$0x1] %vm505_vm3, %v9923_v16  ;;  %v849_v31 = vld [vmem:[#allocation2] sm:$0xc] }
  0x26   : > { %v1209_v27 = vunpack.c.l.b16 %v820_v25  ;;  %510 = vst.msk [vmem:[#allocation2 + $0x20] sm:$0x1] %vm505_vm3, %v9923_v16  ;;  %v851_v32 = vld [vmem:[#allocation2 + $0x8] sm:$0xc]  ;;  %v7487_v33 = vrot.slane %v849_v31, 10 }
  0x27   : > { %678 = vmatpush.bf16.msra.mxu0 %v9427_v3  ;;  %v824_v28 = vsel %vm10098_vm6, %v7480_v24, %v823_v26  ;;  %511 = vst.msk [vmem:[#allocation2 + $0x28] sm:$0x1] %vm505_vm3, %v9923_v16  ;;  %v7488_v36 = vrot.slane %v851_v32, 10  ;;  %v7705_v59 = vld [vmem:[%s13538_s3 + $0x100] sm:$0xf] }
  0x28   : > { %v1210_v29 = vunpack.c.l.b16 %v824_v28  ;;  %512 = vst.msk [vmem:[#allocation2 + $0x30] sm:$0x1] %vm505_vm3, %v9923_v16  ;;  %v9464_v60 = vld [vmem:[%s13538_s3 + $0x104] sm:$0xf0]  ;;  %v9351_v21 = vld [vmem:[%s13548_s13 + $0x270] sm:$0xf] }
  0x29   : > { %513 = vst.msk [vmem:[#allocation2 + $0x38] sm:$0x1] %vm505_vm3, %v9923_v16  ;;  %v7706_v61 = vor.u32 %v9464_v60, %v7705_v59 }
  0x2a   : > { %7475 = vmatmul.msk.bf16.vlgmr.msra.gmra.mxu0 %vm658_vm0, %v10074_v6  ;;  %v1217_v30 = vpack.c.b16 %v1210_v29, %v1209_v27  ;;  %514 = vst.msk [vmem:[#allocation2 + $0x40] sm:$0x1] %vm505_vm3, %v9923_v16 }
  0x2b   : > { %515 = vst.msk [vmem:[#allocation2 + $0x48] sm:$0x1] %vm505_vm3, %v9923_v16  ;;  %1696 = vmatpush.bf16.msrb.mxu0 %v7714_v57  ;;  %9809 = vmatpush.bf16.msra.mxu3 %v7706_v61 }
  0x2c   : > { %1221 = vrot.lane.b32.xlu0 %v1217_v30, %s13558_s18  ;;  %516 = vst.msk [vmem:[#allocation2 + $0x50] sm:$0x1] %vm505_vm3, %v9923_v16 }
  0x2d   : > { %517 = vst.msk [vmem:[#allocation2 + $0x58] sm:$0x1] %vm505_vm3, %v9923_v16 }
  0x2e   : > { %519 = vst.msk [vmem:[#allocation2 + $0x4] sm:$0x2] %vm518_vm7, %v9923_v16 }
  0x2f   : > { %520 = vst.msk [vmem:[#allocation2 + $0xc] sm:$0x2] %vm518_vm7, %v9923_v16  ;;  %1697 = vmatpush.bf16.msrb.mxu0 %v7706_v61 }
  0x30   : > { %521 = vst.msk [vmem:[#allocation2 + $0x14] sm:$0x2] %vm518_vm7, %v9923_v16 }
  0x31   : > { %522 = vst.msk [vmem:[#allocation2 + $0x1c] sm:$0x2] %vm518_vm7, %v9923_v16 }
  0x32   : > { %523 = vst.msk [vmem:[#allocation2 + $0x24] sm:$0x2] %vm518_vm7, %v9923_v16 }
  0x33   : > { %524 = vst.msk [vmem:[#allocation2 + $0x2c] sm:$0x2] %vm518_vm7, %v9923_v16 }
  0x34   : > { %525 = vst.msk [vmem:[#allocation2 + $0x34] sm:$0x2] %vm518_vm7, %v9923_v16 }
  0x35   : > { %v850_v34 = vld [vmem:[#allocation2 + $0x4] sm:$0x3]  ;;  %526 = vst.msk [vmem:[#allocation2 + $0x3c] sm:$0x2] %vm518_vm7, %v9923_v16 }
  0x36   : > { %v852_v37 = vld [vmem:[#allocation2 + $0xc] sm:$0x3]  ;;  %v886_v38 = vrot.slane %v850_v34, 6  ;;  %527 = vst.msk [vmem:[#allocation2 + $0x44] sm:$0x2] %vm518_vm7, %v9923_v16 }
  0x37   : > { %v890_v39 = vrot.slane %v852_v37, 6  ;;  %528 = vst.msk [vmem:[#allocation2 + $0x4c] sm:$0x2] %vm518_vm7, %v9923_v16 }
  0x38   : > { %v887_v40 = vsel %vm10145_vm10, %v7487_v33, %v886_v38  ;;  %529 = vst.msk [vmem:[#allocation2 + $0x54] sm:$0x2] %vm518_vm7, %v9923_v16 }
  0x39   : > { %v891_v41 = vsel %vm10145_vm10, %v7488_v36, %v890_v39  ;;  %v1229_v42 = vunpack.c.l.b16 %v887_v40  ;;  %530 = vst.msk [vmem:[#allocation2 + $0x5c] sm:$0x2] %vm518_vm7, %v9923_v16 }
  0x3a   : > { %7476 = vmatmul.msk.bf16.gmra.mxu0 %vm658_vm0, %v10078_v9  ;;  %v1230_v44 = vunpack.c.l.b16 %v891_v41 }
  0x3c   : > { %v1237_v45 = vpack.c.b16 %v1230_v44, %v1229_v42 }
  0x3e   : > { %1241 = vrot.lane.b32.xlu0 %v1237_v45, %s13556_s27 }
  0x4a   : > { %7477 = vmatmul.msk.bf16.gmra.mxu0 %vm658_vm0, %v10082_v12 }
  0x5a   : > { %7478 = vmatmul.msk.bf16.gmra.mxu0 %vm658_vm0, %v10086_v15 }
  0xa7   : > { %v680_v46 = vpop.f32.mrf.mxu0 }
  0xa8   : > { %v681_v47 = vadd.f32 %v10166_v43, %v680_v46 }
  0xaa   : > { %v700_v48 = vmax.f32 %v681_v47, 0.0 }
  0xac   : > { %v708_v49 = vpack.c.bf16 %v700_v48, %v700_v48 }
  0xae   : > { %v724_v50 = vrot.slane %v708_v49, 7 }
  0xaf   : > { %v682_v51 = vpop.f32.mrf.mxu0 }
  0xb0   : > { %v725_v52 = vrot.slane %v724_v50, 4  ;;  %758 = vst.msk [vmem:[#allocation2 + $0x10] sm:$0xe] %vm757_vm11, %v724_v50  ;;  %v683_v53 = vadd.f32 %v10166_v43, %v682_v51 }
  0xb2   : > { %759 = vst.msk [vmem:[#allocation2 + $0x14] sm:$0x1] %vm505_vm3, %v725_v52  ;;  %v701_v56 = vmax.f32 %v683_v53, 0.0 }
  0xb4   : > { %v709_v58 = vpack.c.bf16 %v701_v56, %v701_v56 }
  0xb6   : > { %v726_v62 = vrot.slane %v709_v58, 7 }
  0xb7   : > { %v685_v63 = vpop.f32.mrf.mxu0  ;;  %v853_v5 = vld [vmem:[#allocation2 + $0x10] sm:$0xc] }
  0xb8   : > { %v727_v0 = vrot.slane %v726_v62, 4  ;;  %760 = vst.msk [vmem:[#allocation2 + $0x18] sm:$0xe] %vm757_vm11, %v726_v62  ;;  %v686_v1 = vadd.f32 %v10166_v43, %v685_v63  ;;  %v786_v7 = vld [vmem:[#allocation2 + $0x10] sm:$0xe]  ;;  %v7489_v16 = vrot.slane %v853_v5, 10 }
  0xb9   : > { %v854_v2 = vld [vmem:[#allocation2 + $0x14] sm:$0x3]  ;;  %v7545_v14 = vld [vmem:[#allocation2 + $0x10] sm:$0xf]  ;;  %v7481_v17 = vrot.slane %v786_v7, 9 }
  0xba   : > { %761 = vst.msk [vmem:[#allocation2 + $0x1c] sm:$0x1] %vm505_vm3, %v727_v0  ;;  %v702_v3 = vmax.f32 %v686_v1, 0.0  ;;  %v787_v4 = vld [vmem:[#allocation2 + $0x14] sm:$0x1]  ;;  %v894_v10 = vrot.slane %v854_v2, 6 }
  0xbb   : > { %v827_v11 = vrot.slane %v787_v4, 5 }
  0xbc   : > { %v710_v8 = vpack.c.bf16 %v702_v3, %v702_v3  ;;  %v895_v27 = vsel %vm10145_vm10, %v7489_v16, %v894_v10 }
  0xbd   : > { %v828_v30 = vsel %vm10098_vm6, %v7481_v17, %v827_v11  ;;  %v1231_v39 = vunpack.c.l.b16 %v895_v27 }
  0xbe   : > { %v728_v13 = vrot.slane %v710_v8, 7  ;;  %v1211_v41 = vunpack.c.l.b16 %v828_v30 }
  0xbf   : > { %v687_v18 = vpop.f32.mrf.mxu0  ;;  %v9511_v19 = vld [vmem:[#allocation2 + $0x14] sm:$0xf0] }
  0xc0   : > { %v855_v20 = vld [vmem:[#allocation2 + $0x18] sm:$0xc]  ;;  %v729_v23 = vrot.slane %v728_v13, 4  ;;  %762 = vst.msk [vmem:[#allocation2 + $0x20] sm:$0xe] %vm757_vm11, %v728_v13  ;;  %v688_v24 = vadd.f32 %v10166_v43, %v687_v18  ;;  %v7546_v25 = vor.u32 %v9511_v19, %v7545_v14 }
  0xc1   : > { %v788_v22 = vld [vmem:[#allocation2 + $0x18] sm:$0xe]  ;;  %v856_v26 = vld [vmem:[#allocation2 + $0x1c] sm:$0x3]  ;;  %v7490_v28 = vrot.slane %v855_v20, 10 }
  0xc2   : > { %v789_v29 = vld [vmem:[#allocation2 + $0x1c] sm:$0x1]  ;;  %763 = vst.msk [vmem:[#allocation2 + $0x24] sm:$0x1] %vm505_vm3, %v729_v23  ;;  %v703_v31 = vmax.f32 %v688_v24, 0.0  ;;  %1269 = vrot.lane.b32.xlu1 %v7546_v25, %s13560_s24  ;;  %v898_v32 = vrot.slane %v856_v26, 6 }
  0xc3   : > { %v7482_v33 = vrot.slane %v788_v22, 9  ;;  %v831_v34 = vrot.slane %v789_v29, 5 }
  0xc4   : > { %v711_v36 = vpack.c.bf16 %v703_v31, %v703_v31  ;;  %v899_v37 = vsel %vm10145_vm10, %v7490_v28, %v898_v32 }
  0xc5   : > { %v832_v38 = vsel %vm10098_vm6, %v7482_v33, %v831_v34  ;;  %v1232_v40 = vunpack.c.l.b16 %v899_v37 }
  0xc6   : > { %v1212_v42 = vunpack.c.l.b16 %v832_v38  ;;  %v730_v44 = vrot.slane %v711_v36, 7 }
  0xc7   : > { %v690_v45 = vpop.f32.mrf.mxu0  ;;  %v1238_v46 = vpack.c.b16 %v1232_v40, %v1231_v39  ;;  %v1125_v50 = vld [vmem:[#allocation2 + $0x20] sm:$0xc] }
  0xc8   : > { %v1218_v47 = vpack.c.b16 %v1212_v42, %v1211_v41  ;;  %v731_v48 = vrot.slane %v730_v44, 4  ;;  %764 = vst.msk [vmem:[#allocation2 + $0x28] sm:$0xe] %vm757_vm11, %v730_v44  ;;  %v691_v49 = vadd.f32 %v10166_v43, %v690_v45  ;;  %v790_v52 = vld [vmem:[#allocation2 + $0x20] sm:$0xe]  ;;  %v7519_v58 = vrot.slane %v1125_v50, 10 }
  0xc9   : > { %1243 = vrot.lane.b32.xlu2 %v1238_v46, %s13556_s27  ;;  %v1126_v51 = vld [vmem:[#allocation2 + $0x24] sm:$0x3]  ;;  %v857_v55 = vld [vmem:[#allocation2 + $0x20] sm:$0xc]  ;;  %v7483_v60 = vrot.slane %v790_v52, 9 }
  0xca   : > { %765 = vst.msk [vmem:[#allocation2 + $0x2c] sm:$0x1] %vm505_vm3, %v731_v48  ;;  %v704_v53 = vmax.f32 %v691_v49, 0.0  ;;  %1223 = vrot.lane.b32.xlu1 %v1218_v47, %s13558_s18  ;;  %v791_v54 = vld [vmem:[#allocation2 + $0x24] sm:$0x1]  ;;  %v1159_v59 = vrot.slane %v1126_v51, 6 }
  0xcb   : > { %v858_v56 = vld [vmem:[#allocation2 + $0x24] sm:$0x3]  ;;  %v835_v61 = vrot.slane %v791_v54, 5  ;;  %v7549_v63 = vld [vmem:[#allocation2 + $0x20] sm:$0xf]  ;;  %v7491_v0 = vrot.slane %v857_v55, 10 }
  0xcc   : > { %v712_v57 = vpack.c.bf16 %v704_v53, %v704_v53  ;;  %v902_v1 = vrot.slane %v858_v56, 6  ;;  %v1160_v14 = vsel %vm10145_vm10, %v7519_v58, %v1159_v59  ;;  %v991_v59 = vld [vmem:[#allocation2 + $0x1c] sm:$0x3] }
  0xcd   : > { %v836_v18 = vsel %vm10098_vm6, %v7483_v60, %v835_v61  ;;  %v1357_v31 = vunpack.c.l.b16 %v1160_v14 }
  0xce   : > { %v732_v62 = vrot.slane %v712_v57, 7  ;;  %v903_v25 = vsel %vm10145_vm10, %v7491_v0, %v902_v1  ;;  %v1213_v33 = vunpack.c.l.b16 %v836_v18  ;;  %v989_v0 = vld [vmem:[#allocation2 + $0x14] sm:$0x3]  ;;  %v990_v1 = vld [vmem:[#allocation2 + $0x18] sm:$0xc] }
  0xcf   : > { %v692_v2 = vpop.f32.mrf.mxu0  ;;  %v9512_v3 = vld [vmem:[#allocation2 + $0x24] sm:$0xf0]  ;;  %v1233_v41 = vunpack.c.l.b16 %v903_v25 }
  0xd0   : > { %v1127_v4 = vld [vmem:[#allocation2 + $0x28] sm:$0xc]  ;;  %v733_v7 = vrot.slane %v732_v62, 4  ;;  %766 = vst.msk [vmem:[#allocation2 + $0x30] sm:$0xe] %vm757_vm11, %v732_v62  ;;  %v693_v8 = vadd.f32 %v10166_v43, %v692_v2  ;;  %v7550_v10 = vor.u32 %v9512_v3, %v7549_v63 }
  0xd1   : > { %v792_v5 = vld [vmem:[#allocation2 + $0x28] sm:$0xe]  ;;  %v1128_v13 = vld [vmem:[#allocation2 + $0x2c] sm:$0x3]  ;;  %v7520_v16 = vrot.slane %v1127_v4, 10 }
  0xd2   : > { %v859_v11 = vld [vmem:[#allocation2 + $0x28] sm:$0xc]  ;;  %v793_v17 = vld [vmem:[#allocation2 + $0x2c] sm:$0x1]  ;;  %767 = vst.msk [vmem:[#allocation2 + $0x34] sm:$0x1] %vm505_vm3, %v733_v7  ;;  %1271 = vrot.lane.b32.xlu2 %v7550_v10, %s13560_s24 }
  0xd3   : > { %v705_v19 = vmax.f32 %v693_v8, 0.0  ;;  %v1163_v20 = vrot.slane %v1128_v13, 6  ;;  %v7484_v22 = vrot.slane %v792_v5, 9  ;;  %v839_v23 = vrot.slane %v793_v17, 5  ;;  %v860_v24 = vld [vmem:[#allocation2 + $0x2c] sm:$0x3] }
  0xd4   : > { %v7492_v26 = vrot.slane %v859_v11, 10  ;;  %v906_v30 = vrot.slane %v860_v24, 6 }
  0xd5   : > { %v713_v27 = vpack.c.bf16 %v705_v19, %v705_v19  ;;  %v1164_v28 = vsel %vm10145_vm10, %v7520_v16, %v1163_v20  ;;  %v840_v29 = vsel %vm10098_vm6, %v7484_v22, %v839_v23  ;;  %v988_v19 = vld [vmem:[#allocation2 + $0x10] sm:$0xc]  ;;  %v1026_v20 = vrot.slane %v991_v59, 6 }
  0xd6   : > { %v1358_v32 = vunpack.c.l.b16 %v1164_v28  ;;  %v1214_v34 = vunpack.c.l.b16 %v840_v29  ;;  %v907_v37 = vsel %vm10145_vm10, %v7492_v26, %v906_v30  ;;  %v1022_v28 = vrot.slane %v989_v0, 6 }
  0xd7   : > { %v734_v36 = vrot.slane %v713_v27, 7  ;;  %v695_v38 = vpop.f32.mrf.mxu0  ;;  %v1234_v42 = vunpack.c.l.b16 %v907_v37  ;;  %v1129_v47 = vld [vmem:[#allocation2 + $0x30] sm:$0xc]  ;;  %v7504_v29 = vrot.slane %v990_v1, 10 }
  0xd8   : > { %v10221_v39 = vpack.c.b16 %v1358_v32, %v1357_v31  ;;  %v1219_v40 = vpack.c.b16 %v1214_v34, %v1213_v33  ;;  %v696_v45 = vadd.f32 %v10166_v43, %v695_v38  ;;  %v794_v49 = vld [vmem:[#allocation2 + $0x30] sm:$0xe]  ;;  %v7521_v55 = vrot.slane %v1129_v47, 10  ;;  %v10248_v47 = vld [vmem:[#allocation2 + $0x20] sm:$0xe] }
  0xd9   : > { %v735_v44 = vrot.slane %v734_v36, 4  ;;  %768 = vst.msk [vmem:[#allocation2 + $0x38] sm:$0xe] %vm757_vm11, %v734_v36  ;;  %v1239_v46 = vpack.c.b16 %v1234_v42, %v1233_v41  ;;  %v1130_v48 = vld [vmem:[#allocation2 + $0x34] sm:$0x3]  ;;  %v7485_v57 = vrot.slane %v794_v49, 9 }
  0xda   : > { %7719 = vmatmul.msk.bf16.vlgmr.msrb.gmra.mxu0 %vm1369_vm12, %v10221_v39  ;;  %1225 = vrot.lane.b32.xlu0 %v1219_v40, %s13558_s18  ;;  %v706_v50 = vmax.f32 %v696_v45, 0.0  ;;  %v795_v51 = vld [vmem:[#allocation2 + $0x34] sm:$0x1]  ;;  %v861_v52 = vld [vmem:[#allocation2 + $0x30] sm:$0xc]  ;;  %v1167_v56 = vrot.slane %v1130_v48, 6 }
  0xdb   : > { %769 = vst.msk [vmem:[#allocation2 + $0x3c] sm:$0x1] %vm505_vm3, %v735_v44  ;;  %1245 = vrot.lane.b32.xlu1 %v1239_v46, %s13556_s27  ;;  %v862_v53 = vld [vmem:[#allocation2 + $0x34] sm:$0x3]  ;;  %v843_v58 = vrot.slane %v795_v51, 5  ;;  %v7493_v62 = vrot.slane %v861_v52, 10  ;;  %v1027_v46 = vsel %vm10145_vm10, %v7504_v29, %v1026_v20 }
  0xdc   : > { %v714_v54 = vpack.c.bf16 %v706_v50, %v706_v50  ;;  %v7553_v61 = vld [vmem:[#allocation2 + $0x30] sm:$0xf]  ;;  %v910_v63 = vrot.slane %v862_v53, 6  ;;  %v1168_v14 = vsel %vm10145_vm10, %v7521_v55, %v1167_v56  ;;  %v992_v40 = vld [vmem:[#allocation2 + $0x20] sm:$0xc]  ;;  %v7503_v45 = vrot.slane %v988_v19, 10 }
  0xdd   : > { %v844_v18 = vsel %vm10098_vm6, %v7485_v57, %v843_v58  ;;  %v1359_v34 = vunpack.c.l.b16 %v1168_v14  ;;  %v993_v41 = vld [vmem:[#allocation2 + $0x24] sm:$0x3]  ;;  %v994_v53 = vld [vmem:[#allocation2 + $0x28] sm:$0xc]  ;;  %v1064_v57 = vld [vmem:[#allocation2 + $0x2c] sm:$0x1] }
  0xde   : > { %v736_v60 = vrot.slane %v714_v54, 7  ;;  %v911_v26 = vsel %vm10145_vm10, %v7493_v62, %v910_v63  ;;  %v1215_v37 = vunpack.c.l.b16 %v844_v18  ;;  %v10250_v48 = vld [vmem:[#allocation2 + $0x24] sm:$0x1]  ;;  %v995_v54 = vld [vmem:[#allocation2 + $0x2c] sm:$0x3]  ;;  %v1023_v59 = vsel %vm10145_vm10, %v7503_v45, %v1022_v28 }
  0xdf   : > { %v697_v2 = vpop.f32.mrf.mxu0  ;;  %v1235_v51 = vunpack.c.l.b16 %v911_v26  ;;  %v1063_v55 = vld [vmem:[#allocation2 + $0x28] sm:$0xe]  ;;  %v7505_v63 = vrot.slane %v992_v40, 10  ;;  %v1030_v0 = vrot.slane %v993_v41, 6  ;;  %v7511_v1 = vrot.slane %v10248_v47, 9 }
  0xe0   : > { %v9513_v3 = vld [vmem:[#allocation2 + $0x34] sm:$0xf0]  ;;  %v737_v7 = vrot.slane %v736_v60, 4  ;;  %770 = vst.msk [vmem:[#allocation2 + $0x40] sm:$0xe] %vm757_vm11, %v736_v60  ;;  %v698_v8 = vadd.f32 %v10166_v43, %v697_v2  ;;  %v1290_v60 = vunpack.c.l.b16 %v1027_v46  ;;  %v1095_v2 = vrot.slane %v10250_v48, 5 }
  0xe1   : > { %v1131_v4 = vld [vmem:[#allocation2 + $0x38] sm:$0xc]  ;;  %v7554_v10 = vor.u32 %v9513_v3, %v7553_v61  ;;  %v7506_v3 = vrot.slane %v994_v53, 10  ;;  %v10266_v14 = vld [vmem:[#allocation2 + $0x34] sm:$0x3] }
  0xe2   : > { %v796_v5 = vld [vmem:[#allocation2 + $0x38] sm:$0xe]  ;;  %v1132_v13 = vld [vmem:[#allocation2 + $0x3c] sm:$0x3]  ;;  %v7522_v16 = vrot.slane %v1131_v4, 10  ;;  %v707_v22 = vmax.f32 %v698_v8, 0.0  ;;  %v1096_v48 = vsel %vm10098_vm6, %v7511_v1, %v1095_v2 }
  0xe3   : > { %v863_v11 = vld [vmem:[#allocation2 + $0x38] sm:$0xc]  ;;  %v797_v17 = vld [vmem:[#allocation2 + $0x3c] sm:$0x1]  ;;  %771 = vst.msk [vmem:[#allocation2 + $0x44] sm:$0x1] %vm505_vm3, %v737_v7  ;;  %1273 = vrot.lane.b32.xlu2 %v7554_v10, %s13560_s24 }
  0xe4   : > { %v1171_v23 = vrot.slane %v1132_v13, 6  ;;  %v7486_v43 = vrot.slane %v796_v5, 9  ;;  %v847_v24 = vrot.slane %v797_v17, 5  ;;  %v864_v25 = vld [vmem:[#allocation2 + $0x3c] sm:$0x3]  ;;  %v7494_v27 = vrot.slane %v863_v11, 10 }
  0xe5   : > { %v715_v30 = vpack.c.bf16 %v707_v22, %v707_v22  ;;  %v914_v33 = vrot.slane %v864_v25, 6  ;;  %v1034_v4 = vrot.slane %v995_v54, 6  ;;  %v7512_v5 = vrot.slane %v1063_v55, 9  ;;  %v9515_v8 = vld [vmem:[#allocation2 + $0x24] sm:$0xf0] }
  0xe6   : > { %v1172_v31 = vsel %vm10145_vm10, %v7522_v16, %v1171_v23  ;;  %v848_v32 = vsel %vm10098_vm6, %v7486_v43, %v847_v24  ;;  %v1099_v7 = vrot.slane %v1064_v57, 5  ;;  %v10264_v13 = vld [vmem:[#allocation2 + $0x30] sm:$0xc]  ;;  %v1289_v16 = vunpack.c.l.b16 %v1023_v59  ;;  %v9446_v19 = vld [vmem:[%s13538_s3 + $0x74] sm:$0xf0] }
  0xe7   : > { %v1360_v36 = vunpack.c.l.b16 %v1172_v31  ;;  %v1216_v38 = vunpack.c.l.b16 %v848_v32  ;;  %v738_v42 = vrot.slane %v715_v30, 7  ;;  %v915_v44 = vsel %vm10145_vm10, %v7494_v27, %v914_v33  ;;  %v1133_v61 = vld [vmem:[#allocation2 + $0x40] sm:$0xc]  ;;  %v7633_v18 = vld [vmem:[%s13538_s3 + $0x70] sm:$0xf] }
  0xe8   : > { %v1236_v52 = vunpack.c.l.b16 %v915_v44  ;;  %v7523_v10 = vrot.slane %v1133_v61, 10  ;;  %v7557_v17 = vld [vmem:[#allocation2 + $0x40] sm:$0xf]  ;;  %v10274_v22 = vld [vmem:[#allocation2 + $0x30] sm:$0xe]  ;;  %v7634_v23 = vor.u32 %v9446_v19, %v7633_v18  ;;  %v1297_v25 = vpack.c.b16 %v1290_v60, %v1289_v16 }
  0xe9   : > { %v10252_v49 = vpack.c.b16 %v1360_v36, %v1359_v34  ;;  %v1220_v50 = vpack.c.b16 %v1216_v38, %v1215_v37  ;;  %v739_v56 = vrot.slane %v738_v42, 4  ;;  %772 = vst.msk [vmem:[#allocation2 + $0x48] sm:$0xe] %vm757_vm11, %v738_v42  ;;  %v7561_v20 = vld [vmem:[#allocation2 + $0x20] sm:$0xf]  ;;  %v1035_v27 = vsel %vm10145_vm10, %v7506_v3, %v1034_v4 }
  0xea   : > { %v1240_v58 = vpack.c.b16 %v1236_v52, %v1235_v51  ;;  %v1134_v62 = vld [vmem:[#allocation2 + $0x44] sm:$0x3]  ;;  %v9445_v43 = vld [vmem:[%s13538_s3 + $0x74] sm:$0xf]  ;;  %v7635_v24 = vld [vmem:[%s13538_s3 + $0x78] sm:$0xf0]  ;;  %v1031_v32 = vsel %vm10145_vm10, %v7505_v63, %v1030_v0  ;;  %1632 = vmatpush.bf16.msra.mxu1 %v7634_v23  ;;  %v7562_v40 = vor.u32 %v9515_v8, %v7561_v20  ;;  %v1100_v41 = vsel %vm10098_vm6, %v7512_v5, %v1099_v7 }
  0xeb   : > { %7720 = vmatmul.msk.bf16.gmra.mxu0 %vm1369_vm12, %v10252_v49  ;;  %1227 = vrot.lane.b32.xlu0 %v1220_v50, %s13558_s18  ;;  %773 = vst.msk [vmem:[#allocation2 + $0x4c] sm:$0x1] %vm505_vm3, %v739_v56  ;;  %v1175_v11 = vrot.slane %v1134_v62, 6  ;;  %v10284_v29 = vld [vmem:[#allocation2 + $0x38] sm:$0xc]  ;;  %v7638_v30 = vor.u32 %v9445_v43, %v7635_v24  ;;  %v7507_v44 = vrot.slane %v10264_v13, 10  ;;  %v1292_v47 = vunpack.c.l.b16 %v1035_v27 }
  0xec   : > { %1247 = vrot.lane.b32.xlu1 %v1240_v58, %s13556_s27  ;;  %v999_v36 = vld [vmem:[#allocation2 + $0x3c] sm:$0x3]  ;;  %v10290_v37 = vld [vmem:[#allocation2 + $0x34] sm:$0x1]  ;;  %v7625_v38 = vld [vmem:[%s13538_s3 + $0x60] sm:$0xf]  ;;  %v1291_v61 = vunpack.c.l.b16 %v1031_v32  ;;  %v1338_v62 = vunpack.c.l.b16 %v1100_v41  ;;  %v1337_v13 = vunpack.c.l.b16 %v1096_v48 }
  0xed   : > { %v1176_v33 = vsel %vm10145_vm10, %v7523_v10, %v1175_v11  ;;  %v1038_v45 = vrot.slane %v10266_v14, 6  ;;  %v1067_v46 = vld [vmem:[#allocation2 + $0x38] sm:$0xe]  ;;  %1719 = vmatpush.bf16.msrb.mxu3 %v7638_v30  ;;  %v7508_v51 = vrot.slane %v10284_v29, 10  ;;  %v1068_v52 = vld [vmem:[#allocation2 + $0x3c] sm:$0x1] }
  0xee   : > { %v9444_v53 = vld [vmem:[%s13538_s3 + $0x64] sm:$0xf0]  ;;  %v9516_v54 = vld [vmem:[#allocation2 + $0x34] sm:$0xf0]  ;;  %v1361_v55 = vunpack.c.l.b16 %v1176_v33  ;;  %v1042_v56 = vrot.slane %v999_v36, 6  ;;  %v7513_v57 = vrot.slane %v10274_v22, 9  ;;  %v1298_v19 = vpack.c.b16 %v1292_v47, %v1291_v61 }
  0xef   : > { %v7626_v58 = vor.u32 %v9444_v53, %v7625_v38  ;;  %v9443_v59 = vld [vmem:[%s13538_s3 + $0x64] sm:$0xf]  ;;  %v7627_v60 = vld [vmem:[%s13538_s3 + $0x68] sm:$0xf0]  ;;  %v7617_v1 = vld [vmem:[%s13538_s3 + $0x50] sm:$0xf]  ;;  %v1039_v30 = vsel %vm10145_vm10, %v7507_v44, %v1038_v45 }
  0xf0   : > { %v9514_v26 = vld [vmem:[#allocation2 + $0x44] sm:$0xf0]  ;;  %v7630_v0 = vor.u32 %v9443_v59, %v7627_v60  ;;  %v9442_v2 = vld [vmem:[%s13538_s3 + $0x54] sm:$0xf0]  ;;  %v9441_v3 = vld [vmem:[%s13538_s3 + $0x54] sm:$0xf]  ;;  %v1043_v27 = vsel %vm10145_vm10, %v7508_v51, %v1042_v56  ;;  %v1293_v47 = vunpack.c.l.b16 %v1039_v30 }
  0xf1   : > { %v1135_v28 = vld [vmem:[#allocation2 + $0x48] sm:$0xc]  ;;  %v7558_v31 = vor.u32 %v9514_v26, %v7557_v17  ;;  %v7565_v4 = vld [vmem:[#allocation2 + $0x30] sm:$0xf]  ;;  %v1103_v7 = vrot.slane %v10290_v37, 5  ;;  %v7514_v8 = vrot.slane %v1067_v46, 9  ;;  %1633 = vmatpush.bf16.msra.mxu1 %v7626_v58  ;;  %v7618_v18 = vor.u32 %v9442_v2, %v7617_v1 }
  0xf2   : > { %v7524_v34 = vrot.slane %v1135_v28, 10  ;;  %v1136_v42 = vld [vmem:[#allocation2 + $0x4c] sm:$0x3]  ;;  %v1107_v10 = vrot.slane %v1068_v52, 5  ;;  %v7619_v11 = vld [vmem:[%s13538_s3 + $0x58] sm:$0xf0]  ;;  %1720 = vmatpush.bf16.msrb.mxu3 %v7630_v0  ;;  %v1345_v26 = vpack.c.b16 %v1338_v62, %v1337_v13  ;;  %v1294_v46 = vunpack.c.l.b16 %v1043_v27 }
  0xf3   : > { %1301 = vrot.lane.b32.xlu0 %v1297_v25, %s13558_s18  ;;  %1275 = vrot.lane.b32.xlu2 %v7558_v31, %s13560_s24  ;;  %v1179_v50 = vrot.slane %v1136_v42, 6  ;;  %v1000_v14 = vld [vmem:[#allocation2 + $0x40] sm:$0xc]  ;;  %v1001_v16 = vld [vmem:[#allocation2 + $0x44] sm:$0x3]  ;;  %v7622_v23 = vor.u32 %v9441_v3, %v7619_v11  ;;  %v7566_v25 = vor.u32 %v9516_v54, %v7565_v4  ;;  %v1104_v44 = vsel %vm10098_vm6, %v7513_v57, %v1103_v7 }
  0xf4   : > { %1329 = vrot.lane.b32.xlu1 %v7562_v40, %s13556_s27  ;;  %v1002_v17 = vld [vmem:[#allocation2 + $0x48] sm:$0xc]  ;;  %v1003_v22 = vld [vmem:[#allocation2 + $0x4c] sm:$0x3]  ;;  %v7609_v43 = vld [vmem:[%s13538_s3 + $0x40] sm:$0xf]  ;;  %v1108_v31 = vsel %vm10098_vm6, %v7514_v8, %v1107_v10  ;;  %v1339_v56 = vunpack.c.l.b16 %v1104_v44  ;;  %v1299_v57 = vpack.c.b16 %v1294_v46, %v1293_v47 }
  0xf5   : > { %v1180_v63 = vsel %vm10145_vm10, %v7524_v34, %v1179_v50  ;;  %v9440_v24 = vld [vmem:[%s13538_s3 + $0x44] sm:$0xf0]  ;;  %v9439_v28 = vld [vmem:[%s13538_s3 + $0x44] sm:$0xf]  ;;  %v7611_v29 = vld [vmem:[%s13538_s3 + $0x48] sm:$0xf0]  ;;  %1634 = vmatpush.bf16.msra.mxu1 %v7618_v18  ;;  %v1340_v51 = vunpack.c.l.b16 %v1108_v31 }
  0xf6   : > { %v1362_v5 = vunpack.c.l.b16 %v1180_v63  ;;  %v7509_v32 = vrot.slane %v1000_v14, 10  ;;  %v1046_v33 = vrot.slane %v1001_v16, 6  ;;  %v1069_v34 = vld [vmem:[#allocation2 + $0x40] sm:$0xe]  ;;  %v1070_v36 = vld [vmem:[#allocation2 + $0x44] sm:$0x1]  ;;  %v7610_v42 = vor.u32 %v9440_v24, %v7609_v43  ;;  %1721 = vmatpush.bf16.msrb.mxu3 %v7622_v23 }
  0xf7   : > { %v7510_v37 = vrot.slane %v1002_v17, 10  ;;  %v1050_v38 = vrot.slane %v1003_v22, 6  ;;  %v1071_v40 = vld [vmem:[#allocation2 + $0x48] sm:$0xe]  ;;  %v1072_v41 = vld [vmem:[#allocation2 + $0x4c] sm:$0x1]  ;;  %v7614_v45 = vor.u32 %v9439_v28, %v7611_v29  ;;  %v1346_v1 = vpack.c.b16 %v1340_v51, %v1339_v56 }
  0xf8   : > { %v10330_v20 = vpack.c.b16 %v1362_v5, %v1361_v55  ;;  %v7569_v48 = vld [vmem:[#allocation2 + $0x40] sm:$0xf]  ;;  %v9517_v50 = vld [vmem:[#allocation2 + $0x44] sm:$0xf0]  ;;  %v7515_v52 = vrot.slane %v1069_v34, 9  ;;  %v1111_v53 = vrot.slane %v1070_v36, 5  ;;  %v1047_v58 = vsel %vm10145_vm10, %v7509_v32, %v1046_v33 }
  0xf9   : > { %v7516_v54 = vrot.slane %v1071_v40, 9  ;;  %v1115_v55 = vrot.slane %v1072_v41, 5  ;;  %v1051_v59 = vsel %vm10145_vm10, %v7510_v37, %v1050_v38  ;;  %1635 = vmatpush.bf16.msra.mxu1 %v7610_v42  ;;  %v1073_v60 = vld [vmem:[#allocation2 + $0x50] sm:$0xe]  ;;  %v7570_v61 = vor.u32 %v9517_v50, %v7569_v48  ;;  %v1074_v62 = vld [vmem:[#allocation2 + $0x54] sm:$0x1] }
  0xfa   : > { %7721 = vmatmul.msk.bf16.vlgmr.msra.gmra.mxu3 %vm1369_vm12, %v10330_v20  ;;  %v1075_v63 = vld [vmem:[#allocation2 + $0x58] sm:$0xe]  ;;  %v1076_v0 = vld [vmem:[#allocation2 + $0x5c] sm:$0x1]  ;;  %v1295_v2 = vunpack.c.l.b16 %v1047_v58  ;;  %v1296_v3 = vunpack.c.l.b16 %v1051_v59  ;;  %v1112_v4 = vsel %vm10098_vm6, %v7515_v52, %v1111_v53  ;;  %v7517_v7 = vrot.slane %v1073_v60, 9 }
  0xfb   : > { %1303 = vrot.lane.b32.xlu0 %v1298_v19, %s13558_s18  ;;  %1349 = vrot.lane.b32.xlu2 %v1345_v26, %s13560_s24  ;;  %v1116_v5 = vsel %vm10098_vm6, %v7516_v54, %v1115_v55  ;;  %v1119_v8 = vrot.slane %v1074_v62, 5  ;;  %v7518_v10 = vrot.slane %v1075_v63, 9  ;;  %v1123_v11 = vrot.slane %v1076_v0, 5  ;;  %v7573_v13 = vld [vmem:[#allocation2 + $0x50] sm:$0xf] }
  0xfc   : > { %1331 = vrot.lane.b32.xlu1 %v7566_v25, %s13556_s27  ;;  %1722 = vmatpush.bf16.msrb.mxu3 %v7614_v45  ;;  %v9518_v14 = vld [vmem:[#allocation2 + $0x54] sm:$0xf0]  ;;  %v1137_v16 = vld [vmem:[#allocation2 + $0x50] sm:$0xc]  ;;  %v1341_v17 = vunpack.c.l.b16 %v1112_v4  ;;  %v1342_v18 = vunpack.c.l.b16 %v1116_v5  ;;  %v1138_v19 = vld [vmem:[#allocation2 + $0x54] sm:$0x3]  ;;  %v1300_v28 = vpack.c.b16 %v1296_v3, %v1295_v2 }
  0xfd   : > { %v1139_v22 = vld [vmem:[#allocation2 + $0x58] sm:$0xc]  ;;  %v1140_v23 = vld [vmem:[#allocation2 + $0x5c] sm:$0x3]  ;;  %v7525_v43 = vrot.slane %v1137_v16, 10  ;;  %v1183_v24 = vrot.slane %v1138_v19, 6  ;;  %v7574_v29 = vor.u32 %v9518_v14, %v7573_v13  ;;  %v1120_v30 = vsel %vm10098_vm6, %v7517_v7, %v1119_v8  ;;  %v1222_v13 = vpop.permute.xlu0 %1221 }
  0xfe   : > { %v7526_v25 = vrot.slane %v1139_v22, 10  ;;  %v1187_v26 = vrot.slane %v1140_v23, 6  ;;  %v7601_v27 = vld [vmem:[%s13538_s3 + $0x30] sm:$0xf]  ;;  %v1124_v31 = vsel %vm10098_vm6, %v7518_v10, %v1123_v11  ;;  %v9438_v32 = vld [vmem:[%s13538_s3 + $0x34] sm:$0xf0]  ;;  %v1347_v44 = vpack.c.b16 %v1342_v18, %v1341_v17 }
  0xff   : > { %v9437_v33 = vld [vmem:[%s13538_s3 + $0x34] sm:$0xf]  ;;  %v7603_v34 = vld [vmem:[%s13538_s3 + $0x38] sm:$0xf0]  ;;  %v1184_v36 = vsel %vm10145_vm10, %v7525_v43, %v1183_v24  ;;  %v7602_v38 = vor.u32 %v9438_v32, %v7601_v27  ;;  %v7593_v41 = vld [vmem:[%s13538_s3 + $0x20] sm:$0xf]  ;;  %v1343_v51 = vunpack.c.l.b16 %v1120_v30  ;;  %v1344_v52 = vunpack.c.l.b16 %v1124_v31 }
 0x100   : > { %v1188_v37 = vsel %vm10145_vm10, %v7526_v25, %v1187_v26  ;;  %v7606_v40 = vor.u32 %v9437_v33, %v7603_v34  ;;  %v9436_v42 = vld [vmem:[%s13538_s3 + $0x24] sm:$0xf0]  ;;  %v9435_v46 = vld [vmem:[%s13538_s3 + $0x24] sm:$0xf]  ;;  %v1363_v45 = vunpack.c.l.b16 %v1184_v36  ;;  %v7595_v48 = vld [vmem:[%s13538_s3 + $0x28] sm:$0xf0] }
 0x101   : > { %v1364_v47 = vunpack.c.l.b16 %v1188_v37  ;;  %1636 = vmatpush.bf16.msra.mxu1 %v7602_v38  ;;  %v7594_v50 = vor.u32 %v9436_v42, %v7593_v41  ;;  %v7598_v54 = vor.u32 %v9435_v46, %v7595_v48  ;;  %v7585_v55 = vld [vmem:[%s13538_s3 + $0x10] sm:$0xf]  ;;  %v9434_v56 = vld [vmem:[%s13538_s3 + $0x14] sm:$0xf0]  ;;  %v9433_v58 = vld [vmem:[%s13538_s3 + $0x14] sm:$0xf] }
 0x102   : > { %1723 = vmatpush.bf16.msrb.mxu3 %v7606_v40  ;;  %v7586_v59 = vor.u32 %v9434_v56, %v7585_v55  ;;  %v7587_v60 = vld [vmem:[%s13538_s3 + $0x18] sm:$0xf0]  ;;  %v7577_v62 = vld [vmem:[%s13538_s3] sm:$0xf]  ;;  %v9432_v63 = vld [vmem:[%s13538_s3 + $0x4] sm:$0xf0] }
 0x103   : > { %1305 = vrot.lane.b32.xlu0 %v1299_v57, %s13558_s18  ;;  %1351 = vrot.lane.b32.xlu2 %v1346_v1, %s13560_s24  ;;  %v10402_v53 = vpack.c.b16 %v1364_v47, %v1363_v45  ;;  %v1348_v57 = vpack.c.b16 %v1344_v52, %v1343_v51  ;;  %v9431_v0 = vld [vmem:[%s13538_s3 + $0x4] sm:$0xf]  ;;  %v7579_v1 = vld [vmem:[%s13538_s3 + $0x8] sm:$0xf0]  ;;  %v7578_v2 = vor.u32 %v9432_v63, %v7577_v62  ;;  %v9507_v18 = vld [vmem:[#allocation2 + $0x4] sm:$0xf0] }
 0x104   : > { %1333 = vrot.lane.b32.xlu1 %v7570_v61, %s13556_s27  ;;  %v7590_v61 = vor.u32 %v9433_v58, %v7587_v60  ;;  %v7582_v3 = vor.u32 %v9431_v0, %v7579_v1  ;;  %v9465_v4 = vld [vmem:[%s13538_s3 + $0x114] sm:$0xf]  ;;  %v7715_v5 = vld [vmem:[%s13538_s3 + $0x118] sm:$0xf0]  ;;  %v7697_v8 = vld [vmem:[%s13538_s3 + $0xf0] sm:$0xf] }
 0x105   : > { %1637 = vmatpush.bf16.msra.mxu1 %v7594_v50  ;;  %v7718_v7 = vor.u32 %v9465_v4, %v7715_v5  ;;  %v9462_v10 = vld [vmem:[%s13538_s3 + $0xf4] sm:$0xf0]  ;;  %v9461_v11 = vld [vmem:[%s13538_s3 + $0xf4] sm:$0xf]  ;;  %v7699_v16 = vld [vmem:[%s13538_s3 + $0xf8] sm:$0xf0]  ;;  %v1242_v33 = vpop.permute.xlu0 %1241 }
 0x106   : > { %1724 = vmatpush.bf16.msrb.mxu3 %v7598_v54  ;;  %v7698_v14 = vor.u32 %v9462_v10, %v7697_v8  ;;  %v7702_v17 = vor.u32 %v9461_v11, %v7699_v16  ;;  %v7529_v19 = vld [vmem:[#allocation2] sm:$0xf]  ;;  %v9460_v43 = vld [vmem:[%s13538_s3 + $0xe4] sm:$0xf0]  ;;  %v9459_v24 = vld [vmem:[%s13538_s3 + $0xe4] sm:$0xf] }
 0x107   : > { %v7530_v22 = vor.u32 %v9507_v18, %v7529_v19  ;;  %v7689_v23 = vld [vmem:[%s13538_s3 + $0xe0] sm:$0xf]  ;;  %v7691_v26 = vld [vmem:[%s13538_s3 + $0xe8] sm:$0xf0]  ;;  %v7681_v27 = vld [vmem:[%s13538_s3 + $0xd0] sm:$0xf] }
 0x108   : > { %1661 = vmatpush.bf16.msra.mxu2 %v7698_v14  ;;  %1748 = vmatpush.bf16.msra.mxu0 %v7702_v17  ;;  %v7690_v25 = vor.u32 %v9460_v43, %v7689_v23  ;;  %v9457_v30 = vld [vmem:[%s13538_s3 + $0xd4] sm:$0xf]  ;;  %v7683_v31 = vld [vmem:[%s13538_s3 + $0xd8] sm:$0xf0]  ;;  %v7673_v36 = vld [vmem:[%s13538_s3 + $0xc0] sm:$0xf] }
 0x109   : > { %1638 = vmatpush.bf16.msra.mxu1 %v7586_v59  ;;  %v1372_v32 = vsel %vm1369_vm12, %v7530_v22, %v1222_v13  ;;  %v9456_v37 = vld [vmem:[%s13538_s3 + $0xc4] sm:$0xf0]  ;;  %v7686_v38 = vor.u32 %v9457_v30, %v7683_v31  ;;  %v9455_v42 = vld [vmem:[%s13538_s3 + $0xc4] sm:$0xf]  ;;  %v7675_v46 = vld [vmem:[%s13538_s3 + $0xc8] sm:$0xf0] }
 0x10a   : > { %7722 = vmatmul.msk.bf16.gmra.mxu3 %vm1369_vm12, %v10402_v53  ;;  %v1383_v40 = vsel %vm658_vm0, %v1372_v32, %v1242_v33  ;;  %v7674_v45 = vor.u32 %v9456_v37, %v7673_v36  ;;  %v9463_v47 = vld [vmem:[%s13538_s3 + $0x104] sm:$0xf]  ;;  %v7707_v48 = vld [vmem:[%s13538_s3 + $0x108] sm:$0xf0]  ;;  %v7665_v50 = vld [vmem:[%s13538_s3 + $0xb0] sm:$0xf]  ;;  %v7678_v51 = vor.u32 %v9455_v42, %v7675_v46 }
 0x10b   : > { %1307 = vrot.lane.b32.xlu0 %v1300_v28, %s13558_s18  ;;  %1353 = vrot.lane.b32.xlu2 %v1347_v44, %s13560_s24  ;;  %v9458_v28 = vld [vmem:[%s13538_s3 + $0xd4] sm:$0xf0]  ;;  %v7710_v52 = vor.u32 %v9463_v47, %v7707_v48  ;;  %v9453_v55 = vld [vmem:[%s13538_s3 + $0xb4] sm:$0xf]  ;;  %v927_v36 = vld [vmem:[#allocation2 + $0x1c] sm:$0x1] }
 0x10c   : > { %1335 = vrot.lane.b32.xlu1 %v7574_v29, %s13556_s27  ;;  %1725 = vmatpush.bf16.msrb.mxu3 %v7590_v61  ;;  %v7694_v29 = vor.u32 %v9459_v24, %v7691_v26  ;;  %v7682_v34 = vor.u32 %v9458_v28, %v7681_v27  ;;  %v9454_v54 = vld [vmem:[%s13538_s3 + $0xb4] sm:$0xf0]  ;;  %v7667_v56 = vld [vmem:[%s13538_s3 + $0xb8] sm:$0xf0]  ;;  %v7533_v61 = vld [vmem:[#allocation2 + $0x10] sm:$0xf] }
 0x10d   : > { %1639 = vmatpush.bf16.msra.mxu1 %v7578_v2  ;;  %1662 = vmatpush.bf16.msra.mxu2 %v7690_v25  ;;  %v7666_v58 = vor.u32 %v9454_v54, %v7665_v50  ;;  %v9508_v60 = vld [vmem:[#allocation2 + $0x14] sm:$0xf0]  ;;  %v7657_v0 = vld [vmem:[%s13538_s3 + $0xa0] sm:$0xf]  ;;  %v9452_v1 = vld [vmem:[%s13538_s3 + $0xa4] sm:$0xf0] }
 0x10e   : > { %1749 = vmatpush.bf16.msra.mxu0 %v7694_v29  ;;  %v7534_v63 = vor.u32 %v9508_v60, %v7533_v61  ;;  %v9451_v2 = vld [vmem:[%s13538_s3 + $0xa4] sm:$0xf]  ;;  %v7658_v4 = vor.u32 %v9452_v1, %v7657_v0  ;;  %v7659_v5 = vld [vmem:[%s13538_s3 + $0xa8] sm:$0xf0]  ;;  %v9450_v8 = vld [vmem:[%s13538_s3 + $0x94] sm:$0xf0] }
 0x10f   : > { %v7662_v10 = vor.u32 %v9451_v2, %v7659_v5  ;;  %v9449_v11 = vld [vmem:[%s13538_s3 + $0x94] sm:$0xf]  ;;  %v7651_v13 = vld [vmem:[%s13538_s3 + $0x98] sm:$0xf0]  ;;  %v7641_v22 = vld [vmem:[%s13538_s3 + $0x80] sm:$0xf] }
 0x110   : > { %1726 = vmatpush.bf16.msrb.mxu3 %v7582_v3  ;;  %v7654_v17 = vor.u32 %v9449_v11, %v7651_v13  ;;  %v9448_v23 = vld [vmem:[%s13538_s3 + $0x84] sm:$0xf0]  ;;  %v9447_v43 = vld [vmem:[%s13538_s3 + $0x84] sm:$0xf]  ;;  %v7643_v25 = vld [vmem:[%s13538_s3 + $0x88] sm:$0xf0] }
 0x111   : > { %1783 = vmatpush.bf16.msrb.mxu1 %v7718_v7  ;;  %1663 = vmatpush.bf16.msra.mxu2 %v7682_v34  ;;  %v7649_v7 = vld [vmem:[%s13538_s3 + $0x90] sm:$0xf]  ;;  %v7642_v24 = vor.u32 %v9448_v23, %v7641_v22  ;;  %v7646_v26 = vor.u32 %v9447_v43, %v7643_v25  ;;  %v9509_v27 = vld [vmem:[#allocation2 + $0x24] sm:$0xf0]  ;;  %v7537_v28 = vld [vmem:[#allocation2 + $0x20] sm:$0xf] }
 0x112   : > { %1750 = vmatpush.bf16.msra.mxu0 %v7686_v38  ;;  %v7650_v14 = vor.u32 %v9450_v8, %v7649_v7  ;;  %v7538_v30 = vor.u32 %v9509_v27, %v7537_v28  ;;  %v926_v38 = vld [vmem:[#allocation2 + $0x18] sm:$0xe]  ;;  %v924_v42 = vld [vmem:[#allocation2 + $0x10] sm:$0xe]  ;;  %v928_v0 = vld [vmem:[#allocation2 + $0x20] sm:$0xe] }
 0x113   : > { %1355 = vrot.lane.b32.xlu2 %v1348_v57, %s13560_s24  ;;  %v7670_v57 = vor.u32 %v9453_v55, %v7667_v56  ;;  %v7496_v46 = vrot.slane %v926_v38, 9  ;;  %v7495_v48 = vrot.slane %v924_v42, 9  ;;  %v929_v1 = vld [vmem:[#allocation2 + $0x24] sm:$0x1]  ;;  %v930_v2 = vld [vmem:[#allocation2 + $0x28] sm:$0xe] }
 0x114   : > { %v7497_v11 = vrot.slane %v928_v0, 9  ;;  %v966_v13 = vrot.slane %v929_v1, 5  ;;  %v932_v27 = vld [vmem:[#allocation2 + $0x30] sm:$0xe]  ;;  %v933_v28 = vld [vmem:[#allocation2 + $0x34] sm:$0x1] }
 0x115   : > { %1664 = vmatpush.bf16.msra.mxu2 %v7674_v45  ;;  %1784 = vmatpush.bf16.msrb.mxu1 %v7710_v52  ;;  %v9510_v45 = vld [vmem:[#allocation2 + $0x34] sm:$0xf0]  ;;  %v7541_v52 = vld [vmem:[#allocation2 + $0x30] sm:$0xf]  ;;  %s485_s27 = sand.u32 1, %s9913_s19   ;;  %s9879_s24 = scalar_lea.hbm %s13550_s15, 256 }
 0x116   : > { %1751 = vmatpush.bf16.msra.mxu0 %v7678_v51  ;;  %v7542_v54 = vor.u32 %v9510_v45, %v7541_v52  ;;  %v936_v45 = vld [vmem:[#allocation2 + $0x40] sm:$0xe] }
 0x117   : > { %v7501_v52 = vrot.slane %v936_v45, 9 }
 0x119   : > { %1665 = vmatpush.bf16.msra.mxu2 %v7666_v58 }
 0x11a   : > { %1752 = vmatpush.bf16.msra.mxu0 %v7670_v57  ;;  %v931_v57 = vld [vmem:[#allocation2 + $0x2c] sm:$0x1] }
 0x11d   : > { %1666 = vmatpush.bf16.msra.mxu2 %v7658_v4  ;;  %v970_v4 = vrot.slane %v931_v57, 5 }
 0x11e   : > { %1753 = vmatpush.bf16.msra.mxu0 %v7662_v10 }
 0x121   : > { %1667 = vmatpush.bf16.msra.mxu2 %v7650_v14  ;;  %v7498_v14 = vrot.slane %v930_v2, 9 }
 0x122   : > { %1754 = vmatpush.bf16.msra.mxu0 %v7654_v17 }
 0x123   : > { %v1244_v59 = vpop.permute.xlu2 %1243  ;;  %v971_v17 = vsel %vm10098_vm6, %v7498_v14, %v970_v4  ;;  %v7777_v14 = vld [vmem:[%s13540_s5 + $0x60] sm:$0xf] }
 0x125   : > { %1668 = vmatpush.bf16.msra.mxu2 %v7642_v24 }
 0x126   : > { %1755 = vmatpush.bf16.msra.mxu0 %v7646_v26  ;;  %v935_v26 = vld [vmem:[#allocation2 + $0x3c] sm:$0x1] }
 0x12c   : > { %v1272_v18 = vpop.permute.xlu2 %1271 }
 0x134   : > { %v1270_v41 = vpop.permute.xlu1 %1269 }
 0x135   : > { %v1392_v44 = vsel %vm1390_vm13, %v1383_v40, %v1270_v41  ;;  %v925_v40 = vld [vmem:[#allocation2 + $0x14] sm:$0x1]  ;;  %v962_v41 = vrot.slane %v927_v36, 5 }
 0x136   : > { %1640 = vmatmul.bf16.vlgmr.msra.gmra.mxu1 %v1392_v44  ;;  %1727 = vmatmul.bf16.vlgmr.msrb.gmra.mxu3 %v1392_v44  ;;  %v958_v44 = vrot.slane %v925_v40, 5 }
 0x137   : > { %v963_v50 = vsel %vm10098_vm6, %v7496_v46, %v962_v41 }
 0x138   : > { %v959_v56 = vsel %vm10098_vm6, %v7495_v48, %v958_v44  ;;  %v1278_v58 = vunpack.c.l.b16 %v963_v50  ;;  %v937_v50 = vld [vmem:[#allocation2 + $0x44] sm:$0x1] }
 0x139   : > { %v1277_v60 = vunpack.c.l.b16 %v959_v56 }
 0x13c   : > { %v1224_v62 = vpop.permute.xlu1 %1223 }
 0x13d   : > { %v1375_v3 = vsel %vm1369_vm12, %v7534_v63, %v1224_v62  ;;  %v1274_v34 = vpop.permute.xlu2 %1273  ;;  %v1285_v62 = vpack.c.b16 %v1278_v58, %v1277_v60 }
 0x13e   : > { %v1385_v16 = vsel %vm658_vm0, %v1375_v3, %v1244_v59 }
 0x13f   : > { %v1395_v19 = vsel %vm1390_vm13, %v1385_v16, %v1272_v18  ;;  %v967_v18 = vsel %vm10098_vm6, %v7497_v11, %v966_v13  ;;  %v7849_v11 = vld [vmem:[%s13540_s5 + $0xf0] sm:$0xf] }
 0x140   : > { %v1279_v22 = vunpack.c.l.b16 %v967_v18  ;;  %v7841_v18 = vld [vmem:[%s13540_s5 + $0xe0] sm:$0xf] }
 0x146   : > { %1645 = vmatmul.bf16.gmra.mxu1 %v1395_v19  ;;  %1732 = vmatmul.bf16.gmra.mxu3 %v1395_v19  ;;  %v1280_v19 = vunpack.c.l.b16 %v971_v17 }
 0x148   : > { %v1286_v43 = vpack.c.b16 %v1280_v19, %v1279_v22  ;;  %v9496_v19 = vld [vmem:[%s13540_s5 + $0xe4] sm:$0xf0] }
 0x149   : > { %v7842_v22 = vor.u32 %v9496_v19, %v7841_v18 }
 0x14c   : > { %v1226_v29 = vpop.permute.xlu0 %1225 }
 0x14d   : > { %v1378_v31 = vsel %vm1369_vm12, %v7538_v30, %v1226_v29  ;;  %v1246_v32 = vpop.permute.xlu1 %1245  ;;  %v1276_v51 = vpop.permute.xlu2 %1275  ;;  %v934_v29 = vld [vmem:[#allocation2 + $0x38] sm:$0xe] }
 0x14e   : > { %v1387_v33 = vsel %vm658_vm0, %v1378_v31, %v1246_v32  ;;  %v978_v31 = vrot.slane %v935_v26, 5  ;;  %v7500_v36 = vrot.slane %v934_v29, 9  ;;  %v9476_v29 = vld [vmem:[%s13540_s5 + $0x44] sm:$0xf0] }
 0x14f   : > { %v1398_v37 = vsel %vm1390_vm13, %v1387_v33, %v1274_v34  ;;  %v7499_v33 = vrot.slane %v932_v27, 9  ;;  %v974_v34 = vrot.slane %v933_v28, 5  ;;  %v7761_v28 = vld [vmem:[%s13540_s5 + $0x40] sm:$0xf] }
 0x150   : > { %v979_v38 = vsel %vm10098_vm6, %v7500_v36, %v978_v31 }
 0x151   : > { %v975_v40 = vsel %vm10098_vm6, %v7499_v33, %v974_v34  ;;  %v1282_v41 = vunpack.c.l.b16 %v979_v38  ;;  %v9492_v33 = vld [vmem:[%s13540_s5 + $0xc4] sm:$0xf0]  ;;  %v7787_v38 = vld [vmem:[%s13540_s5 + $0x78] sm:$0xf0] }
 0x152   : > { %v1281_v42 = vunpack.c.l.b16 %v975_v40  ;;  %v7753_v40 = vld [vmem:[%s13540_s5 + $0x30] sm:$0xf] }
 0x154   : > { %v1287_v44 = vpack.c.b16 %v1282_v41, %v1281_v42  ;;  %v9474_v42 = vld [vmem:[%s13540_s5 + $0x34] sm:$0xf0] }
 0x155   : > { %v1350_v8 = vpop.permute.xlu2 %1349  ;;  %v7754_v45 = vor.u32 %v9474_v42, %v7753_v40  ;;  %v9469_v42 = vld [vmem:[%s13540_s5 + $0x14] sm:$0xf] }
 0x156   : > { %1650 = vmatmul.bf16.gmra.mxu1 %v1398_v37  ;;  %1737 = vmatmul.bf16.gmra.mxu3 %v1398_v37 }
 0x15d   : > { %v1228_v47 = vpop.permute.xlu0 %1227  ;;  %v1352_v32 = vpop.permute.xlu2 %1351 }
 0x15e   : > { %v1248_v55 = vpop.permute.xlu1 %1247  ;;  %v1381_v59 = vsel %vm1369_vm12, %v7542_v54, %v1228_v47 }
 0x15f   : > { %v1389_v61 = vsel %vm658_vm0, %v1381_v59, %v1248_v55  ;;  %v982_v55 = vrot.slane %v937_v50, 5 }
 0x160   : > { %v1401_v7 = vsel %vm1390_vm13, %v1389_v61, %v1276_v51  ;;  %v939_v51 = vld [vmem:[#allocation2 + $0x4c] sm:$0x1] }
 0x161   : > { %v986_v58 = vrot.slane %v939_v51, 5  ;;  %v983_v57 = vsel %vm10098_vm6, %v7501_v52, %v982_v55  ;;  %v9490_v51 = vld [vmem:[%s13540_s5 + $0xb4] sm:$0xf0]  ;;  %v9497_v55 = vld [vmem:[%s13540_s5 + $0xf4] sm:$0xf] }
 0x165   : > { %v1302_v63 = vpop.permute.xlu0 %1301  ;;  %v1354_v59 = vpop.permute.xlu2 %1353 }
 0x166   : > { %v1405_v3 = vsel %vm1369_vm12, %v1285_v62, %v1302_v63  ;;  %v1330_v5 = vpop.permute.xlu1 %1329  ;;  %1655 = vmatmul.bf16.gmra.mxu1 %v1401_v7  ;;  %1742 = vmatmul.bf16.gmra.mxu3 %v1401_v7  ;;  %v1283_v62 = vunpack.c.l.b16 %v983_v57  ;;  %v7785_v7 = vld [vmem:[%s13540_s5 + $0x70] sm:$0xf]  ;;  %v9495_v57 = vld [vmem:[%s13540_s5 + $0xe4] sm:$0xf] }
 0x167   : > { %v1416_v10 = vsel %vm658_vm0, %v1405_v3, %v1330_v5 }
 0x168   : > { %v1424_v16 = vsel %vm1390_vm13, %v1416_v10, %v1350_v8  ;;  %v9482_v8 = vld [vmem:[%s13540_s5 + $0x74] sm:$0xf0] }
 0x169   : > { %1669 = vmatmul.bf16.vlgmr.msra.gmra.mxu2 %v1424_v16  ;;  %1756 = vmatmul.bf16.vlgmr.msra.gmra.mxu0 %v1424_v16  ;;  %v7786_v10 = vor.u32 %v9482_v8, %v7785_v7  ;;  %v9480_v16 = vld [vmem:[%s13540_s5 + $0x64] sm:$0xf0] }
 0x16a   : > { %v7778_v17 = vor.u32 %v9480_v16, %v7777_v14  ;;  %v7835_v14 = vld [vmem:[%s13540_s5 + $0xd8] sm:$0xf0]  ;;  %v9473_v16 = vld [vmem:[%s13540_s5 + $0x34] sm:$0xf] }
 0x16b   : > { %1995 = vmatpush.bf16.msrb.mxu2 %v7786_v10  ;;  %v7809_v10 = vld [vmem:[%s13540_s5 + $0xa0] sm:$0xf] }
 0x16d   : > { %v1304_v23 = vpop.permute.xlu0 %1303 }
 0x16e   : > { %v1408_v24 = vsel %vm1369_vm12, %v1286_v43, %v1304_v23  ;;  %v1332_v25 = vpop.permute.xlu1 %1331  ;;  %v7769_v23 = vld [vmem:[%s13540_s5 + $0x50] sm:$0xf]  ;;  %v9478_v43 = vld [vmem:[%s13540_s5 + $0x54] sm:$0xf0] }
 0x16f   : > { %v1418_v30 = vsel %vm658_vm0, %v1408_v24, %v1332_v25  ;;  %1996 = vmatpush.bf16.msrb.mxu2 %v7778_v17  ;;  %v7833_v24 = vld [vmem:[%s13540_s5 + $0xd0] sm:$0xf]  ;;  %v9494_v25 = vld [vmem:[%s13540_s5 + $0xd4] sm:$0xf0]  ;;  %v7755_v17 = vld [vmem:[%s13540_s5 + $0x38] sm:$0xf0] }
 0x170   : > { %v1427_v37 = vsel %vm1390_vm13, %v1418_v30, %v1352_v32  ;;  %v7834_v27 = vor.u32 %v9494_v25, %v7833_v24  ;;  %v7762_v30 = vor.u32 %v9476_v29, %v7761_v28  ;;  %v7825_v32 = vld [vmem:[%s13540_s5 + $0xc0] sm:$0xf]  ;;  %v7758_v19 = vor.u32 %v9473_v16, %v7755_v17  ;;  %v9470_v25 = vld [vmem:[%s13540_s5 + $0x14] sm:$0xf0]  ;;  %v7747_v28 = vld [vmem:[%s13540_s5 + $0x28] sm:$0xf0] }
 0x171   : > { %v7826_v36 = vor.u32 %v9492_v33, %v7825_v32 }
 0x175   : > { %v1306_v46 = vpop.permute.xlu0 %1305 }
 0x176   : > { %7723 = vmatmul.msk.bf16.vlgmr.msrb.gmra.mxu1 %vm1369_vm12, %v10221_v39  ;;  %v1411_v47 = vsel %vm1369_vm12, %v1287_v44, %v1306_v46  ;;  %v1334_v48 = vpop.permute.xlu1 %1333  ;;  %v938_v39 = vld [vmem:[#allocation2 + $0x48] sm:$0xe]  ;;  %v9479_v46 = vld [vmem:[%s13540_s5 + $0x64] sm:$0xf]  ;;  %v7779_v44 = vld [vmem:[%s13540_s5 + $0x68] sm:$0xf0] }
 0x177   : > { %v1420_v54 = vsel %vm658_vm0, %v1411_v47, %v1334_v48  ;;  %v7502_v56 = vrot.slane %v938_v39, 9  ;;  %v10660_v47 = vpop.f32.mrf.mxu0  ;;  %v7782_v48 = vor.u32 %v9479_v46, %v7779_v44  ;;  %v7817_v39 = vld [vmem:[%s13540_s5 + $0xb0] sm:$0xf]  ;;  %v7739_v46 = vld [vmem:[%s13540_s5 + $0x18] sm:$0xf0] }
 0x178   : > { %v1430_v60 = vsel %vm1390_vm13, %v1420_v54, %v1354_v59  ;;  %v7818_v54 = vor.u32 %v9490_v51, %v7817_v39  ;;  %v9477_v59 = vld [vmem:[%s13540_s5 + $0x54] sm:$0xf]  ;;  %v7811_v39 = vld [vmem:[%s13540_s5 + $0xa8] sm:$0xf0]  ;;  %v7729_v51 = vld [vmem:[%s13540_s5] sm:$0xf] }
 0x179   : > { %1674 = vmatmul.bf16.gmra.mxu2 %v1427_v37  ;;  %1761 = vmatmul.bf16.gmra.mxu0 %v1427_v37  ;;  %v987_v61 = vsel %vm10098_vm6, %v7502_v56, %v986_v58  ;;  %v9481_v37 = vld [vmem:[%s13540_s5 + $0x74] sm:$0xf]  ;;  %v7851_v56 = vld [vmem:[%s13540_s5 + $0xf8] sm:$0xf0] }
 0x17a   : > { %v1284_v63 = vunpack.c.l.b16 %v987_v61  ;;  %v7790_v41 = vor.u32 %v9481_v37, %v7787_v38  ;;  %v7854_v58 = vor.u32 %v9497_v55, %v7851_v56  ;;  %v9486_v37 = vld [vmem:[%s13540_s5 + $0x94] sm:$0xf0]  ;;  %v9489_v38 = vld [vmem:[%s13540_s5 + $0xb4] sm:$0xf]  ;;  %v9468_v55 = vld [vmem:[%s13540_s5 + $0x4] sm:$0xf0] }
 0x17b   : > { %v9467_v56 = vld [vmem:[%s13540_s5 + $0x4] sm:$0xf] }
 0x17c   : > { %v1288_v1 = vpack.c.b16 %v1284_v63, %v1283_v62  ;;  %2053 = vmatpush.bf16.msrb.mxu0 %v7790_v41  ;;  %2082 = vmatpush.bf16.msra.mxu1 %v7854_v58  ;;  %v7843_v62 = vld [vmem:[%s13540_s5 + $0xe8] sm:$0xf0]  ;;  %v7745_v63 = vld [vmem:[%s13540_s5 + $0x20] sm:$0xf]  ;;  %v7819_v41 = vld [vmem:[%s13540_s5 + $0xb8] sm:$0xf0] }
 0x17d   : > { %v1308_v0 = vpop.permute.xlu0 %1307  ;;  %v10632_v31 = vpop.f32.mrf.mxu3  ;;  %v7822_v44 = vor.u32 %v9489_v38, %v7819_v41  ;;  %v7731_v58 = vld [vmem:[%s13540_s5 + $0x8] sm:$0xf0] }
 0x17e   : > { %v1414_v2 = vsel %vm1369_vm12, %v1288_v1, %v1308_v0  ;;  %v1336_v3 = vpop.permute.xlu1 %1335  ;;  %v9472_v0 = vld [vmem:[%s13540_s5 + $0x24] sm:$0xf0]  ;;  %v7846_v1 = vor.u32 %v9495_v57, %v7843_v62  ;;  %v7734_v57 = vor.u32 %v9467_v56, %v7731_v58 }
 0x17f   : > { %v1422_v4 = vsel %vm658_vm0, %v1414_v2, %v1336_v3  ;;  %v7746_v2 = vor.u32 %v9472_v0, %v7745_v63  ;;  %v9475_v3 = vld [vmem:[%s13540_s5 + $0x44] sm:$0xf]  ;;  %v7793_v63 = vld [vmem:[%s13540_s5 + $0x80] sm:$0xf]  ;;  %v9484_v0 = vld [vmem:[%s13540_s5 + $0x84] sm:$0xf0] }
 0x180   : > { %2054 = vmatpush.bf16.msrb.mxu0 %v7782_v48  ;;  %2083 = vmatpush.bf16.msra.mxu1 %v7846_v1  ;;  %v9487_v48 = vld [vmem:[%s13540_s5 + $0xa4] sm:$0xf]  ;;  %v9485_v1 = vld [vmem:[%s13540_s5 + $0x94] sm:$0xf] }
 0x185   : > { %v10662_v50 = vpop.f32.mrf.mxu3 }
 0x186   : > { %7724 = vmatmul.msk.bf16.gmra.mxu1 %vm1369_vm12, %v10252_v49  ;;  %v1356_v49 = vpop.permute.xlu2 %1355 }
 0x187   : > { %v1433_v5 = vsel %vm1390_vm13, %v1422_v4, %v1356_v49  ;;  %v7763_v4 = vld [vmem:[%s13540_s5 + $0x48] sm:$0xf0]  ;;  %v10702_v49 = vpop.f32.mrf.mxu0 }
 0x189   : > { %1679 = vmatmul.bf16.gmra.mxu2 %v1430_v60  ;;  %1766 = vmatmul.bf16.gmra.mxu0 %v1430_v60  ;;  %v7771_v60 = vld [vmem:[%s13540_s5 + $0x58] sm:$0xf0] }
 0x18a   : > { %v7774_v61 = vor.u32 %v9477_v59, %v7771_v60  ;;  %v7814_v59 = vor.u32 %v9487_v48, %v7811_v39  ;;  %v7730_v60 = vor.u32 %v9468_v55, %v7729_v51  ;;  %v9503_v55 = vld [vmem:[%s13542_s7 + $0x24] sm:$0xf] }
 0x18c   : > { %2055 = vmatpush.bf16.msrb.mxu0 %v7774_v61 }
 0x18d   : > { %v10704_v7 = vpop.f32.mrf.mxu3 }
 0x195   : > { %v10748_v29 = vpop.f32.mrf.mxu3 }
 0x196   : > { %7725 = vmatmul.msk.bf16.gmra.mxu1 %vm1369_vm12, %v10330_v20  ;;  %v9498_v20 = vld [vmem:[%s13540_s5 + $0xf4] sm:$0xf0] }
 0x197   : > { %v7850_v13 = vor.u32 %v9498_v20, %v7849_v11  ;;  %v9488_v11 = vld [vmem:[%s13540_s5 + $0xa4] sm:$0xf0]  ;;  %v9493_v20 = vld [vmem:[%s13540_s5 + $0xd4] sm:$0xf] }
 0x198   : > { %v7838_v18 = vor.u32 %v9493_v20, %v7835_v14  ;;  %v9506_v20 = vld [vmem:[%s13542_s7 + $0x34] sm:$0xf0] }
 0x199   : > { %1684 = vmatmul.bf16.gmra.mxu2 %v1433_v5  ;;  %1771 = vmatmul.bf16.gmra.mxu0 %v1433_v5  ;;  %v7766_v5 = vor.u32 %v9475_v3, %v7763_v4  ;;  %v7803_v3 = vld [vmem:[%s13540_s5 + $0x98] sm:$0xf0]  ;;  %v9483_v4 = vld [vmem:[%s13540_s5 + $0x84] sm:$0xf] }
 0x19a   : > { %2024 = vmatpush.bf16.msra.mxu3 %v7850_v13  ;;  %v7810_v13 = vor.u32 %v9488_v11, %v7809_v10  ;;  %2084 = vmatpush.bf16.msra.mxu1 %v7838_v18  ;;  %v7806_v10 = vor.u32 %v9485_v1, %v7803_v3  ;;  %v7881_v11 = vld [vmem:[%s13542_s7 + $0x30] sm:$0xf]  ;;  %v9505_v18 = vld [vmem:[%s13542_s7 + $0x34] sm:$0xf] }
 0x19b   : > { %2056 = vmatpush.bf16.msrb.mxu0 %v7766_v5  ;;  %v7795_v5 = vld [vmem:[%s13540_s5 + $0x88] sm:$0xf0]  ;;  %v7882_v14 = vor.u32 %v9506_v20, %v7881_v11 }
 0x19c   : > { %v7798_v16 = vor.u32 %v9483_v4, %v7795_v5 }
 0x19e   : > { %2025 = vmatpush.bf16.msra.mxu3 %v7842_v22  ;;  %v9491_v22 = vld [vmem:[%s13540_s5 + $0xc4] sm:$0xf] }
 0x19f   : > { %2057 = vmatpush.bf16.msrb.mxu0 %v7758_v19  ;;  %v7883_v19 = vld [vmem:[%s13542_s7 + $0x38] sm:$0xf0] }
 0x1a2   : > { %2026 = vmatpush.bf16.msra.mxu3 %v7834_v27  ;;  %v9471_v27 = vld [vmem:[%s13540_s5 + $0x24] sm:$0xf] }
 0x1a3   : > { %v7750_v33 = vor.u32 %v9471_v27, %v7747_v28 }
 0x1a5   : > { %2058 = vmatpush.bf16.msrb.mxu0 %v7750_v33 }
 0x1a6   : > { %7726 = vmatmul.msk.bf16.gmra.mxu1 %vm1369_vm12, %v10402_v53  ;;  %v7770_v53 = vor.u32 %v9478_v43, %v7769_v23  ;;  %2027 = vmatpush.bf16.msra.mxu3 %v7826_v36  ;;  %v7827_v23 = vld [vmem:[%s13540_s5 + $0xc8] sm:$0xf0]  ;;  %v7737_v43 = vld [vmem:[%s13540_s5 + $0x10] sm:$0xf] }
 0x1a7   : > { %v7738_v32 = vor.u32 %v9470_v25, %v7737_v43  ;;  %v7801_v36 = vld [vmem:[%s13540_s5 + $0x90] sm:$0xf] }
 0x1a8   : > { %1997 = vmatpush.bf16.msrb.mxu2 %v7770_v53  ;;  %v10735_v53 = vpop.f32.mrf.mxu0  ;;  %v7802_v40 = vor.u32 %v9486_v37, %v7801_v36  ;;  %v7873_v36 = vld [vmem:[%s13542_s7 + $0x20] sm:$0xf]  ;;  %v9504_v37 = vld [vmem:[%s13542_s7 + $0x24] sm:$0xf0] }
 0x1a9   : > { %v7874_v38 = vor.u32 %v9504_v37, %v7873_v36 }
 0x1aa   : > { %2028 = vmatpush.bf16.msra.mxu3 %v7818_v54 }
 0x1ac   : > { %1998 = vmatpush.bf16.msrb.mxu2 %v7762_v30  ;;  %v7830_v30 = vor.u32 %v9491_v22, %v7827_v23  ;;  %v584_v22 = vld [vmem:[%s13539_s4] sm:$0x3]  ;;  %v7886_v23 = vor.u32 %v9505_v18, %v7883_v19 }
 0x1ad   : > { %v10825_v25 = vperm.slane %v584_v22, 0 }
 0x1ae   : > { %2029 = vmatpush.bf16.msra.mxu3 %v7810_v13  ;;  %2085 = vmatpush.bf16.msra.mxu1 %v7830_v30 }
 0x1b0   : > { %1999 = vmatpush.bf16.msrb.mxu2 %v7754_v45  ;;  %v7742_v45 = vor.u32 %v9469_v42, %v7739_v46  ;;  %v10788_v61 = vpop.f32.mrf.mxu0 }
 0x1b2   : > { %2030 = vmatpush.bf16.msra.mxu3 %v7802_v40  ;;  %2086 = vmatpush.bf16.msra.mxu1 %v7822_v44  ;;  %v10837_v40 = vperm.slane %v584_v22, 1 }
 0x1b3   : > { %v10624_v26 = vpop.f32.mrf.mxu1  ;;  %2059 = vmatpush.bf16.msrb.mxu0 %v7742_v45 }
 0x1b4   : > { %2000 = vmatpush.bf16.msrb.mxu2 %v7746_v2  ;;  %v7794_v2 = vor.u32 %v9484_v0, %v7793_v63 }
 0x1b6   : > { %2087 = vmatpush.bf16.msra.mxu1 %v7814_v59  ;;  %2031 = vmatpush.bf16.msra.mxu3 %v7794_v2 }
 0x1b7   : > { %2060 = vmatpush.bf16.msrb.mxu0 %v7734_v57 }
 0x1b8   : > { %2001 = vmatpush.bf16.msrb.mxu2 %v7738_v32  ;;  %v1642_v32 = vadd.f32 %v10624_v26, %v10825_v25 }
 0x1b9   : > { %v1728_v62 = vpop.f32.mrf.mxu3 }
 0x1ba   : > { %2088 = vmatpush.bf16.msra.mxu1 %v7806_v10  ;;  %2189 = vmatpush.bf16.msrb.mxu3 %v7886_v23  ;;  %v1729_v39 = vadd.f32 %v1728_v62, %v10837_v40 }
 0x1bb   : > { %v10640_v34 = vpop.f32.mrf.mxu1 }
 0x1bc   : > { %2002 = vmatpush.bf16.msrb.mxu2 %v7730_v60  ;;  %v1644_v41 = vadd.f32 %v10640_v34, %v10825_v25  ;;  %v7875_v34 = vld [vmem:[%s13542_s7 + $0x28] sm:$0xf0] }
 0x1bd   : > { %v7878_v56 = vor.u32 %v9503_v55, %v7875_v34  ;;  %v9500_v34 = vld [vmem:[%s13542_s7 + $0x4] sm:$0xf0] }
 0x1be   : > { %2089 = vmatpush.bf16.msra.mxu1 %v7798_v16  ;;  %v9502_v16 = vld [vmem:[%s13542_s7 + $0x14] sm:$0xf0] }
 0x1bf   : > { %2190 = vmatpush.bf16.msrb.mxu3 %v7878_v56 }
 0x1c0   : > { %2160 = vmatpush.bf16.msra.mxu2 %v7882_v14  ;;  %v7865_v14 = vld [vmem:[%s13542_s7 + $0x10] sm:$0xf] }
 0x1c1   : > { %v1730_v43 = vpop.f32.mrf.mxu3 }
 0x1c2   : > { %v1731_v58 = vadd.f32 %v1730_v43, %v10837_v40 }
 0x1c3   : > { %v10670_v52 = vpop.f32.mrf.mxu1 }
 0x1c4   : > { %2161 = vmatpush.bf16.msra.mxu2 %v7874_v38  ;;  %v1647_v3 = vadd.f32 %v10670_v52, %v10825_v25 }
 0x1c9   : > { %v1733_v42 = vpop.f32.mrf.mxu3 }
 0x1ca   : > { %v1734_v43 = vadd.f32 %v1733_v42, %v10837_v40 }
 0x1cb   : > { %v10706_v8 = vpop.f32.mrf.mxu1 }
 0x1cc   : > { %v1649_v18 = vadd.f32 %v10706_v8, %v10825_v25  ;;  %v7867_v8 = vld [vmem:[%s13542_s7 + $0x18] sm:$0xf0] }
 0x1d1   : > { %v1735_v1 = vpop.f32.mrf.mxu3 }
 0x1d2   : > { %v1736_v36 = vadd.f32 %v1735_v1, %v10837_v40 }
 0x1d3   : > { %v10737_v24 = vpop.f32.mrf.mxu1 }
 0x1db   : > { %v10777_v54 = vpop.f32.mrf.mxu1 }
 0x1e3   : > { %v10814_v13 = vpop.f32.mrf.mxu1 }
 0x1e6   : > { %v1757_v17 = vpop.f32.mrf.mxu0 }
 0x1e7   : > { %v1758_v59 = vadd.f32 %v1757_v17, %v1729_v39  ;;  %v7866_v17 = vor.u32 %v9502_v16, %v7865_v14  ;;  %v1652_v39 = vadd.f32 %v10737_v24, %v10825_v25  ;;  %v9499_v24 = vld [vmem:[%s13542_s7 + $0x4] sm:$0xf] }
 0x1e9   : > { %2162 = vmatpush.bf16.msra.mxu2 %v7866_v17 }
 0x1eb   : > { %v10827_v28 = vpop.f32.mrf.mxu1 }
 0x1ec   : > { %v1670_v27 = vpop.f32.mrf.mxu2 }
 0x1ed   : > { %v1671_v33 = vadd.f32 %v1670_v27, %v1642_v32  ;;  %v1738_v27 = vpop.f32.mrf.mxu3  ;;  %v9501_v32 = vld [vmem:[%s13542_s7 + $0x14] sm:$0xf] }
 0x1ee   : > { %v1759_v30 = vpop.f32.mrf.mxu0 }
 0x1ef   : > { %v1700_v26 = vadd.f32 %v10660_v47, %v1671_v33  ;;  %v1760_v57 = vadd.f32 %v1759_v30, %v1731_v58  ;;  %v7870_v33 = vor.u32 %v9501_v32, %v7867_v8 }
 0x1f1   : > { %v1806_v60 = vmax.f32 %v1700_v26, 0.0  ;;  %2191 = vmatpush.bf16.msrb.mxu3 %v7870_v33 }
 0x1f3   : > { %v1786_v44 = vpop.f32.mrf.mxu1 }
 0x1f4   : > { %v1672_v46 = vpop.f32.mrf.mxu2  ;;  %v1787_v63 = vadd.f32 %v1786_v44, %v1758_v59 }
 0x1f5   : > { %v1673_v45 = vadd.f32 %v1672_v46, %v1644_v41  ;;  %v1740_v58 = vpop.f32.mrf.mxu3 }
 0x1f6   : > { %v1762_v48 = vpop.f32.mrf.mxu0  ;;  %v1807_v4 = vmax.f32 %v1787_v63, 0.0  ;;  %v7859_v63 = vld [vmem:[%s13542_s7 + $0x8] sm:$0xf0] }
 0x1f7   : > { %v1702_v51 = vadd.f32 %v10702_v49, %v1673_v45  ;;  %v1763_v37 = vadd.f32 %v1762_v48, %v1734_v43  ;;  %v7857_v48 = vld [vmem:[%s13542_s7] sm:$0xf] }
 0x1f8   : > { %v7858_v56 = vor.u32 %v9500_v34, %v7857_v48  ;;  %v9524_v48 = vld [vmem:[%s13544_s9 + $0x28] sm:$0xff] }
 0x1f9   : > { %v1808_v47 = vmax.f32 %v1702_v51, 0.0 }
 0x1fa   : > { %2163 = vmatpush.bf16.msra.mxu2 %v7858_v56 }
 0x1fb   : > { %v1822_v62 = vpack.c.bf16 %v1808_v47, %v1806_v60  ;;  %v1788_v49 = vpop.f32.mrf.mxu1  ;;  %v1654_v47 = vadd.f32 %v10777_v54, %v10825_v25  ;;  %v1739_v54 = vadd.f32 %v1738_v27, %v10837_v40 }
 0x1fc   : > { %v1675_v0 = vpop.f32.mrf.mxu2  ;;  %v1789_v2 = vadd.f32 %v1788_v49, %v1760_v57  ;;  %v7862_v49 = vor.u32 %v9499_v24, %v7859_v63  ;;  %v9531_v63 = vld [vmem:[%s13544_s9 + $0x60] sm:$0xff] }
 0x1fd   : > { %2003 = vmatmul.bf16.vlgmr.msrb.gmra.mxu2 %v1822_v62  ;;  %2061 = vmatmul.bf16.vlgmr.msrb.gmra.mxu0 %v1822_v62  ;;  %v1676_v11 = vadd.f32 %v1675_v0, %v1647_v3 }
 0x1fe   : > { %v1809_v5 = vmax.f32 %v1789_v2, 0.0  ;;  %v1764_v10 = vpop.f32.mrf.mxu0  ;;  %2192 = vmatpush.bf16.msrb.mxu3 %v7862_v49 }
 0x1ff   : > { %v1705_v22 = vadd.f32 %v10735_v53, %v1676_v11  ;;  %v1765_v42 = vadd.f32 %v1764_v10, %v1736_v36 }
 0x200   : > { %v1823_v20 = vpack.c.bf16 %v1809_v5, %v1807_v4  ;;  %v1741_v4 = vadd.f32 %v1740_v58, %v10837_v40 }
 0x201   : > { %v1810_v38 = vmax.f32 %v1705_v22, 0.0  ;;  %v1657_v22 = vadd.f32 %v10814_v13, %v10825_v25 }
 0x202   : > { %2032 = vmatmul.bf16.vlgmr.msra.gmra.mxu3 %v1823_v20  ;;  %2090 = vmatmul.bf16.vlgmr.msra.gmra.mxu1 %v1823_v20  ;;  %v1743_v20 = vpop.f32.mrf.mxu3 }
 0x203   : > { %v1791_v19 = vpop.f32.mrf.mxu1 }
 0x204   : > { %v1677_v52 = vpop.f32.mrf.mxu2  ;;  %v1792_v46 = vadd.f32 %v1791_v19, %v1763_v37 }
 0x205   : > { %v1678_v23 = vadd.f32 %v1677_v52, %v1649_v18 }
 0x206   : > { %v1767_v53 = vpop.f32.mrf.mxu0  ;;  %v1811_v51 = vmax.f32 %v1792_v46, 0.0 }
 0x207   : > { %v1707_v30 = vadd.f32 %v10788_v61, %v1678_v23  ;;  %v1768_v5 = vadd.f32 %v1767_v53, %v1739_v54  ;;  %v9530_v54 = vld [vmem:[%s13544_s9 + $0x58] sm:$0xff] }
 0x209   : > { %v1812_v41 = vmax.f32 %v1707_v30, 0.0  ;;  %v1659_v30 = vadd.f32 %v10827_v28, %v10825_v25 }
 0x20a   : > { %v1745_v37 = vpop.f32.mrf.mxu3 }
 0x20b   : > { %v1824_v44 = vpack.c.bf16 %v1812_v41, %v1810_v38  ;;  %v1793_v26 = vpop.f32.mrf.mxu1  ;;  %v1744_v38 = vadd.f32 %v1743_v20, %v10837_v40  ;;  %v1746_v41 = vadd.f32 %v1745_v37, %v10837_v40  ;;  %v9520_v20 = vld [vmem:[%s13544_s9 + $0x8] sm:$0xff] }
 0x20c   : > { %v1680_v61 = vpop.f32.mrf.mxu2  ;;  %v1794_v45 = vadd.f32 %v1793_v26, %v1765_v42 }
 0x20d   : > { %2008 = vmatmul.bf16.gmra.mxu2 %v1824_v44  ;;  %2066 = vmatmul.bf16.gmra.mxu0 %v1824_v44  ;;  %v1681_v59 = vadd.f32 %v1680_v61, %v1652_v39 }
 0x20e   : > { %v1813_v55 = vmax.f32 %v1794_v45, 0.0  ;;  %v1769_v57 = vpop.f32.mrf.mxu0 }
 0x20f   : > { %v1710_v1 = vadd.f32 %v10632_v31, %v1681_v59  ;;  %v1770_v14 = vadd.f32 %v1769_v57, %v1741_v4 }
 0x210   : > { %v1825_v60 = vpack.c.bf16 %v1813_v55, %v1811_v51  ;;  %v9533_v55 = vld [vmem:[%s13544_s9 + $0x70] sm:$0xff] }
 0x211   : > { %v1814_v10 = vmax.f32 %v1710_v1, 0.0 }
 0x212   : > { %2037 = vmatmul.bf16.gmra.mxu3 %v1825_v60  ;;  %2095 = vmatmul.bf16.gmra.mxu1 %v1825_v60  ;;  %v9532_v60 = vld [vmem:[%s13544_s9 + $0x68] sm:$0xff] }
 0x213   : > { %v1796_v0 = vpop.f32.mrf.mxu1 }
 0x214   : > { %v1682_v62 = vpop.f32.mrf.mxu2  ;;  %v1797_v16 = vadd.f32 %v1796_v0, %v1768_v5 }
 0x215   : > { %v1683_v2 = vadd.f32 %v1682_v62, %v1654_v47  ;;  %v9523_v47 = vld [vmem:[%s13544_s9 + $0x20] sm:$0xff]  ;;  %v9522_v62 = vld [vmem:[%s13544_s9 + $0x18] sm:$0xff] }
 0x216   : > { %v1772_v31 = vpop.f32.mrf.mxu0  ;;  %v1815_v23 = vmax.f32 %v1797_v16, 0.0 }
 0x217   : > { %v1712_v3 = vadd.f32 %v10662_v50, %v1683_v2  ;;  %v1773_v42 = vadd.f32 %v1772_v31, %v1744_v38 }
 0x219   : > { %v1816_v11 = vmax.f32 %v1712_v3, 0.0  ;;  %v9521_v3 = vld [vmem:[%s13544_s9 + $0x10] sm:$0xff] }
 0x21b   : > { %v1826_v17 = vpack.c.bf16 %v1816_v11, %v1814_v10  ;;  %v1798_v52 = vpop.f32.mrf.mxu1  ;;  %v9529_v11 = vld [vmem:[%s13544_s9 + $0x50] sm:$0xff] }
 0x21c   : > { %v1685_v18 = vpop.f32.mrf.mxu2  ;;  %v1799_v19 = vadd.f32 %v1798_v52, %v1770_v14  ;;  %v9528_v52 = vld [vmem:[%s13544_s9 + $0x48] sm:$0xff] }
 0x21d   : > { %2013 = vmatmul.bf16.gmra.mxu2 %v1826_v17  ;;  %2071 = vmatmul.bf16.gmra.mxu0 %v1826_v17  ;;  %v1686_v43 = vadd.f32 %v1685_v18, %v1657_v22 }
 0x21e   : > { %v1817_v50 = vmax.f32 %v1799_v19, 0.0  ;;  %v1774_v13 = vpop.f32.mrf.mxu0  ;;  %v9519_v19 = vld [vmem:[%s13544_s9] sm:$0xff] }
 0x21f   : > { %v1715_v33 = vadd.f32 %v10704_v7, %v1686_v43  ;;  %v1775_v61 = vadd.f32 %v1774_v13, %v1746_v41 }
 0x220   : > { %v1827_v27 = vpack.c.bf16 %v1817_v50, %v1815_v23  ;;  %v9527_v50 = vld [vmem:[%s13544_s9 + $0x40] sm:$0xff] }
 0x221   : > { %v1818_v46 = vmax.f32 %v1715_v33, 0.0 }
 0x222   : > { %2042 = vmatmul.bf16.gmra.mxu3 %v1827_v27  ;;  %2100 = vmatmul.bf16.gmra.mxu1 %v1827_v27 }
 0x223   : > { %v1801_v8 = vpop.f32.mrf.mxu1 }
 0x224   : > { %v1687_v32 = vpop.f32.mrf.mxu2  ;;  %v1802_v25 = vadd.f32 %v1801_v8, %v1773_v42 }
 0x225   : > { %v1688_v36 = vadd.f32 %v1687_v32, %v1659_v30 }
 0x226   : > { %v1819_v7 = vmax.f32 %v1802_v25, 0.0 }
 0x227   : > { %v1717_v53 = vadd.f32 %v10748_v29, %v1688_v36  ;;  %v617_v29 = vld [vmem:[%s13541_s6] sm:$0x3] }
 0x228   : > { %v10927_v40 = vperm.slane %v617_v29, 0  ;;  %v626_v36 = vld [vmem:[%s13543_s8] sm:$0x3]  ;;  %v10996_v42 = vperm.slane %v617_v29, 1 }
 0x229   : > { %v1820_v44 = vmax.f32 %v1717_v53, 0.0  ;;  %v10993_v53 = vperm.slane %v626_v36, 0 }
 0x22b   : > { %v1828_v28 = vpack.c.bf16 %v1820_v44, %v1818_v46  ;;  %v1803_v26 = vpop.f32.mrf.mxu1  ;;  %v10999_v44 = vperm.slane %v626_v36, 1 }
 0x22c   : > { %v1804_v45 = vadd.f32 %v1803_v26, %v1775_v61 }
 0x22d   : > { %2018 = vmatmul.bf16.gmra.mxu2 %v1828_v28  ;;  %2076 = vmatmul.bf16.gmra.mxu0 %v1828_v28 }
 0x22e   : > { %v1821_v39 = vmax.f32 %v1804_v45, 0.0 }
 0x230   : > { %v1829_v51 = vpack.c.bf16 %v1821_v39, %v1819_v7 }
 0x232   : > { %2047 = vmatmul.bf16.gmra.mxu3 %v1829_v51  ;;  %2105 = vmatmul.bf16.gmra.mxu1 %v1829_v51 }
 0x23d   : > { %7887 = vmatmul.msk.bf16.vlgmr.msra.gmra.mxu2 %vm658_vm0, %v10074_v6 }
 0x242   : > { %7891 = vmatmul.msk.bf16.vlgmr.msrb.gmra.mxu3 %vm658_vm0, %v10074_v6  ;;  %v9526_v6 = vld [vmem:[%s13544_s9 + $0x38] sm:$0xff] }
 0x243   : > { %2456 = vmatpush.bf16.msra.mxu0 %v9526_v6 }
 0x24d   : > { %7888 = vmatmul.msk.bf16.gmra.mxu2 %vm658_vm0, %v10078_v9 }
 0x252   : > { %7892 = vmatmul.msk.bf16.gmra.mxu3 %vm658_vm0, %v10078_v9  ;;  %v9534_v9 = vld [vmem:[%s13544_s9 + $0x78] sm:$0xff] }
 0x253   : > { %2485 = vmatpush.bf16.msrb.mxu1 %v9534_v9 }
 0x257   : > { %2486 = vmatpush.bf16.msrb.mxu1 %v9533_v55 }
 0x25b   : > { %2487 = vmatpush.bf16.msrb.mxu1 %v9532_v60 }
 0x25d   : > { %7889 = vmatmul.msk.bf16.gmra.mxu2 %vm658_vm0, %v10082_v12 }
 0x25f   : > { %2488 = vmatpush.bf16.msrb.mxu1 %v9531_v63 }
 0x262   : > { %7893 = vmatmul.msk.bf16.gmra.mxu3 %vm658_vm0, %v10082_v12  ;;  %v9525_v12 = vld [vmem:[%s13544_s9 + $0x30] sm:$0xff] }
 0x263   : > { %2457 = vmatpush.bf16.msra.mxu0 %v9525_v12  ;;  %2489 = vmatpush.bf16.msrb.mxu1 %v9530_v54 }
 0x267   : > { %2458 = vmatpush.bf16.msra.mxu0 %v9524_v48  ;;  %2490 = vmatpush.bf16.msrb.mxu1 %v9529_v11 }
 0x26b   : > { %2459 = vmatpush.bf16.msra.mxu0 %v9523_v47  ;;  %2491 = vmatpush.bf16.msrb.mxu1 %v9528_v52 }
 0x26d   : > { %7890 = vmatmul.msk.bf16.gmra.mxu2 %vm658_vm0, %v10086_v15 }
 0x26f   : > { %2460 = vmatpush.bf16.msra.mxu0 %v9522_v62  ;;  %2492 = vmatpush.bf16.msrb.mxu1 %v9527_v50 }
 0x272   : > { %7894 = vmatmul.msk.bf16.gmra.mxu3 %vm658_vm0, %v10086_v15 }
 0x273   : > { %2461 = vmatpush.bf16.msra.mxu0 %v9521_v3 }
 0x277   : > { %2462 = vmatpush.bf16.msra.mxu0 %v9520_v20 }
 0x27a   : > { %v2062_v22 = vpop.f32.mrf.mxu0 }
 0x27b   : > { %2463 = vmatpush.bf16.msra.mxu0 %v9519_v19  ;;  %v2063_v39 = vadd.f32 %v2062_v22, %v10996_v42 }
 0x27f   : > { %v2091_v43 = vpop.f32.mrf.mxu1 }
 0x280   : > { %v2004_v15 = vpop.f32.mrf.mxu2  ;;  %v2092_v9 = vadd.f32 %v2091_v43, %v2063_v39 }
 0x281   : > { %v2005_v34 = vadd.f32 %v2004_v15, %v10927_v40 }
 0x282   : > { %v2064_v8 = vpop.f32.mrf.mxu0 }
 0x283   : > { %v2065_v12 = vadd.f32 %v2064_v8, %v10996_v42 }
 0x285   : > { %v2033_v56 = vpop.f32.mrf.mxu3 }
 0x286   : > { %v2034_v58 = vadd.f32 %v2033_v56, %v2005_v34 }
 0x287   : > { %v2093_v37 = vpop.f32.mrf.mxu1 }
 0x288   : > { %v2006_v59 = vpop.f32.mrf.mxu2  ;;  %v2094_v48 = vadd.f32 %v2093_v37, %v2065_v12 }
 0x289   : > { %v2007_v46 = vadd.f32 %v2006_v59, %v10927_v40 }
 0x28a   : > { %v2067_v61 = vpop.f32.mrf.mxu0 }
 0x28b   : > { %v2068_v20 = vadd.f32 %v2067_v61, %v10996_v42 }
 0x28d   : > { %v2035_v57 = vpop.f32.mrf.mxu3 }
 0x28e   : > { %v2036_v28 = vadd.f32 %v2035_v57, %v2007_v46 }
 0x28f   : > { %v2096_v7 = vpop.f32.mrf.mxu1 }
 0x290   : > { %v2009_v24 = vpop.f32.mrf.mxu2 }
 0x291   : > { %v2010_v0 = vadd.f32 %v2009_v24, %v10927_v40 }
 0x292   : > { %v2069_v47 = vpop.f32.mrf.mxu0 }
 0x293   : > { %v2070_v22 = vadd.f32 %v2069_v47, %v10996_v42 }
 0x295   : > { %v2038_v49 = vpop.f32.mrf.mxu3 }
 0x296   : > { %v10949_v1 = vadd.f32 %v2038_v49, %v2010_v0 }
 0x297   : > { %v2098_v63 = vpop.f32.mrf.mxu1 }
 0x298   : > { %v10951_v2 = vpop.f32.mrf.mxu2 }
 0x299   : > { %v2012_v54 = vadd.f32 %v10951_v2, %v10927_v40 }
 0x29a   : > { %v2072_v19 = vpop.f32.mrf.mxu0 }
 0x29b   : > { %v2073_v12 = vadd.f32 %v2072_v19, %v10996_v42 }
 0x29d   : > { %v10959_v4 = vpop.f32.mrf.mxu3 }
 0x2a0   : > { %v2014_v5 = vpop.f32.mrf.mxu2 }
 0x2a1   : > { %v2015_v10 = vadd.f32 %v2014_v5, %v10927_v40  ;;  %v2041_v5 = vadd.f32 %v10959_v4, %v2012_v54  ;;  %v2101_v4 = vpop.f32.mrf.mxu1 }
 0x2a2   : > { %v2074_v61 = vpop.f32.mrf.mxu0 }
 0x2a5   : > { %v2043_v14 = vpop.f32.mrf.mxu3 }
 0x2a6   : > { %v10968_v16 = vadd.f32 %v2043_v14, %v2015_v10 }
 0x2a8   : > { %v10970_v17 = vpop.f32.mrf.mxu2 }
 0x2ad   : > { %v10972_v18 = vpop.f32.mrf.mxu3 }
 0x2b0   : > { %v2019_v31 = vpop.f32.mrf.mxu2 }
 0x2b1   : > { %v2020_v23 = vadd.f32 %v2019_v31, %v10927_v40  ;;  %v2097_v31 = vadd.f32 %v2096_v7, %v2068_v20 }
 0x2b5   : > { %v2048_v27 = vpop.f32.mrf.mxu3 }
 0x2b6   : > { %v10984_v30 = vadd.f32 %v2048_v27, %v2020_v23 }
 0x2b8   : > { %v10986_v32 = vpop.f32.mrf.mxu2 }
 0x2bd   : > { %v10988_v33 = vpop.f32.mrf.mxu3 }
 0x2c0   : > { %v2165_v38 = vpop.f32.mrf.mxu2 }
 0x2c1   : > { %v2166_v13 = vadd.f32 %v2165_v38, %v10993_v53 }
 0x2c3   : > { %v11001_v26 = vadd.f32 %v2166_v13, %v2034_v58 }
 0x2c5   : > { %v2194_v41 = vpop.f32.mrf.mxu3  ;;  %v2230_v29 = vmax.f32 %v11001_v26, 0.0 }
 0x2c6   : > { %v2195_v51 = vadd.f32 %v2194_v41, %v10999_v44 }
 0x2c8   : > { %v2167_v25 = vpop.f32.mrf.mxu2  ;;  %v11011_v34 = vadd.f32 %v2195_v51, %v2092_v9 }
 0x2c9   : > { %v2168_v45 = vadd.f32 %v2167_v25, %v10993_v53 }
 0x2ca   : > { %v2231_v57 = vmax.f32 %v11011_v34, 0.0 }
 0x2cb   : > { %v11006_v6 = vadd.f32 %v2168_v45, %v2036_v28  ;;  %v2017_v28 = vadd.f32 %v10970_v17, %v10927_v40  ;;  %v2103_v45 = vpop.f32.mrf.mxu1 }
 0x2cd   : > { %v2232_v15 = vmax.f32 %v11006_v6, 0.0  ;;  %v2196_v55 = vpop.f32.mrf.mxu3  ;;  %v2046_v39 = vadd.f32 %v10972_v18, %v2017_v28 }
 0x2ce   : > { %v2197_v58 = vadd.f32 %v2196_v55, %v10999_v44 }
 0x2cf   : > { %v2349_v56 = vpack.c.bf16 %v2232_v15, %v2230_v29 }
 0x2d0   : > { %v2170_v59 = vpop.f32.mrf.mxu2  ;;  %v11018_v60 = vadd.f32 %v2197_v58, %v2094_v48  ;;  %v2075_v58 = vadd.f32 %v2074_v61, %v10996_v42 }
 0x2d1   : > { %2464 = vmatmul.bf16.vlgmr.msra.gmra.mxu0 %v2349_v56  ;;  %v2171_v0 = vadd.f32 %v2170_v59, %v10993_v53  ;;  %v2102_v56 = vadd.f32 %v2101_v4, %v2073_v12  ;;  %v2594_v12 = vld [vmem:[#allocation2] sm:$0xe] }
 0x2d2   : > { %v2233_v24 = vmax.f32 %v11018_v60, 0.0  ;;  %v2104_v18 = vadd.f32 %v2103_v45, %v2075_v58  ;;  %v7959_v58 = vrot.slane %v2594_v12, 9 }
 0x2d3   : > { %v11031_v10 = vadd.f32 %v2171_v0, %v10949_v1  ;;  %v2099_v1 = vadd.f32 %v2098_v63, %v2070_v22  ;;  %v2077_v0 = vpop.f32.mrf.mxu0 }
 0x2d4   : > { %v2350_v62 = vpack.c.bf16 %v2233_v24, %v2231_v57 }
 0x2d5   : > { %v2199_v49 = vpop.f32.mrf.mxu3  ;;  %v2234_v2 = vmax.f32 %v11031_v10, 0.0 }
 0x2d6   : > { %2493 = vmatmul.bf16.vlgmr.msrb.gmra.mxu1 %v2350_v62  ;;  %v2200_v14 = vadd.f32 %v2199_v49, %v10999_v44 }
 0x2d8   : > { %v2172_v3 = vpop.f32.mrf.mxu2  ;;  %v11041_v43 = vadd.f32 %v2200_v14, %v2097_v31  ;;  %v2022_v31 = vadd.f32 %v10986_v32, %v10927_v40 }
 0x2d9   : > { %v2173_v11 = vadd.f32 %v2172_v3, %v10993_v53  ;;  %v2106_v3 = vpop.f32.mrf.mxu1 }
 0x2da   : > { %v2235_v38 = vmax.f32 %v11041_v43, 0.0  ;;  %v2051_v4 = vadd.f32 %v10988_v33, %v2022_v31 }
 0x2db   : > { %v11036_v52 = vadd.f32 %v2173_v11, %v2041_v5 }
 0x2dd   : > { %v2236_v23 = vmax.f32 %v11036_v52, 0.0  ;;  %v2201_v50 = vpop.f32.mrf.mxu3 }
 0x2de   : > { %v2202_v27 = vadd.f32 %v2201_v50, %v10999_v44 }
 0x2df   : > { %v2351_v8 = vpack.c.bf16 %v2236_v23, %v2234_v2 }
 0x2e0   : > { %v2175_v36 = vpop.f32.mrf.mxu2  ;;  %v11048_v37 = vadd.f32 %v2202_v27, %v2099_v1  ;;  %v2079_v27 = vpop.f32.mrf.mxu0 }
 0x2e1   : > { %2469 = vmatmul.bf16.gmra.mxu0 %v2351_v8  ;;  %v2176_v41 = vadd.f32 %v2175_v36, %v10993_v53  ;;  %v2078_v8 = vadd.f32 %v2077_v0, %v10996_v42  ;;  %v2080_v40 = vadd.f32 %v2079_v27, %v10996_v42  ;;  %v2659_v0 = vld [vmem:[#allocation2 + $0x4] sm:$0x3] }
 0x2e2   : > { %v2237_v13 = vmax.f32 %v11048_v37, 0.0 }
 0x2e3   : > { %v11061_v51 = vadd.f32 %v2176_v41, %v10968_v16  ;;  %v2107_v61 = vadd.f32 %v2106_v3, %v2078_v8  ;;  %v2660_v3 = vld [vmem:[#allocation2 + $0x8] sm:$0xc] }
 0x2e4   : > { %v2352_v46 = vpack.c.bf16 %v2237_v13, %v2235_v38 }
 0x2e5   : > { %v2204_v25 = vpop.f32.mrf.mxu3  ;;  %v2238_v17 = vmax.f32 %v11061_v51, 0.0 }
 0x2e6   : > { %2498 = vmatmul.bf16.gmra.mxu1 %v2352_v46  ;;  %v2205_v55 = vadd.f32 %v2204_v25, %v10999_v44  ;;  %v2108_v46 = vpop.f32.mrf.mxu1 }
 0x2e8   : > { %v2177_v7 = vpop.f32.mrf.mxu2  ;;  %v11071_v63 = vadd.f32 %v2205_v55, %v2102_v56  ;;  %v2596_v55 = vld [vmem:[#allocation2 + $0x8] sm:$0xe]  ;;  %v2597_v56 = vld [vmem:[#allocation2 + $0xc] sm:$0x1] }
 0x2e9   : > { %v2178_v9 = vadd.f32 %v2177_v7, %v10993_v53 }
 0x2ea   : > { %v2239_v5 = vmax.f32 %v11071_v63, 0.0 }
 0x2eb   : > { %v11066_v48 = vadd.f32 %v2178_v9, %v2046_v39 }
 0x2ed   : > { %v2240_v59 = vmax.f32 %v11066_v48, 0.0  ;;  %v2206_v47 = vpop.f32.mrf.mxu3 }
 0x2ee   : > { %v2207_v16 = vadd.f32 %v2206_v47, %v10999_v44 }
 0x2ef   : > { %v2353_v62 = vpack.c.bf16 %v2240_v59, %v2238_v17 }
 0x2f0   : > { %v2180_v49 = vpop.f32.mrf.mxu2  ;;  %v11078_v54 = vadd.f32 %v2207_v16, %v2104_v18  ;;  %v7960_v18 = vrot.slane %v2596_v55, 9  ;;  %v2632_v16 = vrot.slane %v2597_v56, 5 }
 0x2f1   : > { %2474 = vmatmul.bf16.gmra.mxu0 %v2353_v62  ;;  %v2181_v20 = vadd.f32 %v2180_v49, %v10993_v53  ;;  %v2658_v62 = vld [vmem:[#allocation2] sm:$0xc] }
 0x2f2   : > { %v13566_v11 = vmax.f32 %v11078_v54, 0.0  ;;  %v2633_v31 = vsel %vm10098_vm6, %v7960_v18, %v2632_v16 }
 0x2f3   : > { %v11091_v50 = vadd.f32 %v2181_v20, %v10984_v30  ;;  %v2109_v30 = vadd.f32 %v2108_v46, %v2080_v40  ;;  %v2661_v20 = vld [vmem:[#allocation2 + $0xc] sm:$0x3]  ;;  %v3015_v27 = vunpack.c.l.b16 %v2633_v31 }
 0x2f4   : > { %v2354_v14 = vpack.c.bf16 %v13566_v11, %v2239_v5 }
 0x2f5   : > { %v2209_v19 = vpop.f32.mrf.mxu3  ;;  %v13565_v32 = vmax.f32 %v11091_v50, 0.0 }
 0x2f6   : > { %2503 = vmatmul.bf16.gmra.mxu1 %v2354_v14  ;;  %v2210_v36 = vadd.f32 %v2209_v19, %v10999_v44  ;;  %v7967_v14 = vrot.slane %v2658_v62, 10  ;;  %v2692_v19 = vrot.slane %v2659_v0, 6 }
 0x2f8   : > { %v2182_v22 = vpop.f32.mrf.mxu2  ;;  %v11101_v28 = vadd.f32 %v2210_v36, %v2107_v61  ;;  %v2693_v8 = vsel %vm10145_vm10, %v7967_v14, %v2692_v19 }
 0x2f9   : > { %v2183_v1 = vadd.f32 %v2182_v22, %v10993_v53  ;;  %v3034_v46 = vunpack.c.l.b16 %v2693_v8  ;;  %v8193_v8 = vld [vmem:[%s13546_s11 + $0x110] sm:$0xf] }
 0x2fa   : > { %v13563_v42 = vmax.f32 %v11101_v28, 0.0 }
 0x2fb   : > { %v11096_v41 = vadd.f32 %v2183_v1, %v2051_v4  ;;  %v7968_v4 = vrot.slane %v2660_v3, 10  ;;  %v2696_v1 = vrot.slane %v2661_v20, 6 }
 0x2fd   : > { %v13564_v33 = vmax.f32 %v11096_v41, 0.0  ;;  %v2211_v25 = vpop.f32.mrf.mxu3  ;;  %v2697_v36 = vsel %vm10145_vm10, %v7968_v4, %v2696_v1 }
 0x2fe   : > { %v2212_v53 = vadd.f32 %v2211_v25, %v10999_v44  ;;  %v2595_v44 = vld [vmem:[#allocation2 + $0x4] sm:$0x1]  ;;  %v3035_v40 = vunpack.c.l.b16 %v2697_v36 }
 0x2ff   : > { %v2355_v45 = vpack.c.bf16 %v13564_v33, %v13565_v32  ;;  %v2628_v47 = vrot.slane %v2595_v44, 5 }
 0x300   : > { %v11108_v7 = vadd.f32 %v2212_v53, %v2109_v30  ;;  %v3042_v25 = vpack.c.b16 %v3035_v40, %v3034_v46  ;;  %v11129_v53 = vld [vmem:[%s13545_s10] ss:$0 sm:$0xff]  ;;  %v9570_v46 = vld [vmem:[%s13546_s11 + $0x114] sm:$0xf0] }
 0x301   : > { %2479 = vmatmul.bf16.gmra.mxu0 %v2355_v45  ;;  %v2629_v49 = vsel %vm10098_vm6, %v7959_v58, %v2628_v47 }
 0x302   : > { %v13562_v39 = vmax.f32 %v11108_v7, 0.0  ;;  %v3014_v22 = vunpack.c.l.b16 %v2629_v49  ;;  %3046 = vrot.lane.b32.xlu1 %v3042_v25, %s13591_s26  ;;  %v8194_v25 = vor.u32 %v9570_v46, %v8193_v8 }
 0x304   : > { %v2356_v9 = vpack.c.bf16 %v13562_v39, %v13563_v42  ;;  %v3022_v61 = vpack.c.b16 %v3015_v27, %v3014_v22  ;;  %3499 = vmatpush.bf16.msrb.mxu0 %v8194_v25 }
 0x306   : > { %2508 = vmatmul.bf16.gmra.mxu1 %v2356_v9  ;;  %3026 = vrot.lane.b32.xlu0 %v3022_v61, %s13590_s25  ;;  %v8185_v61 = vld [vmem:[%s13546_s11 + $0x100] sm:$0xf] }
 0x34e   : > { %v2465_v30 = vpop.f32.mrf.mxu0 }
 0x34f   : > { %v2466_v45 = vadd.f32 %v11129_v53, %v2465_v30  ;;  %v9568_v30 = vld [vmem:[%s13546_s11 + $0x104] sm:$0xf0] }
 0x353   : > { %v2494_v9 = vpop.f32.mrf.mxu1 }
 0x354   : > { %v2495_v12 = vadd.f32 %v2494_v9, %v2466_v45 }
 0x356   : > { %v2467_v44 = vpop.f32.mrf.mxu0  ;;  %v2514_v55 = vmax.f32 %v2495_v12, 0.0 }
 0x357   : > { %v2468_v47 = vadd.f32 %v11129_v53, %v2467_v44 }
 0x358   : > { %v2522_v56 = vpack.c.bf16 %v2514_v55, %v2514_v55 }
 0x35a   : > { %v2538_v58 = vrot.slane %v2522_v56, 7 }
 0x35b   : > { %v2496_v18 = vpop.f32.mrf.mxu1 }
 0x35c   : > { %v2539_v16 = vrot.slane %v2538_v58, 4  ;;  %2570 = vst.msk [vmem:[#allocation2 + $0x10] sm:$0xe] %vm757_vm11, %v2538_v58  ;;  %v2497_v62 = vadd.f32 %v2496_v18, %v2468_v47  ;;  %v8186_v47 = vor.u32 %v9568_v30, %v8185_v61 }
 0x35e   : > { %v2470_v0 = vpop.f32.mrf.mxu0  ;;  %2571 = vst.msk [vmem:[#allocation2 + $0x14] sm:$0x1] %vm505_vm3, %v2539_v16  ;;  %v2515_v49 = vmax.f32 %v2497_v62, 0.0  ;;  %3500 = vmatpush.bf16.msrb.mxu0 %v8186_v47 }
 0x35f   : > { %v2471_v14 = vadd.f32 %v11129_v53, %v2470_v0 }
 0x360   : > { %v2523_v3 = vpack.c.bf16 %v2515_v49, %v2515_v49 }
 0x362   : > { %v2540_v20 = vrot.slane %v2523_v3, 7 }
 0x363   : > { %v2499_v19 = vpop.f32.mrf.mxu1  ;;  %v2794_v40 = vld [vmem:[#allocation2 + $0x10] sm:$0xc] }
 0x364   : > { %v2541_v31 = vrot.slane %v2540_v20, 4  ;;  %2572 = vst.msk [vmem:[#allocation2 + $0x18] sm:$0xe] %vm757_vm11, %v2540_v20  ;;  %v2500_v22 = vadd.f32 %v2499_v19, %v2471_v14  ;;  %v8025_v55 = vld [vmem:[#allocation2 + $0x10] sm:$0xf]  ;;  %v7983_v0 = vrot.slane %v2794_v40, 10 }
 0x365   : > { %v2795_v27 = vld [vmem:[#allocation2 + $0x14] sm:$0x3]  ;;  %v2662_v40 = vld [vmem:[#allocation2 + $0x10] sm:$0xc] }
 0x366   : > { %v2472_v4 = vpop.f32.mrf.mxu0  ;;  %2573 = vst.msk [vmem:[#allocation2 + $0x1c] sm:$0x1] %vm505_vm3, %v2541_v31  ;;  %v2516_v1 = vmax.f32 %v2500_v22, 0.0  ;;  %v2828_v12 = vrot.slane %v2795_v27, 6  ;;  %v2599_v20 = vld [vmem:[#allocation2 + $0x14] sm:$0x1] }
 0x367   : > { %v2473_v9 = vadd.f32 %v11129_v53, %v2472_v4  ;;  %v2663_v25 = vld [vmem:[#allocation2 + $0x14] sm:$0x3] }
 0x368   : > { %v2524_v36 = vpack.c.bf16 %v2516_v1, %v2516_v1  ;;  %v2829_v31 = vsel %vm10145_vm10, %v7983_v0, %v2828_v12  ;;  %v2598_v1 = vld [vmem:[#allocation2 + $0x10] sm:$0xe]  ;;  %v2700_v0 = vrot.slane %v2663_v25, 6 }
 0x369   : > { %v3094_v30 = vunpack.c.l.b16 %v2829_v31  ;;  %v7961_v47 = vrot.slane %v2598_v1, 9 }
 0x36a   : > { %v2542_v45 = vrot.slane %v2524_v36, 7 }
 0x36b   : > { %v2501_v44 = vpop.f32.mrf.mxu1  ;;  %v9607_v56 = vld [vmem:[#allocation2 + $0x14] sm:$0xf0] }
 0x36c   : > { %v2796_v58 = vld [vmem:[#allocation2 + $0x18] sm:$0xc]  ;;  %v2543_v18 = vrot.slane %v2542_v45, 4  ;;  %2574 = vst.msk [vmem:[#allocation2 + $0x20] sm:$0xe] %vm757_vm11, %v2542_v45  ;;  %v2502_v16 = vadd.f32 %v2501_v44, %v2473_v9  ;;  %v8026_v62 = vor.u32 %v9607_v56, %v8025_v55  ;;  %v2636_v9 = vrot.slane %v2599_v20, 5 }
 0x36d   : > { %v2797_v3 = vld [vmem:[#allocation2 + $0x1c] sm:$0x3]  ;;  %v7984_v22 = vrot.slane %v2796_v58, 10  ;;  %v2600_v27 = vld [vmem:[#allocation2 + $0x18] sm:$0xe] }
 0x36e   : > { %v2475_v49 = vpop.f32.mrf.mxu0  ;;  %v2601_v14 = vld [vmem:[#allocation2 + $0x1c] sm:$0x1]  ;;  %2575 = vst.msk [vmem:[#allocation2 + $0x24] sm:$0x1] %vm505_vm3, %v2543_v18  ;;  %v2517_v19 = vmax.f32 %v2502_v16, 0.0  ;;  %3074 = vrot.lane.b32.xlu2 %v8026_v62, %s13592_s30  ;;  %v2832_v4 = vrot.slane %v2797_v3, 6 }
 0x36f   : > { %v2665_v8 = vld [vmem:[#allocation2 + $0x1c] sm:$0x3]  ;;  %v2640_v61 = vrot.slane %v2601_v14, 5  ;;  %v2664_v44 = vld [vmem:[#allocation2 + $0x18] sm:$0xc]  ;;  %v2476_v12 = vadd.f32 %v11129_v53, %v2475_v49  ;;  %v7962_v56 = vrot.slane %v2600_v27, 9 }
 0x370   : > { %v2525_v36 = vpack.c.bf16 %v2517_v19, %v2517_v19  ;;  %v2833_v46 = vsel %vm10145_vm10, %v7984_v22, %v2832_v4  ;;  %v2704_v58 = vrot.slane %v2665_v8, 6  ;;  %v7969_v62 = vrot.slane %v2662_v40, 10 }
 0x371   : > { %v3095_v45 = vunpack.c.l.b16 %v2833_v46  ;;  %v2641_v19 = vsel %vm10098_vm6, %v7962_v56, %v2640_v61  ;;  %v7970_v20 = vrot.slane %v2664_v44, 10  ;;  %v2637_v8 = vsel %vm10098_vm6, %v7961_v47, %v2636_v9 }
 0x372   : > { %v2544_v55 = vrot.slane %v2525_v36, 7  ;;  %v3017_v61 = vunpack.c.l.b16 %v2641_v19 }
 0x373   : > { %v2504_v18 = vpop.f32.mrf.mxu1  ;;  %v3102_v16 = vpack.c.b16 %v3095_v45, %v3094_v30  ;;  %v2866_v31 = vld [vmem:[#allocation2 + $0x20] sm:$0xe]  ;;  %v2705_v40 = vsel %vm10145_vm10, %v7970_v20, %v2704_v58 }
 0x374   : > { %v2545_v3 = vrot.slane %v2544_v55, 4  ;;  %2576 = vst.msk [vmem:[#allocation2 + $0x28] sm:$0xe] %vm757_vm11, %v2544_v55  ;;  %v2505_v14 = vadd.f32 %v2504_v18, %v2476_v12  ;;  %v2798_v4 = vld [vmem:[#allocation2 + $0x20] sm:$0xc]  ;;  %v7991_v45 = vrot.slane %v2866_v31, 9  ;;  %v2701_v55 = vsel %vm10145_vm10, %v7969_v62, %v2700_v0 }
 0x375   : > { %3106 = vrot.lane.b32.xlu0 %v3102_v16, %s13590_s25  ;;  %v2867_v49 = vld [vmem:[#allocation2 + $0x24] sm:$0x1]  ;;  %v2930_v46 = vld [vmem:[#allocation2 + $0x20] sm:$0xc]  ;;  %v3016_v12 = vunpack.c.l.b16 %v2637_v8  ;;  %v7985_v18 = vrot.slane %v2798_v4, 10 }
 0x376   : > { %v2477_v22 = vpop.f32.mrf.mxu0  ;;  %v2799_v27 = vld [vmem:[#allocation2 + $0x24] sm:$0x3]  ;;  %2577 = vst.msk [vmem:[#allocation2 + $0x2c] sm:$0x1] %vm505_vm3, %v2545_v3  ;;  %v2518_v1 = vmax.f32 %v2505_v14, 0.0  ;;  %v2900_v36 = vrot.slane %v2867_v49, 5  ;;  %v3037_v3 = vunpack.c.l.b16 %v2705_v40 }
 0x377   : > { %v2931_v25 = vld [vmem:[#allocation2 + $0x24] sm:$0x3]  ;;  %v2836_v44 = vrot.slane %v2799_v27, 6  ;;  %v8041_v56 = vld [vmem:[#allocation2 + $0x20] sm:$0xf]  ;;  %v7999_v16 = vrot.slane %v2930_v46, 10  ;;  %v2478_v9 = vadd.f32 %v11129_v53, %v2477_v22  ;;  %v3023_v49 = vpack.c.b16 %v3017_v61, %v3016_v12 }
 0x378   : > { %v2526_v30 = vpack.c.bf16 %v2518_v1, %v2518_v1  ;;  %v2901_v47 = vsel %vm10098_vm6, %v7991_v45, %v2900_v36  ;;  %v2964_v58 = vrot.slane %v2931_v25, 6  ;;  %v11173_v19 = vld [vmem:[#allocation2 + $0x20] sm:$0xe]  ;;  %v11175_v20 = vld [vmem:[#allocation2 + $0x24] sm:$0x1]  ;;  %v3036_v1 = vunpack.c.l.b16 %v2701_v55 }
 0x379   : > { %v2837_v22 = vsel %vm10145_vm10, %v7985_v18, %v2836_v44  ;;  %v2667_v40 = vld [vmem:[#allocation2 + $0x24] sm:$0x3]  ;;  %v3142_v61 = vunpack.c.l.b16 %v2901_v47  ;;  %v7963_v55 = vrot.slane %v11173_v19, 9  ;;  %v2644_v47 = vrot.slane %v11175_v20, 5 }
 0x37a   : > { %v2546_v14 = vrot.slane %v2526_v30, 7  ;;  %v3043_v39 = vpack.c.b16 %v3037_v3, %v3036_v1  ;;  %v3096_v18 = vunpack.c.l.b16 %v2837_v22 }
 0x37b   : > { %v2506_v31 = vpop.f32.mrf.mxu1  ;;  %v9611_v27 = vld [vmem:[#allocation2 + $0x24] sm:$0xf0] }
 0x37c   : > { %v2868_v62 = vld [vmem:[#allocation2 + $0x28] sm:$0xe]  ;;  %v2547_v4 = vrot.slane %v2546_v14, 4  ;;  %2578 = vst.msk [vmem:[#allocation2 + $0x30] sm:$0xe] %vm757_vm11, %v2546_v14  ;;  %v2507_v8 = vadd.f32 %v2506_v31, %v2478_v9  ;;  %v8042_v46 = vor.u32 %v9611_v27, %v8041_v56 }
 0x37d   : > { %v2800_v0 = vld [vmem:[#allocation2 + $0x28] sm:$0xc]  ;;  %3028 = vrot.lane.b32.xlu0 %v3023_v49, %s13590_s25  ;;  %v2869_v30 = vld [vmem:[#allocation2 + $0x2c] sm:$0x1]  ;;  %v7992_v45 = vrot.slane %v2868_v62, 9  ;;  %v2965_v49 = vsel %vm10145_vm10, %v7999_v16, %v2964_v58 }
 0x37e   : > { %v2932_v36 = vld [vmem:[#allocation2 + $0x28] sm:$0xc]  ;;  %v2480_v25 = vpop.f32.mrf.mxu0  ;;  %v2801_v12 = vld [vmem:[#allocation2 + $0x2c] sm:$0x3]  ;;  %2579 = vst.msk [vmem:[#allocation2 + $0x34] sm:$0x1] %vm505_vm3, %v2547_v4  ;;  %3134 = vrot.lane.b32.xlu1 %v8042_v46, %s13591_s26 }
 0x37f   : > { %v2519_v14 = vmax.f32 %v2507_v8, 0.0  ;;  %v2904_v56 = vrot.slane %v2869_v30, 5  ;;  %v7986_v9 = vrot.slane %v2800_v0, 10  ;;  %v2840_v44 = vrot.slane %v2801_v12, 6  ;;  %v2933_v31 = vld [vmem:[#allocation2 + $0x2c] sm:$0x3] }
 0x380   : > { %v8000_v27 = vrot.slane %v2932_v36, 10  ;;  %v2604_v62 = vld [vmem:[#allocation2 + $0x28] sm:$0xe]  ;;  %v2968_v4 = vrot.slane %v2933_v31, 6  ;;  %v2605_v8 = vld [vmem:[#allocation2 + $0x2c] sm:$0x1]  ;;  %v2481_v0 = vadd.f32 %v11129_v53, %v2480_v25 }
 0x381   : > { %v2527_v3 = vpack.c.bf16 %v2519_v14, %v2519_v14  ;;  %v2905_v19 = vsel %vm10098_vm6, %v7992_v45, %v2904_v56  ;;  %v2841_v1 = vsel %vm10145_vm10, %v7986_v9, %v2840_v44  ;;  %v2666_v30 = vld [vmem:[#allocation2 + $0x20] sm:$0xc]  ;;  %v2708_v12 = vrot.slane %v2667_v40, 6  ;;  %v2668_v9 = vld [vmem:[#allocation2 + $0x28] sm:$0xc] }
 0x382   : > { %v3143_v46 = vunpack.c.l.b16 %v2905_v19  ;;  %v3097_v22 = vunpack.c.l.b16 %v2841_v1  ;;  %v2969_v58 = vsel %vm10145_vm10, %v8000_v27, %v2968_v4  ;;  %v7964_v20 = vrot.slane %v2604_v62, 9  ;;  %v2669_v40 = vld [vmem:[#allocation2 + $0x2c] sm:$0x3] }
 0x383   : > { %v2548_v16 = vrot.slane %v2527_v3, 7  ;;  %v2648_v36 = vrot.slane %v2605_v8, 5  ;;  %v2509_v14 = vpop.f32.mrf.mxu1  ;;  %v3162_v56 = vunpack.c.l.b16 %v2965_v49  ;;  %v3163_v33 = vunpack.c.l.b16 %v2969_v58  ;;  %v2802_v4 = vld [vmem:[#allocation2 + $0x30] sm:$0xc] }
 0x384   : > { %v3150_v42 = vpack.c.b16 %v3143_v46, %v3142_v61  ;;  %v3103_v45 = vpack.c.b16 %v3097_v22, %v3096_v18  ;;  %v2510_v25 = vadd.f32 %v2509_v14, %v2481_v0  ;;  %v7971_v3 = vrot.slane %v2666_v30, 10  ;;  %v2870_v61 = vld [vmem:[#allocation2 + $0x30] sm:$0xe] }
 0x385   : > { %v2549_v44 = vrot.slane %v2548_v16, 4  ;;  %2580 = vst.msk [vmem:[#allocation2 + $0x38] sm:$0xe] %vm757_vm11, %v2548_v16  ;;  %v2649_v31 = vsel %vm10098_vm6, %v7964_v20, %v2648_v36  ;;  %v11199_v27 = vpack.c.b16 %v3163_v33, %v3162_v56  ;;  %v2871_v18 = vld [vmem:[#allocation2 + $0x34] sm:$0x1]  ;;  %v2645_v19 = vsel %vm10098_vm6, %v7963_v55, %v2644_v47 }
 0x386   : > { %3154 = vrot.lane.b32.xlu2 %v3150_v42, %s13592_s30  ;;  %3108 = vrot.lane.b32.xlu0 %v3103_v45, %s13590_s25  ;;  %v2803_v49 = vld [vmem:[#allocation2 + $0x34] sm:$0x3]  ;;  %v2520_v62 = vmax.f32 %v2510_v25, 0.0  ;;  %v2908_v1 = vrot.slane %v2871_v18, 5  ;;  %v11207_v42 = vsel %vm10145_vm10, %v7971_v3, %v2708_v12  ;;  %v2482_v8 = vpop.f32.mrf.mxu0  ;;  %v3019_v33 = vunpack.c.l.b16 %v2649_v31  ;;  %v2934_v46 = vld [vmem:[#allocation2 + $0x30] sm:$0xc] }
 0x387   : > { %2581 = vst.msk [vmem:[#allocation2 + $0x3c] sm:$0x1] %vm505_vm3, %v2549_v44  ;;  %3048 = vrot.lane.b32.xlu1 %v3043_v39, %s13591_s26  ;;  %8199 = vmatmul.msk.bf16.vlgmr.msrb.gmra.mxu0 %vm1369_vm12, %v11199_v27  ;;  %v2844_v0 = vrot.slane %v2803_v49, 6  ;;  %v2935_v22 = vld [vmem:[#allocation2 + $0x34] sm:$0x3]  ;;  %v7993_v58 = vrot.slane %v2870_v61, 9  ;;  %v3018_v47 = vunpack.c.l.b16 %v2645_v19  ;;  %v3038_v12 = vunpack.c.l.b16 %v11207_v42 }
 0x388   : > { %v2528_v30 = vpack.c.bf16 %v2520_v62, %v2520_v62  ;;  %v8029_v16 = vld [vmem:[#allocation2 + $0x20] sm:$0xf]  ;;  %v9608_v39 = vld [vmem:[#allocation2 + $0x24] sm:$0xf0]  ;;  %v7972_v20 = vrot.slane %v2668_v9, 10  ;;  %v2712_v55 = vrot.slane %v2669_v40, 6  ;;  %v2483_v25 = vadd.f32 %v11129_v53, %v2482_v8 }
 0x389   : > { %v8045_v36 = vld [vmem:[#allocation2 + $0x30] sm:$0xf]  ;;  %v7987_v14 = vrot.slane %v2802_v4, 10  ;;  %v2972_v45 = vrot.slane %v2935_v22, 6  ;;  %v2607_v56 = vld [vmem:[#allocation2 + $0x34] sm:$0x1]  ;;  %v2909_v31 = vsel %vm10098_vm6, %v7993_v58, %v2908_v1  ;;  %v8030_v49 = vor.u32 %v9608_v39, %v8029_v16 }
 0x38a   : > { %v2550_v44 = vrot.slane %v2528_v30, 7  ;;  %v8001_v3 = vrot.slane %v2934_v46, 10  ;;  %v2606_v18 = vld [vmem:[#allocation2 + $0x30] sm:$0xe]  ;;  %v9550_v40 = vld [vmem:[%s13546_s11 + $0x74] sm:$0xf0]  ;;  %v3024_v62 = vpack.c.b16 %v3019_v33, %v3018_v47  ;;  %v2713_v32 = vsel %vm10145_vm10, %v7972_v20, %v2712_v55 }
 0x38b   : > { %v8113_v9 = vld [vmem:[%s13546_s11 + $0x70] sm:$0xf]  ;;  %v2511_v61 = vpop.f32.mrf.mxu1  ;;  %v2845_v53 = vsel %vm10145_vm10, %v7987_v14, %v2844_v0  ;;  %v3144_v39 = vunpack.c.l.b16 %v2909_v31  ;;  %v2652_v14 = vrot.slane %v2607_v56, 5  ;;  %v7965_v31 = vrot.slane %v2606_v18, 9 }
 0x38c   : > { %v9612_v19 = vld [vmem:[#allocation2 + $0x34] sm:$0xf0]  ;;  %v8114_v1 = vor.u32 %v9550_v40, %v8113_v9  ;;  %v2551_v8 = vrot.slane %v2550_v44, 4  ;;  %2582 = vst.msk [vmem:[#allocation2 + $0x40] sm:$0xe] %vm757_vm11, %v2550_v44  ;;  %v2512_v46 = vadd.f32 %v2511_v61, %v2483_v25  ;;  %v2973_v0 = vsel %vm10145_vm10, %v8001_v3, %v2972_v45 }
 0x38d   : > { %v2872_v4 = vld [vmem:[#allocation2 + $0x38] sm:$0xe]  ;;  %v8046_v30 = vor.u32 %v9612_v19, %v8045_v36  ;;  %v3098_v55 = vunpack.c.l.b16 %v2845_v53  ;;  %v3039_v61 = vunpack.c.l.b16 %v2713_v32  ;;  %v2653_v53 = vsel %vm10098_vm6, %v7965_v31, %v2652_v14  ;;  %v9549_v32 = vld [vmem:[%s13546_s11 + $0x74] sm:$0xf] }
 0x38e   : > { %v2804_v22 = vld [vmem:[#allocation2 + $0x38] sm:$0xc]  ;;  %3076 = vrot.lane.b32.xlu2 %v8030_v49, %s13592_s30  ;;  %3030 = vrot.lane.b32.xlu0 %v3024_v62, %s13590_s25  ;;  %v2873_v33 = vld [vmem:[#allocation2 + $0x3c] sm:$0x1]  ;;  %v7994_v16 = vrot.slane %v2872_v4, 9  ;;  %v2521_v44 = vmax.f32 %v2512_v46, 0.0 }
 0x38f   : > { %v2936_v58 = vld [vmem:[#allocation2 + $0x38] sm:$0xc]  ;;  %v2805_v47 = vld [vmem:[#allocation2 + $0x3c] sm:$0x3]  ;;  %2583 = vst.msk [vmem:[#allocation2 + $0x44] sm:$0x1] %vm505_vm3, %v2551_v8  ;;  %3136 = vrot.lane.b32.xlu1 %v8046_v30, %s13591_s26  ;;  %3435 = vmatpush.bf16.msrb.mxu2 %v8114_v1 }
 0x390   : > { %v2912_v36 = vrot.slane %v2873_v33, 5  ;;  %v7988_v25 = vrot.slane %v2804_v22, 10  ;;  %v2848_v20 = vrot.slane %v2805_v47, 6  ;;  %v2937_v9 = vld [vmem:[#allocation2 + $0x3c] sm:$0x3]  ;;  %v8002_v40 = vrot.slane %v2936_v58, 10 }
 0x391   : > { %v2608_v49 = vld [vmem:[#allocation2 + $0x38] sm:$0xe]  ;;  %v2529_v62 = vpack.c.bf16 %v2521_v44, %v2521_v44  ;;  %v2976_v3 = vrot.slane %v2937_v9, 6  ;;  %v2609_v19 = vld [vmem:[#allocation2 + $0x3c] sm:$0x1]  ;;  %v3164_v22 = vunpack.c.l.b16 %v2973_v0 }
 0x392   : > { %v2913_v45 = vsel %vm10098_vm6, %v7994_v16, %v2912_v36  ;;  %v2849_v56 = vsel %vm10145_vm10, %v7988_v25, %v2848_v20  ;;  %v11238_v1 = vld [vmem:[#allocation2 + $0x30] sm:$0xc]  ;;  %v7966_v30 = vrot.slane %v2608_v49, 9  ;;  %v2656_v58 = vrot.slane %v2609_v19, 5  ;;  %v8115_v33 = vld [vmem:[%s13546_s11 + $0x78] sm:$0xf0] }
 0x393   : > { %v3145_v4 = vunpack.c.l.b16 %v2913_v45  ;;  %v3099_v8 = vunpack.c.l.b16 %v2849_v56  ;;  %v2552_v18 = vrot.slane %v2529_v62, 7  ;;  %v2977_v46 = vsel %vm10145_vm10, %v8002_v40, %v2976_v3  ;;  %v2938_v14 = vld [vmem:[#allocation2 + $0x40] sm:$0xc]  ;;  %v11248_v44 = vld [vmem:[#allocation2 + $0x34] sm:$0x3] }
 0x394   : > { %v3165_v0 = vunpack.c.l.b16 %v2977_v46  ;;  %v2672_v36 = vld [vmem:[#allocation2 + $0x38] sm:$0xc]  ;;  %v2673_v25 = vld [vmem:[#allocation2 + $0x3c] sm:$0x3]  ;;  %v8118_v20 = vor.u32 %v9549_v32, %v8115_v33  ;;  %v3044_v40 = vpack.c.b16 %v3039_v61, %v3038_v12  ;;  %v2657_v49 = vsel %vm10098_vm6, %v7966_v30, %v2656_v58  ;;  %v2874_v31 = vld [vmem:[#allocation2 + $0x40] sm:$0xe] }
 0x395   : > { %v3151_v16 = vpack.c.b16 %v3145_v4, %v3144_v39  ;;  %v3104_v47 = vpack.c.b16 %v3099_v8, %v3098_v55  ;;  %v2553_v9 = vrot.slane %v2552_v18, 4  ;;  %2584 = vst.msk [vmem:[#allocation2 + $0x48] sm:$0xe] %vm757_vm11, %v2552_v18  ;;  %v2806_v45 = vld [vmem:[#allocation2 + $0x40] sm:$0xc]  ;;  %v3020_v56 = vunpack.c.l.b16 %v2653_v53 }
 0x396   : > { %v11257_v39 = vpack.c.b16 %v3165_v0, %v3164_v22  ;;  %v2939_v55 = vld [vmem:[#allocation2 + $0x44] sm:$0x3]  ;;  %v3021_v42 = vunpack.c.l.b16 %v2657_v49  ;;  %v7973_v3 = vrot.slane %v11238_v1, 10  ;;  %3522 = vmatpush.bf16.msra.mxu1 %v8118_v20  ;;  %v9609_v19 = vld [vmem:[#allocation2 + $0x34] sm:$0xf0]  ;;  %v8003_v4 = vrot.slane %v2938_v14, 10 }
 0x397   : > { %3156 = vrot.lane.b32.xlu2 %v3151_v16, %s13592_s30  ;;  %3110 = vrot.lane.b32.xlu0 %v3104_v47, %s13590_s25  ;;  %v2875_v62 = vld [vmem:[#allocation2 + $0x44] sm:$0x1]  ;;  %2585 = vst.msk [vmem:[#allocation2 + $0x4c] sm:$0x1] %vm505_vm3, %v2553_v9  ;;  %v2980_v12 = vrot.slane %v2939_v55, 6  ;;  %v7995_v8 = vrot.slane %v2874_v31, 9 }
 0x398   : > { %3050 = vrot.lane.b32.xlu1 %v3044_v40, %s13591_s26  ;;  %v2807_v61 = vld [vmem:[#allocation2 + $0x44] sm:$0x3]  ;;  %8200 = vmatmul.msk.bf16.gmra.mxu0 %vm1369_vm12, %v11257_v39  ;;  %v2916_v22 = vrot.slane %v2875_v62, 5  ;;  %v8033_v18 = vld [vmem:[#allocation2 + $0x30] sm:$0xf]  ;;  %v7989_v46 = vrot.slane %v2806_v45, 10  ;;  %v3025_v14 = vpack.c.b16 %v3021_v42, %v3020_v56 }
 0x399   : > { %v2852_v32 = vrot.slane %v2807_v61, 6  ;;  %v2716_v30 = vrot.slane %v11248_v44, 6  ;;  %v7974_v58 = vrot.slane %v2672_v36, 10  ;;  %v2720_v53 = vrot.slane %v2673_v25, 6  ;;  %v8049_v33 = vld [vmem:[#allocation2 + $0x40] sm:$0xf] }
 0x39a   : > { %v8105_v1 = vld [vmem:[%s13546_s11 + $0x60] sm:$0xf]  ;;  %v9548_v16 = vld [vmem:[%s13546_s11 + $0x64] sm:$0xf0]  ;;  %v9547_v47 = vld [vmem:[%s13546_s11 + $0x64] sm:$0xf]  ;;  %v8034_v0 = vor.u32 %v9609_v19, %v8033_v18  ;;  %v2981_v44 = vsel %vm10145_vm10, %v8003_v4, %v2980_v12  ;;  %v2917_v31 = vsel %vm10098_vm6, %v7995_v8, %v2916_v22 }
 0x39b   : > { %v8107_v36 = vld [vmem:[%s13546_s11 + $0x68] sm:$0xf0]  ;;  %v8097_v25 = vld [vmem:[%s13546_s11 + $0x50] sm:$0xf]  ;;  %v9546_v20 = vld [vmem:[%s13546_s11 + $0x54] sm:$0xf0]  ;;  %v2853_v55 = vsel %vm10145_vm10, %v7989_v46, %v2852_v32  ;;  %v8106_v62 = vor.u32 %v9548_v16, %v8105_v1  ;;  %v2721_v19 = vsel %vm10145_vm10, %v7974_v58, %v2720_v53  ;;  %v3166_v18 = vunpack.c.l.b16 %v2981_v44 }
 0x39c   : > { %v9613_v9 = vld [vmem:[#allocation2 + $0x44] sm:$0xf0]  ;;  %v8110_v45 = vor.u32 %v9547_v47, %v8107_v36  ;;  %v8098_v22 = vor.u32 %v9546_v20, %v8097_v25  ;;  %v8177_v58 = vld [vmem:[%s13546_s11 + $0xf0] sm:$0xf]  ;;  %v3146_v53 = vunpack.c.l.b16 %v2917_v31  ;;  %v3100_v16 = vunpack.c.l.b16 %v2853_v55  ;;  %v8099_v44 = vld [vmem:[%s13546_s11 + $0x58] sm:$0xf0] }
 0x39d   : > { %v2940_v40 = vld [vmem:[#allocation2 + $0x48] sm:$0xc]  ;;  %v8050_v56 = vor.u32 %v9613_v9, %v8049_v33  ;;  %3436 = vmatpush.bf16.msrb.mxu2 %v8106_v62  ;;  %v2717_v47 = vsel %vm10145_vm10, %v7973_v3, %v2716_v30  ;;  %v8089_v20 = vld [vmem:[%s13546_s11 + $0x40] sm:$0xf] }
 0x39e   : > { %v2876_v49 = vld [vmem:[#allocation2 + $0x48] sm:$0xe]  ;;  %v8004_v42 = vrot.slane %v2940_v40, 10  ;;  %v2941_v4 = vld [vmem:[#allocation2 + $0x4c] sm:$0x3]  ;;  %3523 = vmatpush.bf16.msra.mxu1 %v8110_v45 }
 0x39f   : > { %v7996_v12 = vrot.slane %v2876_v49, 9  ;;  %v2808_v61 = vld [vmem:[#allocation2 + $0x48] sm:$0xc]  ;;  %3078 = vrot.lane.b32.xlu2 %v8034_v0, %s13592_s30  ;;  %3032 = vrot.lane.b32.xlu0 %v3025_v14, %s13590_s25  ;;  %v2877_v11 = vld [vmem:[#allocation2 + $0x4c] sm:$0x1]  ;;  %v2984_v32 = vrot.slane %v2941_v4, 6  ;;  %v3041_v0 = vunpack.c.l.b16 %v2721_v19 }
 0x3a0   : > { %v2809_v8 = vld [vmem:[#allocation2 + $0x4c] sm:$0x3]  ;;  %3138 = vrot.lane.b32.xlu1 %v8050_v56, %s13591_s26  ;;  %v2920_v46 = vrot.slane %v2877_v11, 5  ;;  %v7990_v33 = vrot.slane %v2808_v61, 10  ;;  %v9566_v14 = vld [vmem:[%s13546_s11 + $0xf4] sm:$0xf0]  ;;  %v3040_v56 = vunpack.c.l.b16 %v2717_v47 }
 0x3a1   : > { %v2856_v1 = vrot.slane %v2809_v8, 6  ;;  %v9545_v11 = vld [vmem:[%s13546_s11 + $0x54] sm:$0xf]  ;;  %v2985_v36 = vsel %vm10145_vm10, %v8004_v42, %v2984_v32  ;;  %v8178_v25 = vor.u32 %v9566_v14, %v8177_v58  ;;  %v9544_v9 = vld [vmem:[%s13546_s11 + $0x44] sm:$0xf0]  ;;  %3437 = vmatpush.bf16.msrb.mxu2 %v8098_v22 }
 0x3a2   : > { %v2921_v3 = vsel %vm10098_vm6, %v7996_v12, %v2920_v46  ;;  %v9543_v40 = vld [vmem:[%s13546_s11 + $0x44] sm:$0xf]  ;;  %v3167_v49 = vunpack.c.l.b16 %v2985_v36  ;;  %v8102_v62 = vor.u32 %v9545_v11, %v8099_v44  ;;  %v8091_v45 = vld [vmem:[%s13546_s11 + $0x48] sm:$0xf0]  ;;  %v8090_v42 = vor.u32 %v9544_v9, %v8089_v20  ;;  %v8169_v12 = vld [vmem:[%s13546_s11 + $0xe0] sm:$0xf] }
 0x3a3   : > { %v2857_v30 = vsel %vm10145_vm10, %v7990_v33, %v2856_v1  ;;  %v3147_v31 = vunpack.c.l.b16 %v2921_v3  ;;  %3464 = vmatpush.bf16.msra.mxu3 %v8178_v25  ;;  %v9564_v61 = vld [vmem:[%s13546_s11 + $0xe4] sm:$0xf0]  ;;  %v8094_v32 = vor.u32 %v9543_v40, %v8091_v45  ;;  %v8081_v22 = vld [vmem:[%s13546_s11 + $0x30] sm:$0xf]  ;;  %v9542_v46 = vld [vmem:[%s13546_s11 + $0x34] sm:$0xf0]  ;;  %v3045_v33 = vpack.c.b16 %v3041_v0, %v3040_v56 }
 0x3a4   : > { %v3101_v55 = vunpack.c.l.b16 %v2857_v30  ;;  %v11332_v19 = vpack.c.b16 %v3167_v49, %v3166_v18  ;;  %3524 = vmatpush.bf16.msra.mxu1 %v8102_v62  ;;  %v8170_v1 = vor.u32 %v9564_v61, %v8169_v12  ;;  %v9541_v58 = vld [vmem:[%s13546_s11 + $0x34] sm:$0xf]  ;;  %v8083_v18 = vld [vmem:[%s13546_s11 + $0x38] sm:$0xf0]  ;;  %v8161_v47 = vld [vmem:[%s13546_s11 + $0xd0] sm:$0xf]  ;;  %v8082_v0 = vor.u32 %v9542_v46, %v8081_v22 }
 0x3a5   : > { %v3152_v4 = vpack.c.b16 %v3147_v31, %v3146_v53  ;;  %v8053_v53 = vld [vmem:[#allocation2 + $0x50] sm:$0xf]  ;;  %3438 = vmatpush.bf16.msrb.mxu2 %v8090_v42  ;;  %v8073_v14 = vld [vmem:[%s13546_s11 + $0x20] sm:$0xf]  ;;  %v9540_v11 = vld [vmem:[%s13546_s11 + $0x24] sm:$0xf0]  ;;  %v8086_v3 = vor.u32 %v9541_v58, %v8083_v18 }
 0x3a6   : > { %v3105_v8 = vpack.c.b16 %v3101_v55, %v3100_v16  ;;  %v9614_v16 = vld [vmem:[#allocation2 + $0x54] sm:$0xf0]  ;;  %v9610_v36 = vld [vmem:[#allocation2 + $0x44] sm:$0xf0]  ;;  %v8037_v30 = vld [vmem:[#allocation2 + $0x40] sm:$0xf]  ;;  %v8074_v31 = vor.u32 %v9540_v11, %v8073_v14 }
 0x3a7   : > { %3158 = vrot.lane.b32.xlu2 %v3152_v4, %s13592_s30  ;;  %v9562_v44 = vld [vmem:[%s13546_s11 + $0xd4] sm:$0xf0]  ;;  %3465 = vmatpush.bf16.msra.mxu3 %v8170_v1  ;;  %v9539_v25 = vld [vmem:[%s13546_s11 + $0x24] sm:$0xf]  ;;  %v8075_v20 = vld [vmem:[%s13546_s11 + $0x28] sm:$0xf0]  ;;  %v8054_v49 = vor.u32 %v9614_v16, %v8053_v53 }
 0x3a8   : > { %3112 = vrot.lane.b32.xlu0 %v3105_v8, %s13590_s25  ;;  %3052 = vrot.lane.b32.xlu1 %v3045_v33, %s13591_s26  ;;  %v8162_v9 = vor.u32 %v9562_v44, %v8161_v47  ;;  %v2878_v40 = vld [vmem:[#allocation2 + $0x50] sm:$0xe]  ;;  %v2879_v55 = vld [vmem:[#allocation2 + $0x54] sm:$0x1]  ;;  %v2880_v62 = vld [vmem:[#allocation2 + $0x58] sm:$0xe]  ;;  %v8038_v8 = vor.u32 %v9610_v36, %v8037_v30 }
 0x3a9   : > { %8201 = vmatmul.msk.bf16.gmra.mxu0 %vm1369_vm12, %v11332_v19  ;;  %3525 = vmatpush.bf16.msra.mxu1 %v8094_v32  ;;  %v2881_v45 = vld [vmem:[#allocation2 + $0x5c] sm:$0x1]  ;;  %v7997_v56 = vrot.slane %v2878_v40, 9  ;;  %v2924_v42 = vrot.slane %v2879_v55, 5  ;;  %v7998_v12 = vrot.slane %v2880_v62, 9  ;;  %v8078_v32 = vor.u32 %v9539_v25, %v8075_v20 }
 0x3aa   : > { %3439 = vmatpush.bf16.msrb.mxu2 %v8082_v0  ;;  %v2928_v61 = vrot.slane %v2881_v45, 5  ;;  %v8153_v4 = vld [vmem:[%s13546_s11 + $0xc0] sm:$0xf]  ;;  %v8065_v22 = vld [vmem:[%s13546_s11 + $0x10] sm:$0xf] }
 0x3ab   : > { %v9538_v46 = vld [vmem:[%s13546_s11 + $0x14] sm:$0xf0]  ;;  %v9560_v33 = vld [vmem:[%s13546_s11 + $0xc4] sm:$0xf0]  ;;  %3466 = vmatpush.bf16.msra.mxu3 %v8162_v9  ;;  %v9537_v1 = vld [vmem:[%s13546_s11 + $0x14] sm:$0xf]  ;;  %v2925_v18 = vsel %vm10098_vm6, %v7997_v56, %v2924_v42 }
 0x3ac   : > { %v8067_v58 = vld [vmem:[%s13546_s11 + $0x18] sm:$0xf0]  ;;  %v2929_v53 = vsel %vm10098_vm6, %v7998_v12, %v2928_v61  ;;  %v8154_v16 = vor.u32 %v9560_v33, %v8153_v4  ;;  %v3148_v47 = vunpack.c.l.b16 %v2925_v18  ;;  %v8145_v14 = vld [vmem:[%s13546_s11 + $0xb0] sm:$0xf]  ;;  %v9558_v11 = vld [vmem:[%s13546_s11 + $0xb4] sm:$0xf0]  ;;  %v8066_v44 = vor.u32 %v9538_v46, %v8065_v22  ;;  %v3047_v46 = vpop.permute.xlu1 %3046 }
 0x3ad   : > { %3526 = vmatpush.bf16.msra.mxu1 %v8086_v3  ;;  %v3149_v0 = vunpack.c.l.b16 %v2929_v53  ;;  %v8070_v36 = vor.u32 %v9537_v1, %v8067_v58  ;;  %v8057_v3 = vld [vmem:[%s13546_s11] sm:$0xf]  ;;  %v9536_v30 = vld [vmem:[%s13546_s11 + $0x4] sm:$0xf0]  ;;  %v9535_v25 = vld [vmem:[%s13546_s11 + $0x4] sm:$0xf]  ;;  %v8146_v9 = vor.u32 %v9558_v11, %v8145_v14 }
 0x3ae   : > { %3440 = vmatpush.bf16.msrb.mxu2 %v8074_v31  ;;  %v8059_v20 = vld [vmem:[%s13546_s11 + $0x8] sm:$0xf0]  ;;  %v9556_v31 = vld [vmem:[%s13546_s11 + $0xa4] sm:$0xf0]  ;;  %v8058_v55 = vor.u32 %v9536_v30, %v8057_v3  ;;  %v8009_v56 = vld [vmem:[#allocation2] sm:$0xf] }
 0x3af   : > { %3080 = vrot.lane.b32.xlu2 %v8038_v8, %s13592_s30  ;;  %3467 = vmatpush.bf16.msra.mxu3 %v8154_v16  ;;  %v3153_v40 = vpack.c.b16 %v3149_v0, %v3148_v47  ;;  %v8062_v62 = vor.u32 %v9535_v25, %v8059_v20  ;;  %v9603_v42 = vld [vmem:[#allocation2 + $0x4] sm:$0xf0]  ;;  %v8129_v61 = vld [vmem:[%s13546_s11 + $0x90] sm:$0xf]  ;;  %v9554_v4 = vld [vmem:[%s13546_s11 + $0x94] sm:$0xf0]  ;;  %v3027_v8 = vpop.permute.xlu0 %3026 }
 0x3b0   : > { %3140 = vrot.lane.b32.xlu1 %v8054_v49, %s13591_s26  ;;  %v8137_v49 = vld [vmem:[%s13546_s11 + $0xa0] sm:$0xf]  ;;  %v8010_v12 = vor.u32 %v9603_v42, %v8009_v56  ;;  %v9552_v18 = vld [vmem:[%s13546_s11 + $0x84] sm:$0xf0]  ;;  %v9565_v47 = vld [vmem:[%s13546_s11 + $0xf4] sm:$0xf] }
 0x3b1   : > { %3527 = vmatpush.bf16.msra.mxu1 %v8078_v32  ;;  %v8138_v45 = vor.u32 %v9556_v31, %v8137_v49  ;;  %v8130_v32 = vor.u32 %v9554_v4, %v8129_v61  ;;  %v8121_v58 = vld [vmem:[%s13546_s11 + $0x80] sm:$0xf]  ;;  %v8179_v0 = vld [vmem:[%s13546_s11 + $0xf8] sm:$0xf0]  ;;  %v9569_v11 = vld [vmem:[%s13546_s11 + $0x114] sm:$0xf] }
 0x3b2   : > { %3441 = vmatpush.bf16.msrb.mxu2 %v8066_v44  ;;  %v3176_v22 = vsel %vm1369_vm12, %v8010_v12, %v3027_v8  ;;  %v8122_v16 = vor.u32 %v9552_v18, %v8121_v58  ;;  %v8182_v14 = vor.u32 %v9565_v47, %v8179_v0  ;;  %v8195_v44 = vld [vmem:[%s13546_s11 + $0x118] sm:$0xf0]  ;;  %v9563_v3 = vld [vmem:[%s13546_s11 + $0xe4] sm:$0xf]  ;;  %v8171_v30 = vld [vmem:[%s13546_s11 + $0xe8] sm:$0xf0] }
 0x3b3   : > { %3468 = vmatpush.bf16.msra.mxu3 %v8146_v9  ;;  %v3187_v33 = vsel %vm658_vm0, %v3176_v22, %v3047_v46  ;;  %v8174_v25 = vor.u32 %v9563_v3, %v8171_v30  ;;  %v2733_v20 = vld [vmem:[#allocation2 + $0x1c] sm:$0x1]  ;;  %v9561_v9 = vld [vmem:[%s13546_s11 + $0xd4] sm:$0xf]  ;;  %v2732_v49 = vld [vmem:[#allocation2 + $0x18] sm:$0xe] }
 0x3b4   : > { %v2731_v31 = vld [vmem:[#allocation2 + $0x14] sm:$0x1]  ;;  %v7976_v42 = vrot.slane %v2732_v49, 9  ;;  %v9559_v22 = vld [vmem:[%s13546_s11 + $0xc4] sm:$0xf] }
 0x3b5   : > { %3528 = vmatpush.bf16.msra.mxu1 %v8070_v36  ;;  %v8198_v36 = vor.u32 %v9569_v11, %v8195_v44  ;;  %v2764_v12 = vrot.slane %v2731_v31, 5  ;;  %v8155_v46 = vld [vmem:[%s13546_s11 + $0xc8] sm:$0xf0]  ;;  %v9557_v44 = vld [vmem:[%s13546_s11 + $0xb4] sm:$0xf] }
 0x3b6   : > { %3442 = vmatpush.bf16.msrb.mxu2 %v8058_v55  ;;  %v2735_v30 = vld [vmem:[#allocation2 + $0x24] sm:$0x1]  ;;  %v2734_v49 = vld [vmem:[#allocation2 + $0x20] sm:$0xe] }
 0x3b7   : > { %3160 = vrot.lane.b32.xlu2 %v3153_v40, %s13592_s30  ;;  %3469 = vmatpush.bf16.msra.mxu3 %v8138_v45  ;;  %v8163_v40 = vld [vmem:[%s13546_s11 + $0xd8] sm:$0xf0]  ;;  %v2730_v45 = vld [vmem:[#allocation2 + $0x10] sm:$0xe]  ;;  %v9567_v31 = vld [vmem:[%s13546_s11 + $0x104] sm:$0xf] }
 0x3b8   : > { %v8166_v55 = vor.u32 %v9561_v9, %v8163_v40  ;;  %v7975_v61 = vrot.slane %v2730_v45, 9  ;;  %v9604_v9 = vld [vmem:[#allocation2 + $0x14] sm:$0xf0]  ;;  %v2772_v45 = vrot.slane %v2735_v30, 5 }
 0x3b9   : > { %3529 = vmatpush.bf16.msra.mxu1 %v8062_v62  ;;  %v2768_v62 = vrot.slane %v2733_v20, 5 }
 0x3ba   : > { %3551 = vmatpush.bf16.msra.mxu2 %v8182_v14  ;;  %v2737_v14 = vld [vmem:[#allocation2 + $0x2c] sm:$0x1] }
 0x3bb   : > { %3470 = vmatpush.bf16.msra.mxu3 %v8130_v32  ;;  %v2769_v4 = vsel %vm10098_vm6, %v7976_v42, %v2768_v62  ;;  %v2765_v32 = vsel %vm10098_vm6, %v7975_v61, %v2764_v12  ;;  %v2776_v40 = vrot.slane %v2737_v14, 5  ;;  %v8013_v62 = vld [vmem:[#allocation2 + $0x10] sm:$0xf]  ;;  %v7977_v61 = vrot.slane %v2734_v49, 9  ;;  %v2739_v49 = vld [vmem:[#allocation2 + $0x34] sm:$0x1] }
 0x3bc   : > { %v3082_v58 = vunpack.c.l.b16 %v2765_v32  ;;  %v8014_v12 = vor.u32 %v9604_v9, %v8013_v62  ;;  %v9553_v9 = vld [vmem:[%s13546_s11 + $0x94] sm:$0xf] }
 0x3be   : > { %3552 = vmatpush.bf16.msra.mxu2 %v8174_v25  ;;  %v2736_v25 = vld [vmem:[#allocation2 + $0x28] sm:$0xe] }
 0x3bf   : > { %3471 = vmatpush.bf16.msra.mxu3 %v8122_v16 }
 0x3c2   : > { %3553 = vmatpush.bf16.msra.mxu2 %v8166_v55  ;;  %v8187_v55 = vld [vmem:[%s13546_s11 + $0x108] sm:$0xf0] }
 0x3c3   : > { %3586 = vmatpush.bf16.msrb.mxu3 %v8198_v36  ;;  %v8147_v36 = vld [vmem:[%s13546_s11 + $0xb8] sm:$0xf0]  ;;  %v8190_v42 = vor.u32 %v9567_v31, %v8187_v55  ;;  %v2740_v31 = vld [vmem:[#allocation2 + $0x38] sm:$0xe] }
 0x3c4   : > { %v8150_v20 = vor.u32 %v9557_v44, %v8147_v36 }
 0x3c7   : > { %3587 = vmatpush.bf16.msrb.mxu3 %v8190_v42  ;;  %v2738_v42 = vld [vmem:[#allocation2 + $0x30] sm:$0xe] }
 0x3c8   : > { %v3075_v1 = vpop.permute.xlu2 %3074 }
 0x3c9   : > { %v3195_v53 = vsel %vm1390_vm13, %v3187_v33, %v3075_v1  ;;  %v3083_v33 = vunpack.c.l.b16 %v2769_v4  ;;  %v8158_v1 = vor.u32 %v9559_v22, %v8155_v46 }
 0x3ca   : > { %3443 = vmatmul.bf16.vlgmr.msrb.gmra.mxu2 %v3195_v53  ;;  %3530 = vmatmul.bf16.vlgmr.msra.gmra.mxu1 %v3195_v53 }
 0x3cb   : > { %3554 = vmatpush.bf16.msra.mxu2 %v8158_v1  ;;  %v3090_v18 = vpack.c.b16 %v3083_v33, %v3082_v58  ;;  %v2773_v33 = vsel %vm10098_vm6, %v7977_v61, %v2772_v45  ;;  %v9555_v58 = vld [vmem:[%s13546_s11 + $0xa4] sm:$0xf]  ;;  %v9605_v45 = vld [vmem:[#allocation2 + $0x24] sm:$0xf0]  ;;  %v8123_v61 = vld [vmem:[%s13546_s11 + $0x88] sm:$0xf0] }
 0x3cf   : > { %3555 = vmatpush.bf16.msra.mxu2 %v8150_v20 }
 0x3e0   : > { %v3155_v56 = vpop.permute.xlu2 %3154 }
 0x3e7   : > { %v3107_v8 = vpop.permute.xlu0 %3106 }
 0x3e8   : > { %v3077_v53 = vpop.permute.xlu2 %3076  ;;  %v3208_v47 = vsel %vm1369_vm12, %v3090_v18, %v3107_v8  ;;  %v8139_v18 = vld [vmem:[%s13546_s11 + $0xa8] sm:$0xf0] }
 0x3e9   : > { %v8142_v14 = vor.u32 %v9555_v58, %v8139_v18 }
 0x3eb   : > { %3556 = vmatpush.bf16.msra.mxu2 %v8142_v14 }
 0x3ef   : > { %v3029_v16 = vpop.permute.xlu0 %3028 }
 0x3f0   : > { %v3135_v0 = vpop.permute.xlu1 %3134  ;;  %v3179_v32 = vsel %vm1369_vm12, %v8014_v12, %v3029_v16  ;;  %v3084_v16 = vunpack.c.l.b16 %v2773_v33  ;;  %v9551_v12 = vld [vmem:[%s13546_s11 + $0x84] sm:$0xf]  ;;  %v7979_v33 = vrot.slane %v2738_v42, 9 }
 0x3f1   : > { %v3219_v11 = vsel %vm658_vm0, %v3208_v47, %v3135_v0  ;;  %v3157_v46 = vpop.permute.xlu2 %3156 }
 0x3f2   : > { %v11476_v3 = vsel %vm1390_vm13, %v3219_v11, %v3155_v56  ;;  %v7978_v56 = vrot.slane %v2736_v25, 9  ;;  %v2741_v25 = vld [vmem:[#allocation2 + $0x3c] sm:$0x1] }
 0x3f3   : > { %3472 = vmatmul.bf16.vlgmr.msra.gmra.mxu3 %v11476_v3 }
 0x3f4   : > { %v2777_v4 = vsel %vm10098_vm6, %v7978_v56, %v2776_v40  ;;  %v2784_v56 = vrot.slane %v2741_v25, 5  ;;  %v2943_v25 = vld [vmem:[#allocation2 + $0x54] sm:$0x3] }
 0x3f5   : > { %v3085_v47 = vunpack.c.l.b16 %v2777_v4  ;;  %v8017_v4 = vld [vmem:[#allocation2 + $0x20] sm:$0xf] }
 0x3f7   : > { %v3091_v11 = vpack.c.b16 %v3085_v47, %v3084_v16 }
 0x3f8   : > { %v3109_v8 = vpop.permute.xlu0 %3108 }
 0x3f9   : > { %v3049_v22 = vpop.permute.xlu1 %3048  ;;  %v3211_v36 = vsel %vm1369_vm12, %v3091_v11, %v3109_v8  ;;  %v3079_v62 = vpop.permute.xlu2 %3078  ;;  %v2780_v8 = vrot.slane %v2739_v49, 5  ;;  %v2988_v49 = vrot.slane %v2943_v25, 6 }
 0x3fa   : > { %v3189_v1 = vsel %vm658_vm0, %v3179_v32, %v3049_v22  ;;  %v7980_v32 = vrot.slane %v2740_v31, 9  ;;  %v8126_v22 = vor.u32 %v9551_v12, %v8123_v61 }
 0x3fb   : > { %v3198_v0 = vsel %vm1390_vm13, %v3189_v1, %v3077_v53  ;;  %v8131_v53 = vld [vmem:[%s13546_s11 + $0x98] sm:$0xf0]  ;;  %v2781_v47 = vsel %vm10098_vm6, %v7979_v33, %v2780_v8  ;;  %v2743_v33 = vld [vmem:[#allocation2 + $0x44] sm:$0x1] }
 0x3fc   : > { %3448 = vmatmul.bf16.gmra.mxu2 %v3198_v0  ;;  %3535 = vmatmul.bf16.gmra.mxu1 %v3198_v0  ;;  %v8134_v55 = vor.u32 %v9553_v9, %v8131_v53  ;;  %v2785_v1 = vsel %vm10098_vm6, %v7980_v32, %v2784_v56  ;;  %v2945_v53 = vld [vmem:[#allocation2 + $0x5c] sm:$0x3] }
 0x3fd   : > { %v3087_v16 = vunpack.c.l.b16 %v2785_v1  ;;  %v9606_v1 = vld [vmem:[#allocation2 + $0x34] sm:$0xf0] }
 0x3fe   : > { %3557 = vmatpush.bf16.msra.mxu2 %v8134_v55 }
 0x400   : > { %v3031_v44 = vpop.permute.xlu0 %3030 }
 0x401   : > { %v3137_v30 = vpop.permute.xlu1 %3136  ;;  %v3159_v9 = vpop.permute.xlu2 %3158 }
 0x402   : > { %v3221_v20 = vsel %vm658_vm0, %v3211_v36, %v3137_v30  ;;  %3558 = vmatpush.bf16.msra.mxu2 %v8126_v22  ;;  %v3086_v36 = vunpack.c.l.b16 %v2781_v47  ;;  %v2942_v30 = vld [vmem:[#allocation2 + $0x50] sm:$0xc] }
 0x403   : > { %v11507_v40 = vsel %vm1390_vm13, %v3221_v20, %v3157_v46  ;;  %v8018_v46 = vor.u32 %v9605_v45, %v8017_v4  ;;  %v2944_v20 = vld [vmem:[#allocation2 + $0x58] sm:$0xc]  ;;  %v2992_v45 = vrot.slane %v2945_v53, 6 }
 0x404   : > { %3477 = vmatmul.bf16.gmra.mxu3 %v11507_v40  ;;  %v8006_v31 = vrot.slane %v2944_v20, 10  ;;  %v3092_v55 = vpack.c.b16 %v3087_v16, %v3086_v36 }
 0x405   : > { %v3182_v58 = vsel %vm1369_vm12, %v8018_v46, %v3031_v44  ;;  %v8005_v44 = vrot.slane %v2942_v30, 10  ;;  %v2744_v46 = vld [vmem:[#allocation2 + $0x48] sm:$0xe] }
 0x406   : > { %v2993_v61 = vsel %vm10145_vm10, %v8006_v31, %v2992_v45  ;;  %v7982_v16 = vrot.slane %v2744_v46, 9  ;;  %v9586_v46 = vld [vmem:[%s13548_s13 + $0x74] sm:$0xf0] }
 0x407   : > { %v2989_v56 = vsel %vm10145_vm10, %v8005_v44, %v2988_v49  ;;  %v3169_v32 = vunpack.c.l.b16 %v2993_v61 }
 0x408   : > { %v3168_v4 = vunpack.c.l.b16 %v2989_v56 }
 0x409   : > { %v3111_v0 = vpop.permute.xlu0 %3110  ;;  %v3081_v30 = vpop.permute.xlu2 %3080 }
 0x40a   : > { %v3051_v18 = vpop.permute.xlu1 %3050  ;;  %v3214_v42 = vsel %vm1369_vm12, %v3092_v55, %v3111_v0  ;;  %v11530_v47 = vpack.c.b16 %v3169_v32, %v3168_v4  ;;  %v2742_v0 = vld [vmem:[#allocation2 + $0x40] sm:$0xe]  ;;  %v8265_v32 = vld [vmem:[%s13548_s13 + $0x70] sm:$0xf] }
 0x40b   : > { %v3191_v14 = vsel %vm658_vm0, %v3182_v58, %v3051_v18  ;;  %v7981_v25 = vrot.slane %v2742_v0, 9 }
 0x40c   : > { %v3201_v11 = vsel %vm1390_vm13, %v3191_v14, %v3079_v62  ;;  %v2745_v62 = vld [vmem:[#allocation2 + $0x4c] sm:$0x1]  ;;  %v8021_v14 = vld [vmem:[#allocation2 + $0x30] sm:$0xf]  ;;  %8202 = vmatmul.msk.bf16.gmra.mxu0 %vm1369_vm12, %v11530_v47 }
 0x40d   : > { %3453 = vmatmul.bf16.gmra.mxu2 %v3201_v11  ;;  %3540 = vmatmul.bf16.gmra.mxu1 %v3201_v11  ;;  %v2792_v18 = vrot.slane %v2745_v62, 5  ;;  %v2788_v11 = vrot.slane %v2743_v33, 5  ;;  %v8022_v36 = vor.u32 %v9606_v1, %v8021_v14  ;;  %v8266_v33 = vor.u32 %v9586_v46, %v8265_v32  ;;  %v8249_v14 = vld [vmem:[%s13548_s13 + $0x50] sm:$0xf] }
 0x40f   : > { %v2793_v20 = vsel %vm10098_vm6, %v7982_v16, %v2792_v18  ;;  %v2789_v44 = vsel %vm10098_vm6, %v7981_v25, %v2788_v11  ;;  %v8259_v18 = vld [vmem:[%s13548_s13 + $0x68] sm:$0xf0]  ;;  %3798 = vmatpush.bf16.msra.mxu0 %v8266_v33  ;;  %v9582_v16 = vld [vmem:[%s13548_s13 + $0x54] sm:$0xf0] }
 0x410   : > { %v3089_v31 = vunpack.c.l.b16 %v2793_v20  ;;  %v3088_v45 = vunpack.c.l.b16 %v2789_v44  ;;  %v8250_v25 = vor.u32 %v9582_v16, %v8249_v14  ;;  %v8241_v20 = vld [vmem:[%s13548_s13 + $0x40] sm:$0xf]  ;;  %v9579_v44 = vld [vmem:[%s13548_s13 + $0x44] sm:$0xf]  ;;  %v9574_v33 = vld [vmem:[%s13548_s13 + $0x14] sm:$0xf0] }
 0x411   : > { %v3033_v58 = vpop.permute.xlu0 %3032  ;;  %v9601_v14 = vld [vmem:[%s13548_s13 + $0xf4] sm:$0xf] }
 0x412   : > { %v3139_v12 = vpop.permute.xlu1 %3138 }
 0x413   : > { %v3223_v8 = vsel %vm658_vm0, %v3214_v42, %v3139_v12  ;;  %v3093_v42 = vpack.c.b16 %v3089_v31, %v3088_v45  ;;  %v3161_v12 = vpop.permute.xlu2 %3160  ;;  %v9578_v45 = vld [vmem:[%s13548_s13 + $0x34] sm:$0xf0] }
 0x414   : > { %v3233_v22 = vsel %vm1390_vm13, %v3223_v8, %v3159_v9  ;;  %v3185_v9 = vsel %vm1369_vm12, %v8022_v36, %v3033_v58  ;;  %v9583_v58 = vld [vmem:[%s13548_s13 + $0x64] sm:$0xf]  ;;  %v9581_v36 = vld [vmem:[%s13548_s13 + $0x54] sm:$0xf] }
 0x415   : > { %3482 = vmatmul.bf16.gmra.mxu3 %v3233_v22  ;;  %v8262_v11 = vor.u32 %v9583_v58, %v8259_v18  ;;  %v9571_v18 = vld [vmem:[%s13548_s13 + $0x4] sm:$0xf] }
 0x41a   : > { %v3053_v53 = vpop.permute.xlu1 %3052  ;;  %v3113_v56 = vpop.permute.xlu0 %3112 }
 0x41b   : > { %v3193_v49 = vsel %vm658_vm0, %v3185_v9, %v3053_v53  ;;  %v3217_v62 = vsel %vm1369_vm12, %v3093_v42, %v3113_v56  ;;  %v9580_v9 = vld [vmem:[%s13548_s13 + $0x44] sm:$0xf0]  ;;  %v9577_v56 = vld [vmem:[%s13548_s13 + $0x34] sm:$0xf] }
 0x41c   : > { %v3204_v55 = vsel %vm1390_vm13, %v3193_v49, %v3081_v30  ;;  %v8251_v30 = vld [vmem:[%s13548_s13 + $0x58] sm:$0xf0]  ;;  %v8243_v49 = vld [vmem:[%s13548_s13 + $0x48] sm:$0xf0] }
 0x41d   : > { %3458 = vmatmul.bf16.gmra.mxu2 %v3204_v55  ;;  %3545 = vmatmul.bf16.gmra.mxu1 %v3204_v55  ;;  %v8254_v53 = vor.u32 %v9581_v36, %v8251_v30  ;;  %v8246_v31 = vor.u32 %v9579_v44, %v8243_v49  ;;  %v8233_v55 = vld [vmem:[%s13548_s13 + $0x30] sm:$0xf]  ;;  %v3502_v36 = vpop.f32.mrf.mxu0 }
 0x41e   : > { %v8234_v42 = vor.u32 %v9578_v45, %v8233_v55  ;;  %v8321_v45 = vld [vmem:[%s13548_s13 + $0xe0] sm:$0xf] }
 0x422   : > { %v3141_v61 = vpop.permute.xlu1 %3140 }
 0x423   : > { %v3225_v4 = vsel %vm658_vm0, %v3217_v62, %v3141_v61  ;;  %v9576_v62 = vld [vmem:[%s13548_s13 + $0x24] sm:$0xf0] }
 0x424   : > { %v3236_v8 = vsel %vm1390_vm13, %v3225_v4, %v3161_v12  ;;  %v8235_v12 = vld [vmem:[%s13548_s13 + $0x38] sm:$0xf0]  ;;  %v9575_v4 = vld [vmem:[%s13548_s13 + $0x24] sm:$0xf] }
 0x425   : > { %3487 = vmatmul.bf16.gmra.mxu3 %v3236_v8  ;;  %v8238_v61 = vor.u32 %v9577_v56, %v8235_v12  ;;  %v3504_v55 = vpop.f32.mrf.mxu0  ;;  %v9600_v56 = vld [vmem:[%s13548_s13 + $0xe4] sm:$0xf0]  ;;  %v11680_v12 = vld [vmem:[%s13547_s12] sm:$0x3] }
 0x42d   : > { %3559 = vmatmul.bf16.vlgmr.msra.gmra.mxu2 %v11476_v3  ;;  %v9585_v3 = vld [vmem:[%s13548_s13 + $0x74] sm:$0xf] }
 0x435   : > { %8203 = vmatmul.msk.bf16.vlgmr.msrb.gmra.mxu3 %vm1369_vm12, %v11199_v27  ;;  %v8267_v27 = vld [vmem:[%s13548_s13 + $0x78] sm:$0xf0] }
 0x436   : > { %v8270_v1 = vor.u32 %v9585_v3, %v8267_v27  ;;  %v8217_v3 = vld [vmem:[%s13548_s13 + $0x10] sm:$0xf]  ;;  %v9573_v27 = vld [vmem:[%s13548_s13 + $0x14] sm:$0xf] }
 0x438   : > { %3856 = vmatpush.bf16.msrb.mxu2 %v8270_v1  ;;  %v9572_v1 = vld [vmem:[%s13548_s13 + $0x4] sm:$0xf0] }
 0x43c   : > { %3857 = vmatpush.bf16.msrb.mxu2 %v8262_v11  ;;  %v8331_v11 = vld [vmem:[%s13548_s13 + $0xf8] sm:$0xf0] }
 0x43d   : > { %3564 = vmatmul.bf16.gmra.mxu2 %v11507_v40  ;;  %v9584_v40 = vld [vmem:[%s13548_s13 + $0x64] sm:$0xf0] }
 0x440   : > { %3858 = vmatpush.bf16.msrb.mxu2 %v8254_v53  ;;  %v9599_v53 = vld [vmem:[%s13548_s13 + $0xe4] sm:$0xf] }
 0x444   : > { %3859 = vmatpush.bf16.msrb.mxu2 %v8246_v31 }
 0x445   : > { %8204 = vmatmul.msk.bf16.gmra.mxu3 %vm1369_vm12, %v11257_v39  ;;  %v8257_v39 = vld [vmem:[%s13548_s13 + $0x60] sm:$0xf] }
 0x446   : > { %v8258_v0 = vor.u32 %v9584_v40, %v8257_v39  ;;  %v8218_v39 = vor.u32 %v9574_v33, %v8217_v3  ;;  %v8219_v40 = vld [vmem:[%s13548_s13 + $0x18] sm:$0xf0]  ;;  %v8313_v33 = vld [vmem:[%s13548_s13 + $0xd0] sm:$0xf] }
 0x447   : > { %v8222_v58 = vor.u32 %v9573_v27, %v8219_v40  ;;  %v9598_v27 = vld [vmem:[%s13548_s13 + $0xd4] sm:$0xf0]  ;;  %v9595_v40 = vld [vmem:[%s13548_s13 + $0xc4] sm:$0xf] }
 0x448   : > { %3799 = vmatpush.bf16.msra.mxu0 %v8258_v0  ;;  %3860 = vmatpush.bf16.msrb.mxu2 %v8238_v61  ;;  %v8211_v0 = vld [vmem:[%s13548_s13 + $0x8] sm:$0xf0]  ;;  %v11686_v61 = vperm.slane %v11680_v12, 0 }
 0x449   : > { %v8214_v30 = vor.u32 %v9571_v18, %v8211_v0 }
 0x44c   : > { %3800 = vmatpush.bf16.msra.mxu0 %v8250_v25  ;;  %v8334_v25 = vor.u32 %v9601_v14, %v8331_v11 }
 0x44d   : > { %3569 = vmatmul.bf16.gmra.mxu2 %v3233_v22  ;;  %v8242_v22 = vor.u32 %v9580_v9, %v8241_v20  ;;  %v8329_v20 = vld [vmem:[%s13548_s13 + $0xf0] sm:$0xf]  ;;  %v9602_v9 = vld [vmem:[%s13548_s13 + $0xf4] sm:$0xf0]  ;;  %v3444_v44 = vpop.f32.mrf.mxu2 }
 0x44e   : > { %3885 = vmatpush.bf16.msra.mxu3 %v8334_v25  ;;  %v8330_v49 = vor.u32 %v9602_v9, %v8329_v20  ;;  %v8305_v9 = vld [vmem:[%s13548_s13 + $0xc0] sm:$0xf] }
 0x450   : > { %3801 = vmatpush.bf16.msra.mxu0 %v8242_v22  ;;  %v8323_v22 = vld [vmem:[%s13548_s13 + $0xe8] sm:$0xf0]  ;;  %3827 = vmatpush.bf16.msrb.mxu1 %v8330_v49  ;;  %v9593_v49 = vld [vmem:[%s13548_s13 + $0xb4] sm:$0xf] }
 0x451   : > { %v8326_v31 = vor.u32 %v9599_v53, %v8323_v22  ;;  %v9596_v53 = vld [vmem:[%s13548_s13 + $0xc4] sm:$0xf0] }
 0x453   : > { %3886 = vmatpush.bf16.msra.mxu3 %v8326_v31 }
 0x454   : > { %3802 = vmatpush.bf16.msra.mxu0 %v8234_v42  ;;  %v9597_v42 = vld [vmem:[%s13548_s13 + $0xd4] sm:$0xf] }
 0x455   : > { %8205 = vmatmul.msk.bf16.gmra.mxu3 %vm1369_vm12, %v11332_v19  ;;  %v8225_v19 = vld [vmem:[%s13548_s13 + $0x20] sm:$0xf] }
 0x456   : > { %v8226_v32 = vor.u32 %v9576_v62, %v8225_v19  ;;  %v8322_v19 = vor.u32 %v9600_v56, %v8321_v45  ;;  %v8315_v62 = vld [vmem:[%s13548_s13 + $0xd8] sm:$0xf0] }
 0x458   : > { %3803 = vmatpush.bf16.msra.mxu0 %v8226_v32  ;;  %3828 = vmatpush.bf16.msrb.mxu1 %v8322_v19 }
 0x45c   : > { %3804 = vmatpush.bf16.msra.mxu0 %v8218_v39  ;;  %v8314_v39 = vor.u32 %v9598_v27, %v8313_v33 }
 0x45d   : > { %3574 = vmatmul.bf16.gmra.mxu2 %v3236_v8  ;;  %v8227_v8 = vld [vmem:[%s13548_s13 + $0x28] sm:$0xf0] }
 0x45e   : > { %v8230_v46 = vor.u32 %v9575_v4, %v8227_v8  ;;  %v8318_v4 = vor.u32 %v9597_v42, %v8315_v62  ;;  %v3446_v8 = vpop.f32.mrf.mxu2  ;;  %3829 = vmatpush.bf16.msrb.mxu1 %v8314_v39  ;;  %v8297_v62 = vld [vmem:[%s13548_s13 + $0xb0] sm:$0xf] }
 0x460   : > { %3861 = vmatpush.bf16.msrb.mxu2 %v8230_v46  ;;  %3887 = vmatpush.bf16.msra.mxu3 %v8318_v4  ;;  %v3445_v46 = vadd.f32 %v3444_v44, %v11686_v61  ;;  %v8306_v44 = vor.u32 %v9596_v53, %v8305_v9  ;;  %v9594_v4 = vld [vmem:[%s13548_s13 + $0xb4] sm:$0xf0] }
 0x462   : > { %3830 = vmatpush.bf16.msrb.mxu1 %v8306_v44 }
 0x464   : > { %3862 = vmatpush.bf16.msrb.mxu2 %v8222_v58  ;;  %v3447_v58 = vadd.f32 %v3446_v8, %v11686_v61  ;;  %v8298_v8 = vor.u32 %v9594_v4, %v8297_v62 }
 0x465   : > { %8206 = vmatmul.msk.bf16.gmra.mxu3 %vm1369_vm12, %v11530_v47  ;;  %v8209_v47 = vld [vmem:[%s13548_s13] sm:$0xf] }
 0x466   : > { %v8210_v16 = vor.u32 %v9572_v1, %v8209_v47  ;;  %v8307_v47 = vld [vmem:[%s13548_s13 + $0xc8] sm:$0xf0]  ;;  %v3507_v1 = vpop.f32.mrf.mxu0  ;;  %3831 = vmatpush.bf16.msrb.mxu1 %v8298_v8 }
 0x467   : > { %v8310_v18 = vor.u32 %v9595_v40, %v8307_v47 }
 0x468   : > { %3805 = vmatpush.bf16.msra.mxu0 %v8210_v16  ;;  %3863 = vmatpush.bf16.msrb.mxu2 %v8214_v30 }
 0x469   : > { %3888 = vmatpush.bf16.msra.mxu3 %v8310_v18 }
 0x46e   : > { %v3509_v56 = vpop.f32.mrf.mxu0 }
 0x476   : > { %v3473_v32 = vpop.f32.mrf.mxu3 }
 0x477   : > { %v3474_v3 = vadd.f32 %v3473_v32, %v3445_v46  ;;  %v9591_v32 = vld [vmem:[%s13548_s13 + $0xa4] sm:$0xf]  ;;  %v8291_v46 = vld [vmem:[%s13548_s13 + $0xa8] sm:$0xf0] }
 0x478   : > { %v8294_v33 = vor.u32 %v9591_v32, %v8291_v46 }
 0x479   : > { %v3503_v16 = vadd.f32 %v3502_v36, %v3474_v3  ;;  %v8299_v36 = vld [vmem:[%s13548_s13 + $0xb8] sm:$0xf0] }
 0x47a   : > { %v8302_v31 = vor.u32 %v9593_v49, %v8299_v36  ;;  %v8281_v36 = vld [vmem:[%s13548_s13 + $0x90] sm:$0xf] }
 0x47b   : > { %v3609_v25 = vmax.f32 %v3503_v16, 0.0  ;;  %v8289_v16 = vld [vmem:[%s13548_s13 + $0xa0] sm:$0xf] }
 0x47c   : > { %3889 = vmatpush.bf16.msra.mxu3 %v8302_v31  ;;  %v9587_v31 = vld [vmem:[%s13548_s13 + $0x84] sm:$0xf] }
 0x47e   : > { %v3475_v14 = vpop.f32.mrf.mxu3 }
 0x47f   : > { %v3449_v0 = vpop.f32.mrf.mxu2  ;;  %v3476_v11 = vadd.f32 %v3475_v14, %v3447_v58  ;;  %v3512_v58 = vpop.f32.mrf.mxu0 }
 0x480   : > { %v3450_v42 = vadd.f32 %v3449_v0, %v11686_v61  ;;  %3890 = vmatpush.bf16.msra.mxu3 %v8294_v33  ;;  %v3531_v33 = vpop.f32.mrf.mxu1 }
 0x481   : > { %v3505_v30 = vadd.f32 %v3504_v55, %v3476_v11  ;;  %v9592_v11 = vld [vmem:[%s13548_s13 + $0xa4] sm:$0xf0] }
 0x483   : > { %v3611_v20 = vmax.f32 %v3505_v30, 0.0  ;;  %v8290_v30 = vor.u32 %v9592_v11, %v8289_v16 }
 0x485   : > { %v3625_v22 = vpack.c.bf16 %v3611_v20, %v3609_v25  ;;  %v9589_v25 = vld [vmem:[%s13548_s13 + $0x94] sm:$0xf]  ;;  %3832 = vmatpush.bf16.msrb.mxu1 %v8290_v30 }
 0x487   : > { %v3451_v55 = vpop.f32.mrf.mxu2  ;;  %v3478_v45 = vpop.f32.mrf.mxu3  ;;  %3806 = vmatmul.bf16.vlgmr.msra.gmra.mxu0 %v3625_v22  ;;  %3864 = vmatmul.bf16.vlgmr.msrb.gmra.mxu2 %v3625_v22  ;;  %v9590_v22 = vld [vmem:[%s13548_s13 + $0x94] sm:$0xf0] }
 0x488   : > { %v3479_v19 = vadd.f32 %v3478_v45, %v3450_v42  ;;  %v3452_v3 = vadd.f32 %v3451_v55, %v11686_v61  ;;  %v8282_v55 = vor.u32 %v9590_v22, %v8281_v36  ;;  %v8275_v45 = vld [vmem:[%s13548_s13 + $0x88] sm:$0xf0] }
 0x48a   : > { %v3508_v40 = vadd.f32 %v3507_v1, %v3479_v19  ;;  %v8283_v1 = vld [vmem:[%s13548_s13 + $0x98] sm:$0xf0]  ;;  %v8278_v19 = vor.u32 %v9587_v31, %v8275_v45  ;;  %3833 = vmatpush.bf16.msrb.mxu1 %v8282_v55  ;;  %v3240_v55 = vperm.slane %v11680_v12, 1 }
 0x48b   : > { %v8286_v9 = vor.u32 %v9589_v25, %v8283_v1  ;;  %v3533_v25 = vpop.f32.mrf.mxu1 }
 0x48c   : > { %v3613_v0 = vmax.f32 %v3508_v40, 0.0 }
 0x48d   : > { %3891 = vmatpush.bf16.msra.mxu3 %v8286_v9 }
 0x48f   : > { %v3480_v39 = vpop.f32.mrf.mxu3 }
 0x490   : > { %v3454_v27 = vpop.f32.mrf.mxu2  ;;  %v3481_v47 = vadd.f32 %v3480_v39, %v3452_v3 }
 0x491   : > { %v3455_v49 = vadd.f32 %v3454_v27, %v11686_v61  ;;  %3892 = vmatpush.bf16.msra.mxu3 %v8278_v19 }
 0x492   : > { %v3510_v18 = vadd.f32 %v3509_v56, %v3481_v47  ;;  %v3514_v56 = vpop.f32.mrf.mxu0  ;;  %v8273_v47 = vld [vmem:[%s13548_s13 + $0x80] sm:$0xf] }
 0x493   : > { %v3536_v45 = vpop.f32.mrf.mxu1 }
 0x494   : > { %v3615_v14 = vmax.f32 %v3510_v18, 0.0  ;;  %v9588_v18 = vld [vmem:[%s13548_s13 + $0x84] sm:$0xf0] }
 0x496   : > { %v3627_v20 = vpack.c.bf16 %v3615_v14, %v3613_v0  ;;  %v8274_v0 = vor.u32 %v9588_v18, %v8273_v47 }
 0x498   : > { %v3456_v53 = vpop.f32.mrf.mxu2  ;;  %v3483_v44 = vpop.f32.mrf.mxu3  ;;  %3811 = vmatmul.bf16.gmra.mxu0 %v3627_v20  ;;  %3869 = vmatmul.bf16.gmra.mxu2 %v3627_v20 }
 0x499   : > { %v3484_v42 = vadd.f32 %v3483_v44, %v3455_v49  ;;  %v3457_v62 = vadd.f32 %v3456_v53, %v11686_v61  ;;  %3834 = vmatpush.bf16.msrb.mxu1 %v8274_v0 }
 0x49a   : > { %v3517_v40 = vpop.f32.mrf.mxu0 }
 0x49b   : > { %v3513_v32 = vadd.f32 %v3512_v58, %v3484_v42 }
 0x49d   : > { %v3617_v27 = vmax.f32 %v3513_v32, 0.0 }
 0x4a0   : > { %v3459_v4 = vpop.f32.mrf.mxu2  ;;  %v3485_v8 = vpop.f32.mrf.mxu3 }
 0x4a1   : > { %v3486_v46 = vadd.f32 %v3485_v8, %v3457_v62  ;;  %v3460_v58 = vadd.f32 %v3459_v4, %v11686_v61  ;;  %v3532_v62 = vadd.f32 %v3531_v33, %v3240_v55  ;;  %v3534_v4 = vadd.f32 %v3533_v25, %v3240_v55 }
 0x4a2   : > { %v3519_v20 = vpop.f32.mrf.mxu0 }
 0x4a3   : > { %v3515_v3 = vadd.f32 %v3514_v56, %v3486_v46 }
 0x4a5   : > { %v3619_v39 = vmax.f32 %v3515_v3, 0.0 }
 0x4a7   : > { %v3629_v14 = vpack.c.bf16 %v3619_v39, %v3617_v27  ;;  %v3538_v39 = vpop.f32.mrf.mxu1 }
 0x4a8   : > { %v3461_v16 = vpop.f32.mrf.mxu2  ;;  %v3488_v11 = vpop.f32.mrf.mxu3 }
 0x4a9   : > { %3816 = vmatmul.bf16.gmra.mxu0 %v3629_v14  ;;  %3874 = vmatmul.bf16.gmra.mxu2 %v3629_v14  ;;  %v3489_v30 = vadd.f32 %v3488_v11, %v3460_v58  ;;  %v3462_v1 = vadd.f32 %v3461_v16, %v11686_v61  ;;  %v3537_v14 = vadd.f32 %v3536_v45, %v3240_v55 }
 0x4aa   : > { %v3539_v11 = vadd.f32 %v3538_v39, %v3240_v55 }
 0x4ab   : > { %v3518_v44 = vadd.f32 %v3517_v40, %v3489_v30 }
 0x4ad   : > { %v3621_v22 = vmax.f32 %v3518_v44, 0.0 }
 0x4af   : > { %v3541_v16 = vpop.f32.mrf.mxu1 }
 0x4b0   : > { %v3490_v9 = vpop.f32.mrf.mxu3  ;;  %v3560_v53 = vpop.f32.mrf.mxu2 }
 0x4b1   : > { %v3491_v49 = vadd.f32 %v3490_v9, %v3462_v1  ;;  %v3561_v8 = vadd.f32 %v3560_v53, %v3532_v62 }
 0x4b3   : > { %v3520_v36 = vadd.f32 %v3519_v20, %v3491_v49 }
 0x4b5   : > { %v3623_v31 = vmax.f32 %v3520_v36, 0.0 }
 0x4b7   : > { %v3631_v56 = vpack.c.bf16 %v3623_v31, %v3621_v22  ;;  %v3543_v49 = vpop.f32.mrf.mxu1  ;;  %v3542_v31 = vadd.f32 %v3541_v16, %v3240_v55 }
 0x4b8   : > { %v3562_v42 = vpop.f32.mrf.mxu2  ;;  %v3589_v19 = vpop.f32.mrf.mxu3 }
 0x4b9   : > { %3821 = vmatmul.bf16.gmra.mxu0 %v3631_v56  ;;  %3879 = vmatmul.bf16.gmra.mxu2 %v3631_v56  ;;  %v3563_v61 = vadd.f32 %v3562_v42, %v3534_v4  ;;  %v3590_v32 = vadd.f32 %v3589_v19, %v3561_v8  ;;  %v3544_v56 = vadd.f32 %v3543_v49, %v3240_v55  ;;  %v9627_v49 = vld [vmem:[%s13544_s9 + $0xe0] sm:$0xff] }
 0x4bb   : > { %v3610_v40 = vmax.f32 %v3590_v32, 0.0 }
 0x4bf   : > { %v3546_v62 = vpop.f32.mrf.mxu1 }
 0x4c0   : > { %v3565_v46 = vpop.f32.mrf.mxu2  ;;  %v3591_v3 = vpop.f32.mrf.mxu3 }
 0x4c1   : > { %v3592_v27 = vadd.f32 %v3591_v3, %v3563_v61  ;;  %v3566_v58 = vadd.f32 %v3565_v46, %v3537_v14 }
 0x4c3   : > { %v3612_v47 = vmax.f32 %v3592_v27, 0.0 }
 0x4c5   : > { %v3626_v18 = vpack.c.bf16 %v3612_v47, %v3610_v40  ;;  %v3547_v40 = vadd.f32 %v3546_v62, %v3240_v55  ;;  %v9615_v62 = vld [vmem:[%s13544_s9 + $0x80] sm:$0xff] }
 0x4c7   : > { %3835 = vmatmul.bf16.vlgmr.msrb.gmra.mxu1 %v3626_v18  ;;  %3893 = vmatmul.bf16.vlgmr.msra.gmra.mxu3 %v3626_v18  ;;  %v3548_v39 = vpop.f32.mrf.mxu1 }
 0x4c8   : > { %v3567_v12 = vpop.f32.mrf.mxu2  ;;  %v3594_v0 = vpop.f32.mrf.mxu3  ;;  %v3549_v18 = vadd.f32 %v3548_v39, %v3240_v55  ;;  %v9621_v55 = vld [vmem:[%s13544_s9 + $0xb0] sm:$0xff] }
 0x4c9   : > { %v3568_v33 = vadd.f32 %v3567_v12, %v3539_v11  ;;  %v3595_v30 = vadd.f32 %v3594_v0, %v3566_v58 }
 0x4cb   : > { %v3614_v9 = vmax.f32 %v3595_v30, 0.0 }
 0x4d0   : > { %v3570_v25 = vpop.f32.mrf.mxu2  ;;  %v3596_v1 = vpop.f32.mrf.mxu3 }
 0x4d1   : > { %v3597_v20 = vadd.f32 %v3596_v1, %v3568_v33  ;;  %v3571_v42 = vadd.f32 %v3570_v25, %v3542_v31  ;;  %v9622_v25 = vld [vmem:[%s13544_s9 + $0xb8] sm:$0xff]  ;;  %v9617_v31 = vld [vmem:[%s13544_s9 + $0x90] sm:$0xff] }
 0x4d2   : > { %v9630_v1 = vld [vmem:[%s13544_s9 + $0xf8] sm:$0xff]  ;;  %4162 = vmatpush.bf16.msrb.mxu0 %v9622_v25 }
 0x4d3   : > { %v3616_v53 = vmax.f32 %v3597_v20, 0.0  ;;  %4191 = vmatpush.bf16.msra.mxu1 %v9630_v1  ;;  %v9629_v20 = vld [vmem:[%s13544_s9 + $0xf0] sm:$0xff] }
 0x4d5   : > { %v3628_v44 = vpack.c.bf16 %v3616_v53, %v3614_v9  ;;  %v9620_v9 = vld [vmem:[%s13544_s9 + $0xa8] sm:$0xff] }
 0x4d6   : > { %4163 = vmatpush.bf16.msrb.mxu0 %v9621_v55  ;;  %v9628_v53 = vld [vmem:[%s13544_s9 + $0xe8] sm:$0xff] }
 0x4d7   : > { %3840 = vmatmul.bf16.gmra.mxu1 %v3628_v44  ;;  %3898 = vmatmul.bf16.gmra.mxu3 %v3628_v44  ;;  %v9619_v44 = vld [vmem:[%s13544_s9 + $0xa0] sm:$0xff] }
 0x4d8   : > { %v3572_v36 = vpop.f32.mrf.mxu2  ;;  %v3599_v22 = vpop.f32.mrf.mxu3  ;;  %4192 = vmatpush.bf16.msra.mxu1 %v9629_v20 }
 0x4d9   : > { %v3573_v45 = vadd.f32 %v3572_v36, %v3544_v56  ;;  %v3600_v19 = vadd.f32 %v3599_v22, %v3571_v42  ;;  %v9618_v36 = vld [vmem:[%s13544_s9 + $0x98] sm:$0xff]  ;;  %v9625_v56 = vld [vmem:[%s13544_s9 + $0xd0] sm:$0xff]  ;;  %v9616_v42 = vld [vmem:[%s13544_s9 + $0x88] sm:$0xff] }
 0x4da   : > { %4164 = vmatpush.bf16.msrb.mxu0 %v9620_v9  ;;  %v9626_v22 = vld [vmem:[%s13544_s9 + $0xd8] sm:$0xff] }
 0x4db   : > { %v3618_v32 = vmax.f32 %v3600_v19, 0.0 }
 0x4dc   : > { %4193 = vmatpush.bf16.msra.mxu1 %v9628_v53 }
 0x4de   : > { %4165 = vmatpush.bf16.msrb.mxu0 %v9619_v44 }
 0x4e0   : > { %v3601_v4 = vpop.f32.mrf.mxu3  ;;  %v3575_v61 = vpop.f32.mrf.mxu2  ;;  %4194 = vmatpush.bf16.msra.mxu1 %v9627_v49 }
 0x4e1   : > { %v3602_v8 = vadd.f32 %v3601_v4, %v3573_v45  ;;  %v3576_v12 = vadd.f32 %v3575_v61, %v3547_v40  ;;  %v9624_v45 = vld [vmem:[%s13544_s9 + $0xc8] sm:$0xff] }
 0x4e2   : > { %4166 = vmatpush.bf16.msrb.mxu0 %v9618_v36 }
 0x4e3   : > { %v3620_v46 = vmax.f32 %v3602_v8, 0.0  ;;  %v9623_v8 = vld [vmem:[%s13544_s9 + $0xc0] sm:$0xff] }
 0x4e4   : > { %4195 = vmatpush.bf16.msra.mxu1 %v9626_v22 }
 0x4e5   : > { %v3630_v3 = vpack.c.bf16 %v3620_v46, %v3618_v32  ;;  %v2348_v32 = vld [vmem:[%s13549_s14] sm:$0x3] }
 0x4e6   : > { %4167 = vmatpush.bf16.msrb.mxu0 %v9617_v31 }
 0x4e7   : > { %3845 = vmatmul.bf16.gmra.mxu1 %v3630_v3  ;;  %3903 = vmatmul.bf16.gmra.mxu3 %v3630_v3  ;;  %v11814_v3 = vperm.slane %v2348_v32, 0 }
 0x4e8   : > { %v3604_v27 = vpop.f32.mrf.mxu3  ;;  %v3577_v47 = vpop.f32.mrf.mxu2  ;;  %4196 = vmatpush.bf16.msra.mxu1 %v9625_v56 }
 0x4e9   : > { %v3578_v0 = vadd.f32 %v3577_v47, %v3549_v18  ;;  %v3605_v14 = vadd.f32 %v3604_v27, %v3576_v12  ;;  %v11817_v47 = vperm.slane %v2348_v32, 1 }
 0x4ea   : > { %4168 = vmatpush.bf16.msrb.mxu0 %v9616_v42 }
 0x4eb   : > { %v3622_v58 = vmax.f32 %v3605_v14, 0.0 }
 0x4ec   : > { %4197 = vmatpush.bf16.msra.mxu1 %v9624_v45 }
 0x4ee   : > { %4169 = vmatpush.bf16.msrb.mxu0 %v9615_v62 }
 0x4f0   : > { %v3606_v16 = vpop.f32.mrf.mxu3  ;;  %4198 = vmatpush.bf16.msra.mxu1 %v9623_v8 }
 0x4f1   : > { %v3607_v11 = vadd.f32 %v3606_v16, %v3578_v0 }
 0x4f3   : > { %v3624_v33 = vmax.f32 %v3607_v11, 0.0 }
 0x4f5   : > { %v3632_v30 = vpack.c.bf16 %v3624_v33, %v3622_v58 }
 0x4f7   : > { %3850 = vmatmul.bf16.gmra.mxu1 %v3632_v30  ;;  %3908 = vmatmul.bf16.gmra.mxu3 %v3632_v30 }
 0x504   : > { %v3807_v19 = vpop.f32.mrf.mxu0 }
 0x505   : > { %v3808_v40 = vadd.f32 %v3807_v19, %v11814_v3 }
 0x50a   : > { %v3865_v4 = vpop.f32.mrf.mxu2 }
 0x50b   : > { %v3866_v11 = vadd.f32 %v3865_v4, %v11817_v47 }
 0x50c   : > { %v3809_v61 = vpop.f32.mrf.mxu0 }
 0x50d   : > { %v3810_v0 = vadd.f32 %v3809_v61, %v11814_v3 }
 0x512   : > { %v3867_v46 = vpop.f32.mrf.mxu2 }
 0x513   : > { %v3868_v55 = vadd.f32 %v3867_v46, %v11817_v47 }
 0x515   : > { %v3812_v39 = vpop.f32.mrf.mxu0 }
 0x516   : > { %v3813_v36 = vadd.f32 %v3812_v39, %v11814_v3 }
 0x51b   : > { %v3870_v14 = vpop.f32.mrf.mxu2 }
 0x51c   : > { %v3871_v45 = vadd.f32 %v3870_v14, %v11817_v47 }
 0x51d   : > { %v3814_v1 = vpop.f32.mrf.mxu0 }
 0x51e   : > { %v3815_v60 = vadd.f32 %v3814_v1, %v11814_v3 }
 0x523   : > { %v3872_v49 = vpop.f32.mrf.mxu2 }
 0x524   : > { %v3873_v32 = vadd.f32 %v3872_v49, %v11817_v47 }
 0x526   : > { %v3817_v56 = vpop.f32.mrf.mxu0 }
 0x52c   : > { %v3875_v61 = vpop.f32.mrf.mxu2 }
 0x544   : > { %v3836_v27 = vpop.f32.mrf.mxu1 }
 0x545   : > { %v3837_v18 = vadd.f32 %v3836_v27, %v3808_v40 }
 0x547   : > { %v11823_v58 = vadd.f32 %v3837_v18, %v2230_v29 }
 0x549   : > { %v3930_v20 = vmax.f32 %v11823_v58, 0.0 }
 0x54a   : > { %v3894_v12 = vpop.f32.mrf.mxu3 }
 0x54b   : > { %v3895_v30 = vadd.f32 %v3894_v12, %v3866_v11  ;;  %v3818_v12 = vadd.f32 %v3817_v56, %v11814_v3 }
 0x54c   : > { %v3838_v16 = vpop.f32.mrf.mxu1 }
 0x54d   : > { %v3839_v33 = vadd.f32 %v3838_v16, %v3810_v0  ;;  %v11834_v44 = vadd.f32 %v3895_v30, %v2231_v57  ;;  %v3877_v16 = vpop.f32.mrf.mxu2 }
 0x54f   : > { %v11827_v25 = vadd.f32 %v3839_v33, %v2232_v15  ;;  %v3931_v22 = vmax.f32 %v11834_v44, 0.0 }
 0x551   : > { %v3932_v9 = vmax.f32 %v11827_v25, 0.0 }
 0x552   : > { %v3896_v53 = vpop.f32.mrf.mxu3 }
 0x553   : > { %v4055_v26 = vpack.c.bf16 %v3932_v9, %v3930_v20  ;;  %v3897_v6 = vadd.f32 %v3896_v53, %v3868_v55 }
 0x554   : > { %v3841_v29 = vpop.f32.mrf.mxu1 }
 0x555   : > { %v11842_v15 = vadd.f32 %v3897_v6, %v2233_v24  ;;  %4170 = vmatmul.bf16.vlgmr.msrb.gmra.mxu0 %v4055_v26  ;;  %v3842_v31 = vadd.f32 %v3841_v29, %v3813_v36  ;;  %v3878_v6 = vadd.f32 %v3877_v16, %v11817_v47  ;;  %v3880_v48 = vpop.f32.mrf.mxu2 }
 0x557   : > { %v3933_v34 = vmax.f32 %v11842_v15, 0.0  ;;  %v11855_v19 = vadd.f32 %v3842_v31, %v2234_v2  ;;  %v3819_v2 = vpop.f32.mrf.mxu0  ;;  %v13593_v31 = vmax.f32 %v11078_v54, 0.0 }
 0x558   : > { %v3820_v33 = vadd.f32 %v3819_v2, %v11814_v3 }
 0x559   : > { %v4056_v57 = vpack.c.bf16 %v3933_v34, %v3931_v22  ;;  %v3934_v46 = vmax.f32 %v11855_v19, 0.0 }
 0x55a   : > { %v3899_v42 = vpop.f32.mrf.mxu3 }
 0x55b   : > { %4199 = vmatmul.bf16.vlgmr.msra.gmra.mxu1 %v4056_v57  ;;  %v3900_v4 = vadd.f32 %v3899_v42, %v3871_v45 }
 0x55c   : > { %v3843_v24 = vpop.f32.mrf.mxu1 }
 0x55d   : > { %v3844_v62 = vadd.f32 %v3843_v24, %v3815_v60  ;;  %v11866_v40 = vadd.f32 %v3900_v4, %v2235_v38 }
 0x55f   : > { %v11859_v8 = vadd.f32 %v3844_v62, %v2236_v23  ;;  %v3935_v0 = vmax.f32 %v11866_v40, 0.0  ;;  %v3822_v55 = vpop.f32.mrf.mxu0 }
 0x560   : > { %v3823_v42 = vadd.f32 %v3822_v55, %v11814_v3  ;;  %v4300_v55 = vld [vmem:[#allocation2] sm:$0xe] }
 0x561   : > { %v3936_v27 = vmax.f32 %v11859_v8, 0.0 }
 0x562   : > { %v3901_v39 = vpop.f32.mrf.mxu3 }
 0x563   : > { %v3902_v10 = vadd.f32 %v3901_v39, %v3873_v32  ;;  %v4057_v52 = vpack.c.bf16 %v3936_v27, %v3934_v46  ;;  %v13594_v32 = vmax.f32 %v11091_v50, 0.0 }
 0x564   : > { %v3846_v23 = vpop.f32.mrf.mxu1 }
 0x565   : > { %v11874_v18 = vadd.f32 %v3902_v10, %v2237_v13  ;;  %4175 = vmatmul.bf16.gmra.mxu0 %v4057_v52  ;;  %v3847_v38 = vadd.f32 %v3846_v23, %v3818_v12  ;;  %v3876_v13 = vadd.f32 %v3875_v61, %v11817_v47  ;;  %v3881_v61 = vadd.f32 %v3880_v48, %v11817_v47  ;;  %v3882_v52 = vpop.f32.mrf.mxu2 }
 0x566   : > { %v13595_v23 = vmax.f32 %v11096_v41, 0.0  ;;  %v13597_v41 = vmax.f32 %v11108_v7, 0.0 }
 0x567   : > { %v3937_v43 = vmax.f32 %v11874_v18, 0.0  ;;  %v11887_v30 = vadd.f32 %v3847_v38, %v2238_v17  ;;  %v3883_v38 = vadd.f32 %v3882_v52, %v11817_v47 }
 0x569   : > { %v4058_v14 = vpack.c.bf16 %v3937_v43, %v3935_v0  ;;  %v3938_v29 = vmax.f32 %v11887_v30, 0.0 }
 0x56a   : > { %v3904_v11 = vpop.f32.mrf.mxu3 }
 0x56b   : > { %4204 = vmatmul.bf16.gmra.mxu1 %v4058_v14  ;;  %v3905_v53 = vadd.f32 %v3904_v11, %v3876_v13  ;;  %v13596_v11 = vmax.f32 %v11101_v28, 0.0 }
 0x56c   : > { %v3848_v37 = vpop.f32.mrf.mxu1 }
 0x56d   : > { %v3849_v1 = vadd.f32 %v3848_v37, %v3820_v33  ;;  %v11898_v57 = vadd.f32 %v3905_v53, %v2239_v5  ;;  %v3824_v5 = vpop.f32.mrf.mxu0  ;;  %v4301_v53 = vld [vmem:[#allocation2 + $0x4] sm:$0x1] }
 0x56e   : > { %v3825_v4 = vadd.f32 %v3824_v5, %v11814_v3  ;;  %v4366_v5 = vld [vmem:[#allocation2 + $0x8] sm:$0xc] }
 0x56f   : > { %v11891_v26 = vadd.f32 %v3849_v1, %v2240_v59  ;;  %v3939_v60 = vmax.f32 %v11898_v57, 0.0 }
 0x571   : > { %v3940_v49 = vmax.f32 %v11891_v26, 0.0 }
 0x572   : > { %v3906_v36 = vpop.f32.mrf.mxu3 }
 0x573   : > { %v3907_v51 = vadd.f32 %v3906_v36, %v3878_v6  ;;  %v4059_v17 = vpack.c.bf16 %v3940_v49, %v3938_v29  ;;  %v4302_v6 = vld [vmem:[#allocation2 + $0x8] sm:$0xe]  ;;  %v4303_v36 = vld [vmem:[#allocation2 + $0xc] sm:$0x1] }
 0x574   : > { %v3851_v59 = vpop.f32.mrf.mxu1  ;;  %v8503_v7 = vrot.slane %v4302_v6, 9  ;;  %v4338_v48 = vrot.slane %v4303_v36, 5 }
 0x575   : > { %v11906_v56 = vadd.f32 %v3907_v51, %v13593_v31  ;;  %4180 = vmatmul.bf16.gmra.mxu0 %v4059_v17  ;;  %v3852_v24 = vadd.f32 %v3851_v59, %v3823_v42  ;;  %v8502_v51 = vrot.slane %v4300_v55, 9  ;;  %v4334_v17 = vrot.slane %v4301_v53, 5  ;;  %v4364_v59 = vld [vmem:[#allocation2] sm:$0xc]  ;;  %v4365_v31 = vld [vmem:[#allocation2 + $0x4] sm:$0x3] }
 0x577   : > { %v3941_v63 = vmax.f32 %v11906_v56, 0.0  ;;  %v11919_v39 = vadd.f32 %v3852_v24, %v13594_v32  ;;  %v4335_v42 = vsel %vm10098_vm6, %v8502_v51, %v4334_v17  ;;  %v4367_v24 = vld [vmem:[#allocation2 + $0xc] sm:$0x3] }
 0x578   : > { %v4402_v32 = vrot.slane %v4367_v24, 6 }
 0x579   : > { %v4060_v45 = vpack.c.bf16 %v3941_v63, %v3939_v60  ;;  %v3942_v14 = vmax.f32 %v11919_v39, 0.0 }
 0x57a   : > { %v3909_v62 = vpop.f32.mrf.mxu3 }
 0x57b   : > { %4209 = vmatmul.bf16.gmra.mxu1 %v4060_v45  ;;  %v3910_v2 = vadd.f32 %v3909_v62, %v3881_v61  ;;  %v8510_v45 = vrot.slane %v4364_v59, 10  ;;  %v4398_v62 = vrot.slane %v4365_v31, 6  ;;  %v8511_v61 = vrot.slane %v4366_v5, 10 }
 0x57c   : > { %v3853_v54 = vpop.f32.mrf.mxu1 }
 0x57d   : > { %v3854_v10 = vadd.f32 %v3853_v54, %v3825_v4  ;;  %v11930_v33 = vadd.f32 %v3910_v2, %v13596_v11  ;;  %v4339_v4 = vsel %vm10098_vm6, %v8503_v7, %v4338_v48  ;;  %v4720_v54 = vunpack.c.l.b16 %v4335_v42 }
 0x57e   : > { %v4399_v52 = vsel %vm10145_vm10, %v8510_v45, %v4398_v62  ;;  %v4403_v2 = vsel %vm10145_vm10, %v8511_v61, %v4402_v32 }
 0x57f   : > { %v11923_v12 = vadd.f32 %v3854_v10, %v13595_v23  ;;  %v13568_v47 = vmax.f32 %v11930_v33, 0.0  ;;  %v4721_v10 = vunpack.c.l.b16 %v4339_v4  ;;  %v4740_v23 = vunpack.c.l.b16 %v4399_v52  ;;  %v8736_v52 = vld [vmem:[%s13546_s11 + $0x230] sm:$0xf] }
 0x581   : > { %v13569_v3 = vmax.f32 %v11923_v12, 0.0 }
 0x582   : > { %v3911_v16 = vpop.f32.mrf.mxu3 }
 0x583   : > { %v3912_v50 = vadd.f32 %v3911_v16, %v3883_v38  ;;  %v4061_v37 = vpack.c.bf16 %v13569_v3, %v3942_v14  ;;  %v4728_v38 = vpack.c.b16 %v4721_v10, %v4720_v54  ;;  %v4741_v16 = vunpack.c.l.b16 %v4403_v2 }
 0x585   : > { %v11938_v13 = vadd.f32 %v3912_v50, %v13597_v41  ;;  %4185 = vmatmul.bf16.gmra.mxu0 %v4061_v37  ;;  %4732 = vrot.lane.b32.xlu0 %v4728_v38, %s13590_s25  ;;  %v4748_v11 = vpack.c.b16 %v4741_v16, %v4740_v23  ;;  %v11959_v37 = vld [vmem:[%s13545_s10 + $0x1] ss:$0 sm:$0xff]  ;;  %v9666_v23 = vld [vmem:[%s13546_s11 + $0x234] sm:$0xf0] }
 0x586   : > { %v8728_v38 = vld [vmem:[%s13546_s11 + $0x220] sm:$0xf] }
 0x587   : > { %v13567_v1 = vmax.f32 %v11938_v13, 0.0  ;;  %4752 = vrot.lane.b32.xlu1 %v4748_v11, %s13591_s26  ;;  %v8737_v11 = vor.u32 %v9666_v23, %v8736_v52 }
 0x589   : > { %v4062_v28 = vpack.c.bf16 %v13567_v1, %v13568_v47  ;;  %5205 = vmatpush.bf16.msra.mxu0 %v8737_v11 }
 0x58b   : > { %4214 = vmatmul.bf16.gmra.mxu1 %v4062_v28 }
 0x5d2   : > { %v4171_v50 = vpop.f32.mrf.mxu0 }
 0x5d3   : > { %v4172_v41 = vadd.f32 %v11959_v37, %v4171_v50  ;;  %v9664_v50 = vld [vmem:[%s13546_s11 + $0x224] sm:$0xf0] }
 0x5d8   : > { %v4200_v28 = vpop.f32.mrf.mxu1 }
 0x5d9   : > { %v4201_v55 = vadd.f32 %v4200_v28, %v4172_v41 }
 0x5da   : > { %v4173_v53 = vpop.f32.mrf.mxu0 }
 0x5db   : > { %v4220_v6 = vmax.f32 %v4201_v55, 0.0  ;;  %v4174_v17 = vadd.f32 %v11959_v37, %v4173_v53 }
 0x5dd   : > { %v4228_v36 = vpack.c.bf16 %v4220_v6, %v4220_v6 }
 0x5df   : > { %v4244_v51 = vrot.slane %v4228_v36, 7 }
 0x5e0   : > { %v4202_v7 = vpop.f32.mrf.mxu1 }
 0x5e1   : > { %v4245_v48 = vrot.slane %v4244_v51, 4  ;;  %4276 = vst.msk [vmem:[#allocation2 + $0x10] sm:$0xe] %vm757_vm11, %v4244_v51  ;;  %v4203_v59 = vadd.f32 %v4202_v7, %v4174_v17  ;;  %v8729_v17 = vor.u32 %v9664_v50, %v8728_v38 }
 0x5e2   : > { %v4176_v31 = vpop.f32.mrf.mxu0 }
 0x5e3   : > { %4277 = vst.msk [vmem:[#allocation2 + $0x14] sm:$0x1] %vm505_vm3, %v4245_v48  ;;  %v4221_v42 = vmax.f32 %v4203_v59, 0.0  ;;  %v4177_v45 = vadd.f32 %v11959_v37, %v4176_v31  ;;  %5206 = vmatpush.bf16.msra.mxu0 %v8729_v17 }
 0x5e5   : > { %v4229_v5 = vpack.c.bf16 %v4221_v42, %v4221_v42 }
 0x5e7   : > { %v4246_v24 = vrot.slane %v4229_v5, 7 }
 0x5e8   : > { %v4205_v62 = vpop.f32.mrf.mxu1  ;;  %v4500_v16 = vld [vmem:[#allocation2 + $0x10] sm:$0xc] }
 0x5e9   : > { %v4247_v4 = vrot.slane %v4246_v24, 4  ;;  %4278 = vst.msk [vmem:[#allocation2 + $0x18] sm:$0xe] %vm757_vm11, %v4246_v24  ;;  %v4206_v54 = vadd.f32 %v4205_v62, %v4177_v45  ;;  %v8568_v6 = vld [vmem:[#allocation2 + $0x10] sm:$0xf]  ;;  %v8526_v31 = vrot.slane %v4500_v16, 10 }
 0x5ea   : > { %v4178_v61 = vpop.f32.mrf.mxu0  ;;  %v4501_v10 = vld [vmem:[#allocation2 + $0x14] sm:$0x3]  ;;  %v4304_v23 = vld [vmem:[#allocation2 + $0x10] sm:$0xe] }
 0x5eb   : > { %4279 = vst.msk [vmem:[#allocation2 + $0x1c] sm:$0x1] %vm505_vm3, %v4247_v4  ;;  %v4222_v32 = vmax.f32 %v4206_v54, 0.0  ;;  %v4179_v28 = vadd.f32 %v11959_v37, %v4178_v61  ;;  %v4534_v55 = vrot.slane %v4501_v10, 6  ;;  %v4369_v38 = vld [vmem:[#allocation2 + $0x14] sm:$0x3] }
 0x5ed   : > { %v4230_v2 = vpack.c.bf16 %v4222_v32, %v4222_v32  ;;  %v4535_v4 = vsel %vm10145_vm10, %v8526_v31, %v4534_v55  ;;  %v4305_v32 = vld [vmem:[#allocation2 + $0x14] sm:$0x1] }
 0x5ee   : > { %v4800_v16 = vunpack.c.l.b16 %v4535_v4  ;;  %v4342_v55 = vrot.slane %v4305_v32, 5 }
 0x5ef   : > { %v4248_v41 = vrot.slane %v4230_v2, 7 }
 0x5f0   : > { %v4207_v53 = vpop.f32.mrf.mxu1  ;;  %v9703_v36 = vld [vmem:[#allocation2 + $0x14] sm:$0xf0] }
 0x5f1   : > { %v4502_v51 = vld [vmem:[#allocation2 + $0x18] sm:$0xc]  ;;  %v4249_v7 = vrot.slane %v4248_v41, 4  ;;  %4280 = vst.msk [vmem:[#allocation2 + $0x20] sm:$0xe] %vm757_vm11, %v4248_v41  ;;  %v4208_v48 = vadd.f32 %v4207_v53, %v4179_v28  ;;  %v8569_v59 = vor.u32 %v9703_v36, %v8568_v6 }
 0x5f2   : > { %v4181_v42 = vpop.f32.mrf.mxu0  ;;  %v4503_v5 = vld [vmem:[#allocation2 + $0x1c] sm:$0x3]  ;;  %v4306_v24 = vld [vmem:[#allocation2 + $0x18] sm:$0xe]  ;;  %v8527_v54 = vrot.slane %v4502_v51, 10 }
 0x5f3   : > { %v4307_v45 = vld [vmem:[#allocation2 + $0x1c] sm:$0x1]  ;;  %4281 = vst.msk [vmem:[#allocation2 + $0x24] sm:$0x1] %vm505_vm3, %v4249_v7  ;;  %v4223_v62 = vmax.f32 %v4208_v48, 0.0  ;;  %4780 = vrot.lane.b32.xlu2 %v8569_v59, %s13592_s30  ;;  %v4538_v61 = vrot.slane %v4503_v5, 6  ;;  %v4182_v6 = vadd.f32 %v11959_v37, %v4181_v42 }
 0x5f4   : > { %v4346_v10 = vrot.slane %v4307_v45, 5  ;;  %v8505_v50 = vrot.slane %v4306_v24, 9  ;;  %v4370_v41 = vld [vmem:[#allocation2 + $0x18] sm:$0xc]  ;;  %v4371_v28 = vld [vmem:[#allocation2 + $0x1c] sm:$0x3] }
 0x5f5   : > { %v4231_v52 = vpack.c.bf16 %v4223_v62, %v4223_v62  ;;  %v4539_v2 = vsel %vm10145_vm10, %v8527_v54, %v4538_v61  ;;  %v8504_v7 = vrot.slane %v4304_v23, 9  ;;  %v4368_v48 = vld [vmem:[#allocation2 + $0x10] sm:$0xc]  ;;  %v4406_v59 = vrot.slane %v4369_v38, 6 }
 0x5f6   : > { %v4801_v11 = vunpack.c.l.b16 %v4539_v2  ;;  %v4347_v17 = vsel %vm10098_vm6, %v8505_v50, %v4346_v10  ;;  %v8513_v45 = vrot.slane %v4370_v41, 10  ;;  %v4410_v24 = vrot.slane %v4371_v28, 6 }
 0x5f7   : > { %v4250_v53 = vrot.slane %v4231_v52, 7  ;;  %v4343_v32 = vsel %vm10098_vm6, %v8504_v7, %v4342_v55  ;;  %v4723_v2 = vunpack.c.l.b16 %v4347_v17  ;;  %v8512_v38 = vrot.slane %v4368_v48, 10 }
 0x5f8   : > { %v4210_v36 = vpop.f32.mrf.mxu1  ;;  %v4808_v51 = vpack.c.b16 %v4801_v11, %v4800_v16  ;;  %v4572_v4 = vld [vmem:[#allocation2 + $0x20] sm:$0xe]  ;;  %v4411_v41 = vsel %vm10145_vm10, %v8513_v45, %v4410_v24  ;;  %v4722_v28 = vunpack.c.l.b16 %v4343_v32 }
 0x5f9   : > { %v4251_v31 = vrot.slane %v4250_v53, 4  ;;  %4282 = vst.msk [vmem:[#allocation2 + $0x28] sm:$0xe] %vm757_vm11, %v4250_v53  ;;  %v4211_v5 = vadd.f32 %v4210_v36, %v4182_v6  ;;  %v4504_v52 = vld [vmem:[#allocation2 + $0x20] sm:$0xc]  ;;  %v8534_v11 = vrot.slane %v4572_v4, 9  ;;  %v4407_v6 = vsel %vm10145_vm10, %v8512_v38, %v4406_v59 }
 0x5fa   : > { %v4183_v62 = vpop.f32.mrf.mxu0  ;;  %4812 = vrot.lane.b32.xlu0 %v4808_v51, %s13590_s25  ;;  %v4573_v42 = vld [vmem:[#allocation2 + $0x24] sm:$0x1]  ;;  %v8528_v53 = vrot.slane %v4504_v52, 10  ;;  %v8584_v55 = vld [vmem:[#allocation2 + $0x20] sm:$0xf]  ;;  %v4743_v45 = vunpack.c.l.b16 %v4411_v41 }
 0x5fb   : > { %v4505_v54 = vld [vmem:[#allocation2 + $0x24] sm:$0x3]  ;;  %4283 = vst.msk [vmem:[#allocation2 + $0x2c] sm:$0x1] %vm505_vm3, %v4251_v31  ;;  %v4224_v61 = vmax.f32 %v4211_v5, 0.0  ;;  %v4606_v10 = vrot.slane %v4573_v42, 5  ;;  %v4184_v51 = vadd.f32 %v11959_v37, %v4183_v62  ;;  %v4729_v5 = vpack.c.b16 %v4723_v2, %v4722_v28 }
 0x5fc   : > { %v4637_v23 = vld [vmem:[#allocation2 + $0x24] sm:$0x3]  ;;  %v4542_v50 = vrot.slane %v4505_v54, 6  ;;  %v4636_v17 = vld [vmem:[#allocation2 + $0x20] sm:$0xc]  ;;  %v4742_v28 = vunpack.c.l.b16 %v4407_v6 }
 0x5fd   : > { %v4232_v16 = vpack.c.bf16 %v4224_v61, %v4224_v61  ;;  %v4607_v7 = vsel %vm10098_vm6, %v8534_v11, %v4606_v10  ;;  %v4670_v48 = vrot.slane %v4637_v23, 6  ;;  %v4309_v52 = vld [vmem:[#allocation2 + $0x24] sm:$0x1]  ;;  %v8542_v11 = vrot.slane %v4636_v17, 10 }
 0x5fe   : > { %v4543_v62 = vsel %vm10145_vm10, %v8528_v53, %v4542_v50  ;;  %v4848_v2 = vunpack.c.l.b16 %v4607_v7 }
 0x5ff   : > { %v4252_v36 = vrot.slane %v4232_v16, 7  ;;  %v4802_v50 = vunpack.c.l.b16 %v4543_v62 }
 0x600   : > { %v4212_v31 = vpop.f32.mrf.mxu1  ;;  %v9707_v4 = vld [vmem:[#allocation2 + $0x24] sm:$0xf0] }
 0x601   : > { %v4574_v42 = vld [vmem:[#allocation2 + $0x28] sm:$0xe]  ;;  %v4253_v24 = vrot.slane %v4252_v36, 4  ;;  %4284 = vst.msk [vmem:[#allocation2 + $0x30] sm:$0xe] %vm757_vm11, %v4252_v36  ;;  %v4213_v61 = vadd.f32 %v4212_v31, %v4184_v51  ;;  %v8585_v59 = vor.u32 %v9707_v4, %v8584_v55  ;;  %v4671_v31 = vsel %vm10145_vm10, %v8542_v11, %v4670_v48 }
 0x602   : > { %v4506_v54 = vld [vmem:[#allocation2 + $0x28] sm:$0xc]  ;;  %4734 = vrot.lane.b32.xlu0 %v4729_v5, %s13590_s25  ;;  %v4186_v10 = vpop.f32.mrf.mxu0  ;;  %v4575_v23 = vld [vmem:[#allocation2 + $0x2c] sm:$0x1]  ;;  %v8535_v38 = vrot.slane %v4574_v42, 9  ;;  %v4749_v4 = vpack.c.b16 %v4743_v45, %v4742_v28 }
 0x603   : > { %v4638_v32 = vld [vmem:[#allocation2 + $0x28] sm:$0xc]  ;;  %v4507_v16 = vld [vmem:[#allocation2 + $0x2c] sm:$0x3]  ;;  %4285 = vst.msk [vmem:[#allocation2 + $0x34] sm:$0x1] %vm505_vm3, %v4253_v24  ;;  %4840 = vrot.lane.b32.xlu1 %v8585_v59, %s13591_s26 }
 0x604   : > { %v4225_v41 = vmax.f32 %v4213_v61, 0.0  ;;  %v4610_v36 = vrot.slane %v4575_v23, 5  ;;  %v8529_v51 = vrot.slane %v4506_v54, 10  ;;  %v4546_v55 = vrot.slane %v4507_v16, 6  ;;  %v4639_v53 = vld [vmem:[#allocation2 + $0x2c] sm:$0x3] }
 0x605   : > { %v8543_v5 = vrot.slane %v4638_v32, 10  ;;  %v4310_v42 = vld [vmem:[#allocation2 + $0x28] sm:$0xe]  ;;  %v4674_v24 = vrot.slane %v4639_v53, 6  ;;  %v4311_v61 = vld [vmem:[#allocation2 + $0x2c] sm:$0x1]  ;;  %v4187_v54 = vadd.f32 %v11959_v37, %v4186_v10 }
 0x606   : > { %v4233_v7 = vpack.c.bf16 %v4225_v41, %v4225_v41  ;;  %v4611_v6 = vsel %vm10098_vm6, %v8535_v38, %v4610_v36  ;;  %v4547_v17 = vsel %vm10145_vm10, %v8529_v51, %v4546_v55  ;;  %v4308_v23 = vld [vmem:[#allocation2 + $0x20] sm:$0xe]  ;;  %v4350_v16 = vrot.slane %v4309_v52, 5 }
 0x607   : > { %v4849_v59 = vunpack.c.l.b16 %v4611_v6  ;;  %v4803_v62 = vunpack.c.l.b16 %v4547_v17  ;;  %v4675_v48 = vsel %vm10145_vm10, %v8543_v5, %v4674_v24  ;;  %v8507_v45 = vrot.slane %v4310_v42, 9  ;;  %v12018_v51 = vld [vmem:[#allocation2 + $0x20] sm:$0xc]  ;;  %v4375_v6 = vld [vmem:[#allocation2 + $0x2c] sm:$0x3] }
 0x608   : > { %v4254_v1 = vrot.slane %v4233_v7, 7  ;;  %v4354_v32 = vrot.slane %v4311_v61, 5  ;;  %v4215_v11 = vpop.f32.mrf.mxu1  ;;  %v4868_v41 = vunpack.c.l.b16 %v4671_v31  ;;  %v4869_v36 = vunpack.c.l.b16 %v4675_v48  ;;  %v4373_v7 = vld [vmem:[#allocation2 + $0x24] sm:$0x3]  ;;  %v4508_v61 = vld [vmem:[#allocation2 + $0x30] sm:$0xc] }
 0x609   : > { %v4856_v28 = vpack.c.b16 %v4849_v59, %v4848_v2  ;;  %v4809_v38 = vpack.c.b16 %v4803_v62, %v4802_v50  ;;  %v4216_v10 = vadd.f32 %v4215_v11, %v4187_v54  ;;  %v8506_v53 = vrot.slane %v4308_v23, 9  ;;  %v4576_v50 = vld [vmem:[#allocation2 + $0x30] sm:$0xe]  ;;  %v4374_v23 = vld [vmem:[#allocation2 + $0x28] sm:$0xc] }
 0x60a   : > { %v4255_v55 = vrot.slane %v4254_v1, 4  ;;  %4286 = vst.msk [vmem:[#allocation2 + $0x38] sm:$0xe] %vm757_vm11, %v4254_v1  ;;  %v4355_v52 = vsel %vm10098_vm6, %v8507_v45, %v4354_v32  ;;  %v12025_v2 = vpack.c.b16 %v4869_v36, %v4868_v41  ;;  %v4577_v31 = vld [vmem:[#allocation2 + $0x34] sm:$0x1]  ;;  %v4188_v1 = vpop.f32.mrf.mxu0  ;;  %v8536_v11 = vrot.slane %v4576_v50, 9 }
 0x60b   : > { %4860 = vrot.lane.b32.xlu2 %v4856_v28, %s13592_s30  ;;  %4814 = vrot.lane.b32.xlu0 %v4809_v38, %s13590_s25  ;;  %v4509_v5 = vld [vmem:[#allocation2 + $0x34] sm:$0x3]  ;;  %v4226_v42 = vmax.f32 %v4216_v10, 0.0  ;;  %v4351_v17 = vsel %vm10098_vm6, %v8506_v53, %v4350_v16  ;;  %v4614_v24 = vrot.slane %v4577_v31, 5  ;;  %v4725_v54 = vunpack.c.l.b16 %v4355_v52  ;;  %v8572_v45 = vld [vmem:[#allocation2 + $0x20] sm:$0xf] }
 0x60c   : > { %4287 = vst.msk [vmem:[#allocation2 + $0x3c] sm:$0x1] %vm505_vm3, %v4255_v55  ;;  %4754 = vrot.lane.b32.xlu1 %v4749_v4, %s13591_s26  ;;  %8742 = vmatmul.msk.bf16.vlgmr.msra.gmra.mxu0 %vm1369_vm12, %v12025_v2  ;;  %v4550_v59 = vrot.slane %v4509_v5, 6  ;;  %v4641_v62 = vld [vmem:[#allocation2 + $0x34] sm:$0x3]  ;;  %v8514_v28 = vrot.slane %v12018_v51, 10  ;;  %v4189_v4 = vadd.f32 %v11959_v37, %v4188_v1  ;;  %v4724_v41 = vunpack.c.l.b16 %v4351_v17 }
 0x60d   : > { %v4234_v48 = vpack.c.bf16 %v4226_v42, %v4226_v42  ;;  %v9704_v32 = vld [vmem:[#allocation2 + $0x24] sm:$0xf0]  ;;  %v4418_v38 = vrot.slane %v4375_v6, 6  ;;  %v8588_v16 = vld [vmem:[#allocation2 + $0x30] sm:$0xf]  ;;  %v8530_v36 = vrot.slane %v4508_v61, 10  ;;  %v4615_v31 = vsel %vm10098_vm6, %v8536_v11, %v4614_v24 }
 0x60e   : > { %v4640_v55 = vld [vmem:[#allocation2 + $0x30] sm:$0xc]  ;;  %v4414_v10 = vrot.slane %v4373_v7, 6  ;;  %v4678_v5 = vrot.slane %v4641_v62, 6  ;;  %v8515_v50 = vrot.slane %v4374_v23, 10  ;;  %v8573_v6 = vor.u32 %v9704_v32, %v8572_v45 }
 0x60f   : > { %v8656_v53 = vld [vmem:[%s13546_s11 + $0x190] sm:$0xf]  ;;  %v4256_v52 = vrot.slane %v4234_v48, 7  ;;  %v9646_v51 = vld [vmem:[%s13546_s11 + $0x194] sm:$0xf0]  ;;  %v4730_v42 = vpack.c.b16 %v4725_v54, %v4724_v41  ;;  %v4551_v61 = vsel %vm10145_vm10, %v8530_v36, %v4550_v59  ;;  %v4850_v32 = vunpack.c.l.b16 %v4615_v31 }
 0x610   : > { %v4217_v37 = vpop.f32.mrf.mxu1  ;;  %v8657_v47 = vor.u32 %v9646_v51, %v8656_v53  ;;  %v4419_v11 = vsel %vm10145_vm10, %v8515_v50, %v4418_v38  ;;  %v12048_v3 = vld [vmem:[#allocation2 + $0x34] sm:$0x1]  ;;  %v8544_v41 = vrot.slane %v4640_v55, 10  ;;  %v4415_v36 = vsel %vm10145_vm10, %v8514_v28, %v4414_v10 }
 0x611   : > { %v9708_v1 = vld [vmem:[#allocation2 + $0x34] sm:$0xf0]  ;;  %v4257_v48 = vrot.slane %v4256_v52, 4  ;;  %4288 = vst.msk [vmem:[#allocation2 + $0x40] sm:$0xe] %vm757_vm11, %v4256_v52  ;;  %v4218_v24 = vadd.f32 %v4217_v37, %v4189_v4  ;;  %v4804_v52 = vunpack.c.l.b16 %v4551_v61  ;;  %v4745_v37 = vunpack.c.l.b16 %v4419_v11 }
 0x612   : > { %v4578_v17 = vld [vmem:[#allocation2 + $0x38] sm:$0xe]  ;;  %v8589_v62 = vor.u32 %v9708_v1, %v8588_v16  ;;  %5141 = vmatpush.bf16.msra.mxu2 %v8657_v47  ;;  %v4679_v51 = vsel %vm10145_vm10, %v8544_v41, %v4678_v5  ;;  %v4744_v47 = vunpack.c.l.b16 %v4415_v36  ;;  %v4312_v61 = vld [vmem:[#allocation2 + $0x30] sm:$0xe]  ;;  %v9645_v5 = vld [vmem:[%s13546_s11 + $0x194] sm:$0xf] }
 0x613   : > { %v4510_v7 = vld [vmem:[#allocation2 + $0x38] sm:$0xc]  ;;  %4782 = vrot.lane.b32.xlu2 %v8573_v6, %s13592_s30  ;;  %4736 = vrot.lane.b32.xlu0 %v4730_v42, %s13590_s25  ;;  %v4579_v54 = vld [vmem:[#allocation2 + $0x3c] sm:$0x1]  ;;  %v8537_v45 = vrot.slane %v4578_v17, 9  ;;  %v4227_v4 = vmax.f32 %v4218_v24, 0.0  ;;  %v4870_v41 = vunpack.c.l.b16 %v4679_v51 }
 0x614   : > { %v4642_v23 = vld [vmem:[#allocation2 + $0x38] sm:$0xc]  ;;  %v4511_v59 = vld [vmem:[#allocation2 + $0x3c] sm:$0x3]  ;;  %4289 = vst.msk [vmem:[#allocation2 + $0x44] sm:$0x1] %vm505_vm3, %v4257_v48  ;;  %4842 = vrot.lane.b32.xlu1 %v8589_v62, %s13591_s26 }
 0x615   : > { %v4618_v38 = vrot.slane %v4579_v54, 5  ;;  %v8531_v16 = vrot.slane %v4510_v7, 10  ;;  %v4554_v53 = vrot.slane %v4511_v59, 6  ;;  %v4643_v50 = vld [vmem:[#allocation2 + $0x3c] sm:$0x3]  ;;  %v8545_v31 = vrot.slane %v4642_v23, 10 }
 0x616   : > { %v4314_v55 = vld [vmem:[#allocation2 + $0x38] sm:$0xe]  ;;  %v4235_v6 = vpack.c.bf16 %v4227_v4, %v4227_v4  ;;  %v4682_v42 = vrot.slane %v4643_v50, 6  ;;  %v4315_v1 = vld [vmem:[#allocation2 + $0x3c] sm:$0x1]  ;;  %v4358_v48 = vrot.slane %v12048_v3, 5 }
 0x617   : > { %v4619_v28 = vsel %vm10098_vm6, %v8537_v45, %v4618_v38  ;;  %v4555_v10 = vsel %vm10145_vm10, %v8531_v16, %v4554_v53  ;;  %v8509_v23 = vrot.slane %v4314_v55, 9  ;;  %v4362_v11 = vrot.slane %v4315_v1, 5  ;;  %v8658_v54 = vld [vmem:[%s13546_s11 + $0x198] sm:$0xf0]  ;;  %v12071_v3 = vld [vmem:[#allocation2 + $0x30] sm:$0xc] }
 0x618   : > { %v4851_v17 = vunpack.c.l.b16 %v4619_v28  ;;  %v4805_v7 = vunpack.c.l.b16 %v4555_v10  ;;  %v4258_v24 = vrot.slane %v4235_v6, 7  ;;  %v4683_v62 = vsel %vm10145_vm10, %v8545_v31, %v4682_v42  ;;  %v4644_v4 = vld [vmem:[#allocation2 + $0x40] sm:$0xc]  ;;  %v4378_v55 = vld [vmem:[#allocation2 + $0x38] sm:$0xc] }
 0x619   : > { %v4871_v36 = vunpack.c.l.b16 %v4683_v62  ;;  %v4750_v16 = vpack.c.b16 %v4745_v37, %v4744_v47  ;;  %v8508_v53 = vrot.slane %v4312_v61, 9  ;;  %v4363_v50 = vsel %vm10098_vm6, %v8509_v23, %v4362_v11  ;;  %v4580_v31 = vld [vmem:[#allocation2 + $0x40] sm:$0xe]  ;;  %v4379_v6 = vld [vmem:[#allocation2 + $0x3c] sm:$0x3] }
 0x61a   : > { %v4857_v45 = vpack.c.b16 %v4851_v17, %v4850_v32  ;;  %v4810_v59 = vpack.c.b16 %v4805_v7, %v4804_v52  ;;  %v4259_v38 = vrot.slane %v4258_v24, 4  ;;  %4290 = vst.msk [vmem:[#allocation2 + $0x48] sm:$0xe] %vm757_vm11, %v4258_v24  ;;  %v4512_v28 = vld [vmem:[#allocation2 + $0x40] sm:$0xc]  ;;  %v8661_v42 = vor.u32 %v9645_v5, %v8658_v54 }
 0x61b   : > { %v12078_v32 = vpack.c.b16 %v4871_v36, %v4870_v41  ;;  %v4645_v52 = vld [vmem:[#allocation2 + $0x44] sm:$0x3]  ;;  %v12080_v10 = vld [vmem:[#allocation2 + $0x34] sm:$0x3]  ;;  %v4359_v37 = vsel %vm10098_vm6, %v8508_v53, %v4358_v48  ;;  %v9705_v47 = vld [vmem:[#allocation2 + $0x34] sm:$0xf0]  ;;  %v4727_v61 = vunpack.c.l.b16 %v4363_v50 }
 0x61c   : > { %4862 = vrot.lane.b32.xlu2 %v4857_v45, %s13592_s30  ;;  %4816 = vrot.lane.b32.xlu0 %v4810_v59, %s13590_s25  ;;  %v4581_v51 = vld [vmem:[#allocation2 + $0x44] sm:$0x1]  ;;  %4291 = vst.msk [vmem:[#allocation2 + $0x4c] sm:$0x1] %vm505_vm3, %v4259_v38  ;;  %v4686_v1 = vrot.slane %v4645_v52, 6  ;;  %v8546_v24 = vrot.slane %v4644_v4, 10  ;;  %v4726_v59 = vunpack.c.l.b16 %v4359_v37 }
 0x61d   : > { %4756 = vrot.lane.b32.xlu1 %v4750_v16, %s13591_s26  ;;  %v4622_v17 = vrot.slane %v4581_v51, 5  ;;  %v4513_v7 = vld [vmem:[#allocation2 + $0x44] sm:$0x3]  ;;  %8743 = vmatmul.msk.bf16.gmra.mxu0 %vm1369_vm12, %v12078_v32  ;;  %v8538_v62 = vrot.slane %v4580_v31, 9  ;;  %v8576_v5 = vld [vmem:[#allocation2 + $0x30] sm:$0xf] }
 0x61e   : > { %v4558_v23 = vrot.slane %v4513_v7, 6  ;;  %5228 = vmatpush.bf16.msrb.mxu1 %v8661_v42  ;;  %v8532_v11 = vrot.slane %v4512_v28, 10  ;;  %v8516_v54 = vrot.slane %v12071_v3, 10  ;;  %v8648_v48 = vld [vmem:[%s13546_s11 + $0x180] sm:$0xf]  ;;  %v12097_v36 = vsel %vm10145_vm10, %v8546_v24, %v4686_v1 }
 0x61f   : > { %v9644_v45 = vld [vmem:[%s13546_s11 + $0x184] sm:$0xf0]  ;;  %v8592_v41 = vld [vmem:[#allocation2 + $0x40] sm:$0xf]  ;;  %v8517_v4 = vrot.slane %v4378_v55, 10  ;;  %v4426_v38 = vrot.slane %v4379_v6, 6  ;;  %v12107_v53 = vsel %vm10098_vm6, %v8538_v62, %v4622_v17  ;;  %v8577_v51 = vor.u32 %v9705_v47, %v8576_v5 }
 0x620   : > { %v9643_v3 = vld [vmem:[%s13546_s11 + $0x184] sm:$0xf]  ;;  %v8650_v16 = vld [vmem:[%s13546_s11 + $0x188] sm:$0xf0]  ;;  %v4422_v50 = vrot.slane %v12080_v10, 6  ;;  %v8649_v31 = vor.u32 %v9644_v45, %v8648_v48  ;;  %v4731_v28 = vpack.c.b16 %v4727_v61, %v4726_v59  ;;  %v4559_v17 = vsel %vm10145_vm10, %v8532_v11, %v4558_v23 }
 0x621   : > { %v8653_v52 = vor.u32 %v9643_v3, %v8650_v16  ;;  %v8640_v55 = vld [vmem:[%s13546_s11 + $0x170] sm:$0xf]  ;;  %v9642_v6 = vld [vmem:[%s13546_s11 + $0x174] sm:$0xf0]  ;;  %v9709_v42 = vld [vmem:[#allocation2 + $0x44] sm:$0xf0]  ;;  %v4427_v10 = vsel %vm10145_vm10, %v8517_v4, %v4426_v38  ;;  %v4872_v23 = vunpack.c.l.b16 %v12097_v36  ;;  %v4852_v11 = vunpack.c.l.b16 %v12107_v53 }
 0x622   : > { %v4646_v37 = vld [vmem:[#allocation2 + $0x48] sm:$0xc]  ;;  %v8593_v7 = vor.u32 %v9709_v42, %v8592_v41  ;;  %5142 = vmatpush.bf16.msra.mxu2 %v8649_v31  ;;  %v8641_v45 = vor.u32 %v9642_v6, %v8640_v55  ;;  %v8720_v47 = vld [vmem:[%s13546_s11 + $0x210] sm:$0xf]  ;;  %v9662_v16 = vld [vmem:[%s13546_s11 + $0x214] sm:$0xf0]  ;;  %v4806_v31 = vunpack.c.l.b16 %v4559_v17  ;;  %v4747_v55 = vunpack.c.l.b16 %v4427_v10 }
 0x623   : > { %v4582_v1 = vld [vmem:[#allocation2 + $0x48] sm:$0xe]  ;;  %v8547_v24 = vrot.slane %v4646_v37, 10  ;;  %5229 = vmatpush.bf16.msrb.mxu1 %v8653_v52  ;;  %v4647_v61 = vld [vmem:[#allocation2 + $0x4c] sm:$0x3]  ;;  %v4423_v52 = vsel %vm10145_vm10, %v8516_v54, %v4422_v50  ;;  %v8721_v36 = vor.u32 %v9662_v16, %v8720_v47 }
 0x624   : > { %v8539_v62 = vrot.slane %v4582_v1, 9  ;;  %v4514_v48 = vld [vmem:[#allocation2 + $0x48] sm:$0xc]  ;;  %4784 = vrot.lane.b32.xlu2 %v8577_v51, %s13592_s30  ;;  %4738 = vrot.lane.b32.xlu0 %v4731_v28, %s13590_s25  ;;  %v4583_v5 = vld [vmem:[#allocation2 + $0x4c] sm:$0x1]  ;;  %v4690_v41 = vrot.slane %v4647_v61, 6  ;;  %v4746_v61 = vunpack.c.l.b16 %v4423_v52 }
 0x625   : > { %v4515_v59 = vld [vmem:[#allocation2 + $0x4c] sm:$0x3]  ;;  %4844 = vrot.lane.b32.xlu1 %v8593_v7, %s13591_s26  ;;  %v4626_v4 = vrot.slane %v4583_v5, 5  ;;  %v8533_v38 = vrot.slane %v4514_v48, 10  ;;  %v9641_v53 = vld [vmem:[%s13546_s11 + $0x174] sm:$0xf]  ;;  %5170 = vmatpush.bf16.msrb.mxu3 %v8721_v36 }
 0x626   : > { %v4562_v3 = vrot.slane %v4515_v59, 6  ;;  %v8642_v6 = vld [vmem:[%s13546_s11 + $0x178] sm:$0xf0]  ;;  %v8632_v51 = vld [vmem:[%s13546_s11 + $0x160] sm:$0xf]  ;;  %v4691_v28 = vsel %vm10145_vm10, %v8547_v24, %v4690_v41  ;;  %5143 = vmatpush.bf16.msra.mxu2 %v8641_v45  ;;  %v4751_v52 = vpack.c.b16 %v4747_v55, %v4746_v61 }
 0x627   : > { %v4627_v54 = vsel %vm10098_vm6, %v8539_v62, %v4626_v4  ;;  %v8645_v42 = vor.u32 %v9641_v53, %v8642_v6  ;;  %v9640_v37 = vld [vmem:[%s13546_s11 + $0x164] sm:$0xf0]  ;;  %v9639_v1 = vld [vmem:[%s13546_s11 + $0x164] sm:$0xf]  ;;  %v8634_v17 = vld [vmem:[%s13546_s11 + $0x168] sm:$0xf0]  ;;  %v4873_v10 = vunpack.c.l.b16 %v4691_v28 }
 0x628   : > { %v4563_v50 = vsel %vm10145_vm10, %v8533_v38, %v4562_v3  ;;  %v4853_v7 = vunpack.c.l.b16 %v4627_v54  ;;  %v8633_v62 = vor.u32 %v9640_v37, %v8632_v51  ;;  %v8624_v48 = vld [vmem:[%s13546_s11 + $0x150] sm:$0xf]  ;;  %v9638_v45 = vld [vmem:[%s13546_s11 + $0x154] sm:$0xf0]  ;;  %v8712_v47 = vld [vmem:[%s13546_s11 + $0x200] sm:$0xf]  ;;  %v8637_v5 = vor.u32 %v9639_v1, %v8634_v17 }
 0x629   : > { %v4807_v24 = vunpack.c.l.b16 %v4563_v50  ;;  %5230 = vmatpush.bf16.msrb.mxu1 %v8645_v42  ;;  %v9660_v59 = vld [vmem:[%s13546_s11 + $0x204] sm:$0xf0]  ;;  %v12169_v41 = vpack.c.b16 %v4873_v10, %v4872_v23  ;;  %v9637_v16 = vld [vmem:[%s13546_s11 + $0x154] sm:$0xf]  ;;  %v8626_v36 = vld [vmem:[%s13546_s11 + $0x158] sm:$0xf0]  ;;  %v8625_v53 = vor.u32 %v9638_v45, %v8624_v48 }
 0x62a   : > { %v4858_v4 = vpack.c.b16 %v4853_v7, %v4852_v11  ;;  %v8713_v3 = vor.u32 %v9660_v59, %v8712_v47  ;;  %5144 = vmatpush.bf16.msra.mxu2 %v8633_v62  ;;  %v8616_v6 = vld [vmem:[%s13546_s11 + $0x140] sm:$0xf]  ;;  %v9636_v23 = vld [vmem:[%s13546_s11 + $0x144] sm:$0xf0]  ;;  %v8704_v11 = vld [vmem:[%s13546_s11 + $0x1f0] sm:$0xf]  ;;  %v8629_v54 = vor.u32 %v9637_v16, %v8626_v36 }
 0x62b   : > { %v4811_v38 = vpack.c.b16 %v4807_v24, %v4806_v31  ;;  %v9658_v31 = vld [vmem:[%s13546_s11 + $0x1f4] sm:$0xf0]  ;;  %v9706_v55 = vld [vmem:[#allocation2 + $0x44] sm:$0xf0]  ;;  %v8596_v51 = vld [vmem:[#allocation2 + $0x50] sm:$0xf]  ;;  %v8617_v10 = vor.u32 %v9636_v23, %v8616_v6 }
 0x62c   : > { %4864 = vrot.lane.b32.xlu2 %v4858_v4, %s13592_s30  ;;  %v9710_v28 = vld [vmem:[#allocation2 + $0x54] sm:$0xf0]  ;;  %5171 = vmatpush.bf16.msrb.mxu3 %v8713_v3  ;;  %v9635_v50 = vld [vmem:[%s13546_s11 + $0x144] sm:$0xf]  ;;  %v8618_v42 = vld [vmem:[%s13546_s11 + $0x148] sm:$0xf0]  ;;  %v8705_v1 = vor.u32 %v9658_v31, %v8704_v11 }
 0x62d   : > { %4818 = vrot.lane.b32.xlu0 %v4811_v38, %s13590_s25  ;;  %4758 = vrot.lane.b32.xlu1 %v4751_v52, %s13591_s26  ;;  %v8608_v37 = vld [vmem:[%s13546_s11 + $0x130] sm:$0xf]  ;;  %v8580_v17 = vld [vmem:[#allocation2 + $0x40] sm:$0xf]  ;;  %v9634_v7 = vld [vmem:[%s13546_s11 + $0x134] sm:$0xf0]  ;;  %v8621_v59 = vor.u32 %v9635_v50, %v8618_v42 }
 0x62e   : > { %5231 = vmatpush.bf16.msrb.mxu1 %v8637_v5  ;;  %8744 = vmatmul.msk.bf16.gmra.mxu0 %vm1369_vm12, %v12169_v41  ;;  %v4584_v24 = vld [vmem:[#allocation2 + $0x50] sm:$0xe]  ;;  %v4585_v62 = vld [vmem:[#allocation2 + $0x54] sm:$0x1]  ;;  %v4586_v48 = vld [vmem:[#allocation2 + $0x58] sm:$0xe]  ;;  %v8597_v5 = vor.u32 %v9710_v28, %v8596_v51  ;;  %v8581_v36 = vor.u32 %v9706_v55, %v8580_v17  ;;  %v8609_v11 = vor.u32 %v9634_v7, %v8608_v37 }
 0x62f   : > { %5145 = vmatpush.bf16.msra.mxu2 %v8625_v53  ;;  %v4587_v45 = vld [vmem:[#allocation2 + $0x5c] sm:$0x1]  ;;  %v8540_v47 = vrot.slane %v4584_v24, 9  ;;  %v4630_v61 = vrot.slane %v4585_v62, 5  ;;  %v8541_v4 = vrot.slane %v4586_v48, 9 }
 0x630   : > { %v4634_v38 = vrot.slane %v4587_v45, 5  ;;  %v8696_v3 = vld [vmem:[%s13546_s11 + $0x1e0] sm:$0xf]  ;;  %v9656_v16 = vld [vmem:[%s13546_s11 + $0x1e4] sm:$0xf0]  ;;  %5172 = vmatpush.bf16.msrb.mxu3 %v8705_v1 }
 0x631   : > { %v9633_v52 = vld [vmem:[%s13546_s11 + $0x134] sm:$0xf]  ;;  %v8610_v53 = vld [vmem:[%s13546_s11 + $0x138] sm:$0xf0]  ;;  %v4631_v6 = vsel %vm10098_vm6, %v8540_v47, %v4630_v61  ;;  %v8697_v23 = vor.u32 %v9656_v16, %v8696_v3  ;;  %v8688_v55 = vld [vmem:[%s13546_s11 + $0x1d0] sm:$0xf]  ;;  %v4733_v3 = vpop.permute.xlu0 %4732 }
 0x632   : > { %5232 = vmatpush.bf16.msrb.mxu1 %v8629_v54  ;;  %v4635_v31 = vsel %vm10098_vm6, %v8541_v4, %v4634_v38  ;;  %v9654_v51 = vld [vmem:[%s13546_s11 + $0x1d4] sm:$0xf0]  ;;  %v8600_v28 = vld [vmem:[%s13546_s11 + $0x120] sm:$0xf]  ;;  %v9632_v54 = vld [vmem:[%s13546_s11 + $0x124] sm:$0xf0]  ;;  %v4854_v50 = vunpack.c.l.b16 %v4631_v6  ;;  %v8613_v37 = vor.u32 %v9633_v52, %v8610_v53  ;;  %v4753_v52 = vpop.permute.xlu1 %4752 }
 0x633   : > { %5146 = vmatpush.bf16.msra.mxu2 %v8617_v10  ;;  %v4855_v42 = vunpack.c.l.b16 %v4635_v31  ;;  %v9631_v1 = vld [vmem:[%s13546_s11 + $0x124] sm:$0xf]  ;;  %v8602_v17 = vld [vmem:[%s13546_s11 + $0x128] sm:$0xf0]  ;;  %v8689_v10 = vor.u32 %v9654_v51, %v8688_v55  ;;  %v8601_v7 = vor.u32 %v9632_v54, %v8600_v28  ;;  %v8680_v24 = vld [vmem:[%s13546_s11 + $0x1c0] sm:$0xf] }
 0x634   : > { %4786 = vrot.lane.b32.xlu2 %v8581_v36, %s13592_s30  ;;  %5173 = vmatpush.bf16.msrb.mxu3 %v8697_v23  ;;  %v9652_v62 = vld [vmem:[%s13546_s11 + $0x1c4] sm:$0xf0]  ;;  %v8605_v45 = vor.u32 %v9631_v1, %v8602_v17  ;;  %v8552_v61 = vld [vmem:[#allocation2] sm:$0xf]  ;;  %v8672_v4 = vld [vmem:[%s13546_s11 + $0x1b0] sm:$0xf] }
 0x635   : > { %4846 = vrot.lane.b32.xlu1 %v8597_v5, %s13591_s26  ;;  %v4859_v48 = vpack.c.b16 %v4855_v42, %v4854_v50  ;;  %v8681_v47 = vor.u32 %v9652_v62, %v8680_v24  ;;  %v9699_v5 = vld [vmem:[#allocation2 + $0x4] sm:$0xf0]  ;;  %v9650_v38 = vld [vmem:[%s13546_s11 + $0x1b4] sm:$0xf0]  ;;  %v8664_v23 = vld [vmem:[%s13546_s11 + $0x1a0] sm:$0xf] }
 0x636   : > { %5233 = vmatpush.bf16.msrb.mxu1 %v8621_v59  ;;  %v8553_v59 = vor.u32 %v9699_v5, %v8552_v61  ;;  %v8673_v16 = vor.u32 %v9650_v38, %v8672_v4  ;;  %v9661_v51 = vld [vmem:[%s13546_s11 + $0x214] sm:$0xf]  ;;  %v8722_v28 = vld [vmem:[%s13546_s11 + $0x218] sm:$0xf0]  ;;  %v9659_v1 = vld [vmem:[%s13546_s11 + $0x204] sm:$0xf] }
 0x637   : > { %5147 = vmatpush.bf16.msra.mxu2 %v8609_v11  ;;  %v9648_v11 = vld [vmem:[%s13546_s11 + $0x1a4] sm:$0xf0]  ;;  %v8725_v54 = vor.u32 %v9661_v51, %v8722_v28  ;;  %v9665_v50 = vld [vmem:[%s13546_s11 + $0x234] sm:$0xf]  ;;  %v8738_v42 = vld [vmem:[%s13546_s11 + $0x238] sm:$0xf0] }
 0x638   : > { %5174 = vmatpush.bf16.msrb.mxu3 %v8689_v10  ;;  %v4882_v36 = vsel %vm1369_vm12, %v8553_v59, %v4733_v3  ;;  %v8665_v55 = vor.u32 %v9648_v11, %v8664_v23  ;;  %v8714_v17 = vld [vmem:[%s13546_s11 + $0x208] sm:$0xf0]  ;;  %v9657_v24 = vld [vmem:[%s13546_s11 + $0x1f4] sm:$0xf]  ;;  %v8706_v62 = vld [vmem:[%s13546_s11 + $0x1f8] sm:$0xf0] }
 0x639   : > { %v4893_v53 = vsel %vm658_vm0, %v4882_v36, %v4753_v52  ;;  %v8717_v10 = vor.u32 %v9659_v1, %v8714_v17  ;;  %v4436_v5 = vld [vmem:[#allocation2 + $0x10] sm:$0xe]  ;;  %v9653_v1 = vld [vmem:[%s13546_s11 + $0x1d4] sm:$0xf]  ;;  %v8690_v17 = vld [vmem:[%s13546_s11 + $0x1d8] sm:$0xf0] }
 0x63a   : > { %5234 = vmatpush.bf16.msrb.mxu1 %v8613_v37  ;;  %v8741_v37 = vor.u32 %v9665_v50, %v8738_v42  ;;  %v8518_v3 = vrot.slane %v4436_v5, 9  ;;  %v4443_v42 = vld [vmem:[#allocation2 + $0x2c] sm:$0x1] }
 0x63b   : > { %5148 = vmatpush.bf16.msra.mxu2 %v8601_v7  ;;  %v4439_v7 = vld [vmem:[#allocation2 + $0x1c] sm:$0x1]  ;;  %v8730_v5 = vld [vmem:[%s13546_s11 + $0x228] sm:$0xf0] }
 0x63c   : > { %4866 = vrot.lane.b32.xlu2 %v4859_v48, %s13592_s30  ;;  %5175 = vmatpush.bf16.msrb.mxu3 %v8681_v47  ;;  %v4438_v48 = vld [vmem:[#allocation2 + $0x18] sm:$0xe]  ;;  %v8709_v47 = vor.u32 %v9657_v24, %v8706_v62  ;;  %v4474_v61 = vrot.slane %v4439_v7, 5  ;;  %v4441_v7 = vld [vmem:[#allocation2 + $0x24] sm:$0x1]  ;;  %v8693_v62 = vor.u32 %v9653_v1, %v8690_v17 }
 0x63d   : > { %v8519_v4 = vrot.slane %v4438_v48, 9  ;;  %v4442_v24 = vld [vmem:[#allocation2 + $0x28] sm:$0xe]  ;;  %v9700_v48 = vld [vmem:[#allocation2 + $0x14] sm:$0xf0] }
 0x63e   : > { %5235 = vmatpush.bf16.msrb.mxu1 %v8605_v45  ;;  %v4437_v45 = vld [vmem:[#allocation2 + $0x14] sm:$0x1] }
 0x63f   : > { %5257 = vmatpush.bf16.msrb.mxu2 %v8725_v54  ;;  %v4470_v38 = vrot.slane %v4437_v45, 5  ;;  %v4482_v45 = vrot.slane %v4443_v42, 5 }
 0x640   : > { %5176 = vmatpush.bf16.msrb.mxu3 %v8673_v16  ;;  %v4475_v16 = vsel %vm10098_vm6, %v8519_v4, %v4474_v61  ;;  %v9663_v61 = vld [vmem:[%s13546_s11 + $0x224] sm:$0xf]  ;;  %v8556_v4 = vld [vmem:[#allocation2 + $0x10] sm:$0xf] }
 0x641   : > { %v4471_v52 = vsel %vm10098_vm6, %v8518_v3, %v4470_v38  ;;  %v4789_v23 = vunpack.c.l.b16 %v4475_v16  ;;  %v8521_v38 = vrot.slane %v4442_v24, 9  ;;  %v8733_v3 = vor.u32 %v9663_v61, %v8730_v5  ;;  %v4445_v5 = vld [vmem:[#allocation2 + $0x34] sm:$0x1] }
 0x642   : > { %v8557_v16 = vor.u32 %v9700_v48, %v8556_v4  ;;  %v4447_v48 = vld [vmem:[#allocation2 + $0x3c] sm:$0x1]  ;;  %v4446_v4 = vld [vmem:[#allocation2 + $0x38] sm:$0xe] }
 0x643   : > { %5258 = vmatpush.bf16.msrb.mxu2 %v8717_v10 }
 0x644   : > { %5177 = vmatpush.bf16.msrb.mxu3 %v8665_v55 }
 0x647   : > { %5259 = vmatpush.bf16.msrb.mxu2 %v8709_v47  ;;  %v4440_v47 = vld [vmem:[#allocation2 + $0x20] sm:$0xe] }
 0x648   : > { %5292 = vmatpush.bf16.msra.mxu3 %v8741_v37 }
 0x64c   : > { %5293 = vmatpush.bf16.msra.mxu3 %v8733_v3  ;;  %v9701_v3 = vld [vmem:[#allocation2 + $0x24] sm:$0xf0] }
 0x64d   : > { %v4781_v6 = vpop.permute.xlu2 %4780 }
 0x64e   : > { %v4901_v31 = vsel %vm1390_vm13, %v4893_v53, %v4781_v6  ;;  %v9655_v53 = vld [vmem:[%s13546_s11 + $0x1e4] sm:$0xf]  ;;  %v8698_v6 = vld [vmem:[%s13546_s11 + $0x1e8] sm:$0xf0] }
 0x64f   : > { %5149 = vmatmul.bf16.vlgmr.msra.gmra.mxu2 %v4901_v31  ;;  %5236 = vmatmul.bf16.vlgmr.msrb.gmra.mxu1 %v4901_v31  ;;  %v8701_v11 = vor.u32 %v9655_v53, %v8698_v6  ;;  %v4788_v31 = vunpack.c.l.b16 %v4471_v52  ;;  %v4483_v52 = vsel %vm10098_vm6, %v8521_v38, %v4482_v45 }
 0x650   : > { %v4791_v42 = vunpack.c.l.b16 %v4483_v52  ;;  %v9647_v52 = vld [vmem:[%s13546_s11 + $0x1a4] sm:$0xf] }
 0x651   : > { %5260 = vmatpush.bf16.msrb.mxu2 %v8701_v11  ;;  %v4796_v55 = vpack.c.b16 %v4789_v23, %v4788_v31 }
 0x655   : > { %5261 = vmatpush.bf16.msrb.mxu2 %v8693_v62 }
 0x665   : > { %v4861_v59 = vpop.permute.xlu2 %4860 }
 0x66c   : > { %v4813_v36 = vpop.permute.xlu0 %4812 }
 0x66d   : > { %v4783_v51 = vpop.permute.xlu2 %4782  ;;  %v4914_v54 = vsel %vm1369_vm12, %v4796_v55, %v4813_v36  ;;  %v8520_v36 = vrot.slane %v4440_v47, 9  ;;  %v9649_v47 = vld [vmem:[%s13546_s11 + $0x1b4] sm:$0xf] }
 0x674   : > { %v4735_v28 = vpop.permute.xlu0 %4734 }
 0x675   : > { %v4841_v50 = vpop.permute.xlu1 %4840  ;;  %v4885_v6 = vsel %vm1369_vm12, %v8557_v16, %v4735_v28  ;;  %v4490_v16 = vrot.slane %v4447_v48, 5 }
 0x676   : > { %v4925_v37 = vsel %vm658_vm0, %v4914_v54, %v4841_v50  ;;  %v4863_v11 = vpop.permute.xlu2 %4862  ;;  %v9651_v54 = vld [vmem:[%s13546_s11 + $0x1c4] sm:$0xf]  ;;  %v8682_v50 = vld [vmem:[%s13546_s11 + $0x1c8] sm:$0xf0] }
 0x677   : > { %v12307_v10 = vsel %vm1390_vm13, %v4925_v37, %v4861_v59  ;;  %v4478_v59 = vrot.slane %v4441_v7, 5  ;;  %v8685_v1 = vor.u32 %v9651_v54, %v8682_v50 }
 0x678   : > { %5178 = vmatmul.bf16.vlgmr.msrb.gmra.mxu3 %v12307_v10 }
 0x679   : > { %v4479_v31 = vsel %vm10098_vm6, %v8520_v36, %v4478_v59  ;;  %5262 = vmatpush.bf16.msrb.mxu2 %v8685_v1  ;;  %v4444_v36 = vld [vmem:[#allocation2 + $0x30] sm:$0xe] }
 0x67a   : > { %v4790_v28 = vunpack.c.l.b16 %v4479_v31  ;;  %v8522_v54 = vrot.slane %v4444_v36, 9 }
 0x67c   : > { %v4797_v17 = vpack.c.b16 %v4791_v42, %v4790_v28 }
 0x67d   : > { %v4815_v53 = vpop.permute.xlu0 %4814 }
 0x67e   : > { %v4755_v23 = vpop.permute.xlu1 %4754  ;;  %v4917_v24 = vsel %vm1369_vm12, %v4797_v17, %v4815_v53  ;;  %v4785_v38 = vpop.permute.xlu2 %4784  ;;  %v8666_v53 = vld [vmem:[%s13546_s11 + $0x1a8] sm:$0xf0] }
 0x67f   : > { %v4895_v55 = vsel %vm658_vm0, %v4885_v6, %v4755_v23  ;;  %v8560_v6 = vld [vmem:[#allocation2 + $0x20] sm:$0xf]  ;;  %v4486_v23 = vrot.slane %v4445_v5, 5  ;;  %v8669_v31 = vor.u32 %v9647_v52, %v8666_v53 }
 0x680   : > { %v4904_v37 = vsel %vm1390_vm13, %v4895_v55, %v4783_v51  ;;  %v8674_v51 = vld [vmem:[%s13546_s11 + $0x1b8] sm:$0xf0]  ;;  %v8561_v55 = vor.u32 %v9701_v3, %v8560_v6 }
 0x681   : > { %5154 = vmatmul.bf16.gmra.mxu2 %v4904_v37  ;;  %5241 = vmatmul.bf16.gmra.mxu1 %v4904_v37  ;;  %v8677_v59 = vor.u32 %v9649_v47, %v8674_v51  ;;  %v4487_v1 = vsel %vm10098_vm6, %v8522_v54, %v4486_v23  ;;  %v4649_v47 = vld [vmem:[#allocation2 + $0x54] sm:$0x3]  ;;  %v4650_v51 = vld [vmem:[#allocation2 + $0x58] sm:$0xc] }
 0x682   : > { %v4792_v48 = vunpack.c.l.b16 %v4487_v1  ;;  %v8549_v3 = vrot.slane %v4650_v51, 10 }
 0x683   : > { %5263 = vmatpush.bf16.msrb.mxu2 %v8677_v59  ;;  %v4694_v59 = vrot.slane %v4649_v47, 6 }
 0x685   : > { %v4737_v7 = vpop.permute.xlu0 %4736 }
 0x686   : > { %v4843_v62 = vpop.permute.xlu1 %4842  ;;  %v4888_v42 = vsel %vm1369_vm12, %v8561_v55, %v4737_v7  ;;  %v4865_v5 = vpop.permute.xlu2 %4864 }
 0x687   : > { %v4927_v45 = vsel %vm658_vm0, %v4917_v24, %v4843_v62  ;;  %5264 = vmatpush.bf16.msrb.mxu2 %v8669_v31 }
 0x688   : > { %v12338_v61 = vsel %vm1390_vm13, %v4927_v45, %v4863_v11  ;;  %v8523_v11 = vrot.slane %v4446_v4, 9  ;;  %v4648_v45 = vld [vmem:[#allocation2 + $0x50] sm:$0xc]  ;;  %v4651_v4 = vld [vmem:[#allocation2 + $0x5c] sm:$0x3] }
 0x689   : > { %5183 = vmatmul.bf16.gmra.mxu3 %v12338_v61  ;;  %v8548_v7 = vrot.slane %v4648_v45, 10  ;;  %v4698_v36 = vrot.slane %v4651_v4, 6 }
 0x68a   : > { %v4491_v50 = vsel %vm10098_vm6, %v8523_v11, %v4490_v16 }
 0x68b   : > { %v4793_v24 = vunpack.c.l.b16 %v4491_v50  ;;  %v4695_v52 = vsel %vm10145_vm10, %v8548_v7, %v4694_v59  ;;  %v4699_v23 = vsel %vm10145_vm10, %v8549_v3, %v4698_v36  ;;  %v4450_v50 = vld [vmem:[#allocation2 + $0x48] sm:$0xe] }
 0x68c   : > { %v4874_v11 = vunpack.c.l.b16 %v4695_v52  ;;  %v4875_v55 = vunpack.c.l.b16 %v4699_v23 }
 0x68d   : > { %v4798_v16 = vpack.c.b16 %v4793_v24, %v4792_v48  ;;  %v8525_v48 = vrot.slane %v4450_v50, 9 }
 0x68e   : > { %v4817_v28 = vpop.permute.xlu0 %4816  ;;  %v12361_v24 = vpack.c.b16 %v4875_v55, %v4874_v11  ;;  %v4787_v51 = vpop.permute.xlu2 %4786 }
 0x68f   : > { %v4757_v37 = vpop.permute.xlu1 %4756  ;;  %v4920_v53 = vsel %vm1369_vm12, %v4798_v16, %v4817_v28  ;;  %v4448_v28 = vld [vmem:[#allocation2 + $0x40] sm:$0xe] }
 0x690   : > { %v4897_v17 = vsel %vm658_vm0, %v4888_v42, %v4757_v37  ;;  %v4449_v42 = vld [vmem:[#allocation2 + $0x44] sm:$0x1]  ;;  %v9702_v37 = vld [vmem:[#allocation2 + $0x34] sm:$0xf0]  ;;  %8745 = vmatmul.msk.bf16.gmra.mxu0 %vm1369_vm12, %v12361_v24  ;;  %v8524_v4 = vrot.slane %v4448_v28, 9 }
 0x691   : > { %v4907_v62 = vsel %vm1390_vm13, %v4897_v17, %v4785_v38  ;;  %v4451_v38 = vld [vmem:[#allocation2 + $0x4c] sm:$0x1]  ;;  %v4494_v45 = vrot.slane %v4449_v42, 5  ;;  %v8808_v42 = vld [vmem:[%s13548_s13 + $0x170] sm:$0xf] }
 0x692   : > { %5159 = vmatmul.bf16.gmra.mxu2 %v4907_v62  ;;  %5246 = vmatmul.bf16.gmra.mxu1 %v4907_v62  ;;  %v4498_v17 = vrot.slane %v4451_v38, 5  ;;  %v8564_v62 = vld [vmem:[#allocation2 + $0x30] sm:$0xf]  ;;  %v9679_v28 = vld [vmem:[%s13548_s13 + $0x164] sm:$0xf] }
 0x693   : > { %v8565_v47 = vor.u32 %v9702_v37, %v8564_v62  ;;  %v4495_v3 = vsel %vm10098_vm6, %v8524_v4, %v4494_v45  ;;  %v9682_v37 = vld [vmem:[%s13548_s13 + $0x174] sm:$0xf0]  ;;  %v8802_v62 = vld [vmem:[%s13548_s13 + $0x168] sm:$0xf0]  ;;  %v8792_v45 = vld [vmem:[%s13548_s13 + $0x150] sm:$0xf] }
 0x694   : > { %v9677_v4 = vld [vmem:[%s13548_s13 + $0x154] sm:$0xf] }
 0x696   : > { %v4739_v1 = vpop.permute.xlu0 %4738  ;;  %v4867_v23 = vpop.permute.xlu2 %4866 }
 0x697   : > { %v4845_v6 = vpop.permute.xlu1 %4844  ;;  %v4891_v7 = vsel %vm1369_vm12, %v8565_v47, %v4739_v1  ;;  %v8809_v1 = vor.u32 %v9682_v37, %v8808_v42  ;;  %v9678_v47 = vld [vmem:[%s13548_s13 + $0x154] sm:$0xf0]  ;;  %v9671_v42 = vld [vmem:[%s13548_s13 + $0x124] sm:$0xf]  ;;  %v8770_v37 = vld [vmem:[%s13548_s13 + $0x128] sm:$0xf0] }
 0x698   : > { %v4929_v31 = vsel %vm658_vm0, %v4920_v53, %v4845_v6  ;;  %v4794_v53 = vunpack.c.l.b16 %v4495_v3  ;;  %v9676_v3 = vld [vmem:[%s13548_s13 + $0x144] sm:$0xf0] }
 0x699   : > { %v4939_v54 = vsel %vm1390_vm13, %v4929_v31, %v4865_v5  ;;  %v4499_v5 = vsel %vm10098_vm6, %v8525_v48, %v4498_v17  ;;  %5504 = vmatpush.bf16.msrb.mxu0 %v8809_v1  ;;  %v8773_v1 = vor.u32 %v9671_v42, %v8770_v37  ;;  %v8858_v42 = vld [vmem:[%s13548_s13 + $0x1d8] sm:$0xf0] }
 0x69a   : > { %5188 = vmatmul.bf16.gmra.mxu3 %v4939_v54  ;;  %v4795_v36 = vunpack.c.l.b16 %v4499_v5  ;;  %v8794_v5 = vld [vmem:[%s13548_s13 + $0x158] sm:$0xf0] }
 0x69c   : > { %v4799_v38 = vpack.c.b16 %v4795_v36, %v4794_v53  ;;  %v9675_v36 = vld [vmem:[%s13548_s13 + $0x144] sm:$0xf] }
 0x69f   : > { %v4759_v59 = vpop.permute.xlu1 %4758  ;;  %v4819_v6 = vpop.permute.xlu0 %4818 }
 0x6a0   : > { %v4899_v16 = vsel %vm658_vm0, %v4891_v7, %v4759_v59  ;;  %v4923_v11 = vsel %vm1369_vm12, %v4799_v38, %v4819_v6  ;;  %v8793_v7 = vor.u32 %v9678_v47, %v8792_v45  ;;  %v8784_v59 = vld [vmem:[%s13548_s13 + $0x140] sm:$0xf]  ;;  %v8776_v6 = vld [vmem:[%s13548_s13 + $0x130] sm:$0xf]  ;;  %v9674_v38 = vld [vmem:[%s13548_s13 + $0x134] sm:$0xf0] }
 0x6a1   : > { %v4910_v52 = vsel %vm1390_vm13, %v4899_v16, %v4787_v51  ;;  %v8805_v51 = vor.u32 %v9679_v28, %v8802_v62  ;;  %v8797_v16 = vor.u32 %v9677_v4, %v8794_v5  ;;  %v8762_v28 = vld [vmem:[%s13548_s13 + $0x118] sm:$0xf0]  ;;  %v9668_v62 = vld [vmem:[%s13548_s13 + $0x104] sm:$0xf0]  ;;  %v9667_v45 = vld [vmem:[%s13548_s13 + $0x104] sm:$0xf] }
 0x6a2   : > { %5164 = vmatmul.bf16.gmra.mxu2 %v4910_v52  ;;  %5251 = vmatmul.bf16.gmra.mxu1 %v4910_v52  ;;  %v8786_v52 = vld [vmem:[%s13548_s13 + $0x148] sm:$0xf0]  ;;  %v8874_v5 = vld [vmem:[%s13548_s13 + $0x1f8] sm:$0xf0] }
 0x6a3   : > { %v8789_v53 = vor.u32 %v9675_v36, %v8786_v52  ;;  %v8754_v47 = vld [vmem:[%s13548_s13 + $0x108] sm:$0xf0]  ;;  %v9698_v36 = vld [vmem:[%s13548_s13 + $0x1f4] sm:$0xf0]  ;;  %v9695_v52 = vld [vmem:[%s13548_s13 + $0x1e4] sm:$0xf] }
 0x6a7   : > { %v4847_v31 = vpop.permute.xlu1 %4846 }
 0x6a8   : > { %v4931_v55 = vsel %vm658_vm0, %v4923_v11, %v4847_v31  ;;  %v8777_v11 = vor.u32 %v9674_v38, %v8776_v6  ;;  %v8778_v31 = vld [vmem:[%s13548_s13 + $0x138] sm:$0xf0]  ;;  %v8866_v6 = vld [vmem:[%s13548_s13 + $0x1e8] sm:$0xf0] }
 0x6a9   : > { %v4942_v50 = vsel %vm1390_vm13, %v4931_v55, %v4867_v23  ;;  %v9673_v23 = vld [vmem:[%s13548_s13 + $0x134] sm:$0xf]  ;;  %v9672_v55 = vld [vmem:[%s13548_s13 + $0x124] sm:$0xf0]  ;;  %v8869_v38 = vor.u32 %v9695_v52, %v8866_v6 }
 0x6aa   : > { %5193 = vmatmul.bf16.gmra.mxu3 %v4942_v50 }
 0x6b2   : > { %5265 = vmatmul.bf16.vlgmr.msrb.gmra.mxu2 %v12307_v10  ;;  %v9681_v10 = vld [vmem:[%s13548_s13 + $0x174] sm:$0xf] }
 0x6ba   : > { %8746 = vmatmul.msk.bf16.vlgmr.msra.gmra.mxu3 %vm1369_vm12, %v12025_v2  ;;  %v8810_v2 = vld [vmem:[%s13548_s13 + $0x178] sm:$0xf0] }
 0x6bb   : > { %v8813_v17 = vor.u32 %v9681_v10, %v8810_v2  ;;  %v8760_v2 = vld [vmem:[%s13548_s13 + $0x110] sm:$0xf] }
 0x6bd   : > { %5562 = vmatpush.bf16.msra.mxu2 %v8813_v17 }
 0x6c1   : > { %5563 = vmatpush.bf16.msra.mxu2 %v8805_v51  ;;  %v9697_v51 = vld [vmem:[%s13548_s13 + $0x1f4] sm:$0xf] }
 0x6c2   : > { %5270 = vmatmul.bf16.gmra.mxu2 %v12338_v61  ;;  %v9680_v61 = vld [vmem:[%s13548_s13 + $0x164] sm:$0xf0] }
 0x6c5   : > { %5564 = vmatpush.bf16.msra.mxu2 %v8797_v16  ;;  %v8872_v16 = vld [vmem:[%s13548_s13 + $0x1f0] sm:$0xf] }
 0x6c9   : > { %5565 = vmatpush.bf16.msra.mxu2 %v8789_v53  ;;  %v8873_v53 = vor.u32 %v9698_v36, %v8872_v16 }
 0x6ca   : > { %8747 = vmatmul.msk.bf16.gmra.mxu3 %vm1369_vm12, %v12078_v32  ;;  %v8800_v32 = vld [vmem:[%s13548_s13 + $0x160] sm:$0xf] }
 0x6cb   : > { %v8801_v48 = vor.u32 %v9680_v61, %v8800_v32  ;;  %v9670_v32 = vld [vmem:[%s13548_s13 + $0x114] sm:$0xf0]  ;;  %v9669_v61 = vld [vmem:[%s13548_s13 + $0x114] sm:$0xf]  ;;  %5533 = vmatpush.bf16.msra.mxu1 %v8873_v53  ;;  %v9692_v53 = vld [vmem:[%s13548_s13 + $0x1c4] sm:$0xf0] }
 0x6cc   : > { %v8761_v17 = vor.u32 %v9670_v32, %v8760_v2 }
 0x6cd   : > { %5505 = vmatpush.bf16.msrb.mxu0 %v8801_v48  ;;  %v8765_v48 = vor.u32 %v9669_v61, %v8762_v28  ;;  %v9694_v28 = vld [vmem:[%s13548_s13 + $0x1d4] sm:$0xf0] }
 0x6d1   : > { %5506 = vmatpush.bf16.msrb.mxu0 %v8793_v7  ;;  %v5208_v7 = vpop.f32.mrf.mxu0 }
 0x6d2   : > { %5275 = vmatmul.bf16.gmra.mxu2 %v4939_v54  ;;  %v8785_v54 = vor.u32 %v9676_v3, %v8784_v59  ;;  %v8757_v59 = vor.u32 %v9667_v45, %v8754_v47  ;;  %v8877_v3 = vor.u32 %v9697_v51, %v8874_v5 }
 0x6d4   : > { %5591 = vmatpush.bf16.msrb.mxu3 %v8877_v3 }
 0x6d5   : > { %5507 = vmatpush.bf16.msrb.mxu0 %v8785_v54  ;;  %v5150_v54 = vpop.f32.mrf.mxu2 }
 0x6d8   : > { %5592 = vmatpush.bf16.msrb.mxu3 %v8869_v38  ;;  %v9689_v38 = vld [vmem:[%s13548_s13 + $0x1b4] sm:$0xf] }
 0x6d9   : > { %5508 = vmatpush.bf16.msrb.mxu0 %v8777_v11  ;;  %v8864_v11 = vld [vmem:[%s13548_s13 + $0x1e0] sm:$0xf] }
 0x6da   : > { %8748 = vmatmul.msk.bf16.gmra.mxu3 %vm1369_vm12, %v12169_v41  ;;  %v8768_v41 = vld [vmem:[%s13548_s13 + $0x120] sm:$0xf] }
 0x6db   : > { %v8769_v10 = vor.u32 %v9672_v55, %v8768_v41  ;;  %v9693_v41 = vld [vmem:[%s13548_s13 + $0x1d4] sm:$0xf]  ;;  %v12511_v55 = vld [vmem:[%s13547_s12 + $0x2] sm:$0x3] }
 0x6dc   : > { %v12517_v37 = vperm.slane %v12511_v55, 0 }
 0x6dd   : > { %5509 = vmatpush.bf16.msrb.mxu0 %v8769_v10  ;;  %v8861_v10 = vor.u32 %v9693_v41, %v8858_v42 }
 0x6de   : > { %v5151_v32 = vadd.f32 %v5150_v54, %v12517_v37  ;;  %v8848_v54 = vld [vmem:[%s13548_s13 + $0x1c0] sm:$0xf] }
 0x6df   : > { %5593 = vmatpush.bf16.msrb.mxu3 %v8861_v10  ;;  %v8849_v6 = vor.u32 %v9692_v53, %v8848_v54  ;;  %v9685_v54 = vld [vmem:[%s13548_s13 + $0x194] sm:$0xf] }
 0x6e1   : > { %5510 = vmatpush.bf16.msrb.mxu0 %v8761_v17  ;;  %v8856_v17 = vld [vmem:[%s13548_s13 + $0x1d0] sm:$0xf] }
 0x6e2   : > { %5280 = vmatmul.bf16.gmra.mxu2 %v4942_v50  ;;  %v8781_v50 = vor.u32 %v9673_v23, %v8778_v31  ;;  %v5210_v23 = vpop.f32.mrf.mxu0  ;;  %v9696_v31 = vld [vmem:[%s13548_s13 + $0x1e4] sm:$0xf0] }
 0x6e4   : > { %5566 = vmatpush.bf16.msra.mxu2 %v8781_v50  ;;  %v8865_v50 = vor.u32 %v9696_v31, %v8864_v11 }
 0x6e6   : > { %5534 = vmatpush.bf16.msra.mxu1 %v8865_v50 }
 0x6e8   : > { %5567 = vmatpush.bf16.msra.mxu2 %v8773_v1  ;;  %v5152_v1 = vpop.f32.mrf.mxu2 }
 0x6e9   : > { %v5153_v47 = vadd.f32 %v5152_v1, %v12517_v37  ;;  %v8840_v1 = vld [vmem:[%s13548_s13 + $0x1b0] sm:$0xf] }
 0x6ea   : > { %8749 = vmatmul.msk.bf16.gmra.mxu3 %vm1369_vm12, %v12361_v24  ;;  %v8752_v24 = vld [vmem:[%s13548_s13 + $0x100] sm:$0xf]  ;;  %v5213_v45 = vpop.f32.mrf.mxu0 }
 0x6eb   : > { %v8753_v4 = vor.u32 %v9668_v62, %v8752_v24  ;;  %v8857_v24 = vor.u32 %v9694_v28, %v8856_v17  ;;  %v9691_v62 = vld [vmem:[%s13548_s13 + $0x1c4] sm:$0xf]  ;;  %v8834_v17 = vld [vmem:[%s13548_s13 + $0x1a8] sm:$0xf0] }
 0x6ec   : > { %5568 = vmatpush.bf16.msra.mxu2 %v8765_v48  ;;  %v8850_v48 = vld [vmem:[%s13548_s13 + $0x1c8] sm:$0xf0] }
 0x6ed   : > { %5511 = vmatpush.bf16.msrb.mxu0 %v8753_v4  ;;  %v8853_v51 = vor.u32 %v9691_v62, %v8850_v48  ;;  %5535 = vmatpush.bf16.msra.mxu1 %v8857_v24 }
 0x6ef   : > { %5594 = vmatpush.bf16.msrb.mxu3 %v8853_v51 }
 0x6f0   : > { %5569 = vmatpush.bf16.msra.mxu2 %v8757_v59 }
 0x6f1   : > { %5536 = vmatpush.bf16.msra.mxu1 %v8849_v6 }
 0x6f2   : > { %v5215_v50 = vpop.f32.mrf.mxu0 }
 0x6fb   : > { %v5179_v2 = vpop.f32.mrf.mxu3 }
 0x6fc   : > { %v5180_v61 = vadd.f32 %v5179_v2, %v5151_v32  ;;  %v9690_v2 = vld [vmem:[%s13548_s13 + $0x1b4] sm:$0xf0] }
 0x6fd   : > { %v8841_v32 = vor.u32 %v9690_v2, %v8840_v1 }
 0x6fe   : > { %v5209_v59 = vadd.f32 %v5208_v7, %v5180_v61  ;;  %v8842_v7 = vld [vmem:[%s13548_s13 + $0x1b8] sm:$0xf0]  ;;  %v9687_v61 = vld [vmem:[%s13548_s13 + $0x1a4] sm:$0xf] }
 0x6ff   : > { %v8845_v11 = vor.u32 %v9689_v38, %v8842_v7  ;;  %v8837_v24 = vor.u32 %v9687_v61, %v8834_v17  ;;  %5537 = vmatpush.bf16.msra.mxu1 %v8841_v32 }
 0x700   : > { %v5315_v36 = vmax.f32 %v5209_v59, 0.0 }
 0x701   : > { %5595 = vmatpush.bf16.msrb.mxu3 %v8845_v11  ;;  %v8824_v11 = vld [vmem:[%s13548_s13 + $0x190] sm:$0xf] }
 0x703   : > { %v5181_v5 = vpop.f32.mrf.mxu3 }
 0x704   : > { %v5155_v4 = vpop.f32.mrf.mxu2  ;;  %v5182_v3 = vadd.f32 %v5181_v5, %v5153_v47 }
 0x705   : > { %v5156_v42 = vadd.f32 %v5155_v4, %v12517_v37  ;;  %5596 = vmatpush.bf16.msrb.mxu3 %v8837_v24  ;;  %v5218_v4 = vpop.f32.mrf.mxu0 }
 0x706   : > { %v5211_v16 = vadd.f32 %v5210_v23, %v5182_v3 }
 0x708   : > { %v5317_v52 = vmax.f32 %v5211_v16, 0.0  ;;  %v8832_v16 = vld [vmem:[%s13548_s13 + $0x1a0] sm:$0xf] }
 0x70a   : > { %v5331_v23 = vpack.c.bf16 %v5317_v52, %v5315_v36  ;;  %v9688_v36 = vld [vmem:[%s13548_s13 + $0x1a4] sm:$0xf0] }
 0x70b   : > { %v8833_v52 = vor.u32 %v9688_v36, %v8832_v16 }
 0x70c   : > { %v5157_v31 = vpop.f32.mrf.mxu2  ;;  %v5184_v41 = vpop.f32.mrf.mxu3  ;;  %5512 = vmatmul.bf16.vlgmr.msrb.gmra.mxu0 %v5331_v23  ;;  %5570 = vmatmul.bf16.vlgmr.msra.gmra.mxu2 %v5331_v23 }
 0x70d   : > { %v5185_v10 = vadd.f32 %v5184_v41, %v5156_v42  ;;  %v5158_v28 = vadd.f32 %v5157_v31, %v12517_v37  ;;  %5538 = vmatpush.bf16.msra.mxu1 %v8833_v52  ;;  %v9686_v31 = vld [vmem:[%s13548_s13 + $0x194] sm:$0xf0]  ;;  %v9683_v41 = vld [vmem:[%s13548_s13 + $0x184] sm:$0xf]  ;;  %v8818_v42 = vld [vmem:[%s13548_s13 + $0x188] sm:$0xf0] }
 0x70e   : > { %v8821_v2 = vor.u32 %v9683_v41, %v8818_v42 }
 0x70f   : > { %v5214_v47 = vadd.f32 %v5213_v45, %v5185_v10  ;;  %v8826_v45 = vld [vmem:[%s13548_s13 + $0x198] sm:$0xf0]  ;;  %v5220_v10 = vpop.f32.mrf.mxu0 }
 0x710   : > { %v8829_v6 = vor.u32 %v9685_v54, %v8826_v45 }
 0x711   : > { %v5319_v59 = vmax.f32 %v5214_v47, 0.0 }
 0x712   : > { %5597 = vmatpush.bf16.msrb.mxu3 %v8829_v6 }
 0x714   : > { %v5186_v48 = vpop.f32.mrf.mxu3 }
 0x715   : > { %v5160_v62 = vpop.f32.mrf.mxu2  ;;  %v5187_v51 = vadd.f32 %v5186_v48, %v5158_v28  ;;  %v5237_v48 = vpop.f32.mrf.mxu1 }
 0x716   : > { %v5161_v23 = vadd.f32 %v5160_v62, %v12517_v37  ;;  %5598 = vmatpush.bf16.msrb.mxu3 %v8821_v2 }
 0x717   : > { %v5216_v5 = vadd.f32 %v5215_v50, %v5187_v51  ;;  %v8825_v50 = vor.u32 %v9686_v31, %v8824_v11 }
 0x719   : > { %v5321_v3 = vmax.f32 %v5216_v5, 0.0  ;;  %5539 = vmatpush.bf16.msra.mxu1 %v8825_v50  ;;  %v5223_v5 = vpop.f32.mrf.mxu0 }
 0x71b   : > { %v5333_v53 = vpack.c.bf16 %v5321_v3, %v5319_v59  ;;  %v8816_v59 = vld [vmem:[%s13548_s13 + $0x180] sm:$0xf]  ;;  %v9684_v3 = vld [vmem:[%s13548_s13 + $0x184] sm:$0xf0] }
 0x71c   : > { %v8817_v16 = vor.u32 %v9684_v3, %v8816_v59 }
 0x71d   : > { %v5162_v38 = vpop.f32.mrf.mxu2  ;;  %v5189_v7 = vpop.f32.mrf.mxu3  ;;  %5517 = vmatmul.bf16.gmra.mxu0 %v5333_v53  ;;  %5575 = vmatmul.bf16.gmra.mxu2 %v5333_v53 }
 0x71e   : > { %v5190_v1 = vadd.f32 %v5189_v7, %v5161_v23  ;;  %v5163_v32 = vadd.f32 %v5162_v38, %v12517_v37  ;;  %5540 = vmatpush.bf16.msra.mxu1 %v8817_v16  ;;  %v5239_v53 = vpop.f32.mrf.mxu1 }
 0x720   : > { %v5219_v28 = vadd.f32 %v5218_v4, %v5190_v1 }
 0x721   : > { %v5225_v38 = vpop.f32.mrf.mxu0 }
 0x722   : > { %v5323_v47 = vmax.f32 %v5219_v28, 0.0 }
 0x725   : > { %v5165_v61 = vpop.f32.mrf.mxu2  ;;  %v5191_v17 = vpop.f32.mrf.mxu3 }
 0x726   : > { %v5192_v24 = vadd.f32 %v5191_v17, %v5163_v32  ;;  %v5166_v4 = vadd.f32 %v5165_v61, %v12517_v37  ;;  %v5242_v1 = vpop.f32.mrf.mxu1 }
 0x728   : > { %v5221_v62 = vadd.f32 %v5220_v10, %v5192_v24  ;;  %v4946_v10 = vperm.slane %v12511_v55, 1 }
 0x72a   : > { %v5325_v51 = vmax.f32 %v5221_v62, 0.0  ;;  %v5238_v61 = vadd.f32 %v5237_v48, %v4946_v10  ;;  %v5240_v28 = vadd.f32 %v5239_v53, %v4946_v10 }
 0x72c   : > { %v5335_v36 = vpack.c.bf16 %v5325_v51, %v5323_v47 }
 0x72d   : > { %v5167_v52 = vpop.f32.mrf.mxu2  ;;  %v5194_v54 = vpop.f32.mrf.mxu3 }
 0x72e   : > { %5522 = vmatmul.bf16.gmra.mxu0 %v5335_v36  ;;  %5580 = vmatmul.bf16.gmra.mxu2 %v5335_v36  ;;  %v5195_v45 = vadd.f32 %v5194_v54, %v5166_v4  ;;  %v5168_v6 = vadd.f32 %v5167_v52, %v12517_v37  ;;  %v5244_v59 = vpop.f32.mrf.mxu1  ;;  %v5243_v54 = vadd.f32 %v5242_v1, %v4946_v10 }
 0x730   : > { %v5224_v11 = vadd.f32 %v5223_v5, %v5195_v45  ;;  %v5245_v45 = vadd.f32 %v5244_v59, %v4946_v10 }
 0x732   : > { %v5327_v50 = vmax.f32 %v5224_v11, 0.0 }
 0x735   : > { %v5196_v7 = vpop.f32.mrf.mxu3  ;;  %v5266_v23 = vpop.f32.mrf.mxu2 }
 0x736   : > { %v5197_v31 = vadd.f32 %v5196_v7, %v5168_v6  ;;  %v5267_v24 = vadd.f32 %v5266_v23, %v5238_v61  ;;  %v5247_v4 = vpop.f32.mrf.mxu1 }
 0x738   : > { %v5226_v41 = vadd.f32 %v5225_v38, %v5197_v31 }
 0x73a   : > { %v5329_v42 = vmax.f32 %v5226_v41, 0.0 }
 0x73c   : > { %v5337_v2 = vpack.c.bf16 %v5329_v42, %v5327_v50 }
 0x73d   : > { %v5268_v32 = vpop.f32.mrf.mxu2  ;;  %v5295_v17 = vpop.f32.mrf.mxu3 }
 0x73e   : > { %5527 = vmatmul.bf16.gmra.mxu0 %v5337_v2  ;;  %5585 = vmatmul.bf16.gmra.mxu2 %v5337_v2  ;;  %v5269_v37 = vadd.f32 %v5268_v32, %v5240_v28  ;;  %v5296_v62 = vadd.f32 %v5295_v17, %v5267_v24  ;;  %v5249_v50 = vpop.f32.mrf.mxu1  ;;  %v5248_v32 = vadd.f32 %v5247_v4, %v4946_v10 }
 0x73f   : > { %v5250_v17 = vadd.f32 %v5249_v50, %v4946_v10  ;;  %v9724_v50 = vld [vmem:[%s13544_s9 + $0x168] sm:$0xff] }
 0x740   : > { %v5316_v3 = vmax.f32 %v5296_v62, 0.0 }
 0x745   : > { %v5271_v47 = vpop.f32.mrf.mxu2  ;;  %v5297_v51 = vpop.f32.mrf.mxu3 }
 0x746   : > { %v5298_v5 = vadd.f32 %v5297_v51, %v5269_v37  ;;  %v5272_v6 = vadd.f32 %v5271_v47, %v5243_v54  ;;  %v5252_v24 = vpop.f32.mrf.mxu1 }
 0x748   : > { %v5318_v16 = vmax.f32 %v5298_v5, 0.0 }
 0x74a   : > { %v5332_v36 = vpack.c.bf16 %v5318_v16, %v5316_v3 }
 0x74c   : > { %5541 = vmatmul.bf16.vlgmr.msra.gmra.mxu1 %v5332_v36  ;;  %5599 = vmatmul.bf16.vlgmr.msrb.gmra.mxu3 %v5332_v36  ;;  %v5253_v36 = vadd.f32 %v5252_v24, %v4946_v10  ;;  %v9720_v24 = vld [vmem:[%s13544_s9 + $0x148] sm:$0xff] }
 0x74d   : > { %v5273_v55 = vpop.f32.mrf.mxu2  ;;  %v5300_v52 = vpop.f32.mrf.mxu3 }
 0x74e   : > { %v5274_v48 = vadd.f32 %v5273_v55, %v5245_v45  ;;  %v5301_v53 = vadd.f32 %v5300_v52, %v5272_v6  ;;  %v5254_v16 = vpop.f32.mrf.mxu1 }
 0x74f   : > { %v5255_v52 = vadd.f32 %v5254_v16, %v4946_v10  ;;  %v9717_v10 = vld [vmem:[%s13544_s9 + $0x130] sm:$0xff] }
 0x750   : > { %v5320_v11 = vmax.f32 %v5301_v53, 0.0 }
 0x755   : > { %v5276_v38 = vpop.f32.mrf.mxu2  ;;  %v5302_v7 = vpop.f32.mrf.mxu3 }
 0x756   : > { %v5303_v23 = vadd.f32 %v5302_v7, %v5274_v48  ;;  %v5277_v61 = vadd.f32 %v5276_v38, %v5248_v32  ;;  %v9714_v32 = vld [vmem:[%s13544_s9 + $0x118] sm:$0xff] }
 0x758   : > { %v5322_v31 = vmax.f32 %v5303_v23, 0.0  ;;  %v9718_v23 = vld [vmem:[%s13544_s9 + $0x138] sm:$0xff] }
 0x759   : > { %5868 = vmatpush.bf16.msra.mxu0 %v9718_v23 }
 0x75a   : > { %v5334_v41 = vpack.c.bf16 %v5322_v31, %v5320_v11  ;;  %v9726_v11 = vld [vmem:[%s13544_s9 + $0x178] sm:$0xff]  ;;  %v9725_v31 = vld [vmem:[%s13544_s9 + $0x170] sm:$0xff] }
 0x75b   : > { %5897 = vmatpush.bf16.msrb.mxu1 %v9726_v11 }
 0x75c   : > { %5546 = vmatmul.bf16.gmra.mxu1 %v5334_v41  ;;  %5604 = vmatmul.bf16.gmra.mxu3 %v5334_v41  ;;  %v9716_v41 = vld [vmem:[%s13544_s9 + $0x128] sm:$0xff] }
 0x75d   : > { %v5278_v42 = vpop.f32.mrf.mxu2  ;;  %v5305_v2 = vpop.f32.mrf.mxu3  ;;  %5869 = vmatpush.bf16.msra.mxu0 %v9717_v10 }
 0x75e   : > { %v5279_v1 = vadd.f32 %v5278_v42, %v5250_v17  ;;  %v5306_v28 = vadd.f32 %v5305_v2, %v5277_v61  ;;  %v9715_v42 = vld [vmem:[%s13544_s9 + $0x120] sm:$0xff]  ;;  %v9722_v17 = vld [vmem:[%s13544_s9 + $0x158] sm:$0xff]  ;;  %v9713_v61 = vld [vmem:[%s13544_s9 + $0x110] sm:$0xff] }
 0x75f   : > { %5898 = vmatpush.bf16.msrb.mxu1 %v9725_v31  ;;  %v9723_v2 = vld [vmem:[%s13544_s9 + $0x160] sm:$0xff] }
 0x760   : > { %v5324_v51 = vmax.f32 %v5306_v28, 0.0  ;;  %v9712_v28 = vld [vmem:[%s13544_s9 + $0x108] sm:$0xff] }
 0x761   : > { %5870 = vmatpush.bf16.msra.mxu0 %v9716_v41 }
 0x763   : > { %5899 = vmatpush.bf16.msrb.mxu1 %v9724_v50 }
 0x765   : > { %v5307_v37 = vpop.f32.mrf.mxu3  ;;  %v5281_v47 = vpop.f32.mrf.mxu2  ;;  %5871 = vmatpush.bf16.msra.mxu0 %v9715_v42 }
 0x766   : > { %v5308_v62 = vadd.f32 %v5307_v37, %v5279_v1  ;;  %v5282_v54 = vadd.f32 %v5281_v47, %v5253_v36  ;;  %v9721_v1 = vld [vmem:[%s13544_s9 + $0x150] sm:$0xff] }
 0x767   : > { %5900 = vmatpush.bf16.msrb.mxu1 %v9723_v2 }
 0x768   : > { %v5326_v5 = vmax.f32 %v5308_v62, 0.0  ;;  %v9711_v62 = vld [vmem:[%s13544_s9 + $0x100] sm:$0xff] }
 0x769   : > { %5872 = vmatpush.bf16.msra.mxu0 %v9714_v32 }
 0x76a   : > { %v5336_v59 = vpack.c.bf16 %v5326_v5, %v5324_v51  ;;  %v9719_v51 = vld [vmem:[%s13544_s9 + $0x140] sm:$0xff] }
 0x76b   : > { %5901 = vmatpush.bf16.msrb.mxu1 %v9722_v17 }
 0x76c   : > { %5551 = vmatmul.bf16.gmra.mxu1 %v5336_v59  ;;  %5609 = vmatmul.bf16.gmra.mxu3 %v5336_v59  ;;  %v8437_v59 = vld [vmem:[%s13549_s14 + $0x2] sm:$0x3] }
 0x76d   : > { %v5310_v3 = vpop.f32.mrf.mxu3  ;;  %v5283_v55 = vpop.f32.mrf.mxu2  ;;  %5873 = vmatpush.bf16.msra.mxu0 %v9713_v61  ;;  %v12645_v16 = vperm.slane %v8437_v59, 0 }
 0x76e   : > { %v5284_v4 = vadd.f32 %v5283_v55, %v5255_v52  ;;  %v5311_v45 = vadd.f32 %v5310_v3, %v5282_v54  ;;  %v12648_v54 = vperm.slane %v8437_v59, 1 }
 0x76f   : > { %5902 = vmatpush.bf16.msrb.mxu1 %v9721_v1 }
 0x770   : > { %v5328_v53 = vmax.f32 %v5311_v45, 0.0 }
 0x771   : > { %5874 = vmatpush.bf16.msra.mxu0 %v9712_v28 }
 0x773   : > { %5903 = vmatpush.bf16.msrb.mxu1 %v9720_v24 }
 0x775   : > { %v5312_v6 = vpop.f32.mrf.mxu3  ;;  %5875 = vmatpush.bf16.msra.mxu0 %v9711_v62 }
 0x776   : > { %v5313_v48 = vadd.f32 %v5312_v6, %v5284_v4 }
 0x777   : > { %5904 = vmatpush.bf16.msrb.mxu1 %v9719_v51 }
 0x778   : > { %v5330_v38 = vmax.f32 %v5313_v48, 0.0 }
 0x77a   : > { %v5338_v7 = vpack.c.bf16 %v5330_v38, %v5328_v53 }
 0x77c   : > { %5556 = vmatmul.bf16.gmra.mxu1 %v5338_v7  ;;  %5614 = vmatmul.bf16.gmra.mxu3 %v5338_v7 }
 0x789   : > { %v5513_v37 = vpop.f32.mrf.mxu0 }
 0x78a   : > { %v5514_v52 = vadd.f32 %v5513_v37, %v12645_v16 }
 0x78f   : > { %v5571_v47 = vpop.f32.mrf.mxu2 }
 0x790   : > { %v5572_v38 = vadd.f32 %v5571_v47, %v12648_v54 }
 0x791   : > { %v5515_v5 = vpop.f32.mrf.mxu0 }
 0x792   : > { %v5516_v6 = vadd.f32 %v5515_v5, %v12645_v16 }
 0x797   : > { %v5573_v3 = vpop.f32.mrf.mxu2 }
 0x798   : > { %v5574_v41 = vadd.f32 %v5573_v3, %v12648_v54 }
 0x79a   : > { %v5518_v55 = vpop.f32.mrf.mxu0 }
 0x79b   : > { %v5519_v61 = vadd.f32 %v5518_v55, %v12645_v16 }
 0x7a0   : > { %v5576_v48 = vpop.f32.mrf.mxu2 }
 0x7a1   : > { %v5577_v62 = vadd.f32 %v5576_v48, %v12648_v54 }
 0x7a2   : > { %v5520_v31 = vpop.f32.mrf.mxu0 }
 0x7a3   : > { %v5521_v15 = vadd.f32 %v5520_v31, %v12645_v16 }
 0x7a8   : > { %v5578_v17 = vpop.f32.mrf.mxu2 }
 0x7ab   : > { %v5523_v24 = vpop.f32.mrf.mxu0 }
 0x7ac   : > { %v5524_v48 = vadd.f32 %v5523_v24, %v12645_v16 }
 0x7b1   : > { %v5581_v3 = vpop.f32.mrf.mxu2 }
 0x7c9   : > { %v5542_v36 = vpop.f32.mrf.mxu1 }
 0x7ca   : > { %v5543_v4 = vadd.f32 %v5542_v36, %v5514_v52  ;;  %v5579_v36 = vadd.f32 %v5578_v17, %v12648_v54 }
 0x7cc   : > { %v12654_v7 = vadd.f32 %v5543_v4, %v3930_v20 }
 0x7ce   : > { %v5636_v50 = vmax.f32 %v12654_v7, 0.0 }
 0x7cf   : > { %v5600_v45 = vpop.f32.mrf.mxu3 }
 0x7d0   : > { %v5601_v11 = vadd.f32 %v5600_v45, %v5572_v38 }
 0x7d1   : > { %v5544_v53 = vpop.f32.mrf.mxu1 }
 0x7d2   : > { %v5545_v23 = vadd.f32 %v5544_v53, %v5516_v6  ;;  %v12665_v32 = vadd.f32 %v5601_v11, %v3931_v22 }
 0x7d4   : > { %v12658_v10 = vadd.f32 %v5545_v23, %v3932_v9  ;;  %v5637_v1 = vmax.f32 %v12665_v32, 0.0  ;;  %v5583_v23 = vpop.f32.mrf.mxu2 }
 0x7d5   : > { %v5584_v17 = vadd.f32 %v5583_v23, %v12648_v54  ;;  %v13599_v23 = vmax.f32 %v11930_v33, 0.0 }
 0x7d6   : > { %v5638_v42 = vmax.f32 %v12658_v10, 0.0 }
 0x7d7   : > { %v5602_v2 = vpop.f32.mrf.mxu3 }
 0x7d8   : > { %v5761_v58 = vpack.c.bf16 %v5638_v42, %v5636_v50  ;;  %v5603_v25 = vadd.f32 %v5602_v2, %v5574_v41 }
 0x7d9   : > { %v5547_v20 = vpop.f32.mrf.mxu1 }
 0x7da   : > { %v12673_v9 = vadd.f32 %v5603_v25, %v3933_v34  ;;  %5876 = vmatmul.bf16.vlgmr.msra.gmra.mxu0 %v5761_v58  ;;  %v5548_v28 = vadd.f32 %v5547_v20, %v5519_v61 }
 0x7dc   : > { %v5639_v44 = vmax.f32 %v12673_v9, 0.0  ;;  %v12686_v47 = vadd.f32 %v5548_v28, %v3934_v46  ;;  %v5525_v46 = vpop.f32.mrf.mxu0  ;;  %v5586_v26 = vpop.f32.mrf.mxu2 }
 0x7dd   : > { %v5526_v31 = vadd.f32 %v5525_v46, %v12645_v16  ;;  %v13598_v46 = vmax.f32 %v11923_v12, 0.0  ;;  %v13600_v12 = vmax.f32 %v11938_v13, 0.0 }
 0x7de   : > { %v5762_v22 = vpack.c.bf16 %v5639_v44, %v5637_v1  ;;  %v5640_v55 = vmax.f32 %v12686_v47, 0.0 }
 0x7df   : > { %v5605_v37 = vpop.f32.mrf.mxu3 }
 0x7e0   : > { %5905 = vmatmul.bf16.vlgmr.msrb.gmra.mxu1 %v5762_v22  ;;  %v5606_v5 = vadd.f32 %v5605_v37, %v5577_v62 }
 0x7e1   : > { %v5549_v34 = vpop.f32.mrf.mxu1 }
 0x7e2   : > { %v5550_v51 = vadd.f32 %v5549_v34, %v5521_v15  ;;  %v12697_v45 = vadd.f32 %v5606_v5, %v3935_v0 }
 0x7e4   : > { %v12690_v59 = vadd.f32 %v5550_v51, %v3936_v27  ;;  %v5641_v53 = vmax.f32 %v12697_v45, 0.0  ;;  %v5528_v58 = vpop.f32.mrf.mxu0 }
 0x7e5   : > { %v5529_v15 = vadd.f32 %v5528_v58, %v12645_v16  ;;  %v6008_v58 = vld [vmem:[#allocation2 + $0x8] sm:$0xe] }
 0x7e6   : > { %v5642_v52 = vmax.f32 %v12690_v59, 0.0  ;;  %v9046_v13 = vrot.slane %v6008_v58, 9 }
 0x7e7   : > { %v5607_v4 = vpop.f32.mrf.mxu3 }
 0x7e8   : > { %v5608_v19 = vadd.f32 %v5607_v4, %v5579_v36  ;;  %v5763_v8 = vpack.c.bf16 %v5642_v52, %v5640_v55 }
 0x7e9   : > { %v5552_v27 = vpop.f32.mrf.mxu1 }
 0x7ea   : > { %v12705_v6 = vadd.f32 %v5608_v19, %v3937_v43  ;;  %5881 = vmatmul.bf16.gmra.mxu0 %v5763_v8  ;;  %v5553_v0 = vadd.f32 %v5552_v27, %v5524_v48  ;;  %v5582_v43 = vadd.f32 %v5581_v3, %v12648_v54  ;;  %v5588_v19 = vpop.f32.mrf.mxu2 }
 0x7eb   : > { %v5589_v48 = vadd.f32 %v5588_v19, %v12648_v54 }
 0x7ec   : > { %v5643_v40 = vmax.f32 %v12705_v6, 0.0  ;;  %v12718_v41 = vadd.f32 %v5553_v0, %v3938_v29 }
 0x7ee   : > { %v5764_v38 = vpack.c.bf16 %v5643_v40, %v5641_v53  ;;  %v5644_v61 = vmax.f32 %v12718_v41, 0.0 }
 0x7ef   : > { %v5610_v11 = vpop.f32.mrf.mxu3 }
 0x7f0   : > { %5910 = vmatmul.bf16.gmra.mxu1 %v5764_v38  ;;  %v5611_v25 = vadd.f32 %v5610_v11, %v5582_v43  ;;  %v6006_v43 = vld [vmem:[#allocation2] sm:$0xe] }
 0x7f1   : > { %v5554_v18 = vpop.f32.mrf.mxu1 }
 0x7f2   : > { %v5555_v2 = vadd.f32 %v5554_v18, %v5526_v31  ;;  %v12729_v24 = vadd.f32 %v5611_v25, %v3939_v60  ;;  %v5530_v60 = vpop.f32.mrf.mxu0  ;;  %v6009_v25 = vld [vmem:[#allocation2 + $0xc] sm:$0x1] }
 0x7f3   : > { %v5531_v3 = vadd.f32 %v5530_v60, %v12645_v16  ;;  %v6073_v60 = vld [vmem:[#allocation2 + $0xc] sm:$0x3] }
 0x7f4   : > { %v12722_v20 = vadd.f32 %v5555_v2, %v3940_v49  ;;  %v5645_v34 = vmax.f32 %v12729_v24, 0.0  ;;  %v6007_v2 = vld [vmem:[#allocation2 + $0x4] sm:$0x1] }
 0x7f6   : > { %v5646_v22 = vmax.f32 %v12722_v20, 0.0 }
 0x7f7   : > { %v5612_v28 = vpop.f32.mrf.mxu3 }
 0x7f8   : > { %v5613_v30 = vadd.f32 %v5612_v28, %v5584_v17  ;;  %v5765_v29 = vpack.c.bf16 %v5646_v22, %v5644_v61  ;;  %v9045_v17 = vrot.slane %v6006_v43, 9  ;;  %v6040_v28 = vrot.slane %v6007_v2, 5 }
 0x7f9   : > { %v5557_v49 = vpop.f32.mrf.mxu1 }
 0x7fa   : > { %v12737_v37 = vadd.f32 %v5613_v30, %v3941_v63  ;;  %5886 = vmatmul.bf16.gmra.mxu0 %v5765_v29  ;;  %v5558_v62 = vadd.f32 %v5557_v49, %v5529_v15  ;;  %v5587_v63 = vadd.f32 %v5586_v26, %v12648_v54  ;;  %v6044_v30 = vrot.slane %v6009_v25, 5  ;;  %v6070_v29 = vld [vmem:[#allocation2] sm:$0xc]  ;;  %v6071_v26 = vld [vmem:[#allocation2 + $0x4] sm:$0x3] }
 0x7fb   : > { %v6041_v49 = vsel %vm10098_vm6, %v9045_v17, %v6040_v28  ;;  %v6072_v15 = vld [vmem:[#allocation2 + $0x8] sm:$0xc] }
 0x7fc   : > { %v5647_v57 = vmax.f32 %v12737_v37, 0.0  ;;  %v12750_v36 = vadd.f32 %v5558_v62, %v3942_v14  ;;  %v9053_v62 = vrot.slane %v6070_v29, 10 }
 0x7fe   : > { %v5766_v51 = vpack.c.bf16 %v5647_v57, %v5645_v34  ;;  %v5648_v0 = vmax.f32 %v12750_v36, 0.0 }
 0x7ff   : > { %v5615_v5 = vpop.f32.mrf.mxu3 }
 0x800   : > { %5915 = vmatmul.bf16.gmra.mxu1 %v5766_v51  ;;  %v5616_v8 = vadd.f32 %v5615_v5, %v5587_v63  ;;  %v6104_v51 = vrot.slane %v6071_v26, 6  ;;  %v6045_v5 = vsel %vm10098_vm6, %v9046_v13, %v6044_v30  ;;  %v6108_v63 = vrot.slane %v6073_v60, 6 }
 0x801   : > { %v5559_v56 = vpop.f32.mrf.mxu1 }
 0x802   : > { %v5560_v4 = vadd.f32 %v5559_v56, %v5531_v3  ;;  %v12761_v11 = vadd.f32 %v5616_v8, %v13599_v23  ;;  %v6426_v3 = vunpack.c.l.b16 %v6041_v49  ;;  %v9054_v56 = vrot.slane %v6072_v15, 10 }
 0x803   : > { %v6105_v19 = vsel %vm10145_vm10, %v9053_v62, %v6104_v51 }
 0x804   : > { %v12754_v27 = vadd.f32 %v5560_v4, %v13598_v46  ;;  %v13572_v54 = vmax.f32 %v12761_v11, 0.0  ;;  %v6427_v4 = vunpack.c.l.b16 %v6045_v5  ;;  %v6109_v8 = vsel %vm10145_vm10, %v9054_v56, %v6108_v63 }
 0x805   : > { %v6446_v46 = vunpack.c.l.b16 %v6105_v19  ;;  %v9279_v19 = vld [vmem:[%s13546_s11 + $0x350] sm:$0xf] }
 0x806   : > { %v13571_v16 = vmax.f32 %v12754_v27, 0.0 }
 0x807   : > { %v5617_v38 = vpop.f32.mrf.mxu3 }
 0x808   : > { %v5618_v39 = vadd.f32 %v5617_v38, %v5589_v48  ;;  %v5767_v14 = vpack.c.bf16 %v13571_v16, %v5648_v0  ;;  %v6434_v48 = vpack.c.b16 %v6427_v4, %v6426_v3  ;;  %v6447_v38 = vunpack.c.l.b16 %v6109_v8 }
 0x80a   : > { %v12769_v31 = vadd.f32 %v5618_v39, %v13600_v12  ;;  %5891 = vmatmul.bf16.gmra.mxu0 %v5767_v14  ;;  %6438 = vrot.lane.b32.xlu0 %v6434_v48, %s13590_s25  ;;  %v6454_v23 = vpack.c.b16 %v6447_v38, %v6446_v46  ;;  %v12790_v14 = vld [vmem:[%s13545_s10 + $0x2] ss:$0 sm:$0xff]  ;;  %v9762_v46 = vld [vmem:[%s13546_s11 + $0x354] sm:$0xf0] }
 0x80b   : > { %v9271_v48 = vld [vmem:[%s13546_s11 + $0x340] sm:$0xf] }
 0x80c   : > { %v13570_v18 = vmax.f32 %v12769_v31, 0.0  ;;  %6458 = vrot.lane.b32.xlu1 %v6454_v23, %s13591_s26  ;;  %v9280_v23 = vor.u32 %v9762_v46, %v9279_v19 }
 0x80e   : > { %v5768_v33 = vpack.c.bf16 %v13570_v18, %v13572_v54  ;;  %6911 = vmatpush.bf16.msrb.mxu0 %v9280_v23 }
 0x810   : > { %5920 = vmatmul.bf16.gmra.mxu1 %v5768_v33 }
 0x857   : > { %v5877_v39 = vpop.f32.mrf.mxu0 }
 0x858   : > { %v5878_v12 = vadd.f32 %v12790_v14, %v5877_v39  ;;  %v9760_v39 = vld [vmem:[%s13546_s11 + $0x344] sm:$0xf0] }
 0x85d   : > { %v5906_v33 = vpop.f32.mrf.mxu1 }
 0x85e   : > { %v5907_v43 = vadd.f32 %v5906_v33, %v5878_v12 }
 0x85f   : > { %v5879_v2 = vpop.f32.mrf.mxu0 }
 0x860   : > { %v5926_v58 = vmax.f32 %v5907_v43, 0.0  ;;  %v5880_v28 = vadd.f32 %v12790_v14, %v5879_v2 }
 0x862   : > { %v5934_v25 = vpack.c.bf16 %v5926_v58, %v5926_v58 }
 0x864   : > { %v5950_v17 = vrot.slane %v5934_v25, 7 }
 0x865   : > { %v5908_v13 = vpop.f32.mrf.mxu1 }
 0x866   : > { %v5951_v30 = vrot.slane %v5950_v17, 4  ;;  %5982 = vst.msk [vmem:[#allocation2 + $0x10] sm:$0xe] %vm757_vm11, %v5950_v17  ;;  %v5909_v29 = vadd.f32 %v5908_v13, %v5880_v28  ;;  %v9272_v28 = vor.u32 %v9760_v39, %v9271_v48 }
 0x867   : > { %v5882_v26 = vpop.f32.mrf.mxu0 }
 0x868   : > { %5983 = vst.msk [vmem:[#allocation2 + $0x14] sm:$0x1] %vm505_vm3, %v5951_v30  ;;  %v5927_v49 = vmax.f32 %v5909_v29, 0.0  ;;  %v5883_v62 = vadd.f32 %v12790_v14, %v5882_v26  ;;  %6912 = vmatpush.bf16.msrb.mxu0 %v9272_v28 }
 0x86a   : > { %v5935_v15 = vpack.c.bf16 %v5927_v49, %v5927_v49 }
 0x86c   : > { %v5952_v60 = vrot.slane %v5935_v15, 7 }
 0x86d   : > { %v5911_v51 = vpop.f32.mrf.mxu1  ;;  %v6206_v38 = vld [vmem:[#allocation2 + $0x10] sm:$0xc] }
 0x86e   : > { %v5953_v5 = vrot.slane %v5952_v60, 4  ;;  %5984 = vst.msk [vmem:[#allocation2 + $0x18] sm:$0xe] %vm757_vm11, %v5952_v60  ;;  %v5912_v3 = vadd.f32 %v5911_v51, %v5883_v62  ;;  %v9111_v58 = vld [vmem:[#allocation2 + $0x10] sm:$0xf]  ;;  %v9069_v26 = vrot.slane %v6206_v38, 10 }
 0x86f   : > { %v5884_v56 = vpop.f32.mrf.mxu0  ;;  %v6207_v4 = vld [vmem:[#allocation2 + $0x14] sm:$0x3]  ;;  %v6010_v46 = vld [vmem:[#allocation2 + $0x10] sm:$0xe] }
 0x870   : > { %5985 = vst.msk [vmem:[#allocation2 + $0x1c] sm:$0x1] %vm505_vm3, %v5953_v5  ;;  %v5928_v63 = vmax.f32 %v5912_v3, 0.0  ;;  %v5885_v33 = vadd.f32 %v12790_v14, %v5884_v56  ;;  %v6240_v43 = vrot.slane %v6207_v4, 6  ;;  %v6075_v48 = vld [vmem:[#allocation2 + $0x14] sm:$0x3] }
 0x872   : > { %v5936_v8 = vpack.c.bf16 %v5928_v63, %v5928_v63  ;;  %v6241_v5 = vsel %vm10145_vm10, %v9069_v26, %v6240_v43  ;;  %v6011_v63 = vld [vmem:[#allocation2 + $0x14] sm:$0x1] }
 0x873   : > { %v6506_v38 = vunpack.c.l.b16 %v6241_v5  ;;  %v6048_v43 = vrot.slane %v6011_v63, 5 }
 0x874   : > { %v5954_v12 = vrot.slane %v5936_v8, 7 }
 0x875   : > { %v5913_v2 = vpop.f32.mrf.mxu1  ;;  %v9799_v25 = vld [vmem:[#allocation2 + $0x14] sm:$0xf0] }
 0x876   : > { %v6208_v17 = vld [vmem:[#allocation2 + $0x18] sm:$0xc]  ;;  %v5955_v13 = vrot.slane %v5954_v12, 4  ;;  %5986 = vst.msk [vmem:[#allocation2 + $0x20] sm:$0xe] %vm757_vm11, %v5954_v12  ;;  %v5914_v30 = vadd.f32 %v5913_v2, %v5885_v33  ;;  %v9112_v29 = vor.u32 %v9799_v25, %v9111_v58 }
 0x877   : > { %v5887_v49 = vpop.f32.mrf.mxu0  ;;  %v6209_v15 = vld [vmem:[#allocation2 + $0x1c] sm:$0x3]  ;;  %v6012_v60 = vld [vmem:[#allocation2 + $0x18] sm:$0xe]  ;;  %v9070_v3 = vrot.slane %v6208_v17, 10 }
 0x878   : > { %v6013_v62 = vld [vmem:[#allocation2 + $0x1c] sm:$0x1]  ;;  %5987 = vst.msk [vmem:[#allocation2 + $0x24] sm:$0x1] %vm505_vm3, %v5955_v13  ;;  %v5929_v51 = vmax.f32 %v5914_v30, 0.0  ;;  %6486 = vrot.lane.b32.xlu2 %v9112_v29, %s13592_s30  ;;  %v6244_v56 = vrot.slane %v6209_v15, 6  ;;  %v5888_v58 = vadd.f32 %v12790_v14, %v5887_v49 }
 0x879   : > { %v6052_v4 = vrot.slane %v6013_v62, 5  ;;  %v9048_v39 = vrot.slane %v6012_v60, 9  ;;  %v6076_v12 = vld [vmem:[#allocation2 + $0x18] sm:$0xc]  ;;  %v6077_v33 = vld [vmem:[#allocation2 + $0x1c] sm:$0x3] }
 0x87a   : > { %v5937_v19 = vpack.c.bf16 %v5929_v51, %v5929_v51  ;;  %v6245_v8 = vsel %vm10145_vm10, %v9070_v3, %v6244_v56  ;;  %v9047_v13 = vrot.slane %v6010_v46, 9  ;;  %v6074_v30 = vld [vmem:[#allocation2 + $0x10] sm:$0xc]  ;;  %v6112_v29 = vrot.slane %v6075_v48, 6 }
 0x87b   : > { %v6507_v23 = vunpack.c.l.b16 %v6245_v8  ;;  %v6053_v28 = vsel %vm10098_vm6, %v9048_v39, %v6052_v4  ;;  %v9056_v62 = vrot.slane %v6076_v12, 10  ;;  %v6116_v60 = vrot.slane %v6077_v33, 6 }
 0x87c   : > { %v5956_v2 = vrot.slane %v5937_v19, 7  ;;  %v6049_v63 = vsel %vm10098_vm6, %v9047_v13, %v6048_v43  ;;  %v6429_v8 = vunpack.c.l.b16 %v6053_v28  ;;  %v9055_v48 = vrot.slane %v6074_v30, 10 }
 0x87d   : > { %v5916_v25 = vpop.f32.mrf.mxu1  ;;  %v6514_v17 = vpack.c.b16 %v6507_v23, %v6506_v38  ;;  %v6278_v5 = vld [vmem:[#allocation2 + $0x20] sm:$0xe]  ;;  %v6117_v12 = vsel %vm10145_vm10, %v9056_v62, %v6116_v60  ;;  %v6428_v33 = vunpack.c.l.b16 %v6049_v63 }
 0x87e   : > { %v5957_v26 = vrot.slane %v5956_v2, 4  ;;  %5988 = vst.msk [vmem:[#allocation2 + $0x28] sm:$0xe] %vm757_vm11, %v5956_v2  ;;  %v5917_v15 = vadd.f32 %v5916_v25, %v5888_v58  ;;  %v6210_v19 = vld [vmem:[#allocation2 + $0x20] sm:$0xc]  ;;  %v9077_v23 = vrot.slane %v6278_v5, 9  ;;  %v6113_v58 = vsel %vm10145_vm10, %v9055_v48, %v6112_v29 }
 0x87f   : > { %v5889_v51 = vpop.f32.mrf.mxu0  ;;  %6518 = vrot.lane.b32.xlu0 %v6514_v17, %s13590_s25  ;;  %v6279_v49 = vld [vmem:[#allocation2 + $0x24] sm:$0x1]  ;;  %v9071_v2 = vrot.slane %v6210_v19, 10  ;;  %v9127_v43 = vld [vmem:[#allocation2 + $0x20] sm:$0xf]  ;;  %v6449_v62 = vunpack.c.l.b16 %v6117_v12 }
 0x880   : > { %v6211_v3 = vld [vmem:[#allocation2 + $0x24] sm:$0x3]  ;;  %5989 = vst.msk [vmem:[#allocation2 + $0x2c] sm:$0x1] %vm505_vm3, %v5957_v26  ;;  %v5930_v56 = vmax.f32 %v5917_v15, 0.0  ;;  %v6312_v4 = vrot.slane %v6279_v49, 5  ;;  %v5890_v17 = vadd.f32 %v12790_v14, %v5889_v51  ;;  %v6435_v15 = vpack.c.b16 %v6429_v8, %v6428_v33 }
 0x881   : > { %v6343_v46 = vld [vmem:[#allocation2 + $0x24] sm:$0x3]  ;;  %v6248_v39 = vrot.slane %v6211_v3, 6  ;;  %v6342_v28 = vld [vmem:[#allocation2 + $0x20] sm:$0xc]  ;;  %v6448_v33 = vunpack.c.l.b16 %v6113_v58 }
 0x882   : > { %v5938_v38 = vpack.c.bf16 %v5930_v56, %v5930_v56  ;;  %v6313_v13 = vsel %vm10098_vm6, %v9077_v23, %v6312_v4  ;;  %v6376_v30 = vrot.slane %v6343_v46, 6  ;;  %v6015_v19 = vld [vmem:[#allocation2 + $0x24] sm:$0x1]  ;;  %v9085_v23 = vrot.slane %v6342_v28, 10 }
 0x883   : > { %v6249_v51 = vsel %vm10145_vm10, %v9071_v2, %v6248_v39  ;;  %v6554_v8 = vunpack.c.l.b16 %v6313_v13 }
 0x884   : > { %v5958_v25 = vrot.slane %v5938_v38, 7  ;;  %v6508_v39 = vunpack.c.l.b16 %v6249_v51 }
 0x885   : > { %v5918_v26 = vpop.f32.mrf.mxu1  ;;  %v9803_v5 = vld [vmem:[#allocation2 + $0x24] sm:$0xf0] }
 0x886   : > { %v6280_v49 = vld [vmem:[#allocation2 + $0x28] sm:$0xe]  ;;  %v5959_v60 = vrot.slane %v5958_v25, 4  ;;  %5990 = vst.msk [vmem:[#allocation2 + $0x30] sm:$0xe] %vm757_vm11, %v5958_v25  ;;  %v5919_v56 = vadd.f32 %v5918_v26, %v5890_v17  ;;  %v9128_v29 = vor.u32 %v9803_v5, %v9127_v43  ;;  %v6377_v26 = vsel %vm10145_vm10, %v9085_v23, %v6376_v30 }
 0x887   : > { %v6212_v3 = vld [vmem:[#allocation2 + $0x28] sm:$0xc]  ;;  %6440 = vrot.lane.b32.xlu0 %v6435_v15, %s13590_s25  ;;  %v5892_v4 = vpop.f32.mrf.mxu0  ;;  %v6281_v46 = vld [vmem:[#allocation2 + $0x2c] sm:$0x1]  ;;  %v9078_v48 = vrot.slane %v6280_v49, 9  ;;  %v6455_v5 = vpack.c.b16 %v6449_v62, %v6448_v33 }
 0x888   : > { %v6344_v63 = vld [vmem:[#allocation2 + $0x28] sm:$0xc]  ;;  %v6213_v38 = vld [vmem:[#allocation2 + $0x2c] sm:$0x3]  ;;  %5991 = vst.msk [vmem:[#allocation2 + $0x34] sm:$0x1] %vm505_vm3, %v5959_v60  ;;  %6546 = vrot.lane.b32.xlu1 %v9128_v29, %s13591_s26 }
 0x889   : > { %v5931_v12 = vmax.f32 %v5919_v56, 0.0  ;;  %v6316_v25 = vrot.slane %v6281_v46, 5  ;;  %v9072_v17 = vrot.slane %v6212_v3, 10  ;;  %v6252_v43 = vrot.slane %v6213_v38, 6  ;;  %v6345_v2 = vld [vmem:[#allocation2 + $0x2c] sm:$0x3] }
 0x88a   : > { %v9086_v15 = vrot.slane %v6344_v63, 10  ;;  %v6016_v49 = vld [vmem:[#allocation2 + $0x28] sm:$0xe]  ;;  %v6380_v60 = vrot.slane %v6345_v2, 6  ;;  %v6017_v56 = vld [vmem:[#allocation2 + $0x2c] sm:$0x1]  ;;  %v5893_v3 = vadd.f32 %v12790_v14, %v5892_v4 }
 0x88b   : > { %v5939_v13 = vpack.c.bf16 %v5931_v12, %v5931_v12  ;;  %v6317_v58 = vsel %vm10098_vm6, %v9078_v48, %v6316_v25  ;;  %v6253_v28 = vsel %vm10145_vm10, %v9072_v17, %v6252_v43  ;;  %v6014_v46 = vld [vmem:[#allocation2 + $0x20] sm:$0xe]  ;;  %v6056_v38 = vrot.slane %v6015_v19, 5 }
 0x88c   : > { %v6555_v29 = vunpack.c.l.b16 %v6317_v58  ;;  %v6509_v51 = vunpack.c.l.b16 %v6253_v28  ;;  %v6381_v30 = vsel %vm10145_vm10, %v9086_v15, %v6380_v60  ;;  %v9050_v62 = vrot.slane %v6016_v49, 9  ;;  %v12849_v17 = vld [vmem:[#allocation2 + $0x20] sm:$0xc]  ;;  %v6081_v58 = vld [vmem:[#allocation2 + $0x2c] sm:$0x3] }
 0x88d   : > { %v5960_v18 = vrot.slane %v5939_v13, 7  ;;  %v6060_v63 = vrot.slane %v6017_v56, 5  ;;  %v5921_v23 = vpop.f32.mrf.mxu1  ;;  %v6574_v12 = vunpack.c.l.b16 %v6377_v26  ;;  %v6575_v25 = vunpack.c.l.b16 %v6381_v30  ;;  %v6079_v13 = vld [vmem:[#allocation2 + $0x24] sm:$0x3]  ;;  %v6214_v56 = vld [vmem:[#allocation2 + $0x30] sm:$0xc] }
 0x88e   : > { %v6562_v33 = vpack.c.b16 %v6555_v29, %v6554_v8  ;;  %v6515_v48 = vpack.c.b16 %v6509_v51, %v6508_v39  ;;  %v5922_v4 = vadd.f32 %v5921_v23, %v5893_v3  ;;  %v9049_v2 = vrot.slane %v6014_v46, 9  ;;  %v6282_v39 = vld [vmem:[#allocation2 + $0x30] sm:$0xe]  ;;  %v6080_v46 = vld [vmem:[#allocation2 + $0x28] sm:$0xc] }
 0x88f   : > { %v5961_v43 = vrot.slane %v5960_v18, 4  ;;  %5992 = vst.msk [vmem:[#allocation2 + $0x38] sm:$0xe] %vm757_vm11, %v5960_v18  ;;  %v6061_v19 = vsel %vm10098_vm6, %v9050_v62, %v6060_v63  ;;  %v12856_v8 = vpack.c.b16 %v6575_v25, %v6574_v12  ;;  %v6283_v26 = vld [vmem:[#allocation2 + $0x34] sm:$0x1]  ;;  %v5894_v18 = vpop.f32.mrf.mxu0  ;;  %v9079_v23 = vrot.slane %v6282_v39, 9 }
 0x890   : > { %6566 = vrot.lane.b32.xlu2 %v6562_v33, %s13592_s30  ;;  %6520 = vrot.lane.b32.xlu0 %v6515_v48, %s13590_s25  ;;  %v6215_v15 = vld [vmem:[#allocation2 + $0x34] sm:$0x3]  ;;  %v5932_v49 = vmax.f32 %v5922_v4, 0.0  ;;  %v6057_v28 = vsel %vm10098_vm6, %v9049_v2, %v6056_v38  ;;  %v6320_v60 = vrot.slane %v6283_v26, 5  ;;  %v6431_v3 = vunpack.c.l.b16 %v6061_v19  ;;  %v9115_v62 = vld [vmem:[#allocation2 + $0x20] sm:$0xf] }
 0x891   : > { %5993 = vst.msk [vmem:[#allocation2 + $0x3c] sm:$0x1] %vm505_vm3, %v5961_v43  ;;  %6460 = vrot.lane.b32.xlu1 %v6455_v5, %s13591_s26  ;;  %9285 = vmatmul.msk.bf16.vlgmr.msrb.gmra.mxu0 %vm1369_vm12, %v12856_v8  ;;  %v6256_v29 = vrot.slane %v6215_v15, 6  ;;  %v6347_v51 = vld [vmem:[#allocation2 + $0x34] sm:$0x3]  ;;  %v9057_v33 = vrot.slane %v12849_v17, 10  ;;  %v5895_v5 = vadd.f32 %v12790_v14, %v5894_v18  ;;  %v6430_v12 = vunpack.c.l.b16 %v6057_v28 }
 0x892   : > { %v5940_v30 = vpack.c.bf16 %v5932_v49, %v5932_v49  ;;  %v9800_v63 = vld [vmem:[#allocation2 + $0x24] sm:$0xf0]  ;;  %v6124_v48 = vrot.slane %v6081_v58, 6  ;;  %v9131_v38 = vld [vmem:[#allocation2 + $0x30] sm:$0xf]  ;;  %v9073_v25 = vrot.slane %v6214_v56, 10  ;;  %v6321_v26 = vsel %vm10098_vm6, %v9079_v23, %v6320_v60 }
 0x893   : > { %v6346_v43 = vld [vmem:[#allocation2 + $0x30] sm:$0xc]  ;;  %v6120_v4 = vrot.slane %v6079_v13, 6  ;;  %v6384_v15 = vrot.slane %v6347_v51, 6  ;;  %v9058_v39 = vrot.slane %v6080_v46, 10  ;;  %v9116_v58 = vor.u32 %v9800_v63, %v9115_v62 }
 0x894   : > { %v9199_v2 = vld [vmem:[%s13546_s11 + $0x2b0] sm:$0xf]  ;;  %v5962_v19 = vrot.slane %v5940_v30, 7  ;;  %v9742_v17 = vld [vmem:[%s13546_s11 + $0x2b4] sm:$0xf0]  ;;  %v6436_v49 = vpack.c.b16 %v6431_v3, %v6430_v12  ;;  %v6257_v56 = vsel %vm10145_vm10, %v9073_v25, %v6256_v29  ;;  %v6556_v63 = vunpack.c.l.b16 %v6321_v26 }
 0x895   : > { %v5923_v14 = vpop.f32.mrf.mxu1  ;;  %v9200_v16 = vor.u32 %v9742_v17, %v9199_v2  ;;  %v6125_v23 = vsel %vm10145_vm10, %v9058_v39, %v6124_v48  ;;  %v12879_v54 = vld [vmem:[#allocation2 + $0x34] sm:$0x1]  ;;  %v9087_v12 = vrot.slane %v6346_v43, 10  ;;  %v6121_v25 = vsel %vm10145_vm10, %v9057_v33, %v6120_v4 }
 0x896   : > { %v9804_v18 = vld [vmem:[#allocation2 + $0x34] sm:$0xf0]  ;;  %v5963_v30 = vrot.slane %v5962_v19, 4  ;;  %5994 = vst.msk [vmem:[#allocation2 + $0x40] sm:$0xe] %vm757_vm11, %v5962_v19  ;;  %v5924_v60 = vadd.f32 %v5923_v14, %v5895_v5  ;;  %v6510_v19 = vunpack.c.l.b16 %v6257_v56  ;;  %v6451_v14 = vunpack.c.l.b16 %v6125_v23 }
 0x897   : > { %v6284_v28 = vld [vmem:[#allocation2 + $0x38] sm:$0xe]  ;;  %v9132_v51 = vor.u32 %v9804_v18, %v9131_v38  ;;  %6847 = vmatpush.bf16.msrb.mxu2 %v9200_v16  ;;  %v6385_v17 = vsel %vm10145_vm10, %v9087_v12, %v6384_v15  ;;  %v6450_v16 = vunpack.c.l.b16 %v6121_v25  ;;  %v6018_v56 = vld [vmem:[#allocation2 + $0x30] sm:$0xe]  ;;  %v9741_v15 = vld [vmem:[%s13546_s11 + $0x2b4] sm:$0xf] }
 0x898   : > { %v6216_v13 = vld [vmem:[#allocation2 + $0x38] sm:$0xc]  ;;  %6488 = vrot.lane.b32.xlu2 %v9116_v58, %s13592_s30  ;;  %6442 = vrot.lane.b32.xlu0 %v6436_v49, %s13590_s25  ;;  %v6285_v3 = vld [vmem:[#allocation2 + $0x3c] sm:$0x1]  ;;  %v9080_v62 = vrot.slane %v6284_v28, 9  ;;  %v5933_v5 = vmax.f32 %v5924_v60, 0.0  ;;  %v6576_v12 = vunpack.c.l.b16 %v6385_v17 }
 0x899   : > { %v6348_v46 = vld [vmem:[#allocation2 + $0x38] sm:$0xc]  ;;  %v6217_v29 = vld [vmem:[#allocation2 + $0x3c] sm:$0x3]  ;;  %5995 = vst.msk [vmem:[#allocation2 + $0x44] sm:$0x1] %vm505_vm3, %v5963_v30  ;;  %6548 = vrot.lane.b32.xlu1 %v9132_v51, %s13591_s26 }
 0x89a   : > { %v6324_v48 = vrot.slane %v6285_v3, 5  ;;  %v9074_v38 = vrot.slane %v6216_v13, 10  ;;  %v6260_v2 = vrot.slane %v6217_v29, 6  ;;  %v6349_v39 = vld [vmem:[#allocation2 + $0x3c] sm:$0x3]  ;;  %v9088_v26 = vrot.slane %v6348_v46, 10 }
 0x89b   : > { %v6020_v43 = vld [vmem:[#allocation2 + $0x38] sm:$0xe]  ;;  %v5941_v58 = vpack.c.bf16 %v5933_v5, %v5933_v5  ;;  %v6388_v49 = vrot.slane %v6349_v39, 6  ;;  %v6021_v18 = vld [vmem:[#allocation2 + $0x3c] sm:$0x1]  ;;  %v6064_v30 = vrot.slane %v12879_v54, 5 }
 0x89c   : > { %v6325_v33 = vsel %vm10098_vm6, %v9080_v62, %v6324_v48  ;;  %v6261_v4 = vsel %vm10145_vm10, %v9074_v38, %v6260_v2  ;;  %v9052_v46 = vrot.slane %v6020_v43, 9  ;;  %v6068_v23 = vrot.slane %v6021_v18, 5  ;;  %v9201_v3 = vld [vmem:[%s13546_s11 + $0x2b8] sm:$0xf0]  ;;  %v12902_v54 = vld [vmem:[#allocation2 + $0x30] sm:$0xc] }
 0x89d   : > { %v6557_v28 = vunpack.c.l.b16 %v6325_v33  ;;  %v6511_v13 = vunpack.c.l.b16 %v6261_v4  ;;  %v5964_v60 = vrot.slane %v5941_v58, 7  ;;  %v6389_v51 = vsel %vm10145_vm10, %v9088_v26, %v6388_v49  ;;  %v6350_v5 = vld [vmem:[#allocation2 + $0x40] sm:$0xc]  ;;  %v6084_v43 = vld [vmem:[#allocation2 + $0x38] sm:$0xc] }
 0x89e   : > { %v6577_v25 = vunpack.c.l.b16 %v6389_v51  ;;  %v6456_v38 = vpack.c.b16 %v6451_v14, %v6450_v16  ;;  %v9051_v2 = vrot.slane %v6018_v56, 9  ;;  %v6069_v39 = vsel %vm10098_vm6, %v9052_v46, %v6068_v23  ;;  %v6286_v26 = vld [vmem:[#allocation2 + $0x40] sm:$0xe]  ;;  %v6085_v58 = vld [vmem:[#allocation2 + $0x3c] sm:$0x3] }
 0x89f   : > { %v6563_v62 = vpack.c.b16 %v6557_v28, %v6556_v63  ;;  %v6516_v29 = vpack.c.b16 %v6511_v13, %v6510_v19  ;;  %v5965_v48 = vrot.slane %v5964_v60, 4  ;;  %5996 = vst.msk [vmem:[#allocation2 + $0x48] sm:$0xe] %vm757_vm11, %v5964_v60  ;;  %v6218_v33 = vld [vmem:[#allocation2 + $0x40] sm:$0xc]  ;;  %v9204_v49 = vor.u32 %v9741_v15, %v9201_v3 }
 0x8a0   : > { %v12909_v63 = vpack.c.b16 %v6577_v25, %v6576_v12  ;;  %v6351_v19 = vld [vmem:[#allocation2 + $0x44] sm:$0x3]  ;;  %v12911_v4 = vld [vmem:[#allocation2 + $0x34] sm:$0x3]  ;;  %v6065_v14 = vsel %vm10098_vm6, %v9051_v2, %v6064_v30  ;;  %v9801_v16 = vld [vmem:[#allocation2 + $0x34] sm:$0xf0]  ;;  %v6433_v56 = vunpack.c.l.b16 %v6069_v39 }
 0x8a1   : > { %6568 = vrot.lane.b32.xlu2 %v6563_v62, %s13592_s30  ;;  %6522 = vrot.lane.b32.xlu0 %v6516_v29, %s13590_s25  ;;  %v6287_v17 = vld [vmem:[#allocation2 + $0x44] sm:$0x1]  ;;  %5997 = vst.msk [vmem:[#allocation2 + $0x4c] sm:$0x1] %vm505_vm3, %v5965_v48  ;;  %v6392_v18 = vrot.slane %v6351_v19, 6  ;;  %v9089_v60 = vrot.slane %v6350_v5, 10  ;;  %v6432_v29 = vunpack.c.l.b16 %v6065_v14 }
 0x8a2   : > { %6462 = vrot.lane.b32.xlu1 %v6456_v38, %s13591_s26  ;;  %v6328_v28 = vrot.slane %v6287_v17, 5  ;;  %v6219_v13 = vld [vmem:[#allocation2 + $0x44] sm:$0x3]  ;;  %9286 = vmatmul.msk.bf16.gmra.mxu0 %vm1369_vm12, %v12909_v63  ;;  %v9081_v51 = vrot.slane %v6286_v26, 9  ;;  %v9119_v15 = vld [vmem:[#allocation2 + $0x30] sm:$0xf] }
 0x8a3   : > { %v6264_v46 = vrot.slane %v6219_v13, 6  ;;  %6934 = vmatpush.bf16.msra.mxu1 %v9204_v49  ;;  %v9075_v23 = vrot.slane %v6218_v33, 10  ;;  %v9059_v3 = vrot.slane %v12902_v54, 10  ;;  %v9191_v30 = vld [vmem:[%s13546_s11 + $0x2a0] sm:$0xf]  ;;  %v12928_v25 = vsel %vm10145_vm10, %v9089_v60, %v6392_v18 }
 0x8a4   : > { %v9740_v62 = vld [vmem:[%s13546_s11 + $0x2a4] sm:$0xf0]  ;;  %v9135_v12 = vld [vmem:[#allocation2 + $0x40] sm:$0xf]  ;;  %v9060_v5 = vrot.slane %v6084_v43, 10  ;;  %v6132_v48 = vrot.slane %v6085_v58, 6  ;;  %v12938_v2 = vsel %vm10098_vm6, %v9081_v51, %v6328_v28  ;;  %v9120_v17 = vor.u32 %v9801_v16, %v9119_v15 }
 0x8a5   : > { %v9739_v54 = vld [vmem:[%s13546_s11 + $0x2a4] sm:$0xf]  ;;  %v9193_v38 = vld [vmem:[%s13546_s11 + $0x2a8] sm:$0xf0]  ;;  %v6128_v39 = vrot.slane %v12911_v4, 6  ;;  %v9192_v26 = vor.u32 %v9740_v62, %v9191_v30  ;;  %v6437_v33 = vpack.c.b16 %v6433_v56, %v6432_v29  ;;  %v6265_v28 = vsel %vm10145_vm10, %v9075_v23, %v6264_v46 }
 0x8a6   : > { %v9196_v19 = vor.u32 %v9739_v54, %v9193_v38  ;;  %v9183_v43 = vld [vmem:[%s13546_s11 + $0x290] sm:$0xf]  ;;  %v9738_v58 = vld [vmem:[%s13546_s11 + $0x294] sm:$0xf0]  ;;  %v9805_v49 = vld [vmem:[#allocation2 + $0x44] sm:$0xf0]  ;;  %v6133_v4 = vsel %vm10145_vm10, %v9060_v5, %v6132_v48  ;;  %v6578_v46 = vunpack.c.l.b16 %v12928_v25  ;;  %v6558_v23 = vunpack.c.l.b16 %v12938_v2 }
 0x8a7   : > { %v6352_v14 = vld [vmem:[#allocation2 + $0x48] sm:$0xc]  ;;  %v9136_v13 = vor.u32 %v9805_v49, %v9135_v12  ;;  %6848 = vmatpush.bf16.msrb.mxu2 %v9192_v26  ;;  %v9184_v62 = vor.u32 %v9738_v58, %v9183_v43  ;;  %v9263_v16 = vld [vmem:[%s13546_s11 + $0x330] sm:$0xf]  ;;  %v9758_v38 = vld [vmem:[%s13546_s11 + $0x334] sm:$0xf0]  ;;  %v6512_v26 = vunpack.c.l.b16 %v6265_v28  ;;  %v6453_v43 = vunpack.c.l.b16 %v6133_v4 }
 0x8a8   : > { %v6288_v18 = vld [vmem:[#allocation2 + $0x48] sm:$0xe]  ;;  %v9090_v60 = vrot.slane %v6352_v14, 10  ;;  %6935 = vmatpush.bf16.msra.mxu1 %v9196_v19  ;;  %v6353_v56 = vld [vmem:[#allocation2 + $0x4c] sm:$0x3]  ;;  %v6129_v19 = vsel %vm10145_vm10, %v9059_v3, %v6128_v39  ;;  %v9264_v25 = vor.u32 %v9758_v38, %v9263_v16 }
 0x8a9   : > { %v9082_v51 = vrot.slane %v6288_v18, 9  ;;  %v6220_v30 = vld [vmem:[#allocation2 + $0x48] sm:$0xc]  ;;  %6490 = vrot.lane.b32.xlu2 %v9120_v17, %s13592_s30  ;;  %6444 = vrot.lane.b32.xlu0 %v6437_v33, %s13590_s25  ;;  %v6289_v15 = vld [vmem:[#allocation2 + $0x4c] sm:$0x1]  ;;  %v6396_v12 = vrot.slane %v6353_v56, 6  ;;  %v6452_v56 = vunpack.c.l.b16 %v6129_v19 }
 0x8aa   : > { %v6221_v29 = vld [vmem:[#allocation2 + $0x4c] sm:$0x3]  ;;  %6550 = vrot.lane.b32.xlu1 %v9136_v13, %s13591_s26  ;;  %v6332_v5 = vrot.slane %v6289_v15, 5  ;;  %v9076_v48 = vrot.slane %v6220_v30, 10  ;;  %v9737_v2 = vld [vmem:[%s13546_s11 + $0x294] sm:$0xf]  ;;  %6876 = vmatpush.bf16.msra.mxu3 %v9264_v25 }
 0x8ab   : > { %v6268_v54 = vrot.slane %v6221_v29, 6  ;;  %v9185_v58 = vld [vmem:[%s13546_s11 + $0x298] sm:$0xf0]  ;;  %v9175_v17 = vld [vmem:[%s13546_s11 + $0x280] sm:$0xf]  ;;  %v6397_v33 = vsel %vm10145_vm10, %v9090_v60, %v6396_v12  ;;  %6849 = vmatpush.bf16.msrb.mxu2 %v9184_v62  ;;  %v6457_v19 = vpack.c.b16 %v6453_v43, %v6452_v56 }
 0x8ac   : > { %v6333_v3 = vsel %vm10098_vm6, %v9082_v51, %v6332_v5  ;;  %v9188_v49 = vor.u32 %v9737_v2, %v9185_v58  ;;  %v9736_v14 = vld [vmem:[%s13546_s11 + $0x284] sm:$0xf0]  ;;  %v9735_v18 = vld [vmem:[%s13546_s11 + $0x284] sm:$0xf]  ;;  %v9177_v28 = vld [vmem:[%s13546_s11 + $0x288] sm:$0xf0]  ;;  %v6579_v4 = vunpack.c.l.b16 %v6397_v33 }
 0x8ad   : > { %v6269_v39 = vsel %vm10145_vm10, %v9076_v48, %v6268_v54  ;;  %v6559_v13 = vunpack.c.l.b16 %v6333_v3  ;;  %v9176_v51 = vor.u32 %v9736_v14, %v9175_v17  ;;  %v9167_v30 = vld [vmem:[%s13546_s11 + $0x270] sm:$0xf]  ;;  %v9734_v62 = vld [vmem:[%s13546_s11 + $0x274] sm:$0xf0]  ;;  %v9255_v16 = vld [vmem:[%s13546_s11 + $0x320] sm:$0xf]  ;;  %v9180_v15 = vor.u32 %v9735_v18, %v9177_v28 }
 0x8ae   : > { %v6513_v60 = vunpack.c.l.b16 %v6269_v39  ;;  %6936 = vmatpush.bf16.msra.mxu1 %v9188_v49  ;;  %v9756_v29 = vld [vmem:[%s13546_s11 + $0x324] sm:$0xf0]  ;;  %v13000_v12 = vpack.c.b16 %v6579_v4, %v6578_v46  ;;  %v9733_v38 = vld [vmem:[%s13546_s11 + $0x274] sm:$0xf]  ;;  %v9169_v25 = vld [vmem:[%s13546_s11 + $0x278] sm:$0xf0]  ;;  %v9168_v2 = vor.u32 %v9734_v62, %v9167_v30 }
 0x8af   : > { %v6564_v5 = vpack.c.b16 %v6559_v13, %v6558_v23  ;;  %v9256_v54 = vor.u32 %v9756_v29, %v9255_v16  ;;  %6850 = vmatpush.bf16.msrb.mxu2 %v9176_v51  ;;  %v9159_v58 = vld [vmem:[%s13546_s11 + $0x260] sm:$0xf]  ;;  %v9732_v46 = vld [vmem:[%s13546_s11 + $0x264] sm:$0xf0]  ;;  %v9247_v23 = vld [vmem:[%s13546_s11 + $0x310] sm:$0xf]  ;;  %v9172_v3 = vor.u32 %v9733_v38, %v9169_v25 }
 0x8b0   : > { %v6517_v48 = vpack.c.b16 %v6513_v60, %v6512_v26  ;;  %v9754_v26 = vld [vmem:[%s13546_s11 + $0x314] sm:$0xf0]  ;;  %v9802_v43 = vld [vmem:[#allocation2 + $0x44] sm:$0xf0]  ;;  %v9139_v17 = vld [vmem:[#allocation2 + $0x50] sm:$0xf]  ;;  %v9160_v4 = vor.u32 %v9732_v46, %v9159_v58 }
 0x8b1   : > { %6570 = vrot.lane.b32.xlu2 %v6564_v5, %s13592_s30  ;;  %v9806_v33 = vld [vmem:[#allocation2 + $0x54] sm:$0xf0]  ;;  %6877 = vmatpush.bf16.msra.mxu3 %v9256_v54  ;;  %v9731_v39 = vld [vmem:[%s13546_s11 + $0x264] sm:$0xf]  ;;  %v9161_v49 = vld [vmem:[%s13546_s11 + $0x268] sm:$0xf0]  ;;  %v9248_v18 = vor.u32 %v9754_v26, %v9247_v23 }
 0x8b2   : > { %6524 = vrot.lane.b32.xlu0 %v6517_v48, %s13590_s25  ;;  %6464 = vrot.lane.b32.xlu1 %v6457_v19, %s13591_s26  ;;  %v9151_v14 = vld [vmem:[%s13546_s11 + $0x250] sm:$0xf]  ;;  %v9123_v28 = vld [vmem:[#allocation2 + $0x40] sm:$0xf]  ;;  %v9730_v13 = vld [vmem:[%s13546_s11 + $0x254] sm:$0xf0]  ;;  %v9164_v29 = vor.u32 %v9731_v39, %v9161_v49 }
 0x8b3   : > { %6937 = vmatpush.bf16.msra.mxu1 %v9180_v15  ;;  %9287 = vmatmul.msk.bf16.gmra.mxu0 %vm1369_vm12, %v13000_v12  ;;  %v6290_v60 = vld [vmem:[#allocation2 + $0x50] sm:$0xe]  ;;  %v6291_v51 = vld [vmem:[#allocation2 + $0x54] sm:$0x1]  ;;  %v6292_v30 = vld [vmem:[#allocation2 + $0x58] sm:$0xe]  ;;  %v9140_v15 = vor.u32 %v9806_v33, %v9139_v17  ;;  %v9124_v25 = vor.u32 %v9802_v43, %v9123_v28  ;;  %v9152_v23 = vor.u32 %v9730_v13, %v9151_v14 }
 0x8b4   : > { %6851 = vmatpush.bf16.msrb.mxu2 %v9168_v2  ;;  %v6293_v62 = vld [vmem:[#allocation2 + $0x5c] sm:$0x1]  ;;  %v9083_v16 = vrot.slane %v6290_v60, 9  ;;  %v6336_v56 = vrot.slane %v6291_v51, 5  ;;  %v9084_v5 = vrot.slane %v6292_v30, 9  ;;  %s7375_s25 = scalar_lea.sflag [#allocation4], %s485_s27 }
 0x8b5   : > { %v6340_v48 = vrot.slane %v6293_v62, 5  ;;  %v9239_v54 = vld [vmem:[%s13546_s11 + $0x300] sm:$0xf]  ;;  %v9752_v38 = vld [vmem:[%s13546_s11 + $0x304] sm:$0xf0]  ;;  %6878 = vmatpush.bf16.msra.mxu3 %v9248_v18 }
 0x8b6   : > { %v9729_v19 = vld [vmem:[%s13546_s11 + $0x254] sm:$0xf]  ;;  %v9153_v2 = vld [vmem:[%s13546_s11 + $0x258] sm:$0xf0]  ;;  %v6337_v58 = vsel %vm10098_vm6, %v9083_v16, %v6336_v56  ;;  %v9240_v46 = vor.u32 %v9752_v38, %v9239_v54  ;;  %v9231_v43 = vld [vmem:[%s13546_s11 + $0x2f0] sm:$0xf]  ;;  %v6439_v54 = vpop.permute.xlu0 %6438 }
 0x8b7   : > { %6938 = vmatpush.bf16.msra.mxu1 %v9172_v3  ;;  %v6341_v26 = vsel %vm10098_vm6, %v9084_v5, %v6340_v48  ;;  %v9750_v17 = vld [vmem:[%s13546_s11 + $0x2f4] sm:$0xf0]  ;;  %v9143_v33 = vld [vmem:[%s13546_s11 + $0x240] sm:$0xf]  ;;  %v9728_v3 = vld [vmem:[%s13546_s11 + $0x244] sm:$0xf0]  ;;  %v6560_v39 = vunpack.c.l.b16 %v6337_v58  ;;  %v9156_v14 = vor.u32 %v9729_v19, %v9153_v2  ;;  %v6459_v19 = vpop.permute.xlu1 %6458 }
 0x8b8   : > { %6852 = vmatpush.bf16.msrb.mxu2 %v9160_v4  ;;  %v6561_v49 = vunpack.c.l.b16 %v6341_v26  ;;  %v9727_v18 = vld [vmem:[%s13546_s11 + $0x244] sm:$0xf]  ;;  %v9145_v28 = vld [vmem:[%s13546_s11 + $0x248] sm:$0xf0]  ;;  %v9232_v4 = vor.u32 %v9750_v17, %v9231_v43  ;;  %v9144_v13 = vor.u32 %v9728_v3, %v9143_v33  ;;  %v9223_v60 = vld [vmem:[%s13546_s11 + $0x2e0] sm:$0xf] }
 0x8b9   : > { %6492 = vrot.lane.b32.xlu2 %v9124_v25, %s13592_s30  ;;  %6879 = vmatpush.bf16.msra.mxu3 %v9240_v46  ;;  %v9748_v51 = vld [vmem:[%s13546_s11 + $0x2e4] sm:$0xf0]  ;;  %v9148_v62 = vor.u32 %v9727_v18, %v9145_v28  ;;  %v9095_v56 = vld [vmem:[#allocation2] sm:$0xf]  ;;  %v9215_v5 = vld [vmem:[%s13546_s11 + $0x2d0] sm:$0xf] }
 0x8ba   : > { %6552 = vrot.lane.b32.xlu1 %v9140_v15, %s13591_s26  ;;  %v6565_v30 = vpack.c.b16 %v6561_v49, %v6560_v39  ;;  %v9224_v16 = vor.u32 %v9748_v51, %v9223_v60  ;;  %v9795_v15 = vld [vmem:[#allocation2 + $0x4] sm:$0xf0]  ;;  %v9746_v48 = vld [vmem:[%s13546_s11 + $0x2d4] sm:$0xf0]  ;;  %v9207_v46 = vld [vmem:[%s13546_s11 + $0x2c0] sm:$0xf] }
 0x8bb   : > { %6939 = vmatpush.bf16.msra.mxu1 %v9164_v29  ;;  %v9096_v29 = vor.u32 %v9795_v15, %v9095_v56  ;;  %v9216_v38 = vor.u32 %v9746_v48, %v9215_v5  ;;  %v9757_v17 = vld [vmem:[%s13546_s11 + $0x334] sm:$0xf]  ;;  %v9265_v33 = vld [vmem:[%s13546_s11 + $0x338] sm:$0xf0]  ;;  %v9755_v18 = vld [vmem:[%s13546_s11 + $0x324] sm:$0xf] }
 0x8bc   : > { %6853 = vmatpush.bf16.msrb.mxu2 %v9152_v23  ;;  %v9744_v23 = vld [vmem:[%s13546_s11 + $0x2c4] sm:$0xf0]  ;;  %v9268_v3 = vor.u32 %v9757_v17, %v9265_v33  ;;  %v9761_v39 = vld [vmem:[%s13546_s11 + $0x354] sm:$0xf]  ;;  %v9281_v49 = vld [vmem:[%s13546_s11 + $0x358] sm:$0xf0] }
 0x8bd   : > { %6880 = vmatpush.bf16.msra.mxu3 %v9232_v4  ;;  %v6588_v25 = vsel %vm1369_vm12, %v9096_v29, %v6439_v54  ;;  %v9208_v43 = vor.u32 %v9744_v23, %v9207_v46  ;;  %v9257_v28 = vld [vmem:[%s13546_s11 + $0x328] sm:$0xf0]  ;;  %v9753_v60 = vld [vmem:[%s13546_s11 + $0x314] sm:$0xf]  ;;  %v9249_v51 = vld [vmem:[%s13546_s11 + $0x318] sm:$0xf0] }
 0x8be   : > { %v6599_v2 = vsel %vm658_vm0, %v6588_v25, %v6459_v19  ;;  %v9260_v4 = vor.u32 %v9755_v18, %v9257_v28  ;;  %v6142_v15 = vld [vmem:[#allocation2 + $0x10] sm:$0xe]  ;;  %v9749_v18 = vld [vmem:[%s13546_s11 + $0x2f4] sm:$0xf]  ;;  %v9233_v28 = vld [vmem:[%s13546_s11 + $0x2f8] sm:$0xf0] }
 0x8bf   : > { %6940 = vmatpush.bf16.msra.mxu1 %v9156_v14  ;;  %v9284_v14 = vor.u32 %v9761_v39, %v9281_v49  ;;  %v9061_v54 = vrot.slane %v6142_v15, 9  ;;  %v6149_v49 = vld [vmem:[#allocation2 + $0x2c] sm:$0x1]  ;;  %s7456_s26 = sshll.u32 %s485_s27, 7 }
 0x8c0   : > { %6854 = vmatpush.bf16.msrb.mxu2 %v9144_v13  ;;  %v6145_v13 = vld [vmem:[#allocation2 + $0x1c] sm:$0x1]  ;;  %v9273_v15 = vld [vmem:[%s13546_s11 + $0x348] sm:$0xf0]  ;;  %s13440_s16 = scalar_lea.vmem [#allocation3], %s7456_s26 }
 0x8c1   : > { %6572 = vrot.lane.b32.xlu2 %v6565_v30, %s13592_s30  ;;  %6881 = vmatpush.bf16.msra.mxu3 %v9224_v16  ;;  %v6144_v30 = vld [vmem:[#allocation2 + $0x18] sm:$0xe]  ;;  %v9252_v16 = vor.u32 %v9753_v60, %v9249_v51  ;;  %v6180_v56 = vrot.slane %v6145_v13, 5  ;;  %v6147_v13 = vld [vmem:[#allocation2 + $0x24] sm:$0x1]  ;;  %v9236_v51 = vor.u32 %v9749_v18, %v9233_v28  ;;  %s7386_s30 = scalar_lea.hbm %s13550_s15, %s9807_s1  ;;  %s7387_s0 = sshll.u32 %s13440_s16, 4  ;;  %s7388_s0 = int_to_ptr.vmem [resolvable:$true] %s7387_s0 }
 0x8c2   : > { %v9062_v5 = vrot.slane %v6144_v30, 9  ;;  %v6148_v60 = vld [vmem:[#allocation2 + $0x28] sm:$0xe]  ;;  %v9796_v30 = vld [vmem:[#allocation2 + $0x14] sm:$0xf0]  ;;  %s7389_s22 = sshll.u32 %s7386_s30, 4  ;;  %s7390_s22 = int_to_ptr.hbm [resolvable:$true] %s7389_s22 }
 0x8c3   : > { %6941 = vmatpush.bf16.msra.mxu1 %v9148_v62  ;;  %v6143_v62 = vld [vmem:[#allocation2 + $0x14] sm:$0x1]  ;;  %s9873_s29 = sshra.s32 %s7390_s22, 4  ;;  %s9874_s29 = int_to_ptr.hbm [resolvable:$true] %s9873_s29 }
 0x8c4   : > { %6963 = vmatpush.bf16.msra.mxu2 %v9268_v3  ;;  %v6176_v48 = vrot.slane %v6143_v62, 5  ;;  %v6188_v62 = vrot.slane %v6149_v49, 5  ;;  %s9875_s18 = scalar_lea.hbm %s9874_s29, 128  ;;  %p9880_p0 = scmp.lt.s32.totalorder %s9874_s29, %s13550_s15 }
 0x8c5   : > { %6882 = vmatpush.bf16.msra.mxu3 %v9216_v38  ;;  %v6181_v38 = vsel %vm10098_vm6, %v9062_v5, %v6180_v56  ;;  %v9759_v56 = vld [vmem:[%s13546_s11 + $0x344] sm:$0xf]  ;;  %v9099_v5 = vld [vmem:[#allocation2 + $0x10] sm:$0xf]  ;;  %p9876_p11 = scmp.ne.s32.totalorder %s9874_s29, %s9875_s18  ;;  %p9881_p1 = scmp.lt.s32.totalorder %s9879_s24, %s9875_s18 }
 0x8c6   : > { %v6177_v19 = vsel %vm10098_vm6, %v9061_v54, %v6176_v48  ;;  %v6495_v46 = vunpack.c.l.b16 %v6181_v38  ;;  %v9064_v48 = vrot.slane %v6148_v60, 9  ;;  %v9276_v54 = vor.u32 %v9759_v56, %v9273_v15  ;;  %v6151_v15 = vld [vmem:[#allocation2 + $0x34] sm:$0x1] }
 0x8c7   : > { %v9100_v38 = vor.u32 %v9796_v30, %v9099_v5  ;;  %v6153_v30 = vld [vmem:[#allocation2 + $0x3c] sm:$0x1]  ;;  %v6152_v5 = vld [vmem:[#allocation2 + $0x38] sm:$0xe]  ;;  %p9877_p12 = pnand %p9876_p11, %p10047_p5  ;;  %p9882_p2 = por %p9881_p1, %p9880_p0 }
 0x8c8   : > { %6964 = vmatpush.bf16.msra.mxu2 %v9260_v4 }
 0x8c9   : > { %6883 = vmatpush.bf16.msra.mxu3 %v9208_v43  ;;  %p9878_p13 = pneg %p9877_p12 }
 0x8cb   : > { %p9883_p3 = pnand %p9882_p2, %p9878_p13 }
 0x8cc   : > { %6965 = vmatpush.bf16.msra.mxu2 %v9252_v16  ;;  %v6146_v16 = vld [vmem:[#allocation2 + $0x20] sm:$0xe] }
 0x8cd   : > { %6998 = vmatpush.bf16.msrb.mxu3 %v9284_v14 }
 0x8d1   : > { %6999 = vmatpush.bf16.msrb.mxu3 %v9276_v54  ;;  %v9797_v54 = vld [vmem:[#allocation2 + $0x24] sm:$0xf0] }
 0x8d2   : > { %v6487_v58 = vpop.permute.xlu2 %6486 }
 0x8d3   : > { %v6607_v26 = vsel %vm1390_vm13, %v6599_v2, %v6487_v58  ;;  %v9751_v2 = vld [vmem:[%s13546_s11 + $0x304] sm:$0xf]  ;;  %v9241_v58 = vld [vmem:[%s13546_s11 + $0x308] sm:$0xf0] }
 0x8d4   : > { %6855 = vmatmul.bf16.vlgmr.msrb.gmra.mxu2 %v6607_v26  ;;  %6942 = vmatmul.bf16.vlgmr.msra.gmra.mxu1 %v6607_v26  ;;  %v9244_v23 = vor.u32 %v9751_v2, %v9241_v58  ;;  %v6494_v26 = vunpack.c.l.b16 %v6177_v19  ;;  %v6189_v19 = vsel %vm10098_vm6, %v9064_v48, %v6188_v62 }
 0x8d5   : > { %v6497_v49 = vunpack.c.l.b16 %v6189_v19  ;;  %v9743_v19 = vld [vmem:[%s13546_s11 + $0x2c4] sm:$0xf] }
 0x8d6   : > { %6966 = vmatpush.bf16.msra.mxu2 %v9244_v23  ;;  %v6502_v43 = vpack.c.b16 %v6495_v46, %v6494_v26 }
 0x8da   : > { %6967 = vmatpush.bf16.msra.mxu2 %v9236_v51 }
 0x8ea   : > { %v6567_v29 = vpop.permute.xlu2 %6566 }
 0x8f1   : > { %v6519_v25 = vpop.permute.xlu0 %6518 }
 0x8f2   : > { %v6489_v17 = vpop.permute.xlu2 %6488  ;;  %v6620_v3 = vsel %vm1369_vm12, %v6502_v43, %v6519_v25  ;;  %v9063_v25 = vrot.slane %v6146_v16, 9  ;;  %v9745_v16 = vld [vmem:[%s13546_s11 + $0x2d4] sm:$0xf] }
 0x8f9   : > { %v6441_v33 = vpop.permute.xlu0 %6440 }
 0x8fa   : > { %v6547_v39 = vpop.permute.xlu1 %6546  ;;  %v6591_v58 = vsel %vm1369_vm12, %v9100_v38, %v6441_v33  ;;  %v6196_v38 = vrot.slane %v6153_v30, 5 }
 0x8fb   : > { %v6631_v14 = vsel %vm658_vm0, %v6620_v3, %v6547_v39  ;;  %v6569_v23 = vpop.permute.xlu2 %6568  ;;  %v9747_v3 = vld [vmem:[%s13546_s11 + $0x2e4] sm:$0xf]  ;;  %v9225_v39 = vld [vmem:[%s13546_s11 + $0x2e8] sm:$0xf0] }
 0x8fc   : > { %v13138_v4 = vsel %vm1390_vm13, %v6631_v14, %v6567_v29  ;;  %v6184_v29 = vrot.slane %v6147_v13, 5  ;;  %v9228_v18 = vor.u32 %v9747_v3, %v9225_v39 }
 0x8fd   : > { %6884 = vmatmul.bf16.vlgmr.msra.gmra.mxu3 %v13138_v4 }
 0x8fe   : > { %v6185_v26 = vsel %vm10098_vm6, %v9063_v25, %v6184_v29  ;;  %6968 = vmatpush.bf16.msra.mxu2 %v9228_v18  ;;  %v6150_v25 = vld [vmem:[#allocation2 + $0x30] sm:$0xe] }
 0x8ff   : > { %v6496_v33 = vunpack.c.l.b16 %v6185_v26  ;;  %v9065_v3 = vrot.slane %v6150_v25, 9 }
 0x901   : > { %v6503_v28 = vpack.c.b16 %v6497_v49, %v6496_v33 }
 0x902   : > { %v6521_v2 = vpop.permute.xlu0 %6520 }
 0x903   : > { %v6461_v46 = vpop.permute.xlu1 %6460  ;;  %v6623_v60 = vsel %vm1369_vm12, %v6503_v28, %v6521_v2  ;;  %v6491_v48 = vpop.permute.xlu2 %6490  ;;  %v9209_v2 = vld [vmem:[%s13546_s11 + $0x2c8] sm:$0xf0] }
 0x904   : > { %v6601_v43 = vsel %vm658_vm0, %v6591_v58, %v6461_v46  ;;  %v9103_v58 = vld [vmem:[#allocation2 + $0x20] sm:$0xf]  ;;  %v6192_v46 = vrot.slane %v6151_v15, 5  ;;  %v9212_v26 = vor.u32 %v9743_v19, %v9209_v2 }
 0x905   : > { %v6610_v14 = vsel %vm1390_vm13, %v6601_v43, %v6489_v17  ;;  %v9217_v17 = vld [vmem:[%s13546_s11 + $0x2d8] sm:$0xf0]  ;;  %v9104_v43 = vor.u32 %v9797_v54, %v9103_v58 }
 0x906   : > { %6860 = vmatmul.bf16.gmra.mxu2 %v6610_v14  ;;  %6947 = vmatmul.bf16.gmra.mxu1 %v6610_v14  ;;  %v9220_v29 = vor.u32 %v9745_v16, %v9217_v17  ;;  %v6193_v18 = vsel %vm10098_vm6, %v9065_v3, %v6192_v46  ;;  %v6355_v16 = vld [vmem:[#allocation2 + $0x54] sm:$0x3]  ;;  %v6356_v17 = vld [vmem:[#allocation2 + $0x58] sm:$0xc] }
 0x907   : > { %v6498_v30 = vunpack.c.l.b16 %v6193_v18  ;;  %v9092_v54 = vrot.slane %v6356_v17, 10 }
 0x908   : > { %6969 = vmatpush.bf16.msra.mxu2 %v9220_v29  ;;  %v6400_v29 = vrot.slane %v6355_v16, 6 }
 0x90a   : > { %v6443_v13 = vpop.permute.xlu0 %6442 }
 0x90b   : > { %v6549_v51 = vpop.permute.xlu1 %6548  ;;  %v6594_v49 = vsel %vm1369_vm12, %v9104_v43, %v6443_v13  ;;  %v6571_v15 = vpop.permute.xlu2 %6570 }
 0x90c   : > { %v6633_v62 = vsel %vm658_vm0, %v6623_v60, %v6549_v51  ;;  %6970 = vmatpush.bf16.msra.mxu2 %v9212_v26 }
 0x90d   : > { %v13169_v56 = vsel %vm1390_vm13, %v6633_v62, %v6569_v23  ;;  %v9066_v23 = vrot.slane %v6152_v5, 9  ;;  %v6354_v62 = vld [vmem:[#allocation2 + $0x50] sm:$0xc]  ;;  %v6357_v5 = vld [vmem:[#allocation2 + $0x5c] sm:$0x3] }
 0x90e   : > { %6889 = vmatmul.bf16.gmra.mxu3 %v13169_v56  ;;  %v9091_v13 = vrot.slane %v6354_v62, 10  ;;  %v6404_v25 = vrot.slane %v6357_v5, 6 }
 0x90f   : > { %v6197_v39 = vsel %vm10098_vm6, %v9066_v23, %v6196_v38 }
 0x910   : > { %v6499_v60 = vunpack.c.l.b16 %v6197_v39  ;;  %v6401_v19 = vsel %vm10145_vm10, %v9091_v13, %v6400_v29  ;;  %v6405_v46 = vsel %vm10145_vm10, %v9092_v54, %v6404_v25  ;;  %v6156_v39 = vld [vmem:[#allocation2 + $0x48] sm:$0xe] }
 0x911   : > { %v6580_v23 = vunpack.c.l.b16 %v6401_v19  ;;  %v6581_v43 = vunpack.c.l.b16 %v6405_v46 }
 0x912   : > { %v6504_v38 = vpack.c.b16 %v6499_v60, %v6498_v30  ;;  %v9068_v30 = vrot.slane %v6156_v39, 9  ;;  %v9778_v39 = vld [vmem:[%s13548_s13 + $0x274] sm:$0xf0] }
 0x913   : > { %v6523_v33 = vpop.permute.xlu0 %6522  ;;  %v13192_v60 = vpack.c.b16 %v6581_v43, %v6580_v23  ;;  %v6493_v16 = vpop.permute.xlu2 %6492 }
 0x914   : > { %v6463_v14 = vpop.permute.xlu1 %6462  ;;  %v6626_v2 = vsel %vm1369_vm12, %v6504_v38, %v6523_v33  ;;  %v6154_v33 = vld [vmem:[#allocation2 + $0x40] sm:$0xe] }
 0x915   : > { %v6603_v28 = vsel %vm658_vm0, %v6594_v49, %v6463_v14  ;;  %v6155_v49 = vld [vmem:[#allocation2 + $0x44] sm:$0x1]  ;;  %v9798_v14 = vld [vmem:[#allocation2 + $0x34] sm:$0xf0]  ;;  %9288 = vmatmul.msk.bf16.gmra.mxu0 %vm1369_vm12, %v13192_v60  ;;  %v9067_v17 = vrot.slane %v6154_v33, 9 }
 0x916   : > { %v6613_v51 = vsel %vm1390_vm13, %v6603_v28, %v6491_v48  ;;  %v6157_v48 = vld [vmem:[#allocation2 + $0x4c] sm:$0x1]  ;;  %v6200_v62 = vrot.slane %v6155_v49, 5  ;;  %v9352_v49 = vor.u32 %v9778_v39, %v9351_v21 }
 0x917   : > { %6865 = vmatmul.bf16.gmra.mxu2 %v6613_v51  ;;  %6952 = vmatmul.bf16.gmra.mxu1 %v6613_v51  ;;  %v6204_v28 = vrot.slane %v6157_v48, 5  ;;  %v9107_v51 = vld [vmem:[#allocation2 + $0x30] sm:$0xf] }
 0x918   : > { %v9108_v35 = vor.u32 %v9798_v14, %v9107_v51  ;;  %v6201_v29 = vsel %vm10098_vm6, %v9067_v17, %v6200_v62  ;;  %7210 = vmatpush.bf16.msra.mxu0 %v9352_v49  ;;  %v9335_v51 = vld [vmem:[%s13548_s13 + $0x250] sm:$0xf]  ;;  %v9766_v49 = vld [vmem:[%s13548_s13 + $0x214] sm:$0xf0] }
 0x919   : > { %v6500_v19 = vunpack.c.l.b16 %v6201_v29  ;;  %v9771_v29 = vld [vmem:[%s13548_s13 + $0x244] sm:$0xf] }
 0x91b   : > { %v6445_v18 = vpop.permute.xlu0 %6444  ;;  %v6573_v48 = vpop.permute.xlu2 %6572 }
 0x91c   : > { %v6551_v58 = vpop.permute.xlu1 %6550  ;;  %v6597_v5 = vsel %vm1369_vm12, %v9108_v35, %v6445_v18  ;;  %v9775_v18 = vld [vmem:[%s13548_s13 + $0x264] sm:$0xf]  ;;  %v9773_v35 = vld [vmem:[%s13548_s13 + $0x254] sm:$0xf] }
 0x91d   : > { %v6635_v26 = vsel %vm658_vm0, %v6626_v2, %v6551_v58 }
 0x91e   : > { %v6645_v3 = vsel %vm1390_vm13, %v6635_v26, %v6571_v15  ;;  %v6205_v15 = vsel %vm10098_vm6, %v9068_v30, %v6204_v28  ;;  %v9345_v28 = vld [vmem:[%s13548_s13 + $0x268] sm:$0xf0]  ;;  %v9774_v30 = vld [vmem:[%s13548_s13 + $0x254] sm:$0xf0] }
 0x91f   : > { %6894 = vmatmul.bf16.gmra.mxu3 %v6645_v3  ;;  %v6501_v38 = vunpack.c.l.b16 %v6205_v15  ;;  %v9348_v62 = vor.u32 %v9775_v18, %v9345_v28  ;;  %v9336_v17 = vor.u32 %v9774_v30, %v9335_v51  ;;  %v9327_v15 = vld [vmem:[%s13548_s13 + $0x240] sm:$0xf]  ;;  %v9763_v28 = vld [vmem:[%s13548_s13 + $0x204] sm:$0xf]  ;;  %v9793_v51 = vld [vmem:[%s13548_s13 + $0x2f4] sm:$0xf] }
 0x921   : > { %v6505_v58 = vpack.c.b16 %v6501_v38, %v6500_v19  ;;  %v9770_v19 = vld [vmem:[%s13548_s13 + $0x234] sm:$0xf0] }
 0x924   : > { %v6465_v13 = vpop.permute.xlu1 %6464  ;;  %v6525_v2 = vpop.permute.xlu0 %6524 }
 0x925   : > { %v6605_v54 = vsel %vm658_vm0, %v6597_v5, %v6465_v13  ;;  %v6629_v46 = vsel %vm1369_vm12, %v6505_v58, %v6525_v2  ;;  %v9772_v5 = vld [vmem:[%s13548_s13 + $0x244] sm:$0xf0]  ;;  %v9769_v2 = vld [vmem:[%s13548_s13 + $0x234] sm:$0xf] }
 0x926   : > { %v6616_v25 = vsel %vm1390_vm13, %v6605_v54, %v6493_v16  ;;  %v9337_v16 = vld [vmem:[%s13548_s13 + $0x258] sm:$0xf0]  ;;  %v9329_v54 = vld [vmem:[%s13548_s13 + $0x248] sm:$0xf0] }
 0x927   : > { %6870 = vmatmul.bf16.gmra.mxu2 %v6616_v25  ;;  %6957 = vmatmul.bf16.gmra.mxu1 %v6616_v25  ;;  %v9340_v13 = vor.u32 %v9773_v35, %v9337_v16  ;;  %v9332_v38 = vor.u32 %v9771_v29, %v9329_v54  ;;  %v9319_v25 = vld [vmem:[%s13548_s13 + $0x230] sm:$0xf]  ;;  %v6914_v35 = vpop.f32.mrf.mxu0 }
 0x928   : > { %v9320_v58 = vor.u32 %v9770_v19, %v9319_v25  ;;  %v9407_v19 = vld [vmem:[%s13548_s13 + $0x2e0] sm:$0xf] }
 0x92c   : > { %v6553_v23 = vpop.permute.xlu1 %6552 }
 0x92d   : > { %v6637_v26 = vsel %vm658_vm0, %v6629_v46, %v6553_v23  ;;  %v9768_v46 = vld [vmem:[%s13548_s13 + $0x224] sm:$0xf0] }
 0x92e   : > { %v6648_v43 = vsel %vm1390_vm13, %v6637_v26, %v6573_v48  ;;  %v9321_v48 = vld [vmem:[%s13548_s13 + $0x238] sm:$0xf0]  ;;  %v9767_v26 = vld [vmem:[%s13548_s13 + $0x224] sm:$0xf] }
 0x92f   : > { %6899 = vmatmul.bf16.gmra.mxu3 %v6648_v43  ;;  %v9324_v23 = vor.u32 %v9769_v2, %v9321_v48  ;;  %v6916_v25 = vpop.f32.mrf.mxu0  ;;  %v9792_v2 = vld [vmem:[%s13548_s13 + $0x2e4] sm:$0xf0]  ;;  %v13342_v48 = vld [vmem:[%s13547_s12 + $0x4] sm:$0x3] }
 0x937   : > { %6971 = vmatmul.bf16.vlgmr.msra.gmra.mxu2 %v13138_v4  ;;  %v9777_v4 = vld [vmem:[%s13548_s13 + $0x274] sm:$0xf] }
 0x93f   : > { %9289 = vmatmul.msk.bf16.vlgmr.msrb.gmra.mxu3 %vm1369_vm12, %v12856_v8  ;;  %v9353_v8 = vld [vmem:[%s13548_s13 + $0x278] sm:$0xf0] }
 0x940   : > { %v9356_v14 = vor.u32 %v9777_v4, %v9353_v8  ;;  %v9303_v4 = vld [vmem:[%s13548_s13 + $0x210] sm:$0xf]  ;;  %v9765_v8 = vld [vmem:[%s13548_s13 + $0x214] sm:$0xf] }
 0x942   : > { %7268 = vmatpush.bf16.msrb.mxu2 %v9356_v14  ;;  %v9764_v14 = vld [vmem:[%s13548_s13 + $0x204] sm:$0xf0] }
 0x946   : > { %7269 = vmatpush.bf16.msrb.mxu2 %v9348_v62  ;;  %v9417_v62 = vld [vmem:[%s13548_s13 + $0x2f8] sm:$0xf0] }
 0x947   : > { %6976 = vmatmul.bf16.gmra.mxu2 %v13169_v56  ;;  %v9776_v56 = vld [vmem:[%s13548_s13 + $0x264] sm:$0xf0] }
 0x94a   : > { %7270 = vmatpush.bf16.msrb.mxu2 %v9340_v13  ;;  %v9791_v13 = vld [vmem:[%s13548_s13 + $0x2e4] sm:$0xf] }
 0x94e   : > { %7271 = vmatpush.bf16.msrb.mxu2 %v9332_v38 }
 0x94f   : > { %9290 = vmatmul.msk.bf16.gmra.mxu3 %vm1369_vm12, %v12909_v63  ;;  %v9343_v63 = vld [vmem:[%s13548_s13 + $0x260] sm:$0xf] }
 0x950   : > { %v9344_v33 = vor.u32 %v9776_v56, %v9343_v63  ;;  %v9304_v63 = vor.u32 %v9766_v49, %v9303_v4  ;;  %v9305_v56 = vld [vmem:[%s13548_s13 + $0x218] sm:$0xf0]  ;;  %v9399_v49 = vld [vmem:[%s13548_s13 + $0x2d0] sm:$0xf] }
 0x951   : > { %v9308_v18 = vor.u32 %v9765_v8, %v9305_v56  ;;  %v9790_v8 = vld [vmem:[%s13548_s13 + $0x2d4] sm:$0xf0]  ;;  %v9787_v56 = vld [vmem:[%s13548_s13 + $0x2c4] sm:$0xf] }
 0x952   : > { %7211 = vmatpush.bf16.msra.mxu0 %v9344_v33  ;;  %7272 = vmatpush.bf16.msrb.mxu2 %v9324_v23  ;;  %v9297_v33 = vld [vmem:[%s13548_s13 + $0x208] sm:$0xf0]  ;;  %v13348_v23 = vperm.slane %v13342_v48, 0 }
 0x953   : > { %v9300_v16 = vor.u32 %v9763_v28, %v9297_v33 }
 0x956   : > { %7212 = vmatpush.bf16.msra.mxu0 %v9336_v17  ;;  %v9420_v17 = vor.u32 %v9793_v51, %v9417_v62 }
 0x957   : > { %6981 = vmatmul.bf16.gmra.mxu2 %v6645_v3  ;;  %v9328_v3 = vor.u32 %v9772_v5, %v9327_v15  ;;  %v9415_v15 = vld [vmem:[%s13548_s13 + $0x2f0] sm:$0xf]  ;;  %v9794_v5 = vld [vmem:[%s13548_s13 + $0x2f4] sm:$0xf0]  ;;  %v6856_v29 = vpop.f32.mrf.mxu2 }
 0x958   : > { %7297 = vmatpush.bf16.msra.mxu3 %v9420_v17  ;;  %v9416_v54 = vor.u32 %v9794_v5, %v9415_v15  ;;  %v9391_v5 = vld [vmem:[%s13548_s13 + $0x2c0] sm:$0xf] }
 0x95a   : > { %7213 = vmatpush.bf16.msra.mxu0 %v9328_v3  ;;  %v9409_v3 = vld [vmem:[%s13548_s13 + $0x2e8] sm:$0xf0]  ;;  %7239 = vmatpush.bf16.msrb.mxu1 %v9416_v54  ;;  %v9785_v54 = vld [vmem:[%s13548_s13 + $0x2b4] sm:$0xf] }
 0x95b   : > { %v9412_v38 = vor.u32 %v9791_v13, %v9409_v3  ;;  %v9788_v13 = vld [vmem:[%s13548_s13 + $0x2c4] sm:$0xf0] }
 0x95d   : > { %7298 = vmatpush.bf16.msra.mxu3 %v9412_v38 }
 0x95e   : > { %7214 = vmatpush.bf16.msra.mxu0 %v9320_v58  ;;  %v9789_v58 = vld [vmem:[%s13548_s13 + $0x2d4] sm:$0xf] }
 0x95f   : > { %9291 = vmatmul.msk.bf16.gmra.mxu3 %vm1369_vm12, %v13000_v12  ;;  %v9311_v12 = vld [vmem:[%s13548_s13 + $0x220] sm:$0xf] }
 0x960   : > { %v9312_v21 = vor.u32 %v9768_v46, %v9311_v12  ;;  %v9408_v12 = vor.u32 %v9792_v2, %v9407_v19  ;;  %v9401_v46 = vld [vmem:[%s13548_s13 + $0x2d8] sm:$0xf0] }
 0x962   : > { %7215 = vmatpush.bf16.msra.mxu0 %v9312_v21  ;;  %7240 = vmatpush.bf16.msrb.mxu1 %v9408_v12 }
 0x966   : > { %7216 = vmatpush.bf16.msra.mxu0 %v9304_v63  ;;  %v9400_v63 = vor.u32 %v9790_v8, %v9399_v49 }
 0x967   : > { %6986 = vmatmul.bf16.gmra.mxu2 %v6648_v43  ;;  %v9313_v43 = vld [vmem:[%s13548_s13 + $0x228] sm:$0xf0] }
 0x968   : > { %v9316_v39 = vor.u32 %v9767_v26, %v9313_v43  ;;  %v9404_v26 = vor.u32 %v9789_v58, %v9401_v46  ;;  %v6858_v43 = vpop.f32.mrf.mxu2  ;;  %7241 = vmatpush.bf16.msrb.mxu1 %v9400_v63  ;;  %v9383_v46 = vld [vmem:[%s13548_s13 + $0x2b0] sm:$0xf] }
 0x96a   : > { %7273 = vmatpush.bf16.msrb.mxu2 %v9316_v39  ;;  %7299 = vmatpush.bf16.msra.mxu3 %v9404_v26  ;;  %v6857_v39 = vadd.f32 %v6856_v29, %v13348_v23  ;;  %v9392_v29 = vor.u32 %v9788_v13, %v9391_v5  ;;  %v9786_v26 = vld [vmem:[%s13548_s13 + $0x2b4] sm:$0xf0]  ;;  %v9369_v13 = vld [vmem:[%s13548_s13 + $0x298] sm:$0xf0] }
 0x96c   : > { %7242 = vmatpush.bf16.msrb.mxu1 %v9392_v29 }
 0x96e   : > { %7274 = vmatpush.bf16.msrb.mxu2 %v9308_v18  ;;  %v6859_v18 = vadd.f32 %v6858_v43, %v13348_v23  ;;  %v9384_v43 = vor.u32 %v9786_v26, %v9383_v46 }
 0x96f   : > { %9292 = vmatmul.msk.bf16.gmra.mxu3 %vm1369_vm12, %v13192_v60  ;;  %v9295_v60 = vld [vmem:[%s13548_s13 + $0x200] sm:$0xf] }
 0x970   : > { %v9296_v30 = vor.u32 %v9764_v14, %v9295_v60  ;;  %v9393_v60 = vld [vmem:[%s13548_s13 + $0x2c8] sm:$0xf0]  ;;  %v6919_v14 = vpop.f32.mrf.mxu0  ;;  %7243 = vmatpush.bf16.msrb.mxu1 %v9384_v43 }
 0x971   : > { %v9396_v28 = vor.u32 %v9787_v56, %v9393_v60 }
 0x972   : > { %7217 = vmatpush.bf16.msra.mxu0 %v9296_v30  ;;  %7275 = vmatpush.bf16.msrb.mxu2 %v9300_v16 }
 0x973   : > { %7300 = vmatpush.bf16.msra.mxu3 %v9396_v28 }
 0x978   : > { %v6921_v2 = vpop.f32.mrf.mxu0 }
 0x980   : > { %v6885_v21 = vpop.f32.mrf.mxu3 }
 0x981   : > { %v6886_v4 = vadd.f32 %v6885_v21, %v6857_v39  ;;  %v9783_v21 = vld [vmem:[%s13548_s13 + $0x2a4] sm:$0xf]  ;;  %v9377_v39 = vld [vmem:[%s13548_s13 + $0x2a8] sm:$0xf0] }
 0x982   : > { %v9380_v49 = vor.u32 %v9783_v21, %v9377_v39 }
 0x983   : > { %v6915_v30 = vadd.f32 %v6914_v35, %v6886_v4  ;;  %v9385_v35 = vld [vmem:[%s13548_s13 + $0x2b8] sm:$0xf0] }
 0x984   : > { %v9388_v38 = vor.u32 %v9785_v54, %v9385_v35  ;;  %v9367_v35 = vld [vmem:[%s13548_s13 + $0x290] sm:$0xf] }
 0x985   : > { %v7021_v17 = vmax.f32 %v6915_v30, 0.0 }
 0x986   : > { %7301 = vmatpush.bf16.msra.mxu3 %v9388_v38  ;;  %v9779_v38 = vld [vmem:[%s13548_s13 + $0x284] sm:$0xf] }
 0x988   : > { %v6887_v51 = vpop.f32.mrf.mxu3 }
 0x989   : > { %v6861_v33 = vpop.f32.mrf.mxu2  ;;  %v6888_v62 = vadd.f32 %v6887_v51, %v6859_v18  ;;  %v6924_v18 = vpop.f32.mrf.mxu0 }
 0x98a   : > { %v6862_v58 = vadd.f32 %v6861_v33, %v13348_v23  ;;  %7302 = vmatpush.bf16.msra.mxu3 %v9380_v49  ;;  %v6943_v49 = vpop.f32.mrf.mxu1 }
 0x98b   : > { %v6917_v16 = vadd.f32 %v6916_v25, %v6888_v62  ;;  %v9375_v62 = vld [vmem:[%s13548_s13 + $0x2a0] sm:$0xf] }
 0x98d   : > { %v7023_v15 = vmax.f32 %v6917_v16, 0.0  ;;  %v9784_v16 = vld [vmem:[%s13548_s13 + $0x2a4] sm:$0xf0] }
 0x98e   : > { %v9376_v5 = vor.u32 %v9784_v16, %v9375_v62 }
 0x98f   : > { %v7037_v3 = vpack.c.bf16 %v7023_v15, %v7021_v17  ;;  %v9781_v17 = vld [vmem:[%s13548_s13 + $0x294] sm:$0xf] }
 0x990   : > { %v9372_v29 = vor.u32 %v9781_v17, %v9369_v13  ;;  %7244 = vmatpush.bf16.msrb.mxu1 %v9376_v5 }
 0x991   : > { %v6863_v25 = vpop.f32.mrf.mxu2  ;;  %v6890_v19 = vpop.f32.mrf.mxu3  ;;  %7218 = vmatmul.bf16.vlgmr.msra.gmra.mxu0 %v7037_v3  ;;  %7276 = vmatmul.bf16.vlgmr.msrb.gmra.mxu2 %v7037_v3  ;;  %v9782_v3 = vld [vmem:[%s13548_s13 + $0x294] sm:$0xf0] }
 0x992   : > { %v6891_v12 = vadd.f32 %v6890_v19, %v6862_v58  ;;  %v6864_v4 = vadd.f32 %v6863_v25, %v13348_v23  ;;  %7303 = vmatpush.bf16.msra.mxu3 %v9372_v29  ;;  %v9368_v25 = vor.u32 %v9782_v3, %v9367_v35  ;;  %v9361_v19 = vld [vmem:[%s13548_s13 + $0x288] sm:$0xf0]  ;;  %v6945_v17 = vpop.f32.mrf.mxu1 }
 0x994   : > { %v6920_v56 = vadd.f32 %v6919_v14, %v6891_v12  ;;  %v9364_v12 = vor.u32 %v9779_v38, %v9361_v19  ;;  %7245 = vmatpush.bf16.msrb.mxu1 %v9368_v25  ;;  %v6652_v25 = vperm.slane %v13342_v48, 1 }
 0x996   : > { %v7025_v33 = vmax.f32 %v6920_v56, 0.0  ;;  %7304 = vmatpush.bf16.msra.mxu3 %v9364_v12 }
 0x999   : > { %v6892_v63 = vpop.f32.mrf.mxu3 }
 0x99a   : > { %v6866_v8 = vpop.f32.mrf.mxu2  ;;  %v6893_v60 = vadd.f32 %v6892_v63, %v6864_v4  ;;  %v6948_v19 = vpop.f32.mrf.mxu1 }
 0x99b   : > { %v6867_v54 = vadd.f32 %v6866_v8, %v13348_v23 }
 0x99c   : > { %v6922_v28 = vadd.f32 %v6921_v2, %v6893_v60  ;;  %v6926_v2 = vpop.f32.mrf.mxu0  ;;  %v9359_v60 = vld [vmem:[%s13548_s13 + $0x280] sm:$0xf] }
 0x99e   : > { %v7027_v51 = vmax.f32 %v6922_v28, 0.0  ;;  %v9780_v28 = vld [vmem:[%s13548_s13 + $0x284] sm:$0xf0] }
 0x9a0   : > { %v7039_v30 = vpack.c.bf16 %v7027_v51, %v7025_v33  ;;  %v9360_v33 = vor.u32 %v9780_v28, %v9359_v60 }
 0x9a2   : > { %v6868_v14 = vpop.f32.mrf.mxu2  ;;  %v6895_v15 = vpop.f32.mrf.mxu3  ;;  %7223 = vmatmul.bf16.gmra.mxu0 %v7039_v30  ;;  %7281 = vmatmul.bf16.gmra.mxu2 %v7039_v30 }
 0x9a3   : > { %v6896_v58 = vadd.f32 %v6895_v15, %v6867_v54  ;;  %v6869_v46 = vadd.f32 %v6868_v14, %v13348_v23  ;;  %7246 = vmatpush.bf16.msrb.mxu1 %v9360_v33 }
 0x9a4   : > { %v6929_v56 = vpop.f32.mrf.mxu0 }
 0x9a5   : > { %v6925_v21 = vadd.f32 %v6924_v18, %v6896_v58 }
 0x9a7   : > { %v7029_v8 = vmax.f32 %v6925_v21, 0.0 }
 0x9aa   : > { %v6871_v26 = vpop.f32.mrf.mxu2  ;;  %v6897_v43 = vpop.f32.mrf.mxu3 }
 0x9ab   : > { %v6898_v39 = vadd.f32 %v6897_v43, %v6869_v46  ;;  %v6872_v18 = vadd.f32 %v6871_v26, %v13348_v23  ;;  %v6944_v46 = vadd.f32 %v6943_v49, %v6652_v25  ;;  %v6946_v26 = vadd.f32 %v6945_v17, %v6652_v25 }
 0x9ac   : > { %v6931_v15 = vpop.f32.mrf.mxu0 }
 0x9ad   : > { %v6927_v4 = vadd.f32 %v6926_v2, %v6898_v39 }
 0x9af   : > { %v7031_v63 = vmax.f32 %v6927_v4, 0.0 }
 0x9b1   : > { %v7041_v51 = vpack.c.bf16 %v7031_v63, %v7029_v8  ;;  %v6950_v63 = vpop.f32.mrf.mxu1 }
 0x9b2   : > { %v6873_v30 = vpop.f32.mrf.mxu2  ;;  %v6900_v62 = vpop.f32.mrf.mxu3 }
 0x9b3   : > { %7228 = vmatmul.bf16.gmra.mxu0 %v7041_v51  ;;  %7286 = vmatmul.bf16.gmra.mxu2 %v7041_v51  ;;  %v6901_v16 = vadd.f32 %v6900_v62, %v6872_v18  ;;  %v6874_v14 = vadd.f32 %v6873_v30, %v13348_v23  ;;  %v6949_v51 = vadd.f32 %v6948_v19, %v6652_v25 }
 0x9b4   : > { %v6951_v62 = vadd.f32 %v6950_v63, %v6652_v25 }
 0x9b5   : > { %v6930_v29 = vadd.f32 %v6929_v56, %v6901_v16 }
 0x9b7   : > { %v7033_v3 = vmax.f32 %v6930_v29, 0.0 }
 0x9b9   : > { %v6953_v30 = vpop.f32.mrf.mxu1 }
 0x9ba   : > { %v6902_v5 = vpop.f32.mrf.mxu3  ;;  %v6972_v13 = vpop.f32.mrf.mxu2 }
 0x9bb   : > { %v6903_v54 = vadd.f32 %v6902_v5, %v6874_v14  ;;  %v6973_v43 = vadd.f32 %v6972_v13, %v6944_v46 }
 0x9bd   : > { %v6932_v35 = vadd.f32 %v6931_v15, %v6903_v54 }
 0x9bf   : > { %v7035_v38 = vmax.f32 %v6932_v35, 0.0 }
 0x9c1   : > { %v7043_v2 = vpack.c.bf16 %v7035_v38, %v7033_v3  ;;  %v6955_v54 = vpop.f32.mrf.mxu1  ;;  %v6954_v38 = vadd.f32 %v6953_v30, %v6652_v25 }
 0x9c2   : > { %v6974_v58 = vpop.f32.mrf.mxu2  ;;  %v7001_v12 = vpop.f32.mrf.mxu3 }
 0x9c3   : > { %7233 = vmatmul.bf16.gmra.mxu0 %v7043_v2  ;;  %7291 = vmatmul.bf16.gmra.mxu2 %v7043_v2  ;;  %v6975_v23 = vadd.f32 %v6974_v58, %v6946_v26  ;;  %v7002_v21 = vadd.f32 %v7001_v12, %v6973_v43  ;;  %v6956_v2 = vadd.f32 %v6955_v54, %v6652_v25 }
 0x9c5   : > { %v7022_v56 = vmax.f32 %v7002_v21, 0.0 }
 0x9c9   : > { %v6958_v46 = vpop.f32.mrf.mxu1 }
 0x9ca   : > { %v6977_v39 = vpop.f32.mrf.mxu2  ;;  %v7003_v4 = vpop.f32.mrf.mxu3 }
 0x9cb   : > { %v7004_v8 = vadd.f32 %v7003_v4, %v6975_v23  ;;  %v6978_v18 = vadd.f32 %v6977_v39, %v6949_v51 }
 0x9cd   : > { %v7024_v60 = vmax.f32 %v7004_v8, 0.0 }
 0x9cf   : > { %v7038_v28 = vpack.c.bf16 %v7024_v60, %v7022_v56  ;;  %v6959_v56 = vadd.f32 %v6958_v46, %v6652_v25 }
 0x9d1   : > { %7247 = vmatmul.bf16.vlgmr.msrb.gmra.mxu1 %v7038_v28  ;;  %7305 = vmatmul.bf16.vlgmr.msra.gmra.mxu3 %v7038_v28  ;;  %v6960_v63 = vpop.f32.mrf.mxu1 }
 0x9d2   : > { %v6979_v48 = vpop.f32.mrf.mxu2  ;;  %v7006_v33 = vpop.f32.mrf.mxu3  ;;  %v6961_v28 = vadd.f32 %v6960_v63, %v6652_v25 }
 0x9d3   : > { %v6980_v49 = vadd.f32 %v6979_v48, %v6951_v62  ;;  %v7007_v16 = vadd.f32 %v7006_v33, %v6978_v18 }
 0x9d5   : > { %v7026_v5 = vmax.f32 %v7007_v16, 0.0 }
 0x9da   : > { %v6982_v17 = vpop.f32.mrf.mxu2  ;;  %v7008_v14 = vpop.f32.mrf.mxu3 }
 0x9db   : > { %v7009_v15 = vadd.f32 %v7008_v14, %v6980_v49  ;;  %v6983_v58 = vadd.f32 %v6982_v17, %v6954_v38 }
 0x9dd   : > { %v7028_v13 = vmax.f32 %v7009_v15, 0.0  ;;  %v8980_v15 = vld [vmem:[%s13549_s14 + $0x4] sm:$0x3] }
 0x9de   : > { %v13428_v25 = vperm.slane %v8980_v15, 0 }
 0x9df   : > { %v7040_v29 = vpack.c.bf16 %v7028_v13, %v7026_v5 }
 0x9e1   : > { %7252 = vmatmul.bf16.gmra.mxu1 %v7040_v29  ;;  %7310 = vmatmul.bf16.gmra.mxu3 %v7040_v29 }
 0x9e2   : > { %v6984_v35 = vpop.f32.mrf.mxu2  ;;  %v7011_v3 = vpop.f32.mrf.mxu3 }
 0x9e3   : > { %v6985_v19 = vadd.f32 %v6984_v35, %v6956_v2  ;;  %v7012_v12 = vadd.f32 %v7011_v3, %v6983_v58  ;;  %v13432_v35 = vperm.slane %v8980_v15, 1 }
 0x9e5   : > { %v7030_v21 = vmax.f32 %v7012_v12, 0.0 }
 0x9ea   : > { %v7013_v26 = vpop.f32.mrf.mxu3  ;;  %v6987_v23 = vpop.f32.mrf.mxu2 }
 0x9eb   : > { %v7014_v43 = vadd.f32 %v7013_v26, %v6985_v19  ;;  %v6988_v48 = vadd.f32 %v6987_v23, %v6959_v56 }
 0x9ed   : > { %v7032_v39 = vmax.f32 %v7014_v43, 0.0 }
 0x9ef   : > { %v7042_v4 = vpack.c.bf16 %v7032_v39, %v7030_v21 }
 0x9f1   : > { %7257 = vmatmul.bf16.gmra.mxu1 %v7042_v4  ;;  %7315 = vmatmul.bf16.gmra.mxu3 %v7042_v4 }
 0x9f2   : > { %v7016_v8 = vpop.f32.mrf.mxu3  ;;  %v6989_v60 = vpop.f32.mrf.mxu2 }
 0x9f3   : > { %v6990_v33 = vadd.f32 %v6989_v60, %v6961_v28  ;;  %v7017_v51 = vadd.f32 %v7016_v8, %v6988_v48 }
 0x9f5   : > { %v7034_v18 = vmax.f32 %v7017_v51, 0.0 }
 0x9fa   : > { %v7018_v30 = vpop.f32.mrf.mxu3 }
 0x9fb   : > { %v7019_v62 = vadd.f32 %v7018_v30, %v6990_v33 }
 0x9fd   : > { %v7036_v49 = vmax.f32 %v7019_v62, 0.0 }
 0x9ff   : > { %v7044_v16 = vpack.c.bf16 %v7036_v49, %v7034_v18 }
 0xa01   : > { %7262 = vmatmul.bf16.gmra.mxu1 %v7044_v16  ;;  %7320 = vmatmul.bf16.gmra.mxu3 %v7044_v16 }
 0xa0e   : > { %v7219_v17 = vpop.f32.mrf.mxu0 }
 0xa0f   : > { %v7220_v29 = vadd.f32 %v7219_v17, %v13428_v25 }
 0xa14   : > { %v7277_v14 = vpop.f32.mrf.mxu2 }
 0xa15   : > { %v7278_v58 = vadd.f32 %v7277_v14, %v13432_v35 }
 0xa16   : > { %v7221_v5 = vpop.f32.mrf.mxu0 }
 0xa17   : > { %v7222_v46 = vadd.f32 %v7221_v5, %v13428_v25 }
 0xa1c   : > { %v7279_v13 = vpop.f32.mrf.mxu2 }
 0xa1d   : > { %v7280_v8 = vadd.f32 %v7279_v13, %v13432_v35 }
 0xa1f   : > { %v7224_v38 = vpop.f32.mrf.mxu0 }
 0xa20   : > { %v7225_v60 = vadd.f32 %v7224_v38, %v13428_v25 }
 0xa25   : > { %v7282_v43 = vpop.f32.mrf.mxu2 }
 0xa26   : > { %v7283_v51 = vadd.f32 %v7282_v43, %v13432_v35 }
 0xa27   : > { %v7226_v4 = vpop.f32.mrf.mxu0 }
 0xa28   : > { %v7227_v49 = vadd.f32 %v7226_v4, %v13428_v25 }
 0xa2d   : > { %v7284_v33 = vpop.f32.mrf.mxu2 }
 0xa2e   : > { %v7285_v15 = vadd.f32 %v7284_v33, %v13432_v35 }
 0xa30   : > { %v7229_v62 = vpop.f32.mrf.mxu0 }
 0xa4e   : > { %v7248_v54 = vpop.f32.mrf.mxu1 }
 0xa4f   : > { %v7249_v3 = vadd.f32 %v7248_v54, %v7220_v29  ;;  %v7230_v29 = vadd.f32 %v7229_v62, %v13428_v25 }
 0xa51   : > { %v7326_v2 = vadd.f32 %v7249_v3, %v5636_v50  ;;  %v7231_v3 = vpop.f32.mrf.mxu0 }
 0xa53   : > { %v7342_v19 = vmax.f32 %v7326_v2, 0.0 }
 0xa54   : > { %v7306_v12 = vpop.f32.mrf.mxu3 }
 0xa55   : > { %7358 = vst [vmem:[%s13440_s16] sm:$0xff] %v7342_v19  ;;  %v7307_v26 = vadd.f32 %v7306_v12, %v7278_v58 }
 0xa56   : > { %v7250_v23 = vpop.f32.mrf.mxu1 }
 0xa57   : > { %v7327_v21 = vadd.f32 %v7307_v26, %v5637_v1  ;;  %v7251_v7 = vadd.f32 %v7250_v23, %v7222_v46  ;;  %v7232_v46 = vadd.f32 %v7231_v3, %v13428_v25 }
 0xa59   : > { %v7343_v50 = vmax.f32 %v7327_v21, 0.0  ;;  %v7328_v39 = vadd.f32 %v7251_v7, %v5638_v42  ;;  %v7234_v23 = vpop.f32.mrf.mxu0 }
 0xa5b   : > { %7359 = vst [vmem:[%s13440_s16 + $0x8] sm:$0xff] %v7343_v50  ;;  %v7344_v63 = vmax.f32 %v7328_v39, 0.0  ;;  %v7235_v39 = vadd.f32 %v7234_v23, %v13428_v25 }
 0xa5c   : > { %v7308_v56 = vpop.f32.mrf.mxu3 }
 0xa5d   : > { %7360 = vst [vmem:[%s13440_s16 + $0x10] sm:$0xff] %v7344_v63  ;;  %v7309_v28 = vadd.f32 %v7308_v56, %v7280_v8 }
 0xa5e   : > { %v7253_v48 = vpop.f32.mrf.mxu1 }
 0xa5f   : > { %v7329_v32 = vadd.f32 %v7309_v28, %v5639_v44  ;;  %v7254_v1 = vadd.f32 %v7253_v48, %v7225_v60 }
 0xa61   : > { %v7345_v10 = vmax.f32 %v7329_v32, 0.0  ;;  %v7330_v42 = vadd.f32 %v7254_v1, %v5640_v55  ;;  %v7287_v55 = vpop.f32.mrf.mxu2  ;;  %v7236_v56 = vpop.f32.mrf.mxu0  ;;  %v13601_v1 = vmax.f32 %v12761_v11, 0.0 }
 0xa62   : > { %v7288_v2 = vadd.f32 %v7287_v55, %v13432_v35  ;;  %v7237_v32 = vadd.f32 %v7236_v56, %v13428_v25 }
 0xa63   : > { %7361 = vst [vmem:[%s13440_s16 + $0x18] sm:$0xff] %v7345_v10  ;;  %v7346_v30 = vmax.f32 %v7330_v42, 0.0  ;;  %v13602_v42 = vmax.f32 %v12754_v27, 0.0 }
 0xa64   : > { %v7311_v18 = vpop.f32.mrf.mxu3 }
 0xa65   : > { %7362 = vst [vmem:[%s13440_s16 + $0x20] sm:$0xff] %v7346_v30  ;;  %v7312_v16 = vadd.f32 %v7311_v18, %v7283_v51  ;;  %v13603_v18 = vmax.f32 %v12769_v31, 0.0 }
 0xa66   : > { %v7255_v9 = vpop.f32.mrf.mxu1 }
 0xa67   : > { %v7331_v44 = vadd.f32 %v7312_v16, %v5641_v53  ;;  %v7256_v17 = vadd.f32 %v7255_v9, %v7227_v49 }
 0xa69   : > { %v7347_v14 = vmax.f32 %v7331_v44, 0.0  ;;  %v7332_v47 = vadd.f32 %v7256_v17, %v5642_v52  ;;  %v7289_v19 = vpop.f32.mrf.mxu2 }
 0xa6a   : > { %v7290_v21 = vadd.f32 %v7289_v19, %v13432_v35 }
 0xa6b   : > { %7363 = vst [vmem:[%s13440_s16 + $0x28] sm:$0xff] %v7347_v14  ;;  %v7348_v5 = vmax.f32 %v7332_v47, 0.0 }
 0xa6c   : > { %v7313_v13 = vpop.f32.mrf.mxu3 }
 0xa6d   : > { %7364 = vst [vmem:[%s13440_s16 + $0x30] sm:$0xff] %v7348_v5  ;;  %v7314_v54 = vadd.f32 %v7313_v13, %v7285_v15 }
 0xa6e   : > { %v7258_v45 = vpop.f32.mrf.mxu1 }
 0xa6f   : > { %v7333_v53 = vadd.f32 %v7314_v54, %v5643_v40  ;;  %v7259_v38 = vadd.f32 %v7258_v45, %v7230_v29 }
 0xa71   : > { %v7349_v59 = vmax.f32 %v7333_v53, 0.0  ;;  %v7334_v52 = vadd.f32 %v7259_v38, %v5644_v61  ;;  %v7292_v8 = vpop.f32.mrf.mxu2 }
 0xa72   : > { %v7293_v60 = vadd.f32 %v7292_v8, %v13432_v35 }
 0xa73   : > { %7365 = vst [vmem:[%s13440_s16 + $0x38] sm:$0xff] %v7349_v59  ;;  %v7350_v58 = vmax.f32 %v7334_v52, 0.0 }
 0xa74   : > { %v7316_v12 = vpop.f32.mrf.mxu3 }
 0xa75   : > { %7366 = vst [vmem:[%s13440_s16 + $0x40] sm:$0xff] %v7350_v58  ;;  %v7317_v26 = vadd.f32 %v7316_v12, %v7288_v2 }
 0xa76   : > { %v7260_v43 = vpop.f32.mrf.mxu1 }
 0xa77   : > { %v7335_v6 = vadd.f32 %v7317_v26, %v5645_v34  ;;  %v7261_v40 = vadd.f32 %v7260_v43, %v7232_v46 }
 0xa79   : > { %v7351_v41 = vmax.f32 %v7335_v6, 0.0  ;;  %v7336_v61 = vadd.f32 %v7261_v40, %v5646_v22  ;;  %v7294_v36 = vpop.f32.mrf.mxu2 }
 0xa7a   : > { %v7295_v30 = vadd.f32 %v7294_v36, %v13432_v35 }
 0xa7b   : > { %7367 = vst [vmem:[%s13440_s16 + $0x48] sm:$0xff] %v7351_v41  ;;  %v7352_v7 = vmax.f32 %v7336_v61, 0.0 }
 0xa7c   : > { %v7318_v50 = vpop.f32.mrf.mxu3 }
 0xa7d   : > { %7368 = vst [vmem:[%s13440_s16 + $0x50] sm:$0xff] %v7352_v7  ;;  %v7319_v4 = vadd.f32 %v7318_v50, %v7290_v21 }
 0xa7e   : > { %v7263_v24 = vpop.f32.mrf.mxu1 }
 0xa7f   : > { %v7337_v34 = vadd.f32 %v7319_v4, %v5647_v57  ;;  %v7264_v63 = vadd.f32 %v7263_v24, %v7235_v39 }
 0xa81   : > { %v7353_v20 = vmax.f32 %v7337_v34, 0.0  ;;  %v7338_v22 = vadd.f32 %v7264_v63, %v5648_v0 }
 0xa83   : > { %7369 = vst [vmem:[%s13440_s16 + $0x58] sm:$0xff] %v7353_v20  ;;  %v7354_v28 = vmax.f32 %v7338_v22, 0.0 }
 0xa84   : > { %v7321_v48 = vpop.f32.mrf.mxu3 }
 0xa85   : > { %7370 = vst [vmem:[%s13440_s16 + $0x60] sm:$0xff] %v7354_v28  ;;  %v7322_v37 = vadd.f32 %v7321_v48, %v7293_v60 }
 0xa86   : > { %v7265_v57 = vpop.f32.mrf.mxu1 }
 0xa87   : > { %v7339_v33 = vadd.f32 %v7322_v37, %v13601_v1  ;;  %v7266_v10 = vadd.f32 %v7265_v57, %v7237_v32 }
 0xa89   : > { %v7355_v0 = vmax.f32 %v7339_v33, 0.0  ;;  %v7340_v51 = vadd.f32 %v7266_v10, %v13602_v42 }
 0xa8b   : > { %7371 = vst [vmem:[%s13440_s16 + $0x68] sm:$0xff] %v7355_v0  ;;  %v7356_v25 = vmax.f32 %v7340_v51, 0.0 }
 0xa8c   : > { %v7323_v11 = vpop.f32.mrf.mxu3 }
 0xa8d   : > { %7372 = vst [vmem:[%s13440_s16 + $0x70] sm:$0xff] %v7356_v25  ;;  %v7324_v62 = vadd.f32 %v7323_v11, %v7295_v30 }
 0xa8f   : > { %v7341_v49 = vadd.f32 %v7324_v62, %v13603_v18 }
 0xa91   : > { %v7357_v27 = vmax.f32 %v7341_v49, 0.0 }
 0xa93   : > { %7373 = vst [vmem:[%s13440_s16 + $0x78] sm:$0xff] %v7357_v27 }
 0xa94   : > { %9886 = shalt.err (!%p9883_p3)
}
 0xa95   : > { %s9927_s27 = smov 256   ;;  %s9928_s16 = smov 16  }
 0xa96   : > { %9810 = dma.vmem_to_hbm [thread:$0]  (%p10047_p5), %s7388_s0, 2048, %s7390_s22, %s7375_s25, %s9927_s27, %s9927_s27, %s9928_s16  }
 0xa97 PF: > { %s13604_s2 = sld [smem:[#allocation6_spill]]  ;;  %p9816_p4 = scmp.ge.s32.totalorder %s9921_s21, 2 }
 0xa99   : > { %p9813_p7 = pnand %p9816_p4, %p10051_p6 }
 0xa9b   : > { %p9814_p8 = pneg %p9813_p7 }
 0xa9d   : > { %s7404_s30 = sand.u32 1, %s13604_s2  }
 0xa9e   : > { %s7405_s17 = scalar_lea.sflag [#allocation4], %s7404_s30 }
 0xa9f   : > { %9904 = dma.done.wait (%p9814_p8), %s7405_s17, 2048  }
 0xaa0   : > { %9906 = vsyncadd (%p9814_p8), %s7405_s17, 4294965248  ;;  %s13606_s21 = sld [smem:[#allocation8_spill]]  ;;  %s13609_s18 = smov %s9913_s19 }
 0xaa1   : > { %s13607_s29 = sld [smem:[#allocation7_spill]] }
 0xaa2   : > { %s13608_s20 = sld [smem:[#allocation9_spill]] }
 0xaa6   : > { %p25_p9 = scmp.ge.s32.totalorder %s13606_s21, 4  }
 0xaa7   : > { %s13610_s19 = smov %s13607_s29 }
 0xaa8   :  { %27 = sbr.rel (!%p25_p9) target bundleno = 7 (0x7), region = 130 }
 0xaad   :  { %7411 = vsyncpa [#allocation4], 1 }
 0xaae   :  { %7413 = vsyncpa [#allocation4 + $0x1], 1 }

</bundles_post_ra>
